<compile_context>
chip_gen: v5e
topology: v5e:2x2
jax: 0.10.0
libtpu: 0.0.40
codegen_flags: <defaults>
</compile_context>

<pallas_src>
import functools
import math
import random

import jax
import jax.numpy as jnp
import numpy as np
from jax.experimental import pallas as pl
from jax.experimental.pallas import tpu as pltpu

PAD_TOKEN = 1
MOD_SCALE = 1.2           # 'stocastic' moderation scale
NEG_INF = -1e30           # additive mask value (finite: avoids inf-inf NaNs)
VPAD = 128                # lane-dense generator output width (>= output vocab)
VMEM_LIMIT = 32 * 1024 * 1024


# ----------------------------- BlockSpec helpers ------------------------------

def _batch_spec_from_shape(shape):
    """Block only the leading (batch) axis; the rest of the array is one block."""
    blk = (1,) + tuple(shape[1:])
    zeros = (0,) * (len(shape) - 1)

    def idx(b):
        return (b,) + zeros

    return pl.BlockSpec(blk, idx)


def _batch_spec(a):
    return _batch_spec_from_shape(a.shape)


def _full_spec(a):
    """Whole array resident in VMEM; constant block index (no re-DMA per step)."""
    zeros = (0,) * a.ndim

    def idx(b):
        return zeros

    return pl.BlockSpec(a.shape, idx)


# ------------------------------ in-kernel helpers ------------------------------

def _bf(x):
    return x.astype(jnp.bfloat16)


def _ln(x, g, b, eps=1e-5):
    mu = jnp.mean(x, axis=-1, keepdims=True)
    var = jnp.mean((x - mu) ** 2, axis=-1, keepdims=True)
    return (x - mu) * jax.lax.rsqrt(var + eps) * g + b


def _embed(tok, emb_table, pos, vocab):
    """Token embedding as a one-hot MXU matmul against the VMEM-resident table
    (replaces the standalone XLA gather), plus positional encoding."""
    S = tok.shape[0]
    iota = jax.lax.broadcasted_iota(jnp.int32, (S, vocab), 1)
    oh = jnp.where(tok == iota, jnp.float32(1.0), jnp.float32(0.0))
    x = jnp.dot(_bf(oh), emb_table, preferred_element_type=jnp.float32)
    return x + pos


def _attention(q_all, k_all, v_all, mask_add, rand_row, wo, bo,
               *, heads, dk, topk_k):
    """Multi-head attention on already-projected Q/K/V slabs.

    q_all: (Sq, heads*dk) f32 (1/sqrt(dk) already folded in)
    k_all, v_all: (Sk, heads*dk) f32
    mask_add: (1, Sk) or (Sq, Sk) additive mask (0 keep / NEG_INF masked)
    rand_row: (1, Sk) f32, 1.0 on the 'stocastic' random columns
    wo: (heads*dk, H) bf16 output projection (head-concat folded in), bo: (1, H)
    """
    Sq = q_all.shape[0]
    Sk = k_all.shape[0]
    rand_sel = jnp.broadcast_to(rand_row > 0.0, (Sq, Sk))   # hoisted out of head loop
    ctx = []
    # TODO(synk): swap the head / top-k Python loops for lax.fori_loop(unroll=True)
    # if heads or k grow beyond toy sizes (vreg live-range / spill control).
    for h in range(heads):
        sl = slice(h * dk, (h + 1) * dk)
        s = jax.lax.dot_general(_bf(q_all[:, sl]), _bf(k_all[:, sl]),
                                (((1,), (1,)), ((), ())),
                                preferred_element_type=jnp.float32)
        s = s + mask_add
        s = s - jnp.max(s, axis=-1, keepdims=True)
        e = jnp.exp(s)
        p = e * pl.reciprocal(jnp.sum(e, axis=-1, keepdims=True), approx=True)

        # moderate_attention('stocastic'): boost top-k + random cols, renormalize
        if topk_k > 0:
            work = p
            kth = None
            for _ in range(topk_k):
                kth = jnp.max(work, axis=-1, keepdims=True)
                work = jnp.where(work >= kth, jnp.float32(-1.0), work)
            sel = jnp.logical_or(p >= kth, rand_sel)
        else:
            sel = rand_sel
        p = jnp.where(sel, p * MOD_SCALE, p)
        p = p / jnp.sum(p, axis=-1, keepdims=True)           # exact renorm

        ctx.append(jnp.dot(_bf(p), _bf(v_all[:, sl]),
                           preferred_element_type=jnp.float32))
    ctx = jnp.concatenate(ctx, axis=-1)                       # (Sq, heads*dk)
    return jnp.dot(_bf(ctx), wo, preferred_element_type=jnp.float32) + bo


def _ffn(x, w1, b1, w2, b2):
    h = jnp.maximum(
        jnp.dot(_bf(x), w1, preferred_element_type=jnp.float32) + b1, 0.0)
    return jnp.dot(_bf(h), w2, preferred_element_type=jnp.float32) + b2


# ------------------------------- fused kernels ---------------------------------

def _encoder_stack_kernel(tok_ref, pad_ref, rand_ref, emb_ref, pos_ref,
                          lng_ref, lnb_ref, wqkv_ref, bqkv_ref, wo_ref, bo_ref,
                          w1_ref, b1_ref, w2_ref, b2_ref, o_ref,
                          *, layers, heads, dk, vocab, topk_k):
    H = heads * dk
    tok = tok_ref[0]                                          # (Sx, 1) int32
    x = _embed(tok, emb_ref[...], pos_ref[...], vocab)        # (Sx, H) f32
    pad_add = pad_ref[0]                                      # (1, Sx) additive

    for l in range(layers):                                   # weights resident; static loop
        g, bt = lng_ref[l], lnb_ref[l]
        n1 = _ln(x, g, bt)
        qkv = jnp.dot(_bf(n1), wqkv_ref[l],
                      preferred_element_type=jnp.float32) + bqkv_ref[l]  # (Sx, 3H)
        x = x + _attention(qkv[:, :H], qkv[:, H:2 * H], qkv[:, 2 * H:],
                           pad_add, rand_ref[l], wo_ref[l], bo_ref[l],
                           heads=heads, dk=dk, topk_k=topk_k)
        n2 = _ln(x, g, bt)
        x = x + _ffn(n2, w1_ref[l], b1_ref[l], w2_ref[l], b2_ref[l])

    o_ref[0] = x.astype(o_ref.dtype)


def _decoder_stack_kernel(tok_ref, enc_ref, pad_ref, rs_ref, rc_ref,
                          emb_ref, pos_ref, lng_ref, lnb_ref,
                          wqkv1_ref, bqkv1_ref, wo1_ref, bo1_ref,
                          wq2_ref, bq2_ref, wkv2_ref, bkv2_ref, wo2_ref, bo2_ref,
                          w1_ref, b1_ref, w2_ref, b2_ref,
                          gg_ref, gb_ref, gw_ref, gbias_ref, o_ref,
                          *, layers, heads, dk, vocab, topk_self, topk_cross):
    H = heads * dk
    tok = tok_ref[0]                                          # (Sy, 1) int32
    y = _embed(tok, emb_ref[...], pos_ref[...], vocab)        # (Sy, H) f32
    enc = enc_ref[0]                                          # (Sx, H) f32
    pad_add = pad_ref[0]                                      # (1, Sx) additive

    # causal mask rebuilt in-kernel (batch-invariant, no (B,Sy,Sy) DMA)
    Sy = y.shape[0]
    row = jax.lax.broadcasted_iota(jnp.int32, (Sy, Sy), 0)
    col = jax.lax.broadcasted_iota(jnp.int32, (Sy, Sy), 1)
    fut_add = jnp.where(col > row, jnp.float32(NEG_INF), jnp.float32(0.0))

    for l in range(layers):
        g, bt = lng_ref[l], lnb_ref[l]
        # masked self-attention
        n1 = _ln(y, g, bt)
        qkv = jnp.dot(_bf(n1), wqkv1_ref[l],
                      preferred_element_type=jnp.float32) + bqkv1_ref[l]
        y = y + _attention(qkv[:, :H], qkv[:, H:2 * H], qkv[:, 2 * H:],
                           fut_add, rs_ref[l], wo1_ref[l], bo1_ref[l],
                           heads=heads, dk=dk, topk_k=topk_self)
        # cross-attention against the (raw) final encoder output
        n2 = _ln(y, g, bt)
        q = jnp.dot(_bf(n2), wq2_ref[l],
                    preferred_element_type=jnp.float32) + bq2_ref[l]
        kv = jnp.dot(_bf(enc), wkv2_ref[l],
                     preferred_element_type=jnp.float32) + bkv2_ref[l]
        y = y + _attention(q, kv[:, :H], kv[:, H:],
                           pad_add, rc_ref[l], wo2_ref[l], bo2_ref[l],
                           heads=heads, dk=dk, topk_k=topk_cross)
        # FFN
        n3 = _ln(y, g, bt)
        y = y + _ffn(n3, w1_ref[l], b1_ref[l], w2_ref[l], b2_ref[l])

    # generator: LayerNorm -> Linear (lane-padded to VPAD) -> LogSoftmax
    n = _ln(y, gg_ref[...], gb_ref[...])
    logits = jnp.dot(_bf(n), gw_ref[...],
                     preferred_element_type=jnp.float32) + gbias_ref[...]
    s = logits - jnp.max(logits, axis=-1, keepdims=True)
    lse = jnp.log(jnp.sum(jnp.exp(s), axis=-1, keepdims=True))
    o_ref[0] = (s - lse).astype(o_ref.dtype)


# ----------------------------- pallas_call wrappers -----------------------------

def encoder_stack(p, tok3, pad_add, rand_masks, pos, heads):
    B, Sx, _ = tok3.shape
    vocab, H = p["emb"].shape
    dk = H // heads
    L = p["ln_g"].shape[0]
    kernel = functools.partial(_encoder_stack_kernel, layers=L, heads=heads,
                               dk=dk, vocab=vocab, topk_k=round(0.05 * Sx))
    ins = [tok3, pad_add, rand_masks, p["emb"], pos,
           p["ln_g"], p["ln_b"], p["wqkv"], p["bqkv"], p["wo"], p["bo"],
           p["w1"], p["b1"], p["w2"], p["b2"]]
    in_specs = [_batch_spec(tok3), _batch_spec(pad_add)] + \
               [_full_spec(v) for v in ins[2:]]
    return pl.pallas_call(
        kernel,
        out_shape=jax.ShapeDtypeStruct((B, Sx, H), jnp.float32),
        grid=(B,),
        in_specs=in_specs,
        out_specs=_batch_spec_from_shape((B, Sx, H)),
        compiler_params=pltpu.CompilerParams(
            dimension_semantics=("parallel",),       # keeps both v7x TCs busy
            vmem_limit_bytes=VMEM_LIMIT),
    )(*ins)


def decoder_stack(p, tok3, enc_out, pad_add, rand_self, rand_cross, pos, heads):
    B, Sy, _ = tok3.shape
    vocab, H = p["emb"].shape
    dk = H // heads
    Sx = enc_out.shape[1]
    L = p["ln_g"].shape[0]
    kernel = functools.partial(_decoder_stack_kernel, layers=L, heads=heads,
                               dk=dk, vocab=vocab,
                               topk_self=round(0.05 * Sy),
                               topk_cross=round(0.05 * Sx))
    ins = [tok3, enc_out, pad_add, rand_self, rand_cross, p["emb"], pos,
           p["ln_g"], p["ln_b"],
           p["wqkv1"], p["bqkv1"], p["wo1"], p["bo1"],
           p["wq2"], p["bq2"], p["wkv2"], p["bkv2"], p["wo2"], p["bo2"],
           p["w1"], p["b1"], p["w2"], p["b2"],
           p["gen_ln_g"], p["gen_ln_b"], p["gen_w"], p["gen_b"]]
    in_specs = [_batch_spec(tok3), _batch_spec(enc_out), _batch_spec(pad_add)] + \
               [_full_spec(v) for v in ins[3:]]
    return pl.pallas_call(
        kernel,
        out_shape=jax.ShapeDtypeStruct((B, Sy, VPAD), jnp.float32),
        grid=(B,),
        in_specs=in_specs,
        out_specs=_batch_spec_from_shape((B, Sy, VPAD)),
        compiler_params=pltpu.CompilerParams(
            dimension_semantics=("parallel",),
            vmem_limit_bytes=VMEM_LIMIT),
    )(*ins)


# ----------------------------- model forward (jitted) ---------------------------

def transformer_forward(params, x_tok, y_tok, rand_enc, rand_self, rand_cross,
                        *, heads, out_vocab):
    B, Sx = x_tok.shape
    Sy = y_tok.shape[1]
    pos = params["pos_enc"]

    # O(B*Sk) additive key-pad mask over the encoder keys; shared by encoder
    # self-attention and decoder cross-attention.  Causal mask is built in-kernel.
    key_pad = jnp.where(x_tok == PAD_TOKEN,
                        jnp.float32(NEG_INF), jnp.float32(0.0))[:, None, :]

    enc_out = encoder_stack(params["encoder"], x_tok[..., None], key_pad,
                            rand_enc, pos[:Sx], heads)
    dec_out = decoder_stack(params["decoder"], y_tok[..., None], enc_out,
                            key_pad, rand_self, rand_cross, pos[:Sy], heads)
    return dec_out[:, :, :out_vocab]                 # drop lane padding


# -------------------------------- parameter init --------------------------------

def _linear_params(key, fan_in, fan_out):
    kw, kb = jax.random.split(key)
    w = jax.random.normal(kw, (fan_in, fan_out), jnp.float32) * 0.05
    b = jax.random.normal(kb, (fan_out,), jnp.float32) * 0.01
    return w, b


def _mha_params(key, H, heads):
    """Fused attention weights: wqkv (H, 3H) with 1/sqrt(dk) folded into the Q
    columns (zero kernel cost); single output projection wo (H, H)."""
    dk = H // heads
    keys = jax.random.split(key, 4)
    wq, bq = _linear_params(keys[0], H, H)
    wk, bk = _linear_params(keys[1], H, H)
    wv, bv = _linear_params(keys[2], H, H)
    wl, bl = _linear_params(keys[3], H, H)
    scale = 1.0 / math.sqrt(dk)
    return {
        "wqkv": jnp.concatenate([wq * scale, wk, wv], axis=1),
        "bqkv": jnp.concatenate([bq * scale, bk, bv]).reshape(1, 3 * H),
        "wo": wl,
        "bo": bl.reshape(1, H),
    }


def _ffn_params(key, H):
    k1, k2 = jax.random.split(key)
    w1, b1 = _linear_params(k1, H, 4 * H)
    w2, b2 = _linear_params(k2, 4 * H, H)
    return {"w1": w1, "b1": b1.reshape(1, -1), "w2": w2, "b2": b2.reshape(1, -1)}


def make_pos_encoding(max_length, H):
    pos = jnp.arange(max_length, dtype=jnp.float32)[:, None]
    i = jnp.arange(H // 2, dtype=jnp.float32)[None, :] * 2.0
    angle = pos / jnp.power(10000.0, i / H)
    return jnp.stack([jnp.sin(angle), jnp.cos(angle)], axis=-1).reshape(max_length, H)


def init_params(key, input_size, output_size, layers, H, heads, max_length):
    bf = jnp.bfloat16
    keys = jax.random.split(key, 3 + 4 * layers)

    enc_layers, dec_layers = [], []
    ki = 2
    for _ in range(layers):
        enc_layers.append({"ln_g": jnp.ones((1, H), jnp.float32),
                           "ln_b": jnp.zeros((1, H), jnp.float32),
                           "att": _mha_params(keys[ki], H, heads),
                           "ffn": _ffn_params(keys[ki + 1], H)})
        ki += 2
    for _ in range(layers):
        dec_layers.append({"ln_g": jnp.ones((1, H), jnp.float32),
                           "ln_b": jnp.zeros((1, H), jnp.float32),
                           "att1": _mha_params(keys[ki], H, heads),
                           "att2": _mha_params(jax.random.fold_in(keys[ki], 7), H, heads),
                           "ffn": _ffn_params(keys[ki + 1], H)})
        ki += 2
    gw, gb = _linear_params(keys[ki], H, output_size)

    def stack(getter, lst):
        return jnp.stack([getter(l) for l in lst], axis=0)

    encoder = {
        "emb": jax.random.normal(keys[0], (input_size, H), jnp.float32).astype(bf),
        "ln_g": stack(lambda l: l["ln_g"], enc_layers),
        "ln_b": stack(lambda l: l["ln_b"], enc_layers),
        "wqkv": stack(lambda l: l["att"]["wqkv"], enc_layers).astype(bf),
        "bqkv": stack(lambda l: l["att"]["bqkv"], enc_layers),
        "wo": stack(lambda l: l["att"]["wo"], enc_layers).astype(bf),
        "bo": stack(lambda l: l["att"]["bo"], enc_layers),
        "w1": stack(lambda l: l["ffn"]["w1"], enc_layers).astype(bf),
        "b1": stack(lambda l: l["ffn"]["b1"], enc_layers),
        "w2": stack(lambda l: l["ffn"]["w2"], enc_layers).astype(bf),
        "b2": stack(lambda l: l["ffn"]["b2"], enc_layers),
    }

    decoder = {
        "emb": jax.random.normal(keys[1], (output_size, H), jnp.float32).astype(bf),
        "ln_g": stack(lambda l: l["ln_g"], dec_layers),
        "ln_b": stack(lambda l: l["ln_b"], dec_layers),
        "wqkv1": stack(lambda l: l["att1"]["wqkv"], dec_layers).astype(bf),
        "bqkv1": stack(lambda l: l["att1"]["bqkv"], dec_layers),
        "wo1": stack(lambda l: l["att1"]["wo"], dec_layers).astype(bf),
        "bo1": stack(lambda l: l["att1"]["bo"], dec_layers),
        # cross-attention: Q-side and KV-side weights split on the host
        "wq2": stack(lambda l: l["att2"]["wqkv"][:, :H], dec_layers).astype(bf),
        "bq2": stack(lambda l: l["att2"]["bqkv"][:, :H], dec_layers),
        "wkv2": stack(lambda l: l["att2"]["wqkv"][:, H:], dec_layers).astype(bf),
        "bkv2": stack(lambda l: l["att2"]["bqkv"][:, H:], dec_layers),
        "wo2": stack(lambda l: l["att2"]["wo"], dec_layers).astype(bf),
        "bo2": stack(lambda l: l["att2"]["bo"], dec_layers),
        "w1": stack(lambda l: l["ffn"]["w1"], dec_layers).astype(bf),
        "b1": stack(lambda l: l["ffn"]["b1"], dec_layers),
        "w2": stack(lambda l: l["ffn"]["w2"], dec_layers).astype(bf),
        "b2": stack(lambda l: l["ffn"]["b2"], dec_layers),
        # generator, lane-padded to VPAD (padded bias = NEG_INF so padded
        # columns contribute nothing to the log-softmax)
        "gen_ln_g": jnp.ones((1, H), jnp.float32),
        "gen_ln_b": jnp.zeros((1, H), jnp.float32),
        "gen_w": jnp.pad(gw, ((0, 0), (0, VPAD - output_size))).astype(bf),
        "gen_b": jnp.concatenate(
            [gb, jnp.full((VPAD - output_size,), NEG_INF, jnp.float32)]
        ).reshape(1, VPAD),
    }

    return {"pos_enc": make_pos_encoding(max_length, H),
            "encoder": encoder, "decoder": decoder}


def make_rand_masks(pyrng, layers, Sk):
    """Deterministic stand-in for random.randint in moderate_attention('stocastic'):
    one (1, Sk) random-column indicator per layer."""
    n = round(0.1 * Sk)
    m = np.zeros((layers, 1, Sk), np.float32)
    for l in range(layers):
        for _ in range(n):
            m[l, 0, pyrng.randint(0, Sk - 1)] = 1.0
    return jnp.asarray(m)


# ------------------------------------- main -------------------------------------

if __name__ == "__main__":
    INPUT_SIZE, OUTPUT_SIZE = 50, 40
    LAYERS, HIDDEN, HEADS, MAX_LEN = 2, 32, 4, 64
    B, SX, SY = 2, 12, 8

    key = jax.random.PRNGKey(0)
    kp, kx, ky = jax.random.split(key, 3)
    params = init_params(kp, INPUT_SIZE, OUTPUT_SIZE, LAYERS, HIDDEN, HEADS, MAX_LEN)

    x_tok = jax.random.randint(kx, (B, SX), 4, INPUT_SIZE, dtype=jnp.int32)
    x_tok = x_tok.at[:, -2:].set(PAD_TOKEN)   # pad tail -> exercises pad masks
    y_tok = jax.random.randint(ky, (B, SY), 4, OUTPUT_SIZE, dtype=jnp.int32)

    # TODO(synk): the reference draws random.randint per forward call on the host;
    # here the random columns are passed in as runtime arrays (seeded, per layer).
    pyrng = random.Random(0)
    rand_enc = make_rand_masks(pyrng, LAYERS, SX)     # encoder self-attn
    rand_self = make_rand_masks(pyrng, LAYERS, SY)    # decoder self-attn
    rand_cross = make_rand_masks(pyrng, LAYERS, SX)   # decoder cross-attn

    fwd = jax.jit(functools.partial(transformer_forward,
                                    heads=HEADS, out_vocab=OUTPUT_SIZE))
    y_hat = jax.block_until_ready(
        fwd(params, x_tok, y_tok, rand_enc, rand_self, rand_cross))

    assert y_hat.shape == (B, SY, OUTPUT_SIZE), y_hat.shape
    assert bool(jnp.all(jnp.isfinite(y_hat)))
    # log-softmax rows should (approximately) sum to 1 in probability space
    assert bool(jnp.all(jnp.abs(jnp.sum(jnp.exp(y_hat), axis=-1) - 1.0) < 1e-2))
    print("KERNEL_OK")
</pallas_src>

<mosaic_0001>
module attributes {stable_mosaic.version = 11 : i64} {
  func.func @_encoder_stack_kernel(%arg0: i32, %arg1: memref<1x12x1xi32, #tpu.memory_space<vmem>>, %arg2: memref<1x1x12xf32, #tpu.memory_space<vmem>>, %arg3: memref<2x1x12xf32, #tpu.memory_space<vmem>>, %arg4: memref<50x32xbf16, #tpu.memory_space<vmem>>, %arg5: memref<12x32xf32, #tpu.memory_space<vmem>>, %arg6: memref<2x1x32xf32, #tpu.memory_space<vmem>>, %arg7: memref<2x1x32xf32, #tpu.memory_space<vmem>>, %arg8: memref<2x32x96xbf16, #tpu.memory_space<vmem>>, %arg9: memref<2x1x96xf32, #tpu.memory_space<vmem>>, %arg10: memref<2x32x32xbf16, #tpu.memory_space<vmem>>, %arg11: memref<2x1x32xf32, #tpu.memory_space<vmem>>, %arg12: memref<2x32x128xbf16, #tpu.memory_space<vmem>>, %arg13: memref<2x1x128xf32, #tpu.memory_space<vmem>>, %arg14: memref<2x128x32xbf16, #tpu.memory_space<vmem>>, %arg15: memref<2x1x32xf32, #tpu.memory_space<vmem>>, %arg16: memref<1x12x32xf32, #tpu.memory_space<vmem>>) attributes {dimension_semantics = [#tpu.dimension_semantics<parallel>], iteration_bounds = array<i64: 2>, scalar_prefetch = 0 : i64, scratch_operands = 0 : i64, tpu.core_type = #tpu.core_type<tc>, window_params = [{transform_indices = @transform_0, window_bounds = array<i64: 1, 12, 1>}, {transform_indices = @transform_1, window_bounds = array<i64: 1, 1, 12>}, {pipeline_mode = #tpu.pipeline_mode<synchronous>, transform_indices = @transform_2, window_bounds = array<i64: 2, 1, 12>}, {pipeline_mode = #tpu.pipeline_mode<synchronous>, transform_indices = @transform_3, window_bounds = array<i64: 50, 32>}, {pipeline_mode = #tpu.pipeline_mode<synchronous>, transform_indices = @transform_4, window_bounds = array<i64: 12, 32>}, {pipeline_mode = #tpu.pipeline_mode<synchronous>, transform_indices = @transform_5, window_bounds = array<i64: 2, 1, 32>}, {pipeline_mode = #tpu.pipeline_mode<synchronous>, transform_indices = @transform_6, window_bounds = array<i64: 2, 1, 32>}, {pipeline_mode = #tpu.pipeline_mode<synchronous>, transform_indices = @transform_7, window_bounds = array<i64: 2, 32, 96>}, {pipeline_mode = #tpu.pipeline_mode<synchronous>, transform_indices = @transform_8, window_bounds = array<i64: 2, 1, 96>}, {pipeline_mode = #tpu.pipeline_mode<synchronous>, transform_indices = @transform_9, window_bounds = array<i64: 2, 32, 32>}, {pipeline_mode = #tpu.pipeline_mode<synchronous>, transform_indices = @transform_10, window_bounds = array<i64: 2, 1, 32>}, {pipeline_mode = #tpu.pipeline_mode<synchronous>, transform_indices = @transform_11, window_bounds = array<i64: 2, 32, 128>}, {pipeline_mode = #tpu.pipeline_mode<synchronous>, transform_indices = @transform_12, window_bounds = array<i64: 2, 1, 128>}, {pipeline_mode = #tpu.pipeline_mode<synchronous>, transform_indices = @transform_13, window_bounds = array<i64: 2, 128, 32>}, {pipeline_mode = #tpu.pipeline_mode<synchronous>, transform_indices = @transform_14, window_bounds = array<i64: 2, 1, 32>}, {transform_indices = @transform_15, window_bounds = array<i64: 1, 12, 32>}]} {
    %c0 = arith.constant 0 : index
    %c0_0 = arith.constant 0 : index
    %c0_1 = arith.constant 0 : index
    %0 = vector.load %arg1[%c0, %c0_0, %c0_1] : memref<1x12x1xi32, #tpu.memory_space<vmem>>, vector<1x12x1xi32>
    %1 = vector.shape_cast %0 : vector<1x12x1xi32> to vector<12x1xi32>
    %c0_2 = arith.constant 0 : index
    %c0_3 = arith.constant 0 : index
    %2 = vector.load %arg4[%c0_2, %c0_3] : memref<50x32xbf16, #tpu.memory_space<vmem>>, vector<50x32xbf16>
    %c0_4 = arith.constant 0 : index
    %c0_5 = arith.constant 0 : index
    %3 = vector.load %arg5[%c0_4, %c0_5] : memref<12x32xf32, #tpu.memory_space<vmem>>, vector<12x32xf32>
    %4 = tpu.iota {dimensions = array<i32: 1>} : vector<12x50xi32>
    %5 = vector.broadcast %1 : vector<12x1xi32> to vector<12x50xi32>
    %6 = arith.cmpi eq, %5, %4 : vector<12x50xi32>
    %cst = arith.constant 1.000000e+00 : f32
    %cst_6 = arith.constant 0.000000e+00 : f32
    %7 = vector.broadcast %cst : f32 to vector<12x50xf32>
    %8 = vector.broadcast %cst_6 : f32 to vector<12x50xf32>
    %9 = arith.select %6, %7, %8 : vector<12x50xi1>, vector<12x50xf32>
    %10 = arith.truncf %9 : vector<12x50xf32> to vector<12x50xbf16>
    %cst_7 = arith.constant dense<0.000000e+00> : vector<12x32xf32>
    %11 = tpu.matmul %10, %2, %cst_7 {dimension_numbers = #tpu.dot_dimension_numbers<[1], [0], [0], [1], [0, 0, 1, 1], [], []>} : vector<12x50xbf16>, vector<50x32xbf16>, vector<12x32xf32> -> vector<12x32xf32>
    %12 = arith.addf %11, %3 : vector<12x32xf32>
    %c0_8 = arith.constant 0 : index
    %c0_9 = arith.constant 0 : index
    %c0_10 = arith.constant 0 : index
    %13 = vector.load %arg2[%c0_8, %c0_9, %c0_10] : memref<1x1x12xf32, #tpu.memory_space<vmem>>, vector<1x1x12xf32>
    %14 = vector.shape_cast %13 : vector<1x1x12xf32> to vector<1x12xf32>
    %c0_11 = arith.constant 0 : index
    %c0_12 = arith.constant 0 : index
    %c0_13 = arith.constant 0 : index
    %15 = vector.load %arg6[%c0_11, %c0_12, %c0_13] : memref<2x1x32xf32, #tpu.memory_space<vmem>>, vector<1x1x32xf32>
    %16 = vector.shape_cast %15 : vector<1x1x32xf32> to vector<1x32xf32>
    %c0_14 = arith.constant 0 : index
    %c0_15 = arith.constant 0 : index
    %c0_16 = arith.constant 0 : index
    %17 = vector.load %arg7[%c0_14, %c0_15, %c0_16] : memref<2x1x32xf32, #tpu.memory_space<vmem>>, vector<1x1x32xf32>
    %18 = vector.shape_cast %17 : vector<1x1x32xf32> to vector<1x32xf32>
    %cst_17 = arith.constant dense<0.000000e+00> : vector<12xf32>
    %19 = vector.multi_reduction <add>, %12, %cst_17 [1] : vector<12x32xf32> to vector<12xf32>
    %20 = vector.shape_cast %19 : vector<12xf32> to vector<12x1xf32>
    %cst_18 = arith.constant 3.200000e+01 : f32
    %21 = vector.broadcast %cst_18 : f32 to vector<12x1xf32>
    %22 = arith.divf %20, %21 : vector<12x1xf32>
    %23 = vector.broadcast %22 : vector<12x1xf32> to vector<12x32xf32>
    %24 = arith.subf %12, %23 : vector<12x32xf32>
    %25 = arith.mulf %24, %24 : vector<12x32xf32>
    %cst_19 = arith.constant dense<0.000000e+00> : vector<12xf32>
    %26 = vector.multi_reduction <add>, %25, %cst_19 [1] : vector<12x32xf32> to vector<12xf32>
    %27 = vector.shape_cast %26 : vector<12xf32> to vector<12x1xf32>
    %cst_20 = arith.constant 3.200000e+01 : f32
    %28 = vector.broadcast %cst_20 : f32 to vector<12x1xf32>
    %29 = arith.divf %27, %28 : vector<12x1xf32>
    %30 = vector.broadcast %22 : vector<12x1xf32> to vector<12x32xf32>
    %31 = arith.subf %12, %30 : vector<12x32xf32>
    %cst_21 = arith.constant 9.99999974E-6 : f32
    %32 = vector.broadcast %cst_21 : f32 to vector<12x1xf32>
    %33 = arith.addf %29, %32 : vector<12x1xf32>
    %34 = math.rsqrt %33 : vector<12x1xf32>
    %35 = vector.broadcast %34 : vector<12x1xf32> to vector<12x32xf32>
    %36 = arith.mulf %31, %35 : vector<12x32xf32>
    %37 = vector.broadcast %16 : vector<1x32xf32> to vector<12x32xf32>
    %38 = arith.mulf %36, %37 : vector<12x32xf32>
    %39 = vector.broadcast %18 : vector<1x32xf32> to vector<12x32xf32>
    %40 = arith.addf %38, %39 : vector<12x32xf32>
    %41 = arith.truncf %40 : vector<12x32xf32> to vector<12x32xbf16>
    %c0_22 = arith.constant 0 : index
    %c0_23 = arith.constant 0 : index
    %c0_24 = arith.constant 0 : index
    %42 = vector.load %arg8[%c0_22, %c0_23, %c0_24] : memref<2x32x96xbf16, #tpu.memory_space<vmem>>, vector<1x32x96xbf16>
    %43 = vector.shape_cast %42 : vector<1x32x96xbf16> to vector<32x96xbf16>
    %cst_25 = arith.constant dense<0.000000e+00> : vector<12x96xf32>
    %44 = tpu.matmul %41, %43, %cst_25 {dimension_numbers = #tpu.dot_dimension_numbers<[1], [0], [0], [1], [0, 0, 1, 1], [], []>} : vector<12x32xbf16>, vector<32x96xbf16>, vector<12x96xf32> -> vector<12x96xf32>
    %c0_26 = arith.constant 0 : index
    %c0_27 = arith.constant 0 : index
    %c0_28 = arith.constant 0 : index
    %45 = vector.load %arg9[%c0_26, %c0_27, %c0_28] : memref<2x1x96xf32, #tpu.memory_space<vmem>>, vector<1x1x96xf32>
    %46 = vector.shape_cast %45 : vector<1x1x96xf32> to vector<1x96xf32>
    %47 = vector.broadcast %46 : vector<1x96xf32> to vector<12x96xf32>
    %48 = arith.addf %44, %47 : vector<12x96xf32>
    %49 = vector.extract_strided_slice %48 {offsets = [0, 0], sizes = [12, 32], strides = [1, 1]} : vector<12x96xf32> to vector<12x32xf32>
    %50 = vector.extract_strided_slice %48 {offsets = [0, 32], sizes = [12, 32], strides = [1, 1]} : vector<12x96xf32> to vector<12x32xf32>
    %51 = vector.extract_strided_slice %48 {offsets = [0, 64], sizes = [12, 32], strides = [1, 1]} : vector<12x96xf32> to vector<12x32xf32>
    %c0_29 = arith.constant 0 : index
    %c0_30 = arith.constant 0 : index
    %c0_31 = arith.constant 0 : index
    %52 = vector.load %arg3[%c0_29, %c0_30, %c0_31] : memref<2x1x12xf32, #tpu.memory_space<vmem>>, vector<1x1x12xf32>
    %53 = vector.shape_cast %52 : vector<1x1x12xf32> to vector<1x12xf32>
    %c0_32 = arith.constant 0 : index
    %c0_33 = arith.constant 0 : index
    %c0_34 = arith.constant 0 : index
    %54 = vector.load %arg10[%c0_32, %c0_33, %c0_34] : memref<2x32x32xbf16, #tpu.memory_space<vmem>>, vector<1x32x32xbf16>
    %55 = vector.shape_cast %54 : vector<1x32x32xbf16> to vector<32x32xbf16>
    %c0_35 = arith.constant 0 : index
    %c0_36 = arith.constant 0 : index
    %c0_37 = arith.constant 0 : index
    %56 = vector.load %arg11[%c0_35, %c0_36, %c0_37] : memref<2x1x32xf32, #tpu.memory_space<vmem>>, vector<1x1x32xf32>
    %57 = vector.shape_cast %56 : vector<1x1x32xf32> to vector<1x32xf32>
    %cst_38 = arith.constant 0.000000e+00 : f32
    %58 = vector.broadcast %cst_38 : f32 to vector<1x12xf32>
    %59 = arith.cmpf ogt, %53, %58 : vector<1x12xf32>
    %60 = vector.shape_cast %59 : vector<1x12xi1> to vector<1x12xi1>
    %61 = vector.broadcast %60 : vector<1x12xi1> to vector<12x12xi1>
    %62 = vector.extract_strided_slice %49 {offsets = [0, 0], sizes = [12, 8], strides = [1, 1]} : vector<12x32xf32> to vector<12x8xf32>
    %63 = arith.truncf %62 : vector<12x8xf32> to vector<12x8xbf16>
    %64 = vector.extract_strided_slice %50 {offsets = [0, 0], sizes = [12, 8], strides = [1, 1]} : vector<12x32xf32> to vector<12x8xf32>
    %65 = arith.truncf %64 : vector<12x8xf32> to vector<12x8xbf16>
    %cst_39 = arith.constant dense<0.000000e+00> : vector<12x12xf32>
    %66 = tpu.matmul %63, %65, %cst_39 {dimension_numbers = #tpu.dot_dimension_numbers<[1], [1], [0], [0], [0, 0, 1, 0], [], []>} : vector<12x8xbf16>, vector<12x8xbf16>, vector<12x12xf32> -> vector<12x12xf32>
    %67 = vector.broadcast %14 : vector<1x12xf32> to vector<12x12xf32>
    %68 = arith.addf %66, %67 : vector<12x12xf32>
    %cst_40 = arith.constant dense<0xFF800000> : vector<12xf32>
    %69 = vector.multi_reduction <maximumf>, %68, %cst_40 [1] : vector<12x12xf32> to vector<12xf32>
    %70 = vector.shape_cast %69 : vector<12xf32> to vector<12x1xf32>
    %71 = vector.broadcast %70 : vector<12x1xf32> to vector<12x12xf32>
    %72 = arith.subf %68, %71 : vector<12x12xf32>
    %73 = math.exp %72 : vector<12x12xf32>
    %cst_41 = arith.constant dense<0.000000e+00> : vector<12xf32>
    %74 = vector.multi_reduction <add>, %73, %cst_41 [1] : vector<12x12xf32> to vector<12xf32>
    %75 = vector.shape_cast %74 : vector<12xf32> to vector<12x1xf32>
    %76 = tpu.reciprocal %75 {approx = true} : vector<12x1xf32> -> vector<12x1xf32>
    %77 = vector.broadcast %76 : vector<12x1xf32> to vector<12x12xf32>
    %78 = arith.mulf %73, %77 : vector<12x12xf32>
    %cst_42 = arith.constant dense<0xFF800000> : vector<12xf32>
    %79 = vector.multi_reduction <maximumf>, %78, %cst_42 [1] : vector<12x12xf32> to vector<12xf32>
    %80 = vector.shape_cast %79 : vector<12xf32> to vector<12x1xf32>
    %81 = vector.broadcast %80 : vector<12x1xf32> to vector<12x12xf32>
    %82 = arith.cmpf oge, %78, %81 : vector<12x12xf32>
    %83 = arith.ori %82, %61 : vector<12x12xi1>
    %cst_43 = arith.constant 1.200000e+00 : f32
    %84 = vector.broadcast %cst_43 : f32 to vector<12x12xf32>
    %85 = arith.mulf %78, %84 : vector<12x12xf32>
    %86 = arith.select %83, %85, %78 : vector<12x12xi1>, vector<12x12xf32>
    %cst_44 = arith.constant dense<0.000000e+00> : vector<12xf32>
    %87 = vector.multi_reduction <add>, %86, %cst_44 [1] : vector<12x12xf32> to vector<12xf32>
    %88 = vector.shape_cast %87 : vector<12xf32> to vector<12x1xf32>
    %89 = vector.broadcast %88 : vector<12x1xf32> to vector<12x12xf32>
    %90 = arith.divf %86, %89 : vector<12x12xf32>
    %91 = arith.truncf %90 : vector<12x12xf32> to vector<12x12xbf16>
    %92 = vector.extract_strided_slice %51 {offsets = [0, 0], sizes = [12, 8], strides = [1, 1]} : vector<12x32xf32> to vector<12x8xf32>
    %93 = arith.truncf %92 : vector<12x8xf32> to vector<12x8xbf16>
    %cst_45 = arith.constant dense<0.000000e+00> : vector<12x8xf32>
    %94 = tpu.matmul %91, %93, %cst_45 {dimension_numbers = #tpu.dot_dimension_numbers<[1], [0], [0], [1], [0, 0, 1, 1], [], []>} : vector<12x12xbf16>, vector<12x8xbf16>, vector<12x8xf32> -> vector<12x8xf32>
    %95 = vector.extract_strided_slice %49 {offsets = [0, 8], sizes = [12, 8], strides = [1, 1]} : vector<12x32xf32> to vector<12x8xf32>
    %96 = arith.truncf %95 : vector<12x8xf32> to vector<12x8xbf16>
    %97 = vector.extract_strided_slice %50 {offsets = [0, 8], sizes = [12, 8], strides = [1, 1]} : vector<12x32xf32> to vector<12x8xf32>
    %98 = arith.truncf %97 : vector<12x8xf32> to vector<12x8xbf16>
    %cst_46 = arith.constant dense<0.000000e+00> : vector<12x12xf32>
    %99 = tpu.matmul %96, %98, %cst_46 {dimension_numbers = #tpu.dot_dimension_numbers<[1], [1], [0], [0], [0, 0, 1, 0], [], []>} : vector<12x8xbf16>, vector<12x8xbf16>, vector<12x12xf32> -> vector<12x12xf32>
    %100 = vector.broadcast %14 : vector<1x12xf32> to vector<12x12xf32>
    %101 = arith.addf %99, %100 : vector<12x12xf32>
    %cst_47 = arith.constant dense<0xFF800000> : vector<12xf32>
    %102 = vector.multi_reduction <maximumf>, %101, %cst_47 [1] : vector<12x12xf32> to vector<12xf32>
    %103 = vector.shape_cast %102 : vector<12xf32> to vector<12x1xf32>
    %104 = vector.broadcast %103 : vector<12x1xf32> to vector<12x12xf32>
    %105 = arith.subf %101, %104 : vector<12x12xf32>
    %106 = math.exp %105 : vector<12x12xf32>
    %cst_48 = arith.constant dense<0.000000e+00> : vector<12xf32>
    %107 = vector.multi_reduction <add>, %106, %cst_48 [1] : vector<12x12xf32> to vector<12xf32>
    %108 = vector.shape_cast %107 : vector<12xf32> to vector<12x1xf32>
    %109 = tpu.reciprocal %108 {approx = true} : vector<12x1xf32> -> vector<12x1xf32>
    %110 = vector.broadcast %109 : vector<12x1xf32> to vector<12x12xf32>
    %111 = arith.mulf %106, %110 : vector<12x12xf32>
    %cst_49 = arith.constant dense<0xFF800000> : vector<12xf32>
    %112 = vector.multi_reduction <maximumf>, %111, %cst_49 [1] : vector<12x12xf32> to vector<12xf32>
    %113 = vector.shape_cast %112 : vector<12xf32> to vector<12x1xf32>
    %114 = vector.broadcast %113 : vector<12x1xf32> to vector<12x12xf32>
    %115 = arith.cmpf oge, %111, %114 : vector<12x12xf32>
    %116 = arith.ori %115, %61 : vector<12x12xi1>
    %cst_50 = arith.constant 1.200000e+00 : f32
    %117 = vector.broadcast %cst_50 : f32 to vector<12x12xf32>
    %118 = arith.mulf %111, %117 : vector<12x12xf32>
    %119 = arith.select %116, %118, %111 : vector<12x12xi1>, vector<12x12xf32>
    %cst_51 = arith.constant dense<0.000000e+00> : vector<12xf32>
    %120 = vector.multi_reduction <add>, %119, %cst_51 [1] : vector<12x12xf32> to vector<12xf32>
    %121 = vector.shape_cast %120 : vector<12xf32> to vector<12x1xf32>
    %122 = vector.broadcast %121 : vector<12x1xf32> to vector<12x12xf32>
    %123 = arith.divf %119, %122 : vector<12x12xf32>
    %124 = arith.truncf %123 : vector<12x12xf32> to vector<12x12xbf16>
    %125 = vector.extract_strided_slice %51 {offsets = [0, 8], sizes = [12, 8], strides = [1, 1]} : vector<12x32xf32> to vector<12x8xf32>
    %126 = arith.truncf %125 : vector<12x8xf32> to vector<12x8xbf16>
    %cst_52 = arith.constant dense<0.000000e+00> : vector<12x8xf32>
    %127 = tpu.matmul %124, %126, %cst_52 {dimension_numbers = #tpu.dot_dimension_numbers<[1], [0], [0], [1], [0, 0, 1, 1], [], []>} : vector<12x12xbf16>, vector<12x8xbf16>, vector<12x8xf32> -> vector<12x8xf32>
    %128 = vector.extract_strided_slice %49 {offsets = [0, 16], sizes = [12, 8], strides = [1, 1]} : vector<12x32xf32> to vector<12x8xf32>
    %129 = arith.truncf %128 : vector<12x8xf32> to vector<12x8xbf16>
    %130 = vector.extract_strided_slice %50 {offsets = [0, 16], sizes = [12, 8], strides = [1, 1]} : vector<12x32xf32> to vector<12x8xf32>
    %131 = arith.truncf %130 : vector<12x8xf32> to vector<12x8xbf16>
    %cst_53 = arith.constant dense<0.000000e+00> : vector<12x12xf32>
    %132 = tpu.matmul %129, %131, %cst_53 {dimension_numbers = #tpu.dot_dimension_numbers<[1], [1], [0], [0], [0, 0, 1, 0], [], []>} : vector<12x8xbf16>, vector<12x8xbf16>, vector<12x12xf32> -> vector<12x12xf32>
    %133 = vector.broadcast %14 : vector<1x12xf32> to vector<12x12xf32>
    %134 = arith.addf %132, %133 : vector<12x12xf32>
    %cst_54 = arith.constant dense<0xFF800000> : vector<12xf32>
    %135 = vector.multi_reduction <maximumf>, %134, %cst_54 [1] : vector<12x12xf32> to vector<12xf32>
    %136 = vector.shape_cast %135 : vector<12xf32> to vector<12x1xf32>
    %137 = vector.broadcast %136 : vector<12x1xf32> to vector<12x12xf32>
    %138 = arith.subf %134, %137 : vector<12x12xf32>
    %139 = math.exp %138 : vector<12x12xf32>
    %cst_55 = arith.constant dense<0.000000e+00> : vector<12xf32>
    %140 = vector.multi_reduction <add>, %139, %cst_55 [1] : vector<12x12xf32> to vector<12xf32>
    %141 = vector.shape_cast %140 : vector<12xf32> to vector<12x1xf32>
    %142 = tpu.reciprocal %141 {approx = true} : vector<12x1xf32> -> vector<12x1xf32>
    %143 = vector.broadcast %142 : vector<12x1xf32> to vector<12x12xf32>
    %144 = arith.mulf %139, %143 : vector<12x12xf32>
    %cst_56 = arith.constant dense<0xFF800000> : vector<12xf32>
    %145 = vector.multi_reduction <maximumf>, %144, %cst_56 [1] : vector<12x12xf32> to vector<12xf32>
    %146 = vector.shape_cast %145 : vector<12xf32> to vector<12x1xf32>
    %147 = vector.broadcast %146 : vector<12x1xf32> to vector<12x12xf32>
    %148 = arith.cmpf oge, %144, %147 : vector<12x12xf32>
    %149 = arith.ori %148, %61 : vector<12x12xi1>
    %cst_57 = arith.constant 1.200000e+00 : f32
    %150 = vector.broadcast %cst_57 : f32 to vector<12x12xf32>
    %151 = arith.mulf %144, %150 : vector<12x12xf32>
    %152 = arith.select %149, %151, %144 : vector<12x12xi1>, vector<12x12xf32>
    %cst_58 = arith.constant dense<0.000000e+00> : vector<12xf32>
    %153 = vector.multi_reduction <add>, %152, %cst_58 [1] : vector<12x12xf32> to vector<12xf32>
    %154 = vector.shape_cast %153 : vector<12xf32> to vector<12x1xf32>
    %155 = vector.broadcast %154 : vector<12x1xf32> to vector<12x12xf32>
    %156 = arith.divf %152, %155 : vector<12x12xf32>
    %157 = arith.truncf %156 : vector<12x12xf32> to vector<12x12xbf16>
    %158 = vector.extract_strided_slice %51 {offsets = [0, 16], sizes = [12, 8], strides = [1, 1]} : vector<12x32xf32> to vector<12x8xf32>
    %159 = arith.truncf %158 : vector<12x8xf32> to vector<12x8xbf16>
    %cst_59 = arith.constant dense<0.000000e+00> : vector<12x8xf32>
    %160 = tpu.matmul %157, %159, %cst_59 {dimension_numbers = #tpu.dot_dimension_numbers<[1], [0], [0], [1], [0, 0, 1, 1], [], []>} : vector<12x12xbf16>, vector<12x8xbf16>, vector<12x8xf32> -> vector<12x8xf32>
    %161 = vector.extract_strided_slice %49 {offsets = [0, 24], sizes = [12, 8], strides = [1, 1]} : vector<12x32xf32> to vector<12x8xf32>
    %162 = arith.truncf %161 : vector<12x8xf32> to vector<12x8xbf16>
    %163 = vector.extract_strided_slice %50 {offsets = [0, 24], sizes = [12, 8], strides = [1, 1]} : vector<12x32xf32> to vector<12x8xf32>
    %164 = arith.truncf %163 : vector<12x8xf32> to vector<12x8xbf16>
    %cst_60 = arith.constant dense<0.000000e+00> : vector<12x12xf32>
    %165 = tpu.matmul %162, %164, %cst_60 {dimension_numbers = #tpu.dot_dimension_numbers<[1], [1], [0], [0], [0, 0, 1, 0], [], []>} : vector<12x8xbf16>, vector<12x8xbf16>, vector<12x12xf32> -> vector<12x12xf32>
    %166 = vector.broadcast %14 : vector<1x12xf32> to vector<12x12xf32>
    %167 = arith.addf %165, %166 : vector<12x12xf32>
    %cst_61 = arith.constant dense<0xFF800000> : vector<12xf32>
    %168 = vector.multi_reduction <maximumf>, %167, %cst_61 [1] : vector<12x12xf32> to vector<12xf32>
    %169 = vector.shape_cast %168 : vector<12xf32> to vector<12x1xf32>
    %170 = vector.broadcast %169 : vector<12x1xf32> to vector<12x12xf32>
    %171 = arith.subf %167, %170 : vector<12x12xf32>
    %172 = math.exp %171 : vector<12x12xf32>
    %cst_62 = arith.constant dense<0.000000e+00> : vector<12xf32>
    %173 = vector.multi_reduction <add>, %172, %cst_62 [1] : vector<12x12xf32> to vector<12xf32>
    %174 = vector.shape_cast %173 : vector<12xf32> to vector<12x1xf32>
    %175 = tpu.reciprocal %174 {approx = true} : vector<12x1xf32> -> vector<12x1xf32>
    %176 = vector.broadcast %175 : vector<12x1xf32> to vector<12x12xf32>
    %177 = arith.mulf %172, %176 : vector<12x12xf32>
    %cst_63 = arith.constant dense<0xFF800000> : vector<12xf32>
    %178 = vector.multi_reduction <maximumf>, %177, %cst_63 [1] : vector<12x12xf32> to vector<12xf32>
    %179 = vector.shape_cast %178 : vector<12xf32> to vector<12x1xf32>
    %180 = vector.broadcast %179 : vector<12x1xf32> to vector<12x12xf32>
    %181 = arith.cmpf oge, %177, %180 : vector<12x12xf32>
    %182 = arith.ori %181, %61 : vector<12x12xi1>
    %cst_64 = arith.constant 1.200000e+00 : f32
    %183 = vector.broadcast %cst_64 : f32 to vector<12x12xf32>
    %184 = arith.mulf %177, %183 : vector<12x12xf32>
    %185 = arith.select %182, %184, %177 : vector<12x12xi1>, vector<12x12xf32>
    %cst_65 = arith.constant dense<0.000000e+00> : vector<12xf32>
    %186 = vector.multi_reduction <add>, %185, %cst_65 [1] : vector<12x12xf32> to vector<12xf32>
    %187 = vector.shape_cast %186 : vector<12xf32> to vector<12x1xf32>
    %188 = vector.broadcast %187 : vector<12x1xf32> to vector<12x12xf32>
    %189 = arith.divf %185, %188 : vector<12x12xf32>
    %190 = arith.truncf %189 : vector<12x12xf32> to vector<12x12xbf16>
    %191 = vector.extract_strided_slice %51 {offsets = [0, 24], sizes = [12, 8], strides = [1, 1]} : vector<12x32xf32> to vector<12x8xf32>
    %192 = arith.truncf %191 : vector<12x8xf32> to vector<12x8xbf16>
    %cst_66 = arith.constant dense<0.000000e+00> : vector<12x8xf32>
    %193 = tpu.matmul %190, %192, %cst_66 {dimension_numbers = #tpu.dot_dimension_numbers<[1], [0], [0], [1], [0, 0, 1, 1], [], []>} : vector<12x12xbf16>, vector<12x8xbf16>, vector<12x8xf32> -> vector<12x8xf32>
    %194 = tpu.concatenate %94, %127, %160, %193 in 1 : vector<12x8xf32>, vector<12x8xf32>, vector<12x8xf32>, vector<12x8xf32> -> vector<12x32xf32>
    %195 = arith.truncf %194 : vector<12x32xf32> to vector<12x32xbf16>
    %cst_67 = arith.constant dense<0.000000e+00> : vector<12x32xf32>
    %196 = tpu.matmul %195, %55, %cst_67 {dimension_numbers = #tpu.dot_dimension_numbers<[1], [0], [0], [1], [0, 0, 1, 1], [], []>} : vector<12x32xbf16>, vector<32x32xbf16>, vector<12x32xf32> -> vector<12x32xf32>
    %197 = vector.broadcast %57 : vector<1x32xf32> to vector<12x32xf32>
    %198 = arith.addf %196, %197 : vector<12x32xf32>
    %199 = arith.addf %12, %198 : vector<12x32xf32>
    %cst_68 = arith.constant dense<0.000000e+00> : vector<12xf32>
    %200 = vector.multi_reduction <add>, %199, %cst_68 [1] : vector<12x32xf32> to vector<12xf32>
    %201 = vector.shape_cast %200 : vector<12xf32> to vector<12x1xf32>
    %cst_69 = arith.constant 3.200000e+01 : f32
    %202 = vector.broadcast %cst_69 : f32 to vector<12x1xf32>
    %203 = arith.divf %201, %202 : vector<12x1xf32>
    %204 = vector.broadcast %203 : vector<12x1xf32> to vector<12x32xf32>
    %205 = arith.subf %199, %204 : vector<12x32xf32>
    %206 = arith.mulf %205, %205 : vector<12x32xf32>
    %cst_70 = arith.constant dense<0.000000e+00> : vector<12xf32>
    %207 = vector.multi_reduction <add>, %206, %cst_70 [1] : vector<12x32xf32> to vector<12xf32>
    %208 = vector.shape_cast %207 : vector<12xf32> to vector<12x1xf32>
    %cst_71 = arith.constant 3.200000e+01 : f32
    %209 = vector.broadcast %cst_71 : f32 to vector<12x1xf32>
    %210 = arith.divf %208, %209 : vector<12x1xf32>
    %211 = vector.broadcast %203 : vector<12x1xf32> to vector<12x32xf32>
    %212 = arith.subf %199, %211 : vector<12x32xf32>
    %cst_72 = arith.constant 9.99999974E-6 : f32
    %213 = vector.broadcast %cst_72 : f32 to vector<12x1xf32>
    %214 = arith.addf %210, %213 : vector<12x1xf32>
    %215 = math.rsqrt %214 : vector<12x1xf32>
    %216 = vector.broadcast %215 : vector<12x1xf32> to vector<12x32xf32>
    %217 = arith.mulf %212, %216 : vector<12x32xf32>
    %218 = vector.broadcast %16 : vector<1x32xf32> to vector<12x32xf32>
    %219 = arith.mulf %217, %218 : vector<12x32xf32>
    %220 = vector.broadcast %18 : vector<1x32xf32> to vector<12x32xf32>
    %221 = arith.addf %219, %220 : vector<12x32xf32>
    %c0_73 = arith.constant 0 : index
    %c0_74 = arith.constant 0 : index
    %c0_75 = arith.constant 0 : index
    %222 = vector.load %arg12[%c0_73, %c0_74, %c0_75] : memref<2x32x128xbf16, #tpu.memory_space<vmem>>, vector<1x32x128xbf16>
    %223 = vector.shape_cast %222 : vector<1x32x128xbf16> to vector<32x128xbf16>
    %c0_76 = arith.constant 0 : index
    %c0_77 = arith.constant 0 : index
    %c0_78 = arith.constant 0 : index
    %224 = vector.load %arg13[%c0_76, %c0_77, %c0_78] : memref<2x1x128xf32, #tpu.memory_space<vmem>>, vector<1x1x128xf32>
    %225 = vector.shape_cast %224 : vector<1x1x128xf32> to vector<1x128xf32>
    %c0_79 = arith.constant 0 : index
    %c0_80 = arith.constant 0 : index
    %c0_81 = arith.constant 0 : index
    %226 = vector.load %arg14[%c0_79, %c0_80, %c0_81] : memref<2x128x32xbf16, #tpu.memory_space<vmem>>, vector<1x128x32xbf16>
    %227 = vector.shape_cast %226 : vector<1x128x32xbf16> to vector<128x32xbf16>
    %c0_82 = arith.constant 0 : index
    %c0_83 = arith.constant 0 : index
    %c0_84 = arith.constant 0 : index
    %228 = vector.load %arg15[%c0_82, %c0_83, %c0_84] : memref<2x1x32xf32, #tpu.memory_space<vmem>>, vector<1x1x32xf32>
    %229 = vector.shape_cast %228 : vector<1x1x32xf32> to vector<1x32xf32>
    %230 = arith.truncf %221 : vector<12x32xf32> to vector<12x32xbf16>
    %cst_85 = arith.constant dense<0.000000e+00> : vector<12x128xf32>
    %231 = tpu.matmul %230, %223, %cst_85 {dimension_numbers = #tpu.dot_dimension_numbers<[1], [0], [0], [1], [0, 0, 1, 1], [], []>} : vector<12x32xbf16>, vector<32x128xbf16>, vector<12x128xf32> -> vector<12x128xf32>
    %232 = vector.broadcast %225 : vector<1x128xf32> to vector<12x128xf32>
    %233 = arith.addf %231, %232 : vector<12x128xf32>
    %cst_86 = arith.constant 0.000000e+00 : f32
    %234 = vector.broadcast %cst_86 : f32 to vector<12x128xf32>
    %235 = arith.maximumf %233, %234 : vector<12x128xf32>
    %236 = arith.truncf %235 : vector<12x128xf32> to vector<12x128xbf16>
    %cst_87 = arith.constant dense<0.000000e+00> : vector<12x32xf32>
    %237 = tpu.matmul %236, %227, %cst_87 {dimension_numbers = #tpu.dot_dimension_numbers<[1], [0], [0], [1], [0, 0, 1, 1], [], []>} : vector<12x128xbf16>, vector<128x32xbf16>, vector<12x32xf32> -> vector<12x32xf32>
    %238 = vector.broadcast %229 : vector<1x32xf32> to vector<12x32xf32>
    %239 = arith.addf %237, %238 : vector<12x32xf32>
    %240 = arith.addf %199, %239 : vector<12x32xf32>
    %c1 = arith.constant 1 : index
    %c0_88 = arith.constant 0 : index
    %c0_89 = arith.constant 0 : index
    %241 = vector.load %arg6[%c1, %c0_88, %c0_89] : memref<2x1x32xf32, #tpu.memory_space<vmem>>, vector<1x1x32xf32>
    %242 = vector.shape_cast %241 : vector<1x1x32xf32> to vector<1x32xf32>
    %c1_90 = arith.constant 1 : index
    %c0_91 = arith.constant 0 : index
    %c0_92 = arith.constant 0 : index
    %243 = vector.load %arg7[%c1_90, %c0_91, %c0_92] : memref<2x1x32xf32, #tpu.memory_space<vmem>>, vector<1x1x32xf32>
    %244 = vector.shape_cast %243 : vector<1x1x32xf32> to vector<1x32xf32>
    %cst_93 = arith.constant dense<0.000000e+00> : vector<12xf32>
    %245 = vector.multi_reduction <add>, %240, %cst_93 [1] : vector<12x32xf32> to vector<12xf32>
    %246 = vector.shape_cast %245 : vector<12xf32> to vector<12x1xf32>
    %cst_94 = arith.constant 3.200000e+01 : f32
    %247 = vector.broadcast %cst_94 : f32 to vector<12x1xf32>
    %248 = arith.divf %246, %247 : vector<12x1xf32>
    %249 = vector.broadcast %248 : vector<12x1xf32> to vector<12x32xf32>
    %250 = arith.subf %240, %249 : vector<12x32xf32>
    %251 = arith.mulf %250, %250 : vector<12x32xf32>
    %cst_95 = arith.constant dense<0.000000e+00> : vector<12xf32>
    %252 = vector.multi_reduction <add>, %251, %cst_95 [1] : vector<12x32xf32> to vector<12xf32>
    %253 = vector.shape_cast %252 : vector<12xf32> to vector<12x1xf32>
    %cst_96 = arith.constant 3.200000e+01 : f32
    %254 = vector.broadcast %cst_96 : f32 to vector<12x1xf32>
    %255 = arith.divf %253, %254 : vector<12x1xf32>
    %256 = vector.broadcast %248 : vector<12x1xf32> to vector<12x32xf32>
    %257 = arith.subf %240, %256 : vector<12x32xf32>
    %cst_97 = arith.constant 9.99999974E-6 : f32
    %258 = vector.broadcast %cst_97 : f32 to vector<12x1xf32>
    %259 = arith.addf %255, %258 : vector<12x1xf32>
    %260 = math.rsqrt %259 : vector<12x1xf32>
    %261 = vector.broadcast %260 : vector<12x1xf32> to vector<12x32xf32>
    %262 = arith.mulf %257, %261 : vector<12x32xf32>
    %263 = vector.broadcast %242 : vector<1x32xf32> to vector<12x32xf32>
    %264 = arith.mulf %262, %263 : vector<12x32xf32>
    %265 = vector.broadcast %244 : vector<1x32xf32> to vector<12x32xf32>
    %266 = arith.addf %264, %265 : vector<12x32xf32>
    %267 = arith.truncf %266 : vector<12x32xf32> to vector<12x32xbf16>
    %c1_98 = arith.constant 1 : index
    %c0_99 = arith.constant 0 : index
    %c0_100 = arith.constant 0 : index
    %268 = vector.load %arg8[%c1_98, %c0_99, %c0_100] : memref<2x32x96xbf16, #tpu.memory_space<vmem>>, vector<1x32x96xbf16>
    %269 = vector.shape_cast %268 : vector<1x32x96xbf16> to vector<32x96xbf16>
    %cst_101 = arith.constant dense<0.000000e+00> : vector<12x96xf32>
    %270 = tpu.matmul %267, %269, %cst_101 {dimension_numbers = #tpu.dot_dimension_numbers<[1], [0], [0], [1], [0, 0, 1, 1], [], []>} : vector<12x32xbf16>, vector<32x96xbf16>, vector<12x96xf32> -> vector<12x96xf32>
    %c1_102 = arith.constant 1 : index
    %c0_103 = arith.constant 0 : index
    %c0_104 = arith.constant 0 : index
    %271 = vector.load %arg9[%c1_102, %c0_103, %c0_104] : memref<2x1x96xf32, #tpu.memory_space<vmem>>, vector<1x1x96xf32>
    %272 = vector.shape_cast %271 : vector<1x1x96xf32> to vector<1x96xf32>
    %273 = vector.broadcast %272 : vector<1x96xf32> to vector<12x96xf32>
    %274 = arith.addf %270, %273 : vector<12x96xf32>
    %275 = vector.extract_strided_slice %274 {offsets = [0, 0], sizes = [12, 32], strides = [1, 1]} : vector<12x96xf32> to vector<12x32xf32>
    %276 = vector.extract_strided_slice %274 {offsets = [0, 32], sizes = [12, 32], strides = [1, 1]} : vector<12x96xf32> to vector<12x32xf32>
    %277 = vector.extract_strided_slice %274 {offsets = [0, 64], sizes = [12, 32], strides = [1, 1]} : vector<12x96xf32> to vector<12x32xf32>
    %c1_105 = arith.constant 1 : index
    %c0_106 = arith.constant 0 : index
    %c0_107 = arith.constant 0 : index
    %278 = vector.load %arg3[%c1_105, %c0_106, %c0_107] : memref<2x1x12xf32, #tpu.memory_space<vmem>>, vector<1x1x12xf32>
    %279 = vector.shape_cast %278 : vector<1x1x12xf32> to vector<1x12xf32>
    %c1_108 = arith.constant 1 : index
    %c0_109 = arith.constant 0 : index
    %c0_110 = arith.constant 0 : index
    %280 = vector.load %arg10[%c1_108, %c0_109, %c0_110] : memref<2x32x32xbf16, #tpu.memory_space<vmem>>, vector<1x32x32xbf16>
    %281 = vector.shape_cast %280 : vector<1x32x32xbf16> to vector<32x32xbf16>
    %c1_111 = arith.constant 1 : index
    %c0_112 = arith.constant 0 : index
    %c0_113 = arith.constant 0 : index
    %282 = vector.load %arg11[%c1_111, %c0_112, %c0_113] : memref<2x1x32xf32, #tpu.memory_space<vmem>>, vector<1x1x32xf32>
    %283 = vector.shape_cast %282 : vector<1x1x32xf32> to vector<1x32xf32>
    %cst_114 = arith.constant 0.000000e+00 : f32
    %284 = vector.broadcast %cst_114 : f32 to vector<1x12xf32>
    %285 = arith.cmpf ogt, %279, %284 : vector<1x12xf32>
    %286 = vector.shape_cast %285 : vector<1x12xi1> to vector<1x12xi1>
    %287 = vector.broadcast %286 : vector<1x12xi1> to vector<12x12xi1>
    %288 = vector.extract_strided_slice %275 {offsets = [0, 0], sizes = [12, 8], strides = [1, 1]} : vector<12x32xf32> to vector<12x8xf32>
    %289 = arith.truncf %288 : vector<12x8xf32> to vector<12x8xbf16>
    %290 = vector.extract_strided_slice %276 {offsets = [0, 0], sizes = [12, 8], strides = [1, 1]} : vector<12x32xf32> to vector<12x8xf32>
    %291 = arith.truncf %290 : vector<12x8xf32> to vector<12x8xbf16>
    %cst_115 = arith.constant dense<0.000000e+00> : vector<12x12xf32>
    %292 = tpu.matmul %289, %291, %cst_115 {dimension_numbers = #tpu.dot_dimension_numbers<[1], [1], [0], [0], [0, 0, 1, 0], [], []>} : vector<12x8xbf16>, vector<12x8xbf16>, vector<12x12xf32> -> vector<12x12xf32>
    %293 = vector.broadcast %14 : vector<1x12xf32> to vector<12x12xf32>
    %294 = arith.addf %292, %293 : vector<12x12xf32>
    %cst_116 = arith.constant dense<0xFF800000> : vector<12xf32>
    %295 = vector.multi_reduction <maximumf>, %294, %cst_116 [1] : vector<12x12xf32> to vector<12xf32>
    %296 = vector.shape_cast %295 : vector<12xf32> to vector<12x1xf32>
    %297 = vector.broadcast %296 : vector<12x1xf32> to vector<12x12xf32>
    %298 = arith.subf %294, %297 : vector<12x12xf32>
    %299 = math.exp %298 : vector<12x12xf32>
    %cst_117 = arith.constant dense<0.000000e+00> : vector<12xf32>
    %300 = vector.multi_reduction <add>, %299, %cst_117 [1] : vector<12x12xf32> to vector<12xf32>
    %301 = vector.shape_cast %300 : vector<12xf32> to vector<12x1xf32>
    %302 = tpu.reciprocal %301 {approx = true} : vector<12x1xf32> -> vector<12x1xf32>
    %303 = vector.broadcast %302 : vector<12x1xf32> to vector<12x12xf32>
    %304 = arith.mulf %299, %303 : vector<12x12xf32>
    %cst_118 = arith.constant dense<0xFF800000> : vector<12xf32>
    %305 = vector.multi_reduction <maximumf>, %304, %cst_118 [1] : vector<12x12xf32> to vector<12xf32>
    %306 = vector.shape_cast %305 : vector<12xf32> to vector<12x1xf32>
    %307 = vector.broadcast %306 : vector<12x1xf32> to vector<12x12xf32>
    %308 = arith.cmpf oge, %304, %307 : vector<12x12xf32>
    %309 = arith.ori %308, %287 : vector<12x12xi1>
    %cst_119 = arith.constant 1.200000e+00 : f32
    %310 = vector.broadcast %cst_119 : f32 to vector<12x12xf32>
    %311 = arith.mulf %304, %310 : vector<12x12xf32>
    %312 = arith.select %309, %311, %304 : vector<12x12xi1>, vector<12x12xf32>
    %cst_120 = arith.constant dense<0.000000e+00> : vector<12xf32>
    %313 = vector.multi_reduction <add>, %312, %cst_120 [1] : vector<12x12xf32> to vector<12xf32>
    %314 = vector.shape_cast %313 : vector<12xf32> to vector<12x1xf32>
    %315 = vector.broadcast %314 : vector<12x1xf32> to vector<12x12xf32>
    %316 = arith.divf %312, %315 : vector<12x12xf32>
    %317 = arith.truncf %316 : vector<12x12xf32> to vector<12x12xbf16>
    %318 = vector.extract_strided_slice %277 {offsets = [0, 0], sizes = [12, 8], strides = [1, 1]} : vector<12x32xf32> to vector<12x8xf32>
    %319 = arith.truncf %318 : vector<12x8xf32> to vector<12x8xbf16>
    %cst_121 = arith.constant dense<0.000000e+00> : vector<12x8xf32>
    %320 = tpu.matmul %317, %319, %cst_121 {dimension_numbers = #tpu.dot_dimension_numbers<[1], [0], [0], [1], [0, 0, 1, 1], [], []>} : vector<12x12xbf16>, vector<12x8xbf16>, vector<12x8xf32> -> vector<12x8xf32>
    %321 = vector.extract_strided_slice %275 {offsets = [0, 8], sizes = [12, 8], strides = [1, 1]} : vector<12x32xf32> to vector<12x8xf32>
    %322 = arith.truncf %321 : vector<12x8xf32> to vector<12x8xbf16>
    %323 = vector.extract_strided_slice %276 {offsets = [0, 8], sizes = [12, 8], strides = [1, 1]} : vector<12x32xf32> to vector<12x8xf32>
    %324 = arith.truncf %323 : vector<12x8xf32> to vector<12x8xbf16>
    %cst_122 = arith.constant dense<0.000000e+00> : vector<12x12xf32>
    %325 = tpu.matmul %322, %324, %cst_122 {dimension_numbers = #tpu.dot_dimension_numbers<[1], [1], [0], [0], [0, 0, 1, 0], [], []>} : vector<12x8xbf16>, vector<12x8xbf16>, vector<12x12xf32> -> vector<12x12xf32>
    %326 = vector.broadcast %14 : vector<1x12xf32> to vector<12x12xf32>
    %327 = arith.addf %325, %326 : vector<12x12xf32>
    %cst_123 = arith.constant dense<0xFF800000> : vector<12xf32>
    %328 = vector.multi_reduction <maximumf>, %327, %cst_123 [1] : vector<12x12xf32> to vector<12xf32>
    %329 = vector.shape_cast %328 : vector<12xf32> to vector<12x1xf32>
    %330 = vector.broadcast %329 : vector<12x1xf32> to vector<12x12xf32>
    %331 = arith.subf %327, %330 : vector<12x12xf32>
    %332 = math.exp %331 : vector<12x12xf32>
    %cst_124 = arith.constant dense<0.000000e+00> : vector<12xf32>
    %333 = vector.multi_reduction <add>, %332, %cst_124 [1] : vector<12x12xf32> to vector<12xf32>
    %334 = vector.shape_cast %333 : vector<12xf32> to vector<12x1xf32>
    %335 = tpu.reciprocal %334 {approx = true} : vector<12x1xf32> -> vector<12x1xf32>
    %336 = vector.broadcast %335 : vector<12x1xf32> to vector<12x12xf32>
    %337 = arith.mulf %332, %336 : vector<12x12xf32>
    %cst_125 = arith.constant dense<0xFF800000> : vector<12xf32>
    %338 = vector.multi_reduction <maximumf>, %337, %cst_125 [1] : vector<12x12xf32> to vector<12xf32>
    %339 = vector.shape_cast %338 : vector<12xf32> to vector<12x1xf32>
    %340 = vector.broadcast %339 : vector<12x1xf32> to vector<12x12xf32>
    %341 = arith.cmpf oge, %337, %340 : vector<12x12xf32>
    %342 = arith.ori %341, %287 : vector<12x12xi1>
    %cst_126 = arith.constant 1.200000e+00 : f32
    %343 = vector.broadcast %cst_126 : f32 to vector<12x12xf32>
    %344 = arith.mulf %337, %343 : vector<12x12xf32>
    %345 = arith.select %342, %344, %337 : vector<12x12xi1>, vector<12x12xf32>
    %cst_127 = arith.constant dense<0.000000e+00> : vector<12xf32>
    %346 = vector.multi_reduction <add>, %345, %cst_127 [1] : vector<12x12xf32> to vector<12xf32>
    %347 = vector.shape_cast %346 : vector<12xf32> to vector<12x1xf32>
    %348 = vector.broadcast %347 : vector<12x1xf32> to vector<12x12xf32>
    %349 = arith.divf %345, %348 : vector<12x12xf32>
    %350 = arith.truncf %349 : vector<12x12xf32> to vector<12x12xbf16>
    %351 = vector.extract_strided_slice %277 {offsets = [0, 8], sizes = [12, 8], strides = [1, 1]} : vector<12x32xf32> to vector<12x8xf32>
    %352 = arith.truncf %351 : vector<12x8xf32> to vector<12x8xbf16>
    %cst_128 = arith.constant dense<0.000000e+00> : vector<12x8xf32>
    %353 = tpu.matmul %350, %352, %cst_128 {dimension_numbers = #tpu.dot_dimension_numbers<[1], [0], [0], [1], [0, 0, 1, 1], [], []>} : vector<12x12xbf16>, vector<12x8xbf16>, vector<12x8xf32> -> vector<12x8xf32>
    %354 = vector.extract_strided_slice %275 {offsets = [0, 16], sizes = [12, 8], strides = [1, 1]} : vector<12x32xf32> to vector<12x8xf32>
    %355 = arith.truncf %354 : vector<12x8xf32> to vector<12x8xbf16>
    %356 = vector.extract_strided_slice %276 {offsets = [0, 16], sizes = [12, 8], strides = [1, 1]} : vector<12x32xf32> to vector<12x8xf32>
    %357 = arith.truncf %356 : vector<12x8xf32> to vector<12x8xbf16>
    %cst_129 = arith.constant dense<0.000000e+00> : vector<12x12xf32>
    %358 = tpu.matmul %355, %357, %cst_129 {dimension_numbers = #tpu.dot_dimension_numbers<[1], [1], [0], [0], [0, 0, 1, 0], [], []>} : vector<12x8xbf16>, vector<12x8xbf16>, vector<12x12xf32> -> vector<12x12xf32>
    %359 = vector.broadcast %14 : vector<1x12xf32> to vector<12x12xf32>
    %360 = arith.addf %358, %359 : vector<12x12xf32>
    %cst_130 = arith.constant dense<0xFF800000> : vector<12xf32>
    %361 = vector.multi_reduction <maximumf>, %360, %cst_130 [1] : vector<12x12xf32> to vector<12xf32>
    %362 = vector.shape_cast %361 : vector<12xf32> to vector<12x1xf32>
    %363 = vector.broadcast %362 : vector<12x1xf32> to vector<12x12xf32>
    %364 = arith.subf %360, %363 : vector<12x12xf32>
    %365 = math.exp %364 : vector<12x12xf32>
    %cst_131 = arith.constant dense<0.000000e+00> : vector<12xf32>
    %366 = vector.multi_reduction <add>, %365, %cst_131 [1] : vector<12x12xf32> to vector<12xf32>
    %367 = vector.shape_cast %366 : vector<12xf32> to vector<12x1xf32>
    %368 = tpu.reciprocal %367 {approx = true} : vector<12x1xf32> -> vector<12x1xf32>
    %369 = vector.broadcast %368 : vector<12x1xf32> to vector<12x12xf32>
    %370 = arith.mulf %365, %369 : vector<12x12xf32>
    %cst_132 = arith.constant dense<0xFF800000> : vector<12xf32>
    %371 = vector.multi_reduction <maximumf>, %370, %cst_132 [1] : vector<12x12xf32> to vector<12xf32>
    %372 = vector.shape_cast %371 : vector<12xf32> to vector<12x1xf32>
    %373 = vector.broadcast %372 : vector<12x1xf32> to vector<12x12xf32>
    %374 = arith.cmpf oge, %370, %373 : vector<12x12xf32>
    %375 = arith.ori %374, %287 : vector<12x12xi1>
    %cst_133 = arith.constant 1.200000e+00 : f32
    %376 = vector.broadcast %cst_133 : f32 to vector<12x12xf32>
    %377 = arith.mulf %370, %376 : vector<12x12xf32>
    %378 = arith.select %375, %377, %370 : vector<12x12xi1>, vector<12x12xf32>
    %cst_134 = arith.constant dense<0.000000e+00> : vector<12xf32>
    %379 = vector.multi_reduction <add>, %378, %cst_134 [1] : vector<12x12xf32> to vector<12xf32>
    %380 = vector.shape_cast %379 : vector<12xf32> to vector<12x1xf32>
    %381 = vector.broadcast %380 : vector<12x1xf32> to vector<12x12xf32>
    %382 = arith.divf %378, %381 : vector<12x12xf32>
    %383 = arith.truncf %382 : vector<12x12xf32> to vector<12x12xbf16>
    %384 = vector.extract_strided_slice %277 {offsets = [0, 16], sizes = [12, 8], strides = [1, 1]} : vector<12x32xf32> to vector<12x8xf32>
    %385 = arith.truncf %384 : vector<12x8xf32> to vector<12x8xbf16>
    %cst_135 = arith.constant dense<0.000000e+00> : vector<12x8xf32>
    %386 = tpu.matmul %383, %385, %cst_135 {dimension_numbers = #tpu.dot_dimension_numbers<[1], [0], [0], [1], [0, 0, 1, 1], [], []>} : vector<12x12xbf16>, vector<12x8xbf16>, vector<12x8xf32> -> vector<12x8xf32>
    %387 = vector.extract_strided_slice %275 {offsets = [0, 24], sizes = [12, 8], strides = [1, 1]} : vector<12x32xf32> to vector<12x8xf32>
    %388 = arith.truncf %387 : vector<12x8xf32> to vector<12x8xbf16>
    %389 = vector.extract_strided_slice %276 {offsets = [0, 24], sizes = [12, 8], strides = [1, 1]} : vector<12x32xf32> to vector<12x8xf32>
    %390 = arith.truncf %389 : vector<12x8xf32> to vector<12x8xbf16>
    %cst_136 = arith.constant dense<0.000000e+00> : vector<12x12xf32>
    %391 = tpu.matmul %388, %390, %cst_136 {dimension_numbers = #tpu.dot_dimension_numbers<[1], [1], [0], [0], [0, 0, 1, 0], [], []>} : vector<12x8xbf16>, vector<12x8xbf16>, vector<12x12xf32> -> vector<12x12xf32>
    %392 = vector.broadcast %14 : vector<1x12xf32> to vector<12x12xf32>
    %393 = arith.addf %391, %392 : vector<12x12xf32>
    %cst_137 = arith.constant dense<0xFF800000> : vector<12xf32>
    %394 = vector.multi_reduction <maximumf>, %393, %cst_137 [1] : vector<12x12xf32> to vector<12xf32>
    %395 = vector.shape_cast %394 : vector<12xf32> to vector<12x1xf32>
    %396 = vector.broadcast %395 : vector<12x1xf32> to vector<12x12xf32>
    %397 = arith.subf %393, %396 : vector<12x12xf32>
    %398 = math.exp %397 : vector<12x12xf32>
    %cst_138 = arith.constant dense<0.000000e+00> : vector<12xf32>
    %399 = vector.multi_reduction <add>, %398, %cst_138 [1] : vector<12x12xf32> to vector<12xf32>
    %400 = vector.shape_cast %399 : vector<12xf32> to vector<12x1xf32>
    %401 = tpu.reciprocal %400 {approx = true} : vector<12x1xf32> -> vector<12x1xf32>
    %402 = vector.broadcast %401 : vector<12x1xf32> to vector<12x12xf32>
    %403 = arith.mulf %398, %402 : vector<12x12xf32>
    %cst_139 = arith.constant dense<0xFF800000> : vector<12xf32>
    %404 = vector.multi_reduction <maximumf>, %403, %cst_139 [1] : vector<12x12xf32> to vector<12xf32>
    %405 = vector.shape_cast %404 : vector<12xf32> to vector<12x1xf32>
    %406 = vector.broadcast %405 : vector<12x1xf32> to vector<12x12xf32>
    %407 = arith.cmpf oge, %403, %406 : vector<12x12xf32>
    %408 = arith.ori %407, %287 : vector<12x12xi1>
    %cst_140 = arith.constant 1.200000e+00 : f32
    %409 = vector.broadcast %cst_140 : f32 to vector<12x12xf32>
    %410 = arith.mulf %403, %409 : vector<12x12xf32>
    %411 = arith.select %408, %410, %403 : vector<12x12xi1>, vector<12x12xf32>
    %cst_141 = arith.constant dense<0.000000e+00> : vector<12xf32>
    %412 = vector.multi_reduction <add>, %411, %cst_141 [1] : vector<12x12xf32> to vector<12xf32>
    %413 = vector.shape_cast %412 : vector<12xf32> to vector<12x1xf32>
    %414 = vector.broadcast %413 : vector<12x1xf32> to vector<12x12xf32>
    %415 = arith.divf %411, %414 : vector<12x12xf32>
    %416 = arith.truncf %415 : vector<12x12xf32> to vector<12x12xbf16>
    %417 = vector.extract_strided_slice %277 {offsets = [0, 24], sizes = [12, 8], strides = [1, 1]} : vector<12x32xf32> to vector<12x8xf32>
    %418 = arith.truncf %417 : vector<12x8xf32> to vector<12x8xbf16>
    %cst_142 = arith.constant dense<0.000000e+00> : vector<12x8xf32>
    %419 = tpu.matmul %416, %418, %cst_142 {dimension_numbers = #tpu.dot_dimension_numbers<[1], [0], [0], [1], [0, 0, 1, 1], [], []>} : vector<12x12xbf16>, vector<12x8xbf16>, vector<12x8xf32> -> vector<12x8xf32>
    %420 = tpu.concatenate %320, %353, %386, %419 in 1 : vector<12x8xf32>, vector<12x8xf32>, vector<12x8xf32>, vector<12x8xf32> -> vector<12x32xf32>
    %421 = arith.truncf %420 : vector<12x32xf32> to vector<12x32xbf16>
    %cst_143 = arith.constant dense<0.000000e+00> : vector<12x32xf32>
    %422 = tpu.matmul %421, %281, %cst_143 {dimension_numbers = #tpu.dot_dimension_numbers<[1], [0], [0], [1], [0, 0, 1, 1], [], []>} : vector<12x32xbf16>, vector<32x32xbf16>, vector<12x32xf32> -> vector<12x32xf32>
    %423 = vector.broadcast %283 : vector<1x32xf32> to vector<12x32xf32>
    %424 = arith.addf %422, %423 : vector<12x32xf32>
    %425 = arith.addf %240, %424 : vector<12x32xf32>
    %cst_144 = arith.constant dense<0.000000e+00> : vector<12xf32>
    %426 = vector.multi_reduction <add>, %425, %cst_144 [1] : vector<12x32xf32> to vector<12xf32>
    %427 = vector.shape_cast %426 : vector<12xf32> to vector<12x1xf32>
    %cst_145 = arith.constant 3.200000e+01 : f32
    %428 = vector.broadcast %cst_145 : f32 to vector<12x1xf32>
    %429 = arith.divf %427, %428 : vector<12x1xf32>
    %430 = vector.broadcast %429 : vector<12x1xf32> to vector<12x32xf32>
    %431 = arith.subf %425, %430 : vector<12x32xf32>
    %432 = arith.mulf %431, %431 : vector<12x32xf32>
    %cst_146 = arith.constant dense<0.000000e+00> : vector<12xf32>
    %433 = vector.multi_reduction <add>, %432, %cst_146 [1] : vector<12x32xf32> to vector<12xf32>
    %434 = vector.shape_cast %433 : vector<12xf32> to vector<12x1xf32>
    %cst_147 = arith.constant 3.200000e+01 : f32
    %435 = vector.broadcast %cst_147 : f32 to vector<12x1xf32>
    %436 = arith.divf %434, %435 : vector<12x1xf32>
    %437 = vector.broadcast %429 : vector<12x1xf32> to vector<12x32xf32>
    %438 = arith.subf %425, %437 : vector<12x32xf32>
    %cst_148 = arith.constant 9.99999974E-6 : f32
    %439 = vector.broadcast %cst_148 : f32 to vector<12x1xf32>
    %440 = arith.addf %436, %439 : vector<12x1xf32>
    %441 = math.rsqrt %440 : vector<12x1xf32>
    %442 = vector.broadcast %441 : vector<12x1xf32> to vector<12x32xf32>
    %443 = arith.mulf %438, %442 : vector<12x32xf32>
    %444 = vector.broadcast %242 : vector<1x32xf32> to vector<12x32xf32>
    %445 = arith.mulf %443, %444 : vector<12x32xf32>
    %446 = vector.broadcast %244 : vector<1x32xf32> to vector<12x32xf32>
    %447 = arith.addf %445, %446 : vector<12x32xf32>
    %c1_149 = arith.constant 1 : index
    %c0_150 = arith.constant 0 : index
    %c0_151 = arith.constant 0 : index
    %448 = vector.load %arg12[%c1_149, %c0_150, %c0_151] : memref<2x32x128xbf16, #tpu.memory_space<vmem>>, vector<1x32x128xbf16>
    %449 = vector.shape_cast %448 : vector<1x32x128xbf16> to vector<32x128xbf16>
    %c1_152 = arith.constant 1 : index
    %c0_153 = arith.constant 0 : index
    %c0_154 = arith.constant 0 : index
    %450 = vector.load %arg13[%c1_152, %c0_153, %c0_154] : memref<2x1x128xf32, #tpu.memory_space<vmem>>, vector<1x1x128xf32>
    %451 = vector.shape_cast %450 : vector<1x1x128xf32> to vector<1x128xf32>
    %c1_155 = arith.constant 1 : index
    %c0_156 = arith.constant 0 : index
    %c0_157 = arith.constant 0 : index
    %452 = vector.load %arg14[%c1_155, %c0_156, %c0_157] : memref<2x128x32xbf16, #tpu.memory_space<vmem>>, vector<1x128x32xbf16>
    %453 = vector.shape_cast %452 : vector<1x128x32xbf16> to vector<128x32xbf16>
    %c1_158 = arith.constant 1 : index
    %c0_159 = arith.constant 0 : index
    %c0_160 = arith.constant 0 : index
    %454 = vector.load %arg15[%c1_158, %c0_159, %c0_160] : memref<2x1x32xf32, #tpu.memory_space<vmem>>, vector<1x1x32xf32>
    %455 = vector.shape_cast %454 : vector<1x1x32xf32> to vector<1x32xf32>
    %456 = arith.truncf %447 : vector<12x32xf32> to vector<12x32xbf16>
    %cst_161 = arith.constant dense<0.000000e+00> : vector<12x128xf32>
    %457 = tpu.matmul %456, %449, %cst_161 {dimension_numbers = #tpu.dot_dimension_numbers<[1], [0], [0], [1], [0, 0, 1, 1], [], []>} : vector<12x32xbf16>, vector<32x128xbf16>, vector<12x128xf32> -> vector<12x128xf32>
    %458 = vector.broadcast %451 : vector<1x128xf32> to vector<12x128xf32>
    %459 = arith.addf %457, %458 : vector<12x128xf32>
    %cst_162 = arith.constant 0.000000e+00 : f32
    %460 = vector.broadcast %cst_162 : f32 to vector<12x128xf32>
    %461 = arith.maximumf %459, %460 : vector<12x128xf32>
    %462 = arith.truncf %461 : vector<12x128xf32> to vector<12x128xbf16>
    %cst_163 = arith.constant dense<0.000000e+00> : vector<12x32xf32>
    %463 = tpu.matmul %462, %453, %cst_163 {dimension_numbers = #tpu.dot_dimension_numbers<[1], [0], [0], [1], [0, 0, 1, 1], [], []>} : vector<12x128xbf16>, vector<128x32xbf16>, vector<12x32xf32> -> vector<12x32xf32>
    %464 = vector.broadcast %455 : vector<1x32xf32> to vector<12x32xf32>
    %465 = arith.addf %463, %464 : vector<12x32xf32>
    %466 = arith.addf %425, %465 : vector<12x32xf32>
    %c0_164 = arith.constant 0 : index
    %c0_165 = arith.constant 0 : index
    %c0_166 = arith.constant 0 : index
    %467 = vector.load %arg16[%c0_164, %c0_165, %c0_166] : memref<1x12x32xf32, #tpu.memory_space<vmem>>, vector<1x12x32xf32>
    %468 = vector.shape_cast %467 : vector<1x12x32xf32> to vector<12x32xf32>
    %469 = vector.shape_cast %466 : vector<12x32xf32> to vector<1x12x32xf32>
    tpu.vector_store %arg16[%c0_164, %c0_165, %c0_166], %469 {strides = array<i32>} : memref<1x12x32xf32, #tpu.memory_space<vmem>>, vector<1x12x32xf32>,
    return
  }
  func.func @transform_0(%arg0: i32) -> (i32, i32, i32) {
    %c0_i32 = arith.constant 0 : i32
    %c0_i32_0 = arith.constant 0 : i32
    %c0_i32_1 = arith.constant 0 : i32
    return %arg0, %c0_i32, %c0_i32_0 : i32, i32, i32
  }
  func.func @transform_1(%arg0: i32) -> (i32, i32, i32) {
    %c0_i32 = arith.constant 0 : i32
    %c0_i32_0 = arith.constant 0 : i32
    %c0_i32_1 = arith.constant 0 : i32
    return %arg0, %c0_i32, %c0_i32_0 : i32, i32, i32
  }
  func.func @transform_2(%arg0: i32) -> (i32, i32, i32) {
    %c0_i32 = arith.constant 0 : i32
    %c0_i32_0 = arith.constant 0 : i32
    %c0_i32_1 = arith.constant 0 : i32
    %c0_i32_2 = arith.constant 0 : i32
    return %c0_i32, %c0_i32_0, %c0_i32_1 : i32, i32, i32
  }
  func.func @transform_3(%arg0: i32) -> (i32, i32) {
    %c0_i32 = arith.constant 0 : i32
    %c0_i32_0 = arith.constant 0 : i32
    %c0_i32_1 = arith.constant 0 : i32
    return %c0_i32, %c0_i32_0 : i32, i32
  }
  func.func @transform_4(%arg0: i32) -> (i32, i32) {
    %c0_i32 = arith.constant 0 : i32
    %c0_i32_0 = arith.constant 0 : i32
    %c0_i32_1 = arith.constant 0 : i32
    return %c0_i32, %c0_i32_0 : i32, i32
  }
  func.func @transform_5(%arg0: i32) -> (i32, i32, i32) {
    %c0_i32 = arith.constant 0 : i32
    %c0_i32_0 = arith.constant 0 : i32
    %c0_i32_1 = arith.constant 0 : i32
    %c0_i32_2 = arith.constant 0 : i32
    return %c0_i32, %c0_i32_0, %c0_i32_1 : i32, i32, i32
  }
  func.func @transform_6(%arg0: i32) -> (i32, i32, i32) {
    %c0_i32 = arith.constant 0 : i32
    %c0_i32_0 = arith.constant 0 : i32
    %c0_i32_1 = arith.constant 0 : i32
    %c0_i32_2 = arith.constant 0 : i32
    return %c0_i32, %c0_i32_0, %c0_i32_1 : i32, i32, i32
  }
  func.func @transform_7(%arg0: i32) -> (i32, i32, i32) {
    %c0_i32 = arith.constant 0 : i32
    %c0_i32_0 = arith.constant 0 : i32
    %c0_i32_1 = arith.constant 0 : i32
    %c0_i32_2 = arith.constant 0 : i32
    return %c0_i32, %c0_i32_0, %c0_i32_1 : i32, i32, i32
  }
  func.func @transform_8(%arg0: i32) -> (i32, i32, i32) {
    %c0_i32 = arith.constant 0 : i32
    %c0_i32_0 = arith.constant 0 : i32
    %c0_i32_1 = arith.constant 0 : i32
    %c0_i32_2 = arith.constant 0 : i32
    return %c0_i32, %c0_i32_0, %c0_i32_1 : i32, i32, i32
  }
  func.func @transform_9(%arg0: i32) -> (i32, i32, i32) {
    %c0_i32 = arith.constant 0 : i32
    %c0_i32_0 = arith.constant 0 : i32
    %c0_i32_1 = arith.constant 0 : i32
    %c0_i32_2 = arith.constant 0 : i32
    return %c0_i32, %c0_i32_0, %c0_i32_1 : i32, i32, i32
  }
  func.func @transform_10(%arg0: i32) -> (i32, i32, i32) {
    %c0_i32 = arith.constant 0 : i32
    %c0_i32_0 = arith.constant 0 : i32
    %c0_i32_1 = arith.constant 0 : i32
    %c0_i32_2 = arith.constant 0 : i32
    return %c0_i32, %c0_i32_0, %c0_i32_1 : i32, i32, i32
  }
  func.func @transform_11(%arg0: i32) -> (i32, i32, i32) {
    %c0_i32 = arith.constant 0 : i32
    %c0_i32_0 = arith.constant 0 : i32
    %c0_i32_1 = arith.constant 0 : i32
    %c0_i32_2 = arith.constant 0 : i32
    return %c0_i32, %c0_i32_0, %c0_i32_1 : i32, i32, i32
  }
  func.func @transform_12(%arg0: i32) -> (i32, i32, i32) {
    %c0_i32 = arith.constant 0 : i32
    %c0_i32_0 = arith.constant 0 : i32
    %c0_i32_1 = arith.constant 0 : i32
    %c0_i32_2 = arith.constant 0 : i32
    return %c0_i32, %c0_i32_0, %c0_i32_1 : i32, i32, i32
  }
  func.func @transform_13(%arg0: i32) -> (i32, i32, i32) {
    %c0_i32 = arith.constant 0 : i32
    %c0_i32_0 = arith.constant 0 : i32
    %c0_i32_1 = arith.constant 0 : i32
    %c0_i32_2 = arith.constant 0 : i32
    return %c0_i32, %c0_i32_0, %c0_i32_1 : i32, i32, i32
  }
  func.func @transform_14(%arg0: i32) -> (i32, i32, i32) {
    %c0_i32 = arith.constant 0 : i32
    %c0_i32_0 = arith.constant 0 : i32
    %c0_i32_1 = arith.constant 0 : i32
    %c0_i32_2 = arith.constant 0 : i32
    return %c0_i32, %c0_i32_0, %c0_i32_1 : i32, i32, i32
  }
  func.func @transform_15(%arg0: i32) -> (i32, i32, i32) {
    %c0_i32 = arith.constant 0 : i32
    %c0_i32_0 = arith.constant 0 : i32
    %c0_i32_1 = arith.constant 0 : i32
    return %arg0, %c0_i32, %c0_i32_0 : i32, i32, i32
  }
}

module attributes {stable_mosaic.version = 11 : i64} {
  func.func @_decoder_stack_kernel(%arg0: i32, %arg1: memref<1x8x1xi32, #tpu.memory_space<vmem>>, %arg2: memref<1x12x32xf32, #tpu.memory_space<vmem>>, %arg3: memref<1x1x12xf32, #tpu.memory_space<vmem>>, %arg4: memref<2x1x8xf32, #tpu.memory_space<vmem>>, %arg5: memref<2x1x12xf32, #tpu.memory_space<vmem>>, %arg6: memref<40x32xbf16, #tpu.memory_space<vmem>>, %arg7: memref<8x32xf32, #tpu.memory_space<vmem>>, %arg8: memref<2x1x32xf32, #tpu.memory_space<vmem>>, %arg9: memref<2x1x32xf32, #tpu.memory_space<vmem>>, %arg10: memref<2x32x96xbf16, #tpu.memory_space<vmem>>, %arg11: memref<2x1x96xf32, #tpu.memory_space<vmem>>, %arg12: memref<2x32x32xbf16, #tpu.memory_space<vmem>>, %arg13: memref<2x1x32xf32, #tpu.memory_space<vmem>>, %arg14: memref<2x32x32xbf16, #tpu.memory_space<vmem>>, %arg15: memref<2x1x32xf32, #tpu.memory_space<vmem>>, %arg16: memref<2x32x64xbf16, #tpu.memory_space<vmem>>, %arg17: memref<2x1x64xf32, #tpu.memory_space<vmem>>, %arg18: memref<2x32x32xbf16, #tpu.memory_space<vmem>>, %arg19: memref<2x1x32xf32, #tpu.memory_space<vmem>>, %arg20: memref<2x32x128xbf16, #tpu.memory_space<vmem>>, %arg21: memref<2x1x128xf32, #tpu.memory_space<vmem>>, %arg22: memref<2x128x32xbf16, #tpu.memory_space<vmem>>, %arg23: memref<2x1x32xf32, #tpu.memory_space<vmem>>, %arg24: memref<1x32xf32, #tpu.memory_space<vmem>>, %arg25: memref<1x32xf32, #tpu.memory_space<vmem>>, %arg26: memref<32x128xbf16, #tpu.memory_space<vmem>>, %arg27: memref<1x128xf32, #tpu.memory_space<vmem>>, %arg28: memref<1x8x128xf32, #tpu.memory_space<vmem>>) attributes {dimension_semantics = [#tpu.dimension_semantics<parallel>], iteration_bounds = array<i64: 2>, scalar_prefetch = 0 : i64, scratch_operands = 0 : i64, tpu.core_type = #tpu.core_type<tc>, window_params = [{transform_indices = @transform_0, window_bounds = array<i64: 1, 8, 1>}, {transform_indices = @transform_1, window_bounds = array<i64: 1, 12, 32>}, {transform_indices = @transform_2, window_bounds = array<i64: 1, 1, 12>}, {pipeline_mode = #tpu.pipeline_mode<synchronous>, transform_indices = @transform_3, window_bounds = array<i64: 2, 1, 8>}, {pipeline_mode = #tpu.pipeline_mode<synchronous>, transform_indices = @transform_4, window_bounds = array<i64: 2, 1, 12>}, {pipeline_mode = #tpu.pipeline_mode<synchronous>, transform_indices = @transform_5, window_bounds = array<i64: 40, 32>}, {pipeline_mode = #tpu.pipeline_mode<synchronous>, transform_indices = @transform_6, window_bounds = array<i64: 8, 32>}, {pipeline_mode = #tpu.pipeline_mode<synchronous>, transform_indices = @transform_7, window_bounds = array<i64: 2, 1, 32>}, {pipeline_mode = #tpu.pipeline_mode<synchronous>, transform_indices = @transform_8, window_bounds = array<i64: 2, 1, 32>}, {pipeline_mode = #tpu.pipeline_mode<synchronous>, transform_indices = @transform_9, window_bounds = array<i64: 2, 32, 96>}, {pipeline_mode = #tpu.pipeline_mode<synchronous>, transform_indices = @transform_10, window_bounds = array<i64: 2, 1, 96>}, {pipeline_mode = #tpu.pipeline_mode<synchronous>, transform_indices = @transform_11, window_bounds = array<i64: 2, 32, 32>}, {pipeline_mode = #tpu.pipeline_mode<synchronous>, transform_indices = @transform_12, window_bounds = array<i64: 2, 1, 32>}, {pipeline_mode = #tpu.pipeline_mode<synchronous>, transform_indices = @transform_13, window_bounds = array<i64: 2, 32, 32>}, {pipeline_mode = #tpu.pipeline_mode<synchronous>, transform_indices = @transform_14, window_bounds = array<i64: 2, 1, 32>}, {pipeline_mode = #tpu.pipeline_mode<synchronous>, transform_indices = @transform_15, window_bounds = array<i64: 2, 32, 64>}, {pipeline_mode = #tpu.pipeline_mode<synchronous>, transform_indices = @transform_16, window_bounds = array<i64: 2, 1, 64>}, {pipeline_mode = #tpu.pipeline_mode<synchronous>, transform_indices = @transform_17, window_bounds = array<i64: 2, 32, 32>}, {pipeline_mode = #tpu.pipeline_mode<synchronous>, transform_indices = @transform_18, window_bounds = array<i64: 2, 1, 32>}, {pipeline_mode = #tpu.pipeline_mode<synchronous>, transform_indices = @transform_19, window_bounds = array<i64: 2, 32, 128>}, {pipeline_mode = #tpu.pipeline_mode<synchronous>, transform_indices = @transform_20, window_bounds = array<i64: 2, 1, 128>}, {pipeline_mode = #tpu.pipeline_mode<synchronous>, transform_indices = @transform_21, window_bounds = array<i64: 2, 128, 32>}, {pipeline_mode = #tpu.pipeline_mode<synchronous>, transform_indices = @transform_22, window_bounds = array<i64: 2, 1, 32>}, {pipeline_mode = #tpu.pipeline_mode<synchronous>, transform_indices = @transform_23, window_bounds = array<i64: 1, 32>}, {pipeline_mode = #tpu.pipeline_mode<synchronous>, transform_indices = @transform_24, window_bounds = array<i64: 1, 32>}, {pipeline_mode = #tpu.pipeline_mode<synchronous>, transform_indices = @transform_25, window_bounds = array<i64: 32, 128>}, {pipeline_mode = #tpu.pipeline_mode<synchronous>, transform_indices = @transform_26, window_bounds = array<i64: 1, 128>}, {transform_indices = @transform_27, window_bounds = array<i64: 1, 8, 128>}]} {
    %c0 = arith.constant 0 : index
    %c0_0 = arith.constant 0 : index
    %c0_1 = arith.constant 0 : index
    %0 = vector.load %arg1[%c0, %c0_0, %c0_1] : memref<1x8x1xi32, #tpu.memory_space<vmem>>, vector<1x8x1xi32>
    %1 = vector.shape_cast %0 : vector<1x8x1xi32> to vector<8x1xi32>
    %c0_2 = arith.constant 0 : index
    %c0_3 = arith.constant 0 : index
    %2 = vector.load %arg6[%c0_2, %c0_3] : memref<40x32xbf16, #tpu.memory_space<vmem>>, vector<40x32xbf16>
    %c0_4 = arith.constant 0 : index
    %c0_5 = arith.constant 0 : index
    %3 = vector.load %arg7[%c0_4, %c0_5] : memref<8x32xf32, #tpu.memory_space<vmem>>, vector<8x32xf32>
    %4 = tpu.iota {dimensions = array<i32: 1>} : vector<8x40xi32>
    %5 = vector.broadcast %1 : vector<8x1xi32> to vector<8x40xi32>
    %6 = arith.cmpi eq, %5, %4 : vector<8x40xi32>
    %cst = arith.constant 1.000000e+00 : f32
    %cst_6 = arith.constant 0.000000e+00 : f32
    %7 = vector.broadcast %cst : f32 to vector<8x40xf32>
    %8 = vector.broadcast %cst_6 : f32 to vector<8x40xf32>
    %9 = arith.select %6, %7, %8 : vector<8x40xi1>, vector<8x40xf32>
    %10 = arith.truncf %9 : vector<8x40xf32> to vector<8x40xbf16>
    %cst_7 = arith.constant dense<0.000000e+00> : vector<8x32xf32>
    %11 = tpu.matmul %10, %2, %cst_7 {dimension_numbers = #tpu.dot_dimension_numbers<[1], [0], [0], [1], [0, 0, 1, 1], [], []>} : vector<8x40xbf16>, vector<40x32xbf16>, vector<8x32xf32> -> vector<8x32xf32>
    %12 = arith.addf %11, %3 : vector<8x32xf32>
    %c0_8 = arith.constant 0 : index
    %c0_9 = arith.constant 0 : index
    %c0_10 = arith.constant 0 : index
    %13 = vector.load %arg2[%c0_8, %c0_9, %c0_10] : memref<1x12x32xf32, #tpu.memory_space<vmem>>, vector<1x12x32xf32>
    %14 = vector.shape_cast %13 : vector<1x12x32xf32> to vector<12x32xf32>
    %c0_11 = arith.constant 0 : index
    %c0_12 = arith.constant 0 : index
    %c0_13 = arith.constant 0 : index
    %15 = vector.load %arg3[%c0_11, %c0_12, %c0_13] : memref<1x1x12xf32, #tpu.memory_space<vmem>>, vector<1x1x12xf32>
    %16 = vector.shape_cast %15 : vector<1x1x12xf32> to vector<1x12xf32>
    %17 = tpu.iota {dimensions = array<i32: 0>} : vector<8x8xi32>
    %18 = tpu.iota {dimensions = array<i32: 1>} : vector<8x8xi32>
    %19 = arith.cmpi sgt, %18, %17 : vector<8x8xi32>
    %cst_14 = arith.constant -1.000000e+30 : f32
    %cst_15 = arith.constant 0.000000e+00 : f32
    %20 = vector.broadcast %cst_14 : f32 to vector<8x8xf32>
    %21 = vector.broadcast %cst_15 : f32 to vector<8x8xf32>
    %22 = arith.select %19, %20, %21 : vector<8x8xi1>, vector<8x8xf32>
    %c0_16 = arith.constant 0 : index
    %c0_17 = arith.constant 0 : index
    %c0_18 = arith.constant 0 : index
    %23 = vector.load %arg8[%c0_16, %c0_17, %c0_18] : memref<2x1x32xf32, #tpu.memory_space<vmem>>, vector<1x1x32xf32>
    %24 = vector.shape_cast %23 : vector<1x1x32xf32> to vector<1x32xf32>
    %c0_19 = arith.constant 0 : index
    %c0_20 = arith.constant 0 : index
    %c0_21 = arith.constant 0 : index
    %25 = vector.load %arg9[%c0_19, %c0_20, %c0_21] : memref<2x1x32xf32, #tpu.memory_space<vmem>>, vector<1x1x32xf32>
    %26 = vector.shape_cast %25 : vector<1x1x32xf32> to vector<1x32xf32>
    %cst_22 = arith.constant dense<0.000000e+00> : vector<8xf32>
    %27 = vector.multi_reduction <add>, %12, %cst_22 [1] : vector<8x32xf32> to vector<8xf32>
    %28 = vector.shape_cast %27 : vector<8xf32> to vector<8x1xf32>
    %cst_23 = arith.constant 3.200000e+01 : f32
    %29 = vector.broadcast %cst_23 : f32 to vector<8x1xf32>
    %30 = arith.divf %28, %29 : vector<8x1xf32>
    %31 = vector.broadcast %30 : vector<8x1xf32> to vector<8x32xf32>
    %32 = arith.subf %12, %31 : vector<8x32xf32>
    %33 = arith.mulf %32, %32 : vector<8x32xf32>
    %cst_24 = arith.constant dense<0.000000e+00> : vector<8xf32>
    %34 = vector.multi_reduction <add>, %33, %cst_24 [1] : vector<8x32xf32> to vector<8xf32>
    %35 = vector.shape_cast %34 : vector<8xf32> to vector<8x1xf32>
    %cst_25 = arith.constant 3.200000e+01 : f32
    %36 = vector.broadcast %cst_25 : f32 to vector<8x1xf32>
    %37 = arith.divf %35, %36 : vector<8x1xf32>
    %38 = vector.broadcast %30 : vector<8x1xf32> to vector<8x32xf32>
    %39 = arith.subf %12, %38 : vector<8x32xf32>
    %cst_26 = arith.constant 9.99999974E-6 : f32
    %40 = vector.broadcast %cst_26 : f32 to vector<8x1xf32>
    %41 = arith.addf %37, %40 : vector<8x1xf32>
    %42 = math.rsqrt %41 : vector<8x1xf32>
    %43 = vector.broadcast %42 : vector<8x1xf32> to vector<8x32xf32>
    %44 = arith.mulf %39, %43 : vector<8x32xf32>
    %45 = vector.broadcast %24 : vector<1x32xf32> to vector<8x32xf32>
    %46 = arith.mulf %44, %45 : vector<8x32xf32>
    %47 = vector.broadcast %26 : vector<1x32xf32> to vector<8x32xf32>
    %48 = arith.addf %46, %47 : vector<8x32xf32>
    %49 = arith.truncf %48 : vector<8x32xf32> to vector<8x32xbf16>
    %c0_27 = arith.constant 0 : index
    %c0_28 = arith.constant 0 : index
    %c0_29 = arith.constant 0 : index
    %50 = vector.load %arg10[%c0_27, %c0_28, %c0_29] : memref<2x32x96xbf16, #tpu.memory_space<vmem>>, vector<1x32x96xbf16>
    %51 = vector.shape_cast %50 : vector<1x32x96xbf16> to vector<32x96xbf16>
    %cst_30 = arith.constant dense<0.000000e+00> : vector<8x96xf32>
    %52 = tpu.matmul %49, %51, %cst_30 {dimension_numbers = #tpu.dot_dimension_numbers<[1], [0], [0], [1], [0, 0, 1, 1], [], []>} : vector<8x32xbf16>, vector<32x96xbf16>, vector<8x96xf32> -> vector<8x96xf32>
    %c0_31 = arith.constant 0 : index
    %c0_32 = arith.constant 0 : index
    %c0_33 = arith.constant 0 : index
    %53 = vector.load %arg11[%c0_31, %c0_32, %c0_33] : memref<2x1x96xf32, #tpu.memory_space<vmem>>, vector<1x1x96xf32>
    %54 = vector.shape_cast %53 : vector<1x1x96xf32> to vector<1x96xf32>
    %55 = vector.broadcast %54 : vector<1x96xf32> to vector<8x96xf32>
    %56 = arith.addf %52, %55 : vector<8x96xf32>
    %57 = vector.extract_strided_slice %56 {offsets = [0, 0], sizes = [8, 32], strides = [1, 1]} : vector<8x96xf32> to vector<8x32xf32>
    %58 = vector.extract_strided_slice %56 {offsets = [0, 32], sizes = [8, 32], strides = [1, 1]} : vector<8x96xf32> to vector<8x32xf32>
    %59 = vector.extract_strided_slice %56 {offsets = [0, 64], sizes = [8, 32], strides = [1, 1]} : vector<8x96xf32> to vector<8x32xf32>
    %c0_34 = arith.constant 0 : index
    %c0_35 = arith.constant 0 : index
    %c0_36 = arith.constant 0 : index
    %60 = vector.load %arg4[%c0_34, %c0_35, %c0_36] : memref<2x1x8xf32, #tpu.memory_space<vmem>>, vector<1x1x8xf32>
    %61 = vector.shape_cast %60 : vector<1x1x8xf32> to vector<1x8xf32>
    %c0_37 = arith.constant 0 : index
    %c0_38 = arith.constant 0 : index
    %c0_39 = arith.constant 0 : index
    %62 = vector.load %arg12[%c0_37, %c0_38, %c0_39] : memref<2x32x32xbf16, #tpu.memory_space<vmem>>, vector<1x32x32xbf16>
    %63 = vector.shape_cast %62 : vector<1x32x32xbf16> to vector<32x32xbf16>
    %c0_40 = arith.constant 0 : index
    %c0_41 = arith.constant 0 : index
    %c0_42 = arith.constant 0 : index
    %64 = vector.load %arg13[%c0_40, %c0_41, %c0_42] : memref<2x1x32xf32, #tpu.memory_space<vmem>>, vector<1x1x32xf32>
    %65 = vector.shape_cast %64 : vector<1x1x32xf32> to vector<1x32xf32>
    %cst_43 = arith.constant 0.000000e+00 : f32
    %66 = vector.broadcast %cst_43 : f32 to vector<1x8xf32>
    %67 = arith.cmpf ogt, %61, %66 : vector<1x8xf32>
    %68 = vector.shape_cast %67 : vector<1x8xi1> to vector<1x8xi1>
    %69 = vector.broadcast %68 : vector<1x8xi1> to vector<8x8xi1>
    %70 = vector.extract_strided_slice %57 {offsets = [0, 0], sizes = [8, 8], strides = [1, 1]} : vector<8x32xf32> to vector<8x8xf32>
    %71 = arith.truncf %70 : vector<8x8xf32> to vector<8x8xbf16>
    %72 = vector.extract_strided_slice %58 {offsets = [0, 0], sizes = [8, 8], strides = [1, 1]} : vector<8x32xf32> to vector<8x8xf32>
    %73 = arith.truncf %72 : vector<8x8xf32> to vector<8x8xbf16>
    %cst_44 = arith.constant dense<0.000000e+00> : vector<8x8xf32>
    %74 = tpu.matmul %71, %73, %cst_44 {dimension_numbers = #tpu.dot_dimension_numbers<[1], [1], [0], [0], [0, 0, 1, 0], [], []>} : vector<8x8xbf16>, vector<8x8xbf16>, vector<8x8xf32> -> vector<8x8xf32>
    %75 = arith.addf %74, %22 : vector<8x8xf32>
    %cst_45 = arith.constant dense<0xFF800000> : vector<8xf32>
    %76 = vector.multi_reduction <maximumf>, %75, %cst_45 [1] : vector<8x8xf32> to vector<8xf32>
    %77 = vector.shape_cast %76 : vector<8xf32> to vector<8x1xf32>
    %78 = vector.broadcast %77 : vector<8x1xf32> to vector<8x8xf32>
    %79 = arith.subf %75, %78 : vector<8x8xf32>
    %80 = math.exp %79 : vector<8x8xf32>
    %cst_46 = arith.constant dense<0.000000e+00> : vector<8xf32>
    %81 = vector.multi_reduction <add>, %80, %cst_46 [1] : vector<8x8xf32> to vector<8xf32>
    %82 = vector.shape_cast %81 : vector<8xf32> to vector<8x1xf32>
    %83 = tpu.reciprocal %82 {approx = true} : vector<8x1xf32> -> vector<8x1xf32>
    %84 = vector.broadcast %83 : vector<8x1xf32> to vector<8x8xf32>
    %85 = arith.mulf %80, %84 : vector<8x8xf32>
    %cst_47 = arith.constant 1.200000e+00 : f32
    %86 = vector.broadcast %cst_47 : f32 to vector<8x8xf32>
    %87 = arith.mulf %85, %86 : vector<8x8xf32>
    %88 = arith.select %69, %87, %85 : vector<8x8xi1>, vector<8x8xf32>
    %cst_48 = arith.constant dense<0.000000e+00> : vector<8xf32>
    %89 = vector.multi_reduction <add>, %88, %cst_48 [1] : vector<8x8xf32> to vector<8xf32>
    %90 = vector.shape_cast %89 : vector<8xf32> to vector<8x1xf32>
    %91 = vector.broadcast %90 : vector<8x1xf32> to vector<8x8xf32>
    %92 = arith.divf %88, %91 : vector<8x8xf32>
    %93 = arith.truncf %92 : vector<8x8xf32> to vector<8x8xbf16>
    %94 = vector.extract_strided_slice %59 {offsets = [0, 0], sizes = [8, 8], strides = [1, 1]} : vector<8x32xf32> to vector<8x8xf32>
    %95 = arith.truncf %94 : vector<8x8xf32> to vector<8x8xbf16>
    %cst_49 = arith.constant dense<0.000000e+00> : vector<8x8xf32>
    %96 = tpu.matmul %93, %95, %cst_49 {dimension_numbers = #tpu.dot_dimension_numbers<[1], [0], [0], [1], [0, 0, 1, 1], [], []>} : vector<8x8xbf16>, vector<8x8xbf16>, vector<8x8xf32> -> vector<8x8xf32>
    %97 = vector.extract_strided_slice %57 {offsets = [0, 8], sizes = [8, 8], strides = [1, 1]} : vector<8x32xf32> to vector<8x8xf32>
    %98 = arith.truncf %97 : vector<8x8xf32> to vector<8x8xbf16>
    %99 = vector.extract_strided_slice %58 {offsets = [0, 8], sizes = [8, 8], strides = [1, 1]} : vector<8x32xf32> to vector<8x8xf32>
    %100 = arith.truncf %99 : vector<8x8xf32> to vector<8x8xbf16>
    %cst_50 = arith.constant dense<0.000000e+00> : vector<8x8xf32>
    %101 = tpu.matmul %98, %100, %cst_50 {dimension_numbers = #tpu.dot_dimension_numbers<[1], [1], [0], [0], [0, 0, 1, 0], [], []>} : vector<8x8xbf16>, vector<8x8xbf16>, vector<8x8xf32> -> vector<8x8xf32>
    %102 = arith.addf %101, %22 : vector<8x8xf32>
    %cst_51 = arith.constant dense<0xFF800000> : vector<8xf32>
    %103 = vector.multi_reduction <maximumf>, %102, %cst_51 [1] : vector<8x8xf32> to vector<8xf32>
    %104 = vector.shape_cast %103 : vector<8xf32> to vector<8x1xf32>
    %105 = vector.broadcast %104 : vector<8x1xf32> to vector<8x8xf32>
    %106 = arith.subf %102, %105 : vector<8x8xf32>
    %107 = math.exp %106 : vector<8x8xf32>
    %cst_52 = arith.constant dense<0.000000e+00> : vector<8xf32>
    %108 = vector.multi_reduction <add>, %107, %cst_52 [1] : vector<8x8xf32> to vector<8xf32>
    %109 = vector.shape_cast %108 : vector<8xf32> to vector<8x1xf32>
    %110 = tpu.reciprocal %109 {approx = true} : vector<8x1xf32> -> vector<8x1xf32>
    %111 = vector.broadcast %110 : vector<8x1xf32> to vector<8x8xf32>
    %112 = arith.mulf %107, %111 : vector<8x8xf32>
    %cst_53 = arith.constant 1.200000e+00 : f32
    %113 = vector.broadcast %cst_53 : f32 to vector<8x8xf32>
    %114 = arith.mulf %112, %113 : vector<8x8xf32>
    %115 = arith.select %69, %114, %112 : vector<8x8xi1>, vector<8x8xf32>
    %cst_54 = arith.constant dense<0.000000e+00> : vector<8xf32>
    %116 = vector.multi_reduction <add>, %115, %cst_54 [1] : vector<8x8xf32> to vector<8xf32>
    %117 = vector.shape_cast %116 : vector<8xf32> to vector<8x1xf32>
    %118 = vector.broadcast %117 : vector<8x1xf32> to vector<8x8xf32>
    %119 = arith.divf %115, %118 : vector<8x8xf32>
    %120 = arith.truncf %119 : vector<8x8xf32> to vector<8x8xbf16>
    %121 = vector.extract_strided_slice %59 {offsets = [0, 8], sizes = [8, 8], strides = [1, 1]} : vector<8x32xf32> to vector<8x8xf32>
    %122 = arith.truncf %121 : vector<8x8xf32> to vector<8x8xbf16>
    %cst_55 = arith.constant dense<0.000000e+00> : vector<8x8xf32>
    %123 = tpu.matmul %120, %122, %cst_55 {dimension_numbers = #tpu.dot_dimension_numbers<[1], [0], [0], [1], [0, 0, 1, 1], [], []>} : vector<8x8xbf16>, vector<8x8xbf16>, vector<8x8xf32> -> vector<8x8xf32>
    %124 = vector.extract_strided_slice %57 {offsets = [0, 16], sizes = [8, 8], strides = [1, 1]} : vector<8x32xf32> to vector<8x8xf32>
    %125 = arith.truncf %124 : vector<8x8xf32> to vector<8x8xbf16>
    %126 = vector.extract_strided_slice %58 {offsets = [0, 16], sizes = [8, 8], strides = [1, 1]} : vector<8x32xf32> to vector<8x8xf32>
    %127 = arith.truncf %126 : vector<8x8xf32> to vector<8x8xbf16>
    %cst_56 = arith.constant dense<0.000000e+00> : vector<8x8xf32>
    %128 = tpu.matmul %125, %127, %cst_56 {dimension_numbers = #tpu.dot_dimension_numbers<[1], [1], [0], [0], [0, 0, 1, 0], [], []>} : vector<8x8xbf16>, vector<8x8xbf16>, vector<8x8xf32> -> vector<8x8xf32>
    %129 = arith.addf %128, %22 : vector<8x8xf32>
    %cst_57 = arith.constant dense<0xFF800000> : vector<8xf32>
    %130 = vector.multi_reduction <maximumf>, %129, %cst_57 [1] : vector<8x8xf32> to vector<8xf32>
    %131 = vector.shape_cast %130 : vector<8xf32> to vector<8x1xf32>
    %132 = vector.broadcast %131 : vector<8x1xf32> to vector<8x8xf32>
    %133 = arith.subf %129, %132 : vector<8x8xf32>
    %134 = math.exp %133 : vector<8x8xf32>
    %cst_58 = arith.constant dense<0.000000e+00> : vector<8xf32>
    %135 = vector.multi_reduction <add>, %134, %cst_58 [1] : vector<8x8xf32> to vector<8xf32>
    %136 = vector.shape_cast %135 : vector<8xf32> to vector<8x1xf32>
    %137 = tpu.reciprocal %136 {approx = true} : vector<8x1xf32> -> vector<8x1xf32>
    %138 = vector.broadcast %137 : vector<8x1xf32> to vector<8x8xf32>
    %139 = arith.mulf %134, %138 : vector<8x8xf32>
    %cst_59 = arith.constant 1.200000e+00 : f32
    %140 = vector.broadcast %cst_59 : f32 to vector<8x8xf32>
    %141 = arith.mulf %139, %140 : vector<8x8xf32>
    %142 = arith.select %69, %141, %139 : vector<8x8xi1>, vector<8x8xf32>
    %cst_60 = arith.constant dense<0.000000e+00> : vector<8xf32>
    %143 = vector.multi_reduction <add>, %142, %cst_60 [1] : vector<8x8xf32> to vector<8xf32>
    %144 = vector.shape_cast %143 : vector<8xf32> to vector<8x1xf32>
    %145 = vector.broadcast %144 : vector<8x1xf32> to vector<8x8xf32>
    %146 = arith.divf %142, %145 : vector<8x8xf32>
    %147 = arith.truncf %146 : vector<8x8xf32> to vector<8x8xbf16>
    %148 = vector.extract_strided_slice %59 {offsets = [0, 16], sizes = [8, 8], strides = [1, 1]} : vector<8x32xf32> to vector<8x8xf32>
    %149 = arith.truncf %148 : vector<8x8xf32> to vector<8x8xbf16>
    %cst_61 = arith.constant dense<0.000000e+00> : vector<8x8xf32>
    %150 = tpu.matmul %147, %149, %cst_61 {dimension_numbers = #tpu.dot_dimension_numbers<[1], [0], [0], [1], [0, 0, 1, 1], [], []>} : vector<8x8xbf16>, vector<8x8xbf16>, vector<8x8xf32> -> vector<8x8xf32>
    %151 = vector.extract_strided_slice %57 {offsets = [0, 24], sizes = [8, 8], strides = [1, 1]} : vector<8x32xf32> to vector<8x8xf32>
    %152 = arith.truncf %151 : vector<8x8xf32> to vector<8x8xbf16>
    %153 = vector.extract_strided_slice %58 {offsets = [0, 24], sizes = [8, 8], strides = [1, 1]} : vector<8x32xf32> to vector<8x8xf32>
    %154 = arith.truncf %153 : vector<8x8xf32> to vector<8x8xbf16>
    %cst_62 = arith.constant dense<0.000000e+00> : vector<8x8xf32>
    %155 = tpu.matmul %152, %154, %cst_62 {dimension_numbers = #tpu.dot_dimension_numbers<[1], [1], [0], [0], [0, 0, 1, 0], [], []>} : vector<8x8xbf16>, vector<8x8xbf16>, vector<8x8xf32> -> vector<8x8xf32>
    %156 = arith.addf %155, %22 : vector<8x8xf32>
    %cst_63 = arith.constant dense<0xFF800000> : vector<8xf32>
    %157 = vector.multi_reduction <maximumf>, %156, %cst_63 [1] : vector<8x8xf32> to vector<8xf32>
    %158 = vector.shape_cast %157 : vector<8xf32> to vector<8x1xf32>
    %159 = vector.broadcast %158 : vector<8x1xf32> to vector<8x8xf32>
    %160 = arith.subf %156, %159 : vector<8x8xf32>
    %161 = math.exp %160 : vector<8x8xf32>
    %cst_64 = arith.constant dense<0.000000e+00> : vector<8xf32>
    %162 = vector.multi_reduction <add>, %161, %cst_64 [1] : vector<8x8xf32> to vector<8xf32>
    %163 = vector.shape_cast %162 : vector<8xf32> to vector<8x1xf32>
    %164 = tpu.reciprocal %163 {approx = true} : vector<8x1xf32> -> vector<8x1xf32>
    %165 = vector.broadcast %164 : vector<8x1xf32> to vector<8x8xf32>
    %166 = arith.mulf %161, %165 : vector<8x8xf32>
    %cst_65 = arith.constant 1.200000e+00 : f32
    %167 = vector.broadcast %cst_65 : f32 to vector<8x8xf32>
    %168 = arith.mulf %166, %167 : vector<8x8xf32>
    %169 = arith.select %69, %168, %166 : vector<8x8xi1>, vector<8x8xf32>
    %cst_66 = arith.constant dense<0.000000e+00> : vector<8xf32>
    %170 = vector.multi_reduction <add>, %169, %cst_66 [1] : vector<8x8xf32> to vector<8xf32>
    %171 = vector.shape_cast %170 : vector<8xf32> to vector<8x1xf32>
    %172 = vector.broadcast %171 : vector<8x1xf32> to vector<8x8xf32>
    %173 = arith.divf %169, %172 : vector<8x8xf32>
    %174 = arith.truncf %173 : vector<8x8xf32> to vector<8x8xbf16>
    %175 = vector.extract_strided_slice %59 {offsets = [0, 24], sizes = [8, 8], strides = [1, 1]} : vector<8x32xf32> to vector<8x8xf32>
    %176 = arith.truncf %175 : vector<8x8xf32> to vector<8x8xbf16>
    %cst_67 = arith.constant dense<0.000000e+00> : vector<8x8xf32>
    %177 = tpu.matmul %174, %176, %cst_67 {dimension_numbers = #tpu.dot_dimension_numbers<[1], [0], [0], [1], [0, 0, 1, 1], [], []>} : vector<8x8xbf16>, vector<8x8xbf16>, vector<8x8xf32> -> vector<8x8xf32>
    %178 = tpu.concatenate %96, %123, %150, %177 in 1 : vector<8x8xf32>, vector<8x8xf32>, vector<8x8xf32>, vector<8x8xf32> -> vector<8x32xf32>
    %179 = arith.truncf %178 : vector<8x32xf32> to vector<8x32xbf16>
    %cst_68 = arith.constant dense<0.000000e+00> : vector<8x32xf32>
    %180 = tpu.matmul %179, %63, %cst_68 {dimension_numbers = #tpu.dot_dimension_numbers<[1], [0], [0], [1], [0, 0, 1, 1], [], []>} : vector<8x32xbf16>, vector<32x32xbf16>, vector<8x32xf32> -> vector<8x32xf32>
    %181 = vector.broadcast %65 : vector<1x32xf32> to vector<8x32xf32>
    %182 = arith.addf %180, %181 : vector<8x32xf32>
    %183 = arith.addf %12, %182 : vector<8x32xf32>
    %cst_69 = arith.constant dense<0.000000e+00> : vector<8xf32>
    %184 = vector.multi_reduction <add>, %183, %cst_69 [1] : vector<8x32xf32> to vector<8xf32>
    %185 = vector.shape_cast %184 : vector<8xf32> to vector<8x1xf32>
    %cst_70 = arith.constant 3.200000e+01 : f32
    %186 = vector.broadcast %cst_70 : f32 to vector<8x1xf32>
    %187 = arith.divf %185, %186 : vector<8x1xf32>
    %188 = vector.broadcast %187 : vector<8x1xf32> to vector<8x32xf32>
    %189 = arith.subf %183, %188 : vector<8x32xf32>
    %190 = arith.mulf %189, %189 : vector<8x32xf32>
    %cst_71 = arith.constant dense<0.000000e+00> : vector<8xf32>
    %191 = vector.multi_reduction <add>, %190, %cst_71 [1] : vector<8x32xf32> to vector<8xf32>
    %192 = vector.shape_cast %191 : vector<8xf32> to vector<8x1xf32>
    %cst_72 = arith.constant 3.200000e+01 : f32
    %193 = vector.broadcast %cst_72 : f32 to vector<8x1xf32>
    %194 = arith.divf %192, %193 : vector<8x1xf32>
    %195 = vector.broadcast %187 : vector<8x1xf32> to vector<8x32xf32>
    %196 = arith.subf %183, %195 : vector<8x32xf32>
    %cst_73 = arith.constant 9.99999974E-6 : f32
    %197 = vector.broadcast %cst_73 : f32 to vector<8x1xf32>
    %198 = arith.addf %194, %197 : vector<8x1xf32>
    %199 = math.rsqrt %198 : vector<8x1xf32>
    %200 = vector.broadcast %199 : vector<8x1xf32> to vector<8x32xf32>
    %201 = arith.mulf %196, %200 : vector<8x32xf32>
    %202 = vector.broadcast %24 : vector<1x32xf32> to vector<8x32xf32>
    %203 = arith.mulf %201, %202 : vector<8x32xf32>
    %204 = vector.broadcast %26 : vector<1x32xf32> to vector<8x32xf32>
    %205 = arith.addf %203, %204 : vector<8x32xf32>
    %206 = arith.truncf %205 : vector<8x32xf32> to vector<8x32xbf16>
    %c0_74 = arith.constant 0 : index
    %c0_75 = arith.constant 0 : index
    %c0_76 = arith.constant 0 : index
    %207 = vector.load %arg14[%c0_74, %c0_75, %c0_76] : memref<2x32x32xbf16, #tpu.memory_space<vmem>>, vector<1x32x32xbf16>
    %208 = vector.shape_cast %207 : vector<1x32x32xbf16> to vector<32x32xbf16>
    %cst_77 = arith.constant dense<0.000000e+00> : vector<8x32xf32>
    %209 = tpu.matmul %206, %208, %cst_77 {dimension_numbers = #tpu.dot_dimension_numbers<[1], [0], [0], [1], [0, 0, 1, 1], [], []>} : vector<8x32xbf16>, vector<32x32xbf16>, vector<8x32xf32> -> vector<8x32xf32>
    %c0_78 = arith.constant 0 : index
    %c0_79 = arith.constant 0 : index
    %c0_80 = arith.constant 0 : index
    %210 = vector.load %arg15[%c0_78, %c0_79, %c0_80] : memref<2x1x32xf32, #tpu.memory_space<vmem>>, vector<1x1x32xf32>
    %211 = vector.shape_cast %210 : vector<1x1x32xf32> to vector<1x32xf32>
    %212 = vector.broadcast %211 : vector<1x32xf32> to vector<8x32xf32>
    %213 = arith.addf %209, %212 : vector<8x32xf32>
    %214 = arith.truncf %14 : vector<12x32xf32> to vector<12x32xbf16>
    %c0_81 = arith.constant 0 : index
    %c0_82 = arith.constant 0 : index
    %c0_83 = arith.constant 0 : index
    %215 = vector.load %arg16[%c0_81, %c0_82, %c0_83] : memref<2x32x64xbf16, #tpu.memory_space<vmem>>, vector<1x32x64xbf16>
    %216 = vector.shape_cast %215 : vector<1x32x64xbf16> to vector<32x64xbf16>
    %cst_84 = arith.constant dense<0.000000e+00> : vector<12x64xf32>
    %217 = tpu.matmul %214, %216, %cst_84 {dimension_numbers = #tpu.dot_dimension_numbers<[1], [0], [0], [1], [0, 0, 1, 1], [], []>} : vector<12x32xbf16>, vector<32x64xbf16>, vector<12x64xf32> -> vector<12x64xf32>
    %c0_85 = arith.constant 0 : index
    %c0_86 = arith.constant 0 : index
    %c0_87 = arith.constant 0 : index
    %218 = vector.load %arg17[%c0_85, %c0_86, %c0_87] : memref<2x1x64xf32, #tpu.memory_space<vmem>>, vector<1x1x64xf32>
    %219 = vector.shape_cast %218 : vector<1x1x64xf32> to vector<1x64xf32>
    %220 = vector.broadcast %219 : vector<1x64xf32> to vector<12x64xf32>
    %221 = arith.addf %217, %220 : vector<12x64xf32>
    %222 = vector.extract_strided_slice %221 {offsets = [0, 0], sizes = [12, 32], strides = [1, 1]} : vector<12x64xf32> to vector<12x32xf32>
    %223 = vector.extract_strided_slice %221 {offsets = [0, 32], sizes = [12, 32], strides = [1, 1]} : vector<12x64xf32> to vector<12x32xf32>
    %c0_88 = arith.constant 0 : index
    %c0_89 = arith.constant 0 : index
    %c0_90 = arith.constant 0 : index
    %224 = vector.load %arg5[%c0_88, %c0_89, %c0_90] : memref<2x1x12xf32, #tpu.memory_space<vmem>>, vector<1x1x12xf32>
    %225 = vector.shape_cast %224 : vector<1x1x12xf32> to vector<1x12xf32>
    %c0_91 = arith.constant 0 : index
    %c0_92 = arith.constant 0 : index
    %c0_93 = arith.constant 0 : index
    %226 = vector.load %arg18[%c0_91, %c0_92, %c0_93] : memref<2x32x32xbf16, #tpu.memory_space<vmem>>, vector<1x32x32xbf16>
    %227 = vector.shape_cast %226 : vector<1x32x32xbf16> to vector<32x32xbf16>
    %c0_94 = arith.constant 0 : index
    %c0_95 = arith.constant 0 : index
    %c0_96 = arith.constant 0 : index
    %228 = vector.load %arg19[%c0_94, %c0_95, %c0_96] : memref<2x1x32xf32, #tpu.memory_space<vmem>>, vector<1x1x32xf32>
    %229 = vector.shape_cast %228 : vector<1x1x32xf32> to vector<1x32xf32>
    %cst_97 = arith.constant 0.000000e+00 : f32
    %230 = vector.broadcast %cst_97 : f32 to vector<1x12xf32>
    %231 = arith.cmpf ogt, %225, %230 : vector<1x12xf32>
    %232 = vector.shape_cast %231 : vector<1x12xi1> to vector<1x12xi1>
    %233 = vector.broadcast %232 : vector<1x12xi1> to vector<8x12xi1>
    %234 = vector.extract_strided_slice %213 {offsets = [0, 0], sizes = [8, 8], strides = [1, 1]} : vector<8x32xf32> to vector<8x8xf32>
    %235 = arith.truncf %234 : vector<8x8xf32> to vector<8x8xbf16>
    %236 = vector.extract_strided_slice %222 {offsets = [0, 0], sizes = [12, 8], strides = [1, 1]} : vector<12x32xf32> to vector<12x8xf32>
    %237 = arith.truncf %236 : vector<12x8xf32> to vector<12x8xbf16>
    %cst_98 = arith.constant dense<0.000000e+00> : vector<8x12xf32>
    %238 = tpu.matmul %235, %237, %cst_98 {dimension_numbers = #tpu.dot_dimension_numbers<[1], [1], [0], [0], [0, 0, 1, 0], [], []>} : vector<8x8xbf16>, vector<12x8xbf16>, vector<8x12xf32> -> vector<8x12xf32>
    %239 = vector.broadcast %16 : vector<1x12xf32> to vector<8x12xf32>
    %240 = arith.addf %238, %239 : vector<8x12xf32>
    %cst_99 = arith.constant dense<0xFF800000> : vector<8xf32>
    %241 = vector.multi_reduction <maximumf>, %240, %cst_99 [1] : vector<8x12xf32> to vector<8xf32>
    %242 = vector.shape_cast %241 : vector<8xf32> to vector<8x1xf32>
    %243 = vector.broadcast %242 : vector<8x1xf32> to vector<8x12xf32>
    %244 = arith.subf %240, %243 : vector<8x12xf32>
    %245 = math.exp %244 : vector<8x12xf32>
    %cst_100 = arith.constant dense<0.000000e+00> : vector<8xf32>
    %246 = vector.multi_reduction <add>, %245, %cst_100 [1] : vector<8x12xf32> to vector<8xf32>
    %247 = vector.shape_cast %246 : vector<8xf32> to vector<8x1xf32>
    %248 = tpu.reciprocal %247 {approx = true} : vector<8x1xf32> -> vector<8x1xf32>
    %249 = vector.broadcast %248 : vector<8x1xf32> to vector<8x12xf32>
    %250 = arith.mulf %245, %249 : vector<8x12xf32>
    %cst_101 = arith.constant dense<0xFF800000> : vector<8xf32>
    %251 = vector.multi_reduction <maximumf>, %250, %cst_101 [1] : vector<8x12xf32> to vector<8xf32>
    %252 = vector.shape_cast %251 : vector<8xf32> to vector<8x1xf32>
    %253 = vector.broadcast %252 : vector<8x1xf32> to vector<8x12xf32>
    %254 = arith.cmpf oge, %250, %253 : vector<8x12xf32>
    %255 = arith.ori %254, %233 : vector<8x12xi1>
    %cst_102 = arith.constant 1.200000e+00 : f32
    %256 = vector.broadcast %cst_102 : f32 to vector<8x12xf32>
    %257 = arith.mulf %250, %256 : vector<8x12xf32>
    %258 = arith.select %255, %257, %250 : vector<8x12xi1>, vector<8x12xf32>
    %cst_103 = arith.constant dense<0.000000e+00> : vector<8xf32>
    %259 = vector.multi_reduction <add>, %258, %cst_103 [1] : vector<8x12xf32> to vector<8xf32>
    %260 = vector.shape_cast %259 : vector<8xf32> to vector<8x1xf32>
    %261 = vector.broadcast %260 : vector<8x1xf32> to vector<8x12xf32>
    %262 = arith.divf %258, %261 : vector<8x12xf32>
    %263 = arith.truncf %262 : vector<8x12xf32> to vector<8x12xbf16>
    %264 = vector.extract_strided_slice %223 {offsets = [0, 0], sizes = [12, 8], strides = [1, 1]} : vector<12x32xf32> to vector<12x8xf32>
    %265 = arith.truncf %264 : vector<12x8xf32> to vector<12x8xbf16>
    %cst_104 = arith.constant dense<0.000000e+00> : vector<8x8xf32>
    %266 = tpu.matmul %263, %265, %cst_104 {dimension_numbers = #tpu.dot_dimension_numbers<[1], [0], [0], [1], [0, 0, 1, 1], [], []>} : vector<8x12xbf16>, vector<12x8xbf16>, vector<8x8xf32> -> vector<8x8xf32>
    %267 = vector.extract_strided_slice %213 {offsets = [0, 8], sizes = [8, 8], strides = [1, 1]} : vector<8x32xf32> to vector<8x8xf32>
    %268 = arith.truncf %267 : vector<8x8xf32> to vector<8x8xbf16>
    %269 = vector.extract_strided_slice %222 {offsets = [0, 8], sizes = [12, 8], strides = [1, 1]} : vector<12x32xf32> to vector<12x8xf32>
    %270 = arith.truncf %269 : vector<12x8xf32> to vector<12x8xbf16>
    %cst_105 = arith.constant dense<0.000000e+00> : vector<8x12xf32>
    %271 = tpu.matmul %268, %270, %cst_105 {dimension_numbers = #tpu.dot_dimension_numbers<[1], [1], [0], [0], [0, 0, 1, 0], [], []>} : vector<8x8xbf16>, vector<12x8xbf16>, vector<8x12xf32> -> vector<8x12xf32>
    %272 = vector.broadcast %16 : vector<1x12xf32> to vector<8x12xf32>
    %273 = arith.addf %271, %272 : vector<8x12xf32>
    %cst_106 = arith.constant dense<0xFF800000> : vector<8xf32>
    %274 = vector.multi_reduction <maximumf>, %273, %cst_106 [1] : vector<8x12xf32> to vector<8xf32>
    %275 = vector.shape_cast %274 : vector<8xf32> to vector<8x1xf32>
    %276 = vector.broadcast %275 : vector<8x1xf32> to vector<8x12xf32>
    %277 = arith.subf %273, %276 : vector<8x12xf32>
    %278 = math.exp %277 : vector<8x12xf32>
    %cst_107 = arith.constant dense<0.000000e+00> : vector<8xf32>
    %279 = vector.multi_reduction <add>, %278, %cst_107 [1] : vector<8x12xf32> to vector<8xf32>
    %280 = vector.shape_cast %279 : vector<8xf32> to vector<8x1xf32>
    %281 = tpu.reciprocal %280 {approx = true} : vector<8x1xf32> -> vector<8x1xf32>
    %282 = vector.broadcast %281 : vector<8x1xf32> to vector<8x12xf32>
    %283 = arith.mulf %278, %282 : vector<8x12xf32>
    %cst_108 = arith.constant dense<0xFF800000> : vector<8xf32>
    %284 = vector.multi_reduction <maximumf>, %283, %cst_108 [1] : vector<8x12xf32> to vector<8xf32>
    %285 = vector.shape_cast %284 : vector<8xf32> to vector<8x1xf32>
    %286 = vector.broadcast %285 : vector<8x1xf32> to vector<8x12xf32>
    %287 = arith.cmpf oge, %283, %286 : vector<8x12xf32>
    %288 = arith.ori %287, %233 : vector<8x12xi1>
    %cst_109 = arith.constant 1.200000e+00 : f32
    %289 = vector.broadcast %cst_109 : f32 to vector<8x12xf32>
    %290 = arith.mulf %283, %289 : vector<8x12xf32>
    %291 = arith.select %288, %290, %283 : vector<8x12xi1>, vector<8x12xf32>
    %cst_110 = arith.constant dense<0.000000e+00> : vector<8xf32>
    %292 = vector.multi_reduction <add>, %291, %cst_110 [1] : vector<8x12xf32> to vector<8xf32>
    %293 = vector.shape_cast %292 : vector<8xf32> to vector<8x1xf32>
    %294 = vector.broadcast %293 : vector<8x1xf32> to vector<8x12xf32>
    %295 = arith.divf %291, %294 : vector<8x12xf32>
    %296 = arith.truncf %295 : vector<8x12xf32> to vector<8x12xbf16>
    %297 = vector.extract_strided_slice %223 {offsets = [0, 8], sizes = [12, 8], strides = [1, 1]} : vector<12x32xf32> to vector<12x8xf32>
    %298 = arith.truncf %297 : vector<12x8xf32> to vector<12x8xbf16>
    %cst_111 = arith.constant dense<0.000000e+00> : vector<8x8xf32>
    %299 = tpu.matmul %296, %298, %cst_111 {dimension_numbers = #tpu.dot_dimension_numbers<[1], [0], [0], [1], [0, 0, 1, 1], [], []>} : vector<8x12xbf16>, vector<12x8xbf16>, vector<8x8xf32> -> vector<8x8xf32>
    %300 = vector.extract_strided_slice %213 {offsets = [0, 16], sizes = [8, 8], strides = [1, 1]} : vector<8x32xf32> to vector<8x8xf32>
    %301 = arith.truncf %300 : vector<8x8xf32> to vector<8x8xbf16>
    %302 = vector.extract_strided_slice %222 {offsets = [0, 16], sizes = [12, 8], strides = [1, 1]} : vector<12x32xf32> to vector<12x8xf32>
    %303 = arith.truncf %302 : vector<12x8xf32> to vector<12x8xbf16>
    %cst_112 = arith.constant dense<0.000000e+00> : vector<8x12xf32>
    %304 = tpu.matmul %301, %303, %cst_112 {dimension_numbers = #tpu.dot_dimension_numbers<[1], [1], [0], [0], [0, 0, 1, 0], [], []>} : vector<8x8xbf16>, vector<12x8xbf16>, vector<8x12xf32> -> vector<8x12xf32>
    %305 = vector.broadcast %16 : vector<1x12xf32> to vector<8x12xf32>
    %306 = arith.addf %304, %305 : vector<8x12xf32>
    %cst_113 = arith.constant dense<0xFF800000> : vector<8xf32>
    %307 = vector.multi_reduction <maximumf>, %306, %cst_113 [1] : vector<8x12xf32> to vector<8xf32>
    %308 = vector.shape_cast %307 : vector<8xf32> to vector<8x1xf32>
    %309 = vector.broadcast %308 : vector<8x1xf32> to vector<8x12xf32>
    %310 = arith.subf %306, %309 : vector<8x12xf32>
    %311 = math.exp %310 : vector<8x12xf32>
    %cst_114 = arith.constant dense<0.000000e+00> : vector<8xf32>
    %312 = vector.multi_reduction <add>, %311, %cst_114 [1] : vector<8x12xf32> to vector<8xf32>
    %313 = vector.shape_cast %312 : vector<8xf32> to vector<8x1xf32>
    %314 = tpu.reciprocal %313 {approx = true} : vector<8x1xf32> -> vector<8x1xf32>
    %315 = vector.broadcast %314 : vector<8x1xf32> to vector<8x12xf32>
    %316 = arith.mulf %311, %315 : vector<8x12xf32>
    %cst_115 = arith.constant dense<0xFF800000> : vector<8xf32>
    %317 = vector.multi_reduction <maximumf>, %316, %cst_115 [1] : vector<8x12xf32> to vector<8xf32>
    %318 = vector.shape_cast %317 : vector<8xf32> to vector<8x1xf32>
    %319 = vector.broadcast %318 : vector<8x1xf32> to vector<8x12xf32>
    %320 = arith.cmpf oge, %316, %319 : vector<8x12xf32>
    %321 = arith.ori %320, %233 : vector<8x12xi1>
    %cst_116 = arith.constant 1.200000e+00 : f32
    %322 = vector.broadcast %cst_116 : f32 to vector<8x12xf32>
    %323 = arith.mulf %316, %322 : vector<8x12xf32>
    %324 = arith.select %321, %323, %316 : vector<8x12xi1>, vector<8x12xf32>
    %cst_117 = arith.constant dense<0.000000e+00> : vector<8xf32>
    %325 = vector.multi_reduction <add>, %324, %cst_117 [1] : vector<8x12xf32> to vector<8xf32>
    %326 = vector.shape_cast %325 : vector<8xf32> to vector<8x1xf32>
    %327 = vector.broadcast %326 : vector<8x1xf32> to vector<8x12xf32>
    %328 = arith.divf %324, %327 : vector<8x12xf32>
    %329 = arith.truncf %328 : vector<8x12xf32> to vector<8x12xbf16>
    %330 = vector.extract_strided_slice %223 {offsets = [0, 16], sizes = [12, 8], strides = [1, 1]} : vector<12x32xf32> to vector<12x8xf32>
    %331 = arith.truncf %330 : vector<12x8xf32> to vector<12x8xbf16>
    %cst_118 = arith.constant dense<0.000000e+00> : vector<8x8xf32>
    %332 = tpu.matmul %329, %331, %cst_118 {dimension_numbers = #tpu.dot_dimension_numbers<[1], [0], [0], [1], [0, 0, 1, 1], [], []>} : vector<8x12xbf16>, vector<12x8xbf16>, vector<8x8xf32> -> vector<8x8xf32>
    %333 = vector.extract_strided_slice %213 {offsets = [0, 24], sizes = [8, 8], strides = [1, 1]} : vector<8x32xf32> to vector<8x8xf32>
    %334 = arith.truncf %333 : vector<8x8xf32> to vector<8x8xbf16>
    %335 = vector.extract_strided_slice %222 {offsets = [0, 24], sizes = [12, 8], strides = [1, 1]} : vector<12x32xf32> to vector<12x8xf32>
    %336 = arith.truncf %335 : vector<12x8xf32> to vector<12x8xbf16>
    %cst_119 = arith.constant dense<0.000000e+00> : vector<8x12xf32>
    %337 = tpu.matmul %334, %336, %cst_119 {dimension_numbers = #tpu.dot_dimension_numbers<[1], [1], [0], [0], [0, 0, 1, 0], [], []>} : vector<8x8xbf16>, vector<12x8xbf16>, vector<8x12xf32> -> vector<8x12xf32>
    %338 = vector.broadcast %16 : vector<1x12xf32> to vector<8x12xf32>
    %339 = arith.addf %337, %338 : vector<8x12xf32>
    %cst_120 = arith.constant dense<0xFF800000> : vector<8xf32>
    %340 = vector.multi_reduction <maximumf>, %339, %cst_120 [1] : vector<8x12xf32> to vector<8xf32>
    %341 = vector.shape_cast %340 : vector<8xf32> to vector<8x1xf32>
    %342 = vector.broadcast %341 : vector<8x1xf32> to vector<8x12xf32>
    %343 = arith.subf %339, %342 : vector<8x12xf32>
    %344 = math.exp %343 : vector<8x12xf32>
    %cst_121 = arith.constant dense<0.000000e+00> : vector<8xf32>
    %345 = vector.multi_reduction <add>, %344, %cst_121 [1] : vector<8x12xf32> to vector<8xf32>
    %346 = vector.shape_cast %345 : vector<8xf32> to vector<8x1xf32>
    %347 = tpu.reciprocal %346 {approx = true} : vector<8x1xf32> -> vector<8x1xf32>
    %348 = vector.broadcast %347 : vector<8x1xf32> to vector<8x12xf32>
    %349 = arith.mulf %344, %348 : vector<8x12xf32>
    %cst_122 = arith.constant dense<0xFF800000> : vector<8xf32>
    %350 = vector.multi_reduction <maximumf>, %349, %cst_122 [1] : vector<8x12xf32> to vector<8xf32>
    %351 = vector.shape_cast %350 : vector<8xf32> to vector<8x1xf32>
    %352 = vector.broadcast %351 : vector<8x1xf32> to vector<8x12xf32>
    %353 = arith.cmpf oge, %349, %352 : vector<8x12xf32>
    %354 = arith.ori %353, %233 : vector<8x12xi1>
    %cst_123 = arith.constant 1.200000e+00 : f32
    %355 = vector.broadcast %cst_123 : f32 to vector<8x12xf32>
    %356 = arith.mulf %349, %355 : vector<8x12xf32>
    %357 = arith.select %354, %356, %349 : vector<8x12xi1>, vector<8x12xf32>
    %cst_124 = arith.constant dense<0.000000e+00> : vector<8xf32>
    %358 = vector.multi_reduction <add>, %357, %cst_124 [1] : vector<8x12xf32> to vector<8xf32>
    %359 = vector.shape_cast %358 : vector<8xf32> to vector<8x1xf32>
    %360 = vector.broadcast %359 : vector<8x1xf32> to vector<8x12xf32>
    %361 = arith.divf %357, %360 : vector<8x12xf32>
    %362 = arith.truncf %361 : vector<8x12xf32> to vector<8x12xbf16>
    %363 = vector.extract_strided_slice %223 {offsets = [0, 24], sizes = [12, 8], strides = [1, 1]} : vector<12x32xf32> to vector<12x8xf32>
    %364 = arith.truncf %363 : vector<12x8xf32> to vector<12x8xbf16>
    %cst_125 = arith.constant dense<0.000000e+00> : vector<8x8xf32>
    %365 = tpu.matmul %362, %364, %cst_125 {dimension_numbers = #tpu.dot_dimension_numbers<[1], [0], [0], [1], [0, 0, 1, 1], [], []>} : vector<8x12xbf16>, vector<12x8xbf16>, vector<8x8xf32> -> vector<8x8xf32>
    %366 = tpu.concatenate %266, %299, %332, %365 in 1 : vector<8x8xf32>, vector<8x8xf32>, vector<8x8xf32>, vector<8x8xf32> -> vector<8x32xf32>
    %367 = arith.truncf %366 : vector<8x32xf32> to vector<8x32xbf16>
    %cst_126 = arith.constant dense<0.000000e+00> : vector<8x32xf32>
    %368 = tpu.matmul %367, %227, %cst_126 {dimension_numbers = #tpu.dot_dimension_numbers<[1], [0], [0], [1], [0, 0, 1, 1], [], []>} : vector<8x32xbf16>, vector<32x32xbf16>, vector<8x32xf32> -> vector<8x32xf32>
    %369 = vector.broadcast %229 : vector<1x32xf32> to vector<8x32xf32>
    %370 = arith.addf %368, %369 : vector<8x32xf32>
    %371 = arith.addf %183, %370 : vector<8x32xf32>
    %cst_127 = arith.constant dense<0.000000e+00> : vector<8xf32>
    %372 = vector.multi_reduction <add>, %371, %cst_127 [1] : vector<8x32xf32> to vector<8xf32>
    %373 = vector.shape_cast %372 : vector<8xf32> to vector<8x1xf32>
    %cst_128 = arith.constant 3.200000e+01 : f32
    %374 = vector.broadcast %cst_128 : f32 to vector<8x1xf32>
    %375 = arith.divf %373, %374 : vector<8x1xf32>
    %376 = vector.broadcast %375 : vector<8x1xf32> to vector<8x32xf32>
    %377 = arith.subf %371, %376 : vector<8x32xf32>
    %378 = arith.mulf %377, %377 : vector<8x32xf32>
    %cst_129 = arith.constant dense<0.000000e+00> : vector<8xf32>
    %379 = vector.multi_reduction <add>, %378, %cst_129 [1] : vector<8x32xf32> to vector<8xf32>
    %380 = vector.shape_cast %379 : vector<8xf32> to vector<8x1xf32>
    %cst_130 = arith.constant 3.200000e+01 : f32
    %381 = vector.broadcast %cst_130 : f32 to vector<8x1xf32>
    %382 = arith.divf %380, %381 : vector<8x1xf32>
    %383 = vector.broadcast %375 : vector<8x1xf32> to vector<8x32xf32>
    %384 = arith.subf %371, %383 : vector<8x32xf32>
    %cst_131 = arith.constant 9.99999974E-6 : f32
    %385 = vector.broadcast %cst_131 : f32 to vector<8x1xf32>
    %386 = arith.addf %382, %385 : vector<8x1xf32>
    %387 = math.rsqrt %386 : vector<8x1xf32>
    %388 = vector.broadcast %387 : vector<8x1xf32> to vector<8x32xf32>
    %389 = arith.mulf %384, %388 : vector<8x32xf32>
    %390 = vector.broadcast %24 : vector<1x32xf32> to vector<8x32xf32>
    %391 = arith.mulf %389, %390 : vector<8x32xf32>
    %392 = vector.broadcast %26 : vector<1x32xf32> to vector<8x32xf32>
    %393 = arith.addf %391, %392 : vector<8x32xf32>
    %c0_132 = arith.constant 0 : index
    %c0_133 = arith.constant 0 : index
    %c0_134 = arith.constant 0 : index
    %394 = vector.load %arg20[%c0_132, %c0_133, %c0_134] : memref<2x32x128xbf16, #tpu.memory_space<vmem>>, vector<1x32x128xbf16>
    %395 = vector.shape_cast %394 : vector<1x32x128xbf16> to vector<32x128xbf16>
    %c0_135 = arith.constant 0 : index
    %c0_136 = arith.constant 0 : index
    %c0_137 = arith.constant 0 : index
    %396 = vector.load %arg21[%c0_135, %c0_136, %c0_137] : memref<2x1x128xf32, #tpu.memory_space<vmem>>, vector<1x1x128xf32>
    %397 = vector.shape_cast %396 : vector<1x1x128xf32> to vector<1x128xf32>
    %c0_138 = arith.constant 0 : index
    %c0_139 = arith.constant 0 : index
    %c0_140 = arith.constant 0 : index
    %398 = vector.load %arg22[%c0_138, %c0_139, %c0_140] : memref<2x128x32xbf16, #tpu.memory_space<vmem>>, vector<1x128x32xbf16>
    %399 = vector.shape_cast %398 : vector<1x128x32xbf16> to vector<128x32xbf16>
    %c0_141 = arith.constant 0 : index
    %c0_142 = arith.constant 0 : index
    %c0_143 = arith.constant 0 : index
    %400 = vector.load %arg23[%c0_141, %c0_142, %c0_143] : memref<2x1x32xf32, #tpu.memory_space<vmem>>, vector<1x1x32xf32>
    %401 = vector.shape_cast %400 : vector<1x1x32xf32> to vector<1x32xf32>
    %402 = arith.truncf %393 : vector<8x32xf32> to vector<8x32xbf16>
    %cst_144 = arith.constant dense<0.000000e+00> : vector<8x128xf32>
    %403 = tpu.matmul %402, %395, %cst_144 {dimension_numbers = #tpu.dot_dimension_numbers<[1], [0], [0], [1], [0, 0, 1, 1], [], []>} : vector<8x32xbf16>, vector<32x128xbf16>, vector<8x128xf32> -> vector<8x128xf32>
    %404 = vector.broadcast %397 : vector<1x128xf32> to vector<8x128xf32>
    %405 = arith.addf %403, %404 : vector<8x128xf32>
    %cst_145 = arith.constant 0.000000e+00 : f32
    %406 = vector.broadcast %cst_145 : f32 to vector<8x128xf32>
    %407 = arith.maximumf %405, %406 : vector<8x128xf32>
    %408 = arith.truncf %407 : vector<8x128xf32> to vector<8x128xbf16>
    %cst_146 = arith.constant dense<0.000000e+00> : vector<8x32xf32>
    %409 = tpu.matmul %408, %399, %cst_146 {dimension_numbers = #tpu.dot_dimension_numbers<[1], [0], [0], [1], [0, 0, 1, 1], [], []>} : vector<8x128xbf16>, vector<128x32xbf16>, vector<8x32xf32> -> vector<8x32xf32>
    %410 = vector.broadcast %401 : vector<1x32xf32> to vector<8x32xf32>
    %411 = arith.addf %409, %410 : vector<8x32xf32>
    %412 = arith.addf %371, %411 : vector<8x32xf32>
    %c1 = arith.constant 1 : index
    %c0_147 = arith.constant 0 : index
    %c0_148 = arith.constant 0 : index
    %413 = vector.load %arg8[%c1, %c0_147, %c0_148] : memref<2x1x32xf32, #tpu.memory_space<vmem>>, vector<1x1x32xf32>
    %414 = vector.shape_cast %413 : vector<1x1x32xf32> to vector<1x32xf32>
    %c1_149 = arith.constant 1 : index
    %c0_150 = arith.constant 0 : index
    %c0_151 = arith.constant 0 : index
    %415 = vector.load %arg9[%c1_149, %c0_150, %c0_151] : memref<2x1x32xf32, #tpu.memory_space<vmem>>, vector<1x1x32xf32>
    %416 = vector.shape_cast %415 : vector<1x1x32xf32> to vector<1x32xf32>
    %cst_152 = arith.constant dense<0.000000e+00> : vector<8xf32>
    %417 = vector.multi_reduction <add>, %412, %cst_152 [1] : vector<8x32xf32> to vector<8xf32>
    %418 = vector.shape_cast %417 : vector<8xf32> to vector<8x1xf32>
    %cst_153 = arith.constant 3.200000e+01 : f32
    %419 = vector.broadcast %cst_153 : f32 to vector<8x1xf32>
    %420 = arith.divf %418, %419 : vector<8x1xf32>
    %421 = vector.broadcast %420 : vector<8x1xf32> to vector<8x32xf32>
    %422 = arith.subf %412, %421 : vector<8x32xf32>
    %423 = arith.mulf %422, %422 : vector<8x32xf32>
    %cst_154 = arith.constant dense<0.000000e+00> : vector<8xf32>
    %424 = vector.multi_reduction <add>, %423, %cst_154 [1] : vector<8x32xf32> to vector<8xf32>
    %425 = vector.shape_cast %424 : vector<8xf32> to vector<8x1xf32>
    %cst_155 = arith.constant 3.200000e+01 : f32
    %426 = vector.broadcast %cst_155 : f32 to vector<8x1xf32>
    %427 = arith.divf %425, %426 : vector<8x1xf32>
    %428 = vector.broadcast %420 : vector<8x1xf32> to vector<8x32xf32>
    %429 = arith.subf %412, %428 : vector<8x32xf32>
    %cst_156 = arith.constant 9.99999974E-6 : f32
    %430 = vector.broadcast %cst_156 : f32 to vector<8x1xf32>
    %431 = arith.addf %427, %430 : vector<8x1xf32>
    %432 = math.rsqrt %431 : vector<8x1xf32>
    %433 = vector.broadcast %432 : vector<8x1xf32> to vector<8x32xf32>
    %434 = arith.mulf %429, %433 : vector<8x32xf32>
    %435 = vector.broadcast %414 : vector<1x32xf32> to vector<8x32xf32>
    %436 = arith.mulf %434, %435 : vector<8x32xf32>
    %437 = vector.broadcast %416 : vector<1x32xf32> to vector<8x32xf32>
    %438 = arith.addf %436, %437 : vector<8x32xf32>
    %439 = arith.truncf %438 : vector<8x32xf32> to vector<8x32xbf16>
    %c1_157 = arith.constant 1 : index
    %c0_158 = arith.constant 0 : index
    %c0_159 = arith.constant 0 : index
    %440 = vector.load %arg10[%c1_157, %c0_158, %c0_159] : memref<2x32x96xbf16, #tpu.memory_space<vmem>>, vector<1x32x96xbf16>
    %441 = vector.shape_cast %440 : vector<1x32x96xbf16> to vector<32x96xbf16>
    %cst_160 = arith.constant dense<0.000000e+00> : vector<8x96xf32>
    %442 = tpu.matmul %439, %441, %cst_160 {dimension_numbers = #tpu.dot_dimension_numbers<[1], [0], [0], [1], [0, 0, 1, 1], [], []>} : vector<8x32xbf16>, vector<32x96xbf16>, vector<8x96xf32> -> vector<8x96xf32>
    %c1_161 = arith.constant 1 : index
    %c0_162 = arith.constant 0 : index
    %c0_163 = arith.constant 0 : index
    %443 = vector.load %arg11[%c1_161, %c0_162, %c0_163] : memref<2x1x96xf32, #tpu.memory_space<vmem>>, vector<1x1x96xf32>
    %444 = vector.shape_cast %443 : vector<1x1x96xf32> to vector<1x96xf32>
    %445 = vector.broadcast %444 : vector<1x96xf32> to vector<8x96xf32>
    %446 = arith.addf %442, %445 : vector<8x96xf32>
    %447 = vector.extract_strided_slice %446 {offsets = [0, 0], sizes = [8, 32], strides = [1, 1]} : vector<8x96xf32> to vector<8x32xf32>
    %448 = vector.extract_strided_slice %446 {offsets = [0, 32], sizes = [8, 32], strides = [1, 1]} : vector<8x96xf32> to vector<8x32xf32>
    %449 = vector.extract_strided_slice %446 {offsets = [0, 64], sizes = [8, 32], strides = [1, 1]} : vector<8x96xf32> to vector<8x32xf32>
    %c1_164 = arith.constant 1 : index
    %c0_165 = arith.constant 0 : index
    %c0_166 = arith.constant 0 : index
    %450 = vector.load %arg4[%c1_164, %c0_165, %c0_166] : memref<2x1x8xf32, #tpu.memory_space<vmem>>, vector<1x1x8xf32>
    %451 = vector.shape_cast %450 : vector<1x1x8xf32> to vector<1x8xf32>
    %c1_167 = arith.constant 1 : index
    %c0_168 = arith.constant 0 : index
    %c0_169 = arith.constant 0 : index
    %452 = vector.load %arg12[%c1_167, %c0_168, %c0_169] : memref<2x32x32xbf16, #tpu.memory_space<vmem>>, vector<1x32x32xbf16>
    %453 = vector.shape_cast %452 : vector<1x32x32xbf16> to vector<32x32xbf16>
    %c1_170 = arith.constant 1 : index
    %c0_171 = arith.constant 0 : index
    %c0_172 = arith.constant 0 : index
    %454 = vector.load %arg13[%c1_170, %c0_171, %c0_172] : memref<2x1x32xf32, #tpu.memory_space<vmem>>, vector<1x1x32xf32>
    %455 = vector.shape_cast %454 : vector<1x1x32xf32> to vector<1x32xf32>
    %cst_173 = arith.constant 0.000000e+00 : f32
    %456 = vector.broadcast %cst_173 : f32 to vector<1x8xf32>
    %457 = arith.cmpf ogt, %451, %456 : vector<1x8xf32>
    %458 = vector.shape_cast %457 : vector<1x8xi1> to vector<1x8xi1>
    %459 = vector.broadcast %458 : vector<1x8xi1> to vector<8x8xi1>
    %460 = vector.extract_strided_slice %447 {offsets = [0, 0], sizes = [8, 8], strides = [1, 1]} : vector<8x32xf32> to vector<8x8xf32>
    %461 = arith.truncf %460 : vector<8x8xf32> to vector<8x8xbf16>
    %462 = vector.extract_strided_slice %448 {offsets = [0, 0], sizes = [8, 8], strides = [1, 1]} : vector<8x32xf32> to vector<8x8xf32>
    %463 = arith.truncf %462 : vector<8x8xf32> to vector<8x8xbf16>
    %cst_174 = arith.constant dense<0.000000e+00> : vector<8x8xf32>
    %464 = tpu.matmul %461, %463, %cst_174 {dimension_numbers = #tpu.dot_dimension_numbers<[1], [1], [0], [0], [0, 0, 1, 0], [], []>} : vector<8x8xbf16>, vector<8x8xbf16>, vector<8x8xf32> -> vector<8x8xf32>
    %465 = arith.addf %464, %22 : vector<8x8xf32>
    %cst_175 = arith.constant dense<0xFF800000> : vector<8xf32>
    %466 = vector.multi_reduction <maximumf>, %465, %cst_175 [1] : vector<8x8xf32> to vector<8xf32>
    %467 = vector.shape_cast %466 : vector<8xf32> to vector<8x1xf32>
    %468 = vector.broadcast %467 : vector<8x1xf32> to vector<8x8xf32>
    %469 = arith.subf %465, %468 : vector<8x8xf32>
    %470 = math.exp %469 : vector<8x8xf32>
    %cst_176 = arith.constant dense<0.000000e+00> : vector<8xf32>
    %471 = vector.multi_reduction <add>, %470, %cst_176 [1] : vector<8x8xf32> to vector<8xf32>
    %472 = vector.shape_cast %471 : vector<8xf32> to vector<8x1xf32>
    %473 = tpu.reciprocal %472 {approx = true} : vector<8x1xf32> -> vector<8x1xf32>
    %474 = vector.broadcast %473 : vector<8x1xf32> to vector<8x8xf32>
    %475 = arith.mulf %470, %474 : vector<8x8xf32>
    %cst_177 = arith.constant 1.200000e+00 : f32
    %476 = vector.broadcast %cst_177 : f32 to vector<8x8xf32>
    %477 = arith.mulf %475, %476 : vector<8x8xf32>
    %478 = arith.select %459, %477, %475 : vector<8x8xi1>, vector<8x8xf32>
    %cst_178 = arith.constant dense<0.000000e+00> : vector<8xf32>
    %479 = vector.multi_reduction <add>, %478, %cst_178 [1] : vector<8x8xf32> to vector<8xf32>
    %480 = vector.shape_cast %479 : vector<8xf32> to vector<8x1xf32>
    %481 = vector.broadcast %480 : vector<8x1xf32> to vector<8x8xf32>
    %482 = arith.divf %478, %481 : vector<8x8xf32>
    %483 = arith.truncf %482 : vector<8x8xf32> to vector<8x8xbf16>
    %484 = vector.extract_strided_slice %449 {offsets = [0, 0], sizes = [8, 8], strides = [1, 1]} : vector<8x32xf32> to vector<8x8xf32>
    %485 = arith.truncf %484 : vector<8x8xf32> to vector<8x8xbf16>
    %cst_179 = arith.constant dense<0.000000e+00> : vector<8x8xf32>
    %486 = tpu.matmul %483, %485, %cst_179 {dimension_numbers = #tpu.dot_dimension_numbers<[1], [0], [0], [1], [0, 0, 1, 1], [], []>} : vector<8x8xbf16>, vector<8x8xbf16>, vector<8x8xf32> -> vector<8x8xf32>
    %487 = vector.extract_strided_slice %447 {offsets = [0, 8], sizes = [8, 8], strides = [1, 1]} : vector<8x32xf32> to vector<8x8xf32>
    %488 = arith.truncf %487 : vector<8x8xf32> to vector<8x8xbf16>
    %489 = vector.extract_strided_slice %448 {offsets = [0, 8], sizes = [8, 8], strides = [1, 1]} : vector<8x32xf32> to vector<8x8xf32>
    %490 = arith.truncf %489 : vector<8x8xf32> to vector<8x8xbf16>
    %cst_180 = arith.constant dense<0.000000e+00> : vector<8x8xf32>
    %491 = tpu.matmul %488, %490, %cst_180 {dimension_numbers = #tpu.dot_dimension_numbers<[1], [1], [0], [0], [0, 0, 1, 0], [], []>} : vector<8x8xbf16>, vector<8x8xbf16>, vector<8x8xf32> -> vector<8x8xf32>
    %492 = arith.addf %491, %22 : vector<8x8xf32>
    %cst_181 = arith.constant dense<0xFF800000> : vector<8xf32>
    %493 = vector.multi_reduction <maximumf>, %492, %cst_181 [1] : vector<8x8xf32> to vector<8xf32>
    %494 = vector.shape_cast %493 : vector<8xf32> to vector<8x1xf32>
    %495 = vector.broadcast %494 : vector<8x1xf32> to vector<8x8xf32>
    %496 = arith.subf %492, %495 : vector<8x8xf32>
    %497 = math.exp %496 : vector<8x8xf32>
    %cst_182 = arith.constant dense<0.000000e+00> : vector<8xf32>
    %498 = vector.multi_reduction <add>, %497, %cst_182 [1] : vector<8x8xf32> to vector<8xf32>
    %499 = vector.shape_cast %498 : vector<8xf32> to vector<8x1xf32>
    %500 = tpu.reciprocal %499 {approx = true} : vector<8x1xf32> -> vector<8x1xf32>
    %501 = vector.broadcast %500 : vector<8x1xf32> to vector<8x8xf32>
    %502 = arith.mulf %497, %501 : vector<8x8xf32>
    %cst_183 = arith.constant 1.200000e+00 : f32
    %503 = vector.broadcast %cst_183 : f32 to vector<8x8xf32>
    %504 = arith.mulf %502, %503 : vector<8x8xf32>
    %505 = arith.select %459, %504, %502 : vector<8x8xi1>, vector<8x8xf32>
    %cst_184 = arith.constant dense<0.000000e+00> : vector<8xf32>
    %506 = vector.multi_reduction <add>, %505, %cst_184 [1] : vector<8x8xf32> to vector<8xf32>
    %507 = vector.shape_cast %506 : vector<8xf32> to vector<8x1xf32>
    %508 = vector.broadcast %507 : vector<8x1xf32> to vector<8x8xf32>
    %509 = arith.divf %505, %508 : vector<8x8xf32>
    %510 = arith.truncf %509 : vector<8x8xf32> to vector<8x8xbf16>
    %511 = vector.extract_strided_slice %449 {offsets = [0, 8], sizes = [8, 8], strides = [1, 1]} : vector<8x32xf32> to vector<8x8xf32>
    %512 = arith.truncf %511 : vector<8x8xf32> to vector<8x8xbf16>
    %cst_185 = arith.constant dense<0.000000e+00> : vector<8x8xf32>
    %513 = tpu.matmul %510, %512, %cst_185 {dimension_numbers = #tpu.dot_dimension_numbers<[1], [0], [0], [1], [0, 0, 1, 1], [], []>} : vector<8x8xbf16>, vector<8x8xbf16>, vector<8x8xf32> -> vector<8x8xf32>
    %514 = vector.extract_strided_slice %447 {offsets = [0, 16], sizes = [8, 8], strides = [1, 1]} : vector<8x32xf32> to vector<8x8xf32>
    %515 = arith.truncf %514 : vector<8x8xf32> to vector<8x8xbf16>
    %516 = vector.extract_strided_slice %448 {offsets = [0, 16], sizes = [8, 8], strides = [1, 1]} : vector<8x32xf32> to vector<8x8xf32>
    %517 = arith.truncf %516 : vector<8x8xf32> to vector<8x8xbf16>
    %cst_186 = arith.constant dense<0.000000e+00> : vector<8x8xf32>
    %518 = tpu.matmul %515, %517, %cst_186 {dimension_numbers = #tpu.dot_dimension_numbers<[1], [1], [0], [0], [0, 0, 1, 0], [], []>} : vector<8x8xbf16>, vector<8x8xbf16>, vector<8x8xf32> -> vector<8x8xf32>
    %519 = arith.addf %518, %22 : vector<8x8xf32>
    %cst_187 = arith.constant dense<0xFF800000> : vector<8xf32>
    %520 = vector.multi_reduction <maximumf>, %519, %cst_187 [1] : vector<8x8xf32> to vector<8xf32>
    %521 = vector.shape_cast %520 : vector<8xf32> to vector<8x1xf32>
    %522 = vector.broadcast %521 : vector<8x1xf32> to vector<8x8xf32>
    %523 = arith.subf %519, %522 : vector<8x8xf32>
    %524 = math.exp %523 : vector<8x8xf32>
    %cst_188 = arith.constant dense<0.000000e+00> : vector<8xf32>
    %525 = vector.multi_reduction <add>, %524, %cst_188 [1] : vector<8x8xf32> to vector<8xf32>
    %526 = vector.shape_cast %525 : vector<8xf32> to vector<8x1xf32>
    %527 = tpu.reciprocal %526 {approx = true} : vector<8x1xf32> -> vector<8x1xf32>
    %528 = vector.broadcast %527 : vector<8x1xf32> to vector<8x8xf32>
    %529 = arith.mulf %524, %528 : vector<8x8xf32>
    %cst_189 = arith.constant 1.200000e+00 : f32
    %530 = vector.broadcast %cst_189 : f32 to vector<8x8xf32>
    %531 = arith.mulf %529, %530 : vector<8x8xf32>
    %532 = arith.select %459, %531, %529 : vector<8x8xi1>, vector<8x8xf32>
    %cst_190 = arith.constant dense<0.000000e+00> : vector<8xf32>
    %533 = vector.multi_reduction <add>, %532, %cst_190 [1] : vector<8x8xf32> to vector<8xf32>
    %534 = vector.shape_cast %533 : vector<8xf32> to vector<8x1xf32>
    %535 = vector.broadcast %534 : vector<8x1xf32> to vector<8x8xf32>
    %536 = arith.divf %532, %535 : vector<8x8xf32>
    %537 = arith.truncf %536 : vector<8x8xf32> to vector<8x8xbf16>
    %538 = vector.extract_strided_slice %449 {offsets = [0, 16], sizes = [8, 8], strides = [1, 1]} : vector<8x32xf32> to vector<8x8xf32>
    %539 = arith.truncf %538 : vector<8x8xf32> to vector<8x8xbf16>
    %cst_191 = arith.constant dense<0.000000e+00> : vector<8x8xf32>
    %540 = tpu.matmul %537, %539, %cst_191 {dimension_numbers = #tpu.dot_dimension_numbers<[1], [0], [0], [1], [0, 0, 1, 1], [], []>} : vector<8x8xbf16>, vector<8x8xbf16>, vector<8x8xf32> -> vector<8x8xf32>
    %541 = vector.extract_strided_slice %447 {offsets = [0, 24], sizes = [8, 8], strides = [1, 1]} : vector<8x32xf32> to vector<8x8xf32>
    %542 = arith.truncf %541 : vector<8x8xf32> to vector<8x8xbf16>
    %543 = vector.extract_strided_slice %448 {offsets = [0, 24], sizes = [8, 8], strides = [1, 1]} : vector<8x32xf32> to vector<8x8xf32>
    %544 = arith.truncf %543 : vector<8x8xf32> to vector<8x8xbf16>
    %cst_192 = arith.constant dense<0.000000e+00> : vector<8x8xf32>
    %545 = tpu.matmul %542, %544, %cst_192 {dimension_numbers = #tpu.dot_dimension_numbers<[1], [1], [0], [0], [0, 0, 1, 0], [], []>} : vector<8x8xbf16>, vector<8x8xbf16>, vector<8x8xf32> -> vector<8x8xf32>
    %546 = arith.addf %545, %22 : vector<8x8xf32>
    %cst_193 = arith.constant dense<0xFF800000> : vector<8xf32>
    %547 = vector.multi_reduction <maximumf>, %546, %cst_193 [1] : vector<8x8xf32> to vector<8xf32>
    %548 = vector.shape_cast %547 : vector<8xf32> to vector<8x1xf32>
    %549 = vector.broadcast %548 : vector<8x1xf32> to vector<8x8xf32>
    %550 = arith.subf %546, %549 : vector<8x8xf32>
    %551 = math.exp %550 : vector<8x8xf32>
    %cst_194 = arith.constant dense<0.000000e+00> : vector<8xf32>
    %552 = vector.multi_reduction <add>, %551, %cst_194 [1] : vector<8x8xf32> to vector<8xf32>
    %553 = vector.shape_cast %552 : vector<8xf32> to vector<8x1xf32>
    %554 = tpu.reciprocal %553 {approx = true} : vector<8x1xf32> -> vector<8x1xf32>
    %555 = vector.broadcast %554 : vector<8x1xf32> to vector<8x8xf32>
    %556 = arith.mulf %551, %555 : vector<8x8xf32>
    %cst_195 = arith.constant 1.200000e+00 : f32
    %557 = vector.broadcast %cst_195 : f32 to vector<8x8xf32>
    %558 = arith.mulf %556, %557 : vector<8x8xf32>
    %559 = arith.select %459, %558, %556 : vector<8x8xi1>, vector<8x8xf32>
    %cst_196 = arith.constant dense<0.000000e+00> : vector<8xf32>
    %560 = vector.multi_reduction <add>, %559, %cst_196 [1] : vector<8x8xf32> to vector<8xf32>
    %561 = vector.shape_cast %560 : vector<8xf32> to vector<8x1xf32>
    %562 = vector.broadcast %561 : vector<8x1xf32> to vector<8x8xf32>
    %563 = arith.divf %559, %562 : vector<8x8xf32>
    %564 = arith.truncf %563 : vector<8x8xf32> to vector<8x8xbf16>
    %565 = vector.extract_strided_slice %449 {offsets = [0, 24], sizes = [8, 8], strides = [1, 1]} : vector<8x32xf32> to vector<8x8xf32>
    %566 = arith.truncf %565 : vector<8x8xf32> to vector<8x8xbf16>
    %cst_197 = arith.constant dense<0.000000e+00> : vector<8x8xf32>
    %567 = tpu.matmul %564, %566, %cst_197 {dimension_numbers = #tpu.dot_dimension_numbers<[1], [0], [0], [1], [0, 0, 1, 1], [], []>} : vector<8x8xbf16>, vector<8x8xbf16>, vector<8x8xf32> -> vector<8x8xf32>
    %568 = tpu.concatenate %486, %513, %540, %567 in 1 : vector<8x8xf32>, vector<8x8xf32>, vector<8x8xf32>, vector<8x8xf32> -> vector<8x32xf32>
    %569 = arith.truncf %568 : vector<8x32xf32> to vector<8x32xbf16>
    %cst_198 = arith.constant dense<0.000000e+00> : vector<8x32xf32>
    %570 = tpu.matmul %569, %453, %cst_198 {dimension_numbers = #tpu.dot_dimension_numbers<[1], [0], [0], [1], [0, 0, 1, 1], [], []>} : vector<8x32xbf16>, vector<32x32xbf16>, vector<8x32xf32> -> vector<8x32xf32>
    %571 = vector.broadcast %455 : vector<1x32xf32> to vector<8x32xf32>
    %572 = arith.addf %570, %571 : vector<8x32xf32>
    %573 = arith.addf %412, %572 : vector<8x32xf32>
    %cst_199 = arith.constant dense<0.000000e+00> : vector<8xf32>
    %574 = vector.multi_reduction <add>, %573, %cst_199 [1] : vector<8x32xf32> to vector<8xf32>
    %575 = vector.shape_cast %574 : vector<8xf32> to vector<8x1xf32>
    %cst_200 = arith.constant 3.200000e+01 : f32
    %576 = vector.broadcast %cst_200 : f32 to vector<8x1xf32>
    %577 = arith.divf %575, %576 : vector<8x1xf32>
    %578 = vector.broadcast %577 : vector<8x1xf32> to vector<8x32xf32>
    %579 = arith.subf %573, %578 : vector<8x32xf32>
    %580 = arith.mulf %579, %579 : vector<8x32xf32>
    %cst_201 = arith.constant dense<0.000000e+00> : vector<8xf32>
    %581 = vector.multi_reduction <add>, %580, %cst_201 [1] : vector<8x32xf32> to vector<8xf32>
    %582 = vector.shape_cast %581 : vector<8xf32> to vector<8x1xf32>
    %cst_202 = arith.constant 3.200000e+01 : f32
    %583 = vector.broadcast %cst_202 : f32 to vector<8x1xf32>
    %584 = arith.divf %582, %583 : vector<8x1xf32>
    %585 = vector.broadcast %577 : vector<8x1xf32> to vector<8x32xf32>
    %586 = arith.subf %573, %585 : vector<8x32xf32>
    %cst_203 = arith.constant 9.99999974E-6 : f32
    %587 = vector.broadcast %cst_203 : f32 to vector<8x1xf32>
    %588 = arith.addf %584, %587 : vector<8x1xf32>
    %589 = math.rsqrt %588 : vector<8x1xf32>
    %590 = vector.broadcast %589 : vector<8x1xf32> to vector<8x32xf32>
    %591 = arith.mulf %586, %590 : vector<8x32xf32>
    %592 = vector.broadcast %414 : vector<1x32xf32> to vector<8x32xf32>
    %593 = arith.mulf %591, %592 : vector<8x32xf32>
    %594 = vector.broadcast %416 : vector<1x32xf32> to vector<8x32xf32>
    %595 = arith.addf %593, %594 : vector<8x32xf32>
    %596 = arith.truncf %595 : vector<8x32xf32> to vector<8x32xbf16>
    %c1_204 = arith.constant 1 : index
    %c0_205 = arith.constant 0 : index
    %c0_206 = arith.constant 0 : index
    %597 = vector.load %arg14[%c1_204, %c0_205, %c0_206] : memref<2x32x32xbf16, #tpu.memory_space<vmem>>, vector<1x32x32xbf16>
    %598 = vector.shape_cast %597 : vector<1x32x32xbf16> to vector<32x32xbf16>
    %cst_207 = arith.constant dense<0.000000e+00> : vector<8x32xf32>
    %599 = tpu.matmul %596, %598, %cst_207 {dimension_numbers = #tpu.dot_dimension_numbers<[1], [0], [0], [1], [0, 0, 1, 1], [], []>} : vector<8x32xbf16>, vector<32x32xbf16>, vector<8x32xf32> -> vector<8x32xf32>
    %c1_208 = arith.constant 1 : index
    %c0_209 = arith.constant 0 : index
    %c0_210 = arith.constant 0 : index
    %600 = vector.load %arg15[%c1_208, %c0_209, %c0_210] : memref<2x1x32xf32, #tpu.memory_space<vmem>>, vector<1x1x32xf32>
    %601 = vector.shape_cast %600 : vector<1x1x32xf32> to vector<1x32xf32>
    %602 = vector.broadcast %601 : vector<1x32xf32> to vector<8x32xf32>
    %603 = arith.addf %599, %602 : vector<8x32xf32>
    %604 = arith.truncf %14 : vector<12x32xf32> to vector<12x32xbf16>
    %c1_211 = arith.constant 1 : index
    %c0_212 = arith.constant 0 : index
    %c0_213 = arith.constant 0 : index
    %605 = vector.load %arg16[%c1_211, %c0_212, %c0_213] : memref<2x32x64xbf16, #tpu.memory_space<vmem>>, vector<1x32x64xbf16>
    %606 = vector.shape_cast %605 : vector<1x32x64xbf16> to vector<32x64xbf16>
    %cst_214 = arith.constant dense<0.000000e+00> : vector<12x64xf32>
    %607 = tpu.matmul %604, %606, %cst_214 {dimension_numbers = #tpu.dot_dimension_numbers<[1], [0], [0], [1], [0, 0, 1, 1], [], []>} : vector<12x32xbf16>, vector<32x64xbf16>, vector<12x64xf32> -> vector<12x64xf32>
    %c1_215 = arith.constant 1 : index
    %c0_216 = arith.constant 0 : index
    %c0_217 = arith.constant 0 : index
    %608 = vector.load %arg17[%c1_215, %c0_216, %c0_217] : memref<2x1x64xf32, #tpu.memory_space<vmem>>, vector<1x1x64xf32>
    %609 = vector.shape_cast %608 : vector<1x1x64xf32> to vector<1x64xf32>
    %610 = vector.broadcast %609 : vector<1x64xf32> to vector<12x64xf32>
    %611 = arith.addf %607, %610 : vector<12x64xf32>
    %612 = vector.extract_strided_slice %611 {offsets = [0, 0], sizes = [12, 32], strides = [1, 1]} : vector<12x64xf32> to vector<12x32xf32>
    %613 = vector.extract_strided_slice %611 {offsets = [0, 32], sizes = [12, 32], strides = [1, 1]} : vector<12x64xf32> to vector<12x32xf32>
    %c1_218 = arith.constant 1 : index
    %c0_219 = arith.constant 0 : index
    %c0_220 = arith.constant 0 : index
    %614 = vector.load %arg5[%c1_218, %c0_219, %c0_220] : memref<2x1x12xf32, #tpu.memory_space<vmem>>, vector<1x1x12xf32>
    %615 = vector.shape_cast %614 : vector<1x1x12xf32> to vector<1x12xf32>
    %c1_221 = arith.constant 1 : index
    %c0_222 = arith.constant 0 : index
    %c0_223 = arith.constant 0 : index
    %616 = vector.load %arg18[%c1_221, %c0_222, %c0_223] : memref<2x32x32xbf16, #tpu.memory_space<vmem>>, vector<1x32x32xbf16>
    %617 = vector.shape_cast %616 : vector<1x32x32xbf16> to vector<32x32xbf16>
    %c1_224 = arith.constant 1 : index
    %c0_225 = arith.constant 0 : index
    %c0_226 = arith.constant 0 : index
    %618 = vector.load %arg19[%c1_224, %c0_225, %c0_226] : memref<2x1x32xf32, #tpu.memory_space<vmem>>, vector<1x1x32xf32>
    %619 = vector.shape_cast %618 : vector<1x1x32xf32> to vector<1x32xf32>
    %cst_227 = arith.constant 0.000000e+00 : f32
    %620 = vector.broadcast %cst_227 : f32 to vector<1x12xf32>
    %621 = arith.cmpf ogt, %615, %620 : vector<1x12xf32>
    %622 = vector.shape_cast %621 : vector<1x12xi1> to vector<1x12xi1>
    %623 = vector.broadcast %622 : vector<1x12xi1> to vector<8x12xi1>
    %624 = vector.extract_strided_slice %603 {offsets = [0, 0], sizes = [8, 8], strides = [1, 1]} : vector<8x32xf32> to vector<8x8xf32>
    %625 = arith.truncf %624 : vector<8x8xf32> to vector<8x8xbf16>
    %626 = vector.extract_strided_slice %612 {offsets = [0, 0], sizes = [12, 8], strides = [1, 1]} : vector<12x32xf32> to vector<12x8xf32>
    %627 = arith.truncf %626 : vector<12x8xf32> to vector<12x8xbf16>
    %cst_228 = arith.constant dense<0.000000e+00> : vector<8x12xf32>
    %628 = tpu.matmul %625, %627, %cst_228 {dimension_numbers = #tpu.dot_dimension_numbers<[1], [1], [0], [0], [0, 0, 1, 0], [], []>} : vector<8x8xbf16>, vector<12x8xbf16>, vector<8x12xf32> -> vector<8x12xf32>
    %629 = vector.broadcast %16 : vector<1x12xf32> to vector<8x12xf32>
    %630 = arith.addf %628, %629 : vector<8x12xf32>
    %cst_229 = arith.constant dense<0xFF800000> : vector<8xf32>
    %631 = vector.multi_reduction <maximumf>, %630, %cst_229 [1] : vector<8x12xf32> to vector<8xf32>
    %632 = vector.shape_cast %631 : vector<8xf32> to vector<8x1xf32>
    %633 = vector.broadcast %632 : vector<8x1xf32> to vector<8x12xf32>
    %634 = arith.subf %630, %633 : vector<8x12xf32>
    %635 = math.exp %634 : vector<8x12xf32>
    %cst_230 = arith.constant dense<0.000000e+00> : vector<8xf32>
    %636 = vector.multi_reduction <add>, %635, %cst_230 [1] : vector<8x12xf32> to vector<8xf32>
    %637 = vector.shape_cast %636 : vector<8xf32> to vector<8x1xf32>
    %638 = tpu.reciprocal %637 {approx = true} : vector<8x1xf32> -> vector<8x1xf32>
    %639 = vector.broadcast %638 : vector<8x1xf32> to vector<8x12xf32>
    %640 = arith.mulf %635, %639 : vector<8x12xf32>
    %cst_231 = arith.constant dense<0xFF800000> : vector<8xf32>
    %641 = vector.multi_reduction <maximumf>, %640, %cst_231 [1] : vector<8x12xf32> to vector<8xf32>
    %642 = vector.shape_cast %641 : vector<8xf32> to vector<8x1xf32>
    %643 = vector.broadcast %642 : vector<8x1xf32> to vector<8x12xf32>
    %644 = arith.cmpf oge, %640, %643 : vector<8x12xf32>
    %645 = arith.ori %644, %623 : vector<8x12xi1>
    %cst_232 = arith.constant 1.200000e+00 : f32
    %646 = vector.broadcast %cst_232 : f32 to vector<8x12xf32>
    %647 = arith.mulf %640, %646 : vector<8x12xf32>
    %648 = arith.select %645, %647, %640 : vector<8x12xi1>, vector<8x12xf32>
    %cst_233 = arith.constant dense<0.000000e+00> : vector<8xf32>
    %649 = vector.multi_reduction <add>, %648, %cst_233 [1] : vector<8x12xf32> to vector<8xf32>
    %650 = vector.shape_cast %649 : vector<8xf32> to vector<8x1xf32>
    %651 = vector.broadcast %650 : vector<8x1xf32> to vector<8x12xf32>
    %652 = arith.divf %648, %651 : vector<8x12xf32>
    %653 = arith.truncf %652 : vector<8x12xf32> to vector<8x12xbf16>
    %654 = vector.extract_strided_slice %613 {offsets = [0, 0], sizes = [12, 8], strides = [1, 1]} : vector<12x32xf32> to vector<12x8xf32>
    %655 = arith.truncf %654 : vector<12x8xf32> to vector<12x8xbf16>
    %cst_234 = arith.constant dense<0.000000e+00> : vector<8x8xf32>
    %656 = tpu.matmul %653, %655, %cst_234 {dimension_numbers = #tpu.dot_dimension_numbers<[1], [0], [0], [1], [0, 0, 1, 1], [], []>} : vector<8x12xbf16>, vector<12x8xbf16>, vector<8x8xf32> -> vector<8x8xf32>
    %657 = vector.extract_strided_slice %603 {offsets = [0, 8], sizes = [8, 8], strides = [1, 1]} : vector<8x32xf32> to vector<8x8xf32>
    %658 = arith.truncf %657 : vector<8x8xf32> to vector<8x8xbf16>
    %659 = vector.extract_strided_slice %612 {offsets = [0, 8], sizes = [12, 8], strides = [1, 1]} : vector<12x32xf32> to vector<12x8xf32>
    %660 = arith.truncf %659 : vector<12x8xf32> to vector<12x8xbf16>
    %cst_235 = arith.constant dense<0.000000e+00> : vector<8x12xf32>
    %661 = tpu.matmul %658, %660, %cst_235 {dimension_numbers = #tpu.dot_dimension_numbers<[1], [1], [0], [0], [0, 0, 1, 0], [], []>} : vector<8x8xbf16>, vector<12x8xbf16>, vector<8x12xf32> -> vector<8x12xf32>
    %662 = vector.broadcast %16 : vector<1x12xf32> to vector<8x12xf32>
    %663 = arith.addf %661, %662 : vector<8x12xf32>
    %cst_236 = arith.constant dense<0xFF800000> : vector<8xf32>
    %664 = vector.multi_reduction <maximumf>, %663, %cst_236 [1] : vector<8x12xf32> to vector<8xf32>
    %665 = vector.shape_cast %664 : vector<8xf32> to vector<8x1xf32>
    %666 = vector.broadcast %665 : vector<8x1xf32> to vector<8x12xf32>
    %667 = arith.subf %663, %666 : vector<8x12xf32>
    %668 = math.exp %667 : vector<8x12xf32>
    %cst_237 = arith.constant dense<0.000000e+00> : vector<8xf32>
    %669 = vector.multi_reduction <add>, %668, %cst_237 [1] : vector<8x12xf32> to vector<8xf32>
    %670 = vector.shape_cast %669 : vector<8xf32> to vector<8x1xf32>
    %671 = tpu.reciprocal %670 {approx = true} : vector<8x1xf32> -> vector<8x1xf32>
    %672 = vector.broadcast %671 : vector<8x1xf32> to vector<8x12xf32>
    %673 = arith.mulf %668, %672 : vector<8x12xf32>
    %cst_238 = arith.constant dense<0xFF800000> : vector<8xf32>
    %674 = vector.multi_reduction <maximumf>, %673, %cst_238 [1] : vector<8x12xf32> to vector<8xf32>
    %675 = vector.shape_cast %674 : vector<8xf32> to vector<8x1xf32>
    %676 = vector.broadcast %675 : vector<8x1xf32> to vector<8x12xf32>
    %677 = arith.cmpf oge, %673, %676 : vector<8x12xf32>
    %678 = arith.ori %677, %623 : vector<8x12xi1>
    %cst_239 = arith.constant 1.200000e+00 : f32
    %679 = vector.broadcast %cst_239 : f32 to vector<8x12xf32>
    %680 = arith.mulf %673, %679 : vector<8x12xf32>
    %681 = arith.select %678, %680, %673 : vector<8x12xi1>, vector<8x12xf32>
    %cst_240 = arith.constant dense<0.000000e+00> : vector<8xf32>
    %682 = vector.multi_reduction <add>, %681, %cst_240 [1] : vector<8x12xf32> to vector<8xf32>
    %683 = vector.shape_cast %682 : vector<8xf32> to vector<8x1xf32>
    %684 = vector.broadcast %683 : vector<8x1xf32> to vector<8x12xf32>
    %685 = arith.divf %681, %684 : vector<8x12xf32>
    %686 = arith.truncf %685 : vector<8x12xf32> to vector<8x12xbf16>
    %687 = vector.extract_strided_slice %613 {offsets = [0, 8], sizes = [12, 8], strides = [1, 1]} : vector<12x32xf32> to vector<12x8xf32>
    %688 = arith.truncf %687 : vector<12x8xf32> to vector<12x8xbf16>
    %cst_241 = arith.constant dense<0.000000e+00> : vector<8x8xf32>
    %689 = tpu.matmul %686, %688, %cst_241 {dimension_numbers = #tpu.dot_dimension_numbers<[1], [0], [0], [1], [0, 0, 1, 1], [], []>} : vector<8x12xbf16>, vector<12x8xbf16>, vector<8x8xf32> -> vector<8x8xf32>
    %690 = vector.extract_strided_slice %603 {offsets = [0, 16], sizes = [8, 8], strides = [1, 1]} : vector<8x32xf32> to vector<8x8xf32>
    %691 = arith.truncf %690 : vector<8x8xf32> to vector<8x8xbf16>
    %692 = vector.extract_strided_slice %612 {offsets = [0, 16], sizes = [12, 8], strides = [1, 1]} : vector<12x32xf32> to vector<12x8xf32>
    %693 = arith.truncf %692 : vector<12x8xf32> to vector<12x8xbf16>
    %cst_242 = arith.constant dense<0.000000e+00> : vector<8x12xf32>
    %694 = tpu.matmul %691, %693, %cst_242 {dimension_numbers = #tpu.dot_dimension_numbers<[1], [1], [0], [0], [0, 0, 1, 0], [], []>} : vector<8x8xbf16>, vector<12x8xbf16>, vector<8x12xf32> -> vector<8x12xf32>
    %695 = vector.broadcast %16 : vector<1x12xf32> to vector<8x12xf32>
    %696 = arith.addf %694, %695 : vector<8x12xf32>
    %cst_243 = arith.constant dense<0xFF800000> : vector<8xf32>
    %697 = vector.multi_reduction <maximumf>, %696, %cst_243 [1] : vector<8x12xf32> to vector<8xf32>
    %698 = vector.shape_cast %697 : vector<8xf32> to vector<8x1xf32>
    %699 = vector.broadcast %698 : vector<8x1xf32> to vector<8x12xf32>
    %700 = arith.subf %696, %699 : vector<8x12xf32>
    %701 = math.exp %700 : vector<8x12xf32>
    %cst_244 = arith.constant dense<0.000000e+00> : vector<8xf32>
    %702 = vector.multi_reduction <add>, %701, %cst_244 [1] : vector<8x12xf32> to vector<8xf32>
    %703 = vector.shape_cast %702 : vector<8xf32> to vector<8x1xf32>
    %704 = tpu.reciprocal %703 {approx = true} : vector<8x1xf32> -> vector<8x1xf32>
    %705 = vector.broadcast %704 : vector<8x1xf32> to vector<8x12xf32>
    %706 = arith.mulf %701, %705 : vector<8x12xf32>
    %cst_245 = arith.constant dense<0xFF800000> : vector<8xf32>
    %707 = vector.multi_reduction <maximumf>, %706, %cst_245 [1] : vector<8x12xf32> to vector<8xf32>
    %708 = vector.shape_cast %707 : vector<8xf32> to vector<8x1xf32>
    %709 = vector.broadcast %708 : vector<8x1xf32> to vector<8x12xf32>
    %710 = arith.cmpf oge, %706, %709 : vector<8x12xf32>
    %711 = arith.ori %710, %623 : vector<8x12xi1>
    %cst_246 = arith.constant 1.200000e+00 : f32
    %712 = vector.broadcast %cst_246 : f32 to vector<8x12xf32>
    %713 = arith.mulf %706, %712 : vector<8x12xf32>
    %714 = arith.select %711, %713, %706 : vector<8x12xi1>, vector<8x12xf32>
    %cst_247 = arith.constant dense<0.000000e+00> : vector<8xf32>
    %715 = vector.multi_reduction <add>, %714, %cst_247 [1] : vector<8x12xf32> to vector<8xf32>
    %716 = vector.shape_cast %715 : vector<8xf32> to vector<8x1xf32>
    %717 = vector.broadcast %716 : vector<8x1xf32> to vector<8x12xf32>
    %718 = arith.divf %714, %717 : vector<8x12xf32>
    %719 = arith.truncf %718 : vector<8x12xf32> to vector<8x12xbf16>
    %720 = vector.extract_strided_slice %613 {offsets = [0, 16], sizes = [12, 8], strides = [1, 1]} : vector<12x32xf32> to vector<12x8xf32>
    %721 = arith.truncf %720 : vector<12x8xf32> to vector<12x8xbf16>
    %cst_248 = arith.constant dense<0.000000e+00> : vector<8x8xf32>
    %722 = tpu.matmul %719, %721, %cst_248 {dimension_numbers = #tpu.dot_dimension_numbers<[1], [0], [0], [1], [0, 0, 1, 1], [], []>} : vector<8x12xbf16>, vector<12x8xbf16>, vector<8x8xf32> -> vector<8x8xf32>
    %723 = vector.extract_strided_slice %603 {offsets = [0, 24], sizes = [8, 8], strides = [1, 1]} : vector<8x32xf32> to vector<8x8xf32>
    %724 = arith.truncf %723 : vector<8x8xf32> to vector<8x8xbf16>
    %725 = vector.extract_strided_slice %612 {offsets = [0, 24], sizes = [12, 8], strides = [1, 1]} : vector<12x32xf32> to vector<12x8xf32>
    %726 = arith.truncf %725 : vector<12x8xf32> to vector<12x8xbf16>
    %cst_249 = arith.constant dense<0.000000e+00> : vector<8x12xf32>
    %727 = tpu.matmul %724, %726, %cst_249 {dimension_numbers = #tpu.dot_dimension_numbers<[1], [1], [0], [0], [0, 0, 1, 0], [], []>} : vector<8x8xbf16>, vector<12x8xbf16>, vector<8x12xf32> -> vector<8x12xf32>
    %728 = vector.broadcast %16 : vector<1x12xf32> to vector<8x12xf32>
    %729 = arith.addf %727, %728 : vector<8x12xf32>
    %cst_250 = arith.constant dense<0xFF800000> : vector<8xf32>
    %730 = vector.multi_reduction <maximumf>, %729, %cst_250 [1] : vector<8x12xf32> to vector<8xf32>
    %731 = vector.shape_cast %730 : vector<8xf32> to vector<8x1xf32>
    %732 = vector.broadcast %731 : vector<8x1xf32> to vector<8x12xf32>
    %733 = arith.subf %729, %732 : vector<8x12xf32>
    %734 = math.exp %733 : vector<8x12xf32>
    %cst_251 = arith.constant dense<0.000000e+00> : vector<8xf32>
    %735 = vector.multi_reduction <add>, %734, %cst_251 [1] : vector<8x12xf32> to vector<8xf32>
    %736 = vector.shape_cast %735 : vector<8xf32> to vector<8x1xf32>
    %737 = tpu.reciprocal %736 {approx = true} : vector<8x1xf32> -> vector<8x1xf32>
    %738 = vector.broadcast %737 : vector<8x1xf32> to vector<8x12xf32>
    %739 = arith.mulf %734, %738 : vector<8x12xf32>
    %cst_252 = arith.constant dense<0xFF800000> : vector<8xf32>
    %740 = vector.multi_reduction <maximumf>, %739, %cst_252 [1] : vector<8x12xf32> to vector<8xf32>
    %741 = vector.shape_cast %740 : vector<8xf32> to vector<8x1xf32>
    %742 = vector.broadcast %741 : vector<8x1xf32> to vector<8x12xf32>
    %743 = arith.cmpf oge, %739, %742 : vector<8x12xf32>
    %744 = arith.ori %743, %623 : vector<8x12xi1>
    %cst_253 = arith.constant 1.200000e+00 : f32
    %745 = vector.broadcast %cst_253 : f32 to vector<8x12xf32>
    %746 = arith.mulf %739, %745 : vector<8x12xf32>
    %747 = arith.select %744, %746, %739 : vector<8x12xi1>, vector<8x12xf32>
    %cst_254 = arith.constant dense<0.000000e+00> : vector<8xf32>
    %748 = vector.multi_reduction <add>, %747, %cst_254 [1] : vector<8x12xf32> to vector<8xf32>
    %749 = vector.shape_cast %748 : vector<8xf32> to vector<8x1xf32>
    %750 = vector.broadcast %749 : vector<8x1xf32> to vector<8x12xf32>
    %751 = arith.divf %747, %750 : vector<8x12xf32>
    %752 = arith.truncf %751 : vector<8x12xf32> to vector<8x12xbf16>
    %753 = vector.extract_strided_slice %613 {offsets = [0, 24], sizes = [12, 8], strides = [1, 1]} : vector<12x32xf32> to vector<12x8xf32>
    %754 = arith.truncf %753 : vector<12x8xf32> to vector<12x8xbf16>
    %cst_255 = arith.constant dense<0.000000e+00> : vector<8x8xf32>
    %755 = tpu.matmul %752, %754, %cst_255 {dimension_numbers = #tpu.dot_dimension_numbers<[1], [0], [0], [1], [0, 0, 1, 1], [], []>} : vector<8x12xbf16>, vector<12x8xbf16>, vector<8x8xf32> -> vector<8x8xf32>
    %756 = tpu.concatenate %656, %689, %722, %755 in 1 : vector<8x8xf32>, vector<8x8xf32>, vector<8x8xf32>, vector<8x8xf32> -> vector<8x32xf32>
    %757 = arith.truncf %756 : vector<8x32xf32> to vector<8x32xbf16>
    %cst_256 = arith.constant dense<0.000000e+00> : vector<8x32xf32>
    %758 = tpu.matmul %757, %617, %cst_256 {dimension_numbers = #tpu.dot_dimension_numbers<[1], [0], [0], [1], [0, 0, 1, 1], [], []>} : vector<8x32xbf16>, vector<32x32xbf16>, vector<8x32xf32> -> vector<8x32xf32>
    %759 = vector.broadcast %619 : vector<1x32xf32> to vector<8x32xf32>
    %760 = arith.addf %758, %759 : vector<8x32xf32>
    %761 = arith.addf %573, %760 : vector<8x32xf32>
    %cst_257 = arith.constant dense<0.000000e+00> : vector<8xf32>
    %762 = vector.multi_reduction <add>, %761, %cst_257 [1] : vector<8x32xf32> to vector<8xf32>
    %763 = vector.shape_cast %762 : vector<8xf32> to vector<8x1xf32>
    %cst_258 = arith.constant 3.200000e+01 : f32
    %764 = vector.broadcast %cst_258 : f32 to vector<8x1xf32>
    %765 = arith.divf %763, %764 : vector<8x1xf32>
    %766 = vector.broadcast %765 : vector<8x1xf32> to vector<8x32xf32>
    %767 = arith.subf %761, %766 : vector<8x32xf32>
    %768 = arith.mulf %767, %767 : vector<8x32xf32>
    %cst_259 = arith.constant dense<0.000000e+00> : vector<8xf32>
    %769 = vector.multi_reduction <add>, %768, %cst_259 [1] : vector<8x32xf32> to vector<8xf32>
    %770 = vector.shape_cast %769 : vector<8xf32> to vector<8x1xf32>
    %cst_260 = arith.constant 3.200000e+01 : f32
    %771 = vector.broadcast %cst_260 : f32 to vector<8x1xf32>
    %772 = arith.divf %770, %771 : vector<8x1xf32>
    %773 = vector.broadcast %765 : vector<8x1xf32> to vector<8x32xf32>
    %774 = arith.subf %761, %773 : vector<8x32xf32>
    %cst_261 = arith.constant 9.99999974E-6 : f32
    %775 = vector.broadcast %cst_261 : f32 to vector<8x1xf32>
    %776 = arith.addf %772, %775 : vector<8x1xf32>
    %777 = math.rsqrt %776 : vector<8x1xf32>
    %778 = vector.broadcast %777 : vector<8x1xf32> to vector<8x32xf32>
    %779 = arith.mulf %774, %778 : vector<8x32xf32>
    %780 = vector.broadcast %414 : vector<1x32xf32> to vector<8x32xf32>
    %781 = arith.mulf %779, %780 : vector<8x32xf32>
    %782 = vector.broadcast %416 : vector<1x32xf32> to vector<8x32xf32>
    %783 = arith.addf %781, %782 : vector<8x32xf32>
    %c1_262 = arith.constant 1 : index
    %c0_263 = arith.constant 0 : index
    %c0_264 = arith.constant 0 : index
    %784 = vector.load %arg20[%c1_262, %c0_263, %c0_264] : memref<2x32x128xbf16, #tpu.memory_space<vmem>>, vector<1x32x128xbf16>
    %785 = vector.shape_cast %784 : vector<1x32x128xbf16> to vector<32x128xbf16>
    %c1_265 = arith.constant 1 : index
    %c0_266 = arith.constant 0 : index
    %c0_267 = arith.constant 0 : index
    %786 = vector.load %arg21[%c1_265, %c0_266, %c0_267] : memref<2x1x128xf32, #tpu.memory_space<vmem>>, vector<1x1x128xf32>
    %787 = vector.shape_cast %786 : vector<1x1x128xf32> to vector<1x128xf32>
    %c1_268 = arith.constant 1 : index
    %c0_269 = arith.constant 0 : index
    %c0_270 = arith.constant 0 : index
    %788 = vector.load %arg22[%c1_268, %c0_269, %c0_270] : memref<2x128x32xbf16, #tpu.memory_space<vmem>>, vector<1x128x32xbf16>
    %789 = vector.shape_cast %788 : vector<1x128x32xbf16> to vector<128x32xbf16>
    %c1_271 = arith.constant 1 : index
    %c0_272 = arith.constant 0 : index
    %c0_273 = arith.constant 0 : index
    %790 = vector.load %arg23[%c1_271, %c0_272, %c0_273] : memref<2x1x32xf32, #tpu.memory_space<vmem>>, vector<1x1x32xf32>
    %791 = vector.shape_cast %790 : vector<1x1x32xf32> to vector<1x32xf32>
    %792 = arith.truncf %783 : vector<8x32xf32> to vector<8x32xbf16>
    %cst_274 = arith.constant dense<0.000000e+00> : vector<8x128xf32>
    %793 = tpu.matmul %792, %785, %cst_274 {dimension_numbers = #tpu.dot_dimension_numbers<[1], [0], [0], [1], [0, 0, 1, 1], [], []>} : vector<8x32xbf16>, vector<32x128xbf16>, vector<8x128xf32> -> vector<8x128xf32>
    %794 = vector.broadcast %787 : vector<1x128xf32> to vector<8x128xf32>
    %795 = arith.addf %793, %794 : vector<8x128xf32>
    %cst_275 = arith.constant 0.000000e+00 : f32
    %796 = vector.broadcast %cst_275 : f32 to vector<8x128xf32>
    %797 = arith.maximumf %795, %796 : vector<8x128xf32>
    %798 = arith.truncf %797 : vector<8x128xf32> to vector<8x128xbf16>
    %cst_276 = arith.constant dense<0.000000e+00> : vector<8x32xf32>
    %799 = tpu.matmul %798, %789, %cst_276 {dimension_numbers = #tpu.dot_dimension_numbers<[1], [0], [0], [1], [0, 0, 1, 1], [], []>} : vector<8x128xbf16>, vector<128x32xbf16>, vector<8x32xf32> -> vector<8x32xf32>
    %800 = vector.broadcast %791 : vector<1x32xf32> to vector<8x32xf32>
    %801 = arith.addf %799, %800 : vector<8x32xf32>
    %802 = arith.addf %761, %801 : vector<8x32xf32>
    %c0_277 = arith.constant 0 : index
    %c0_278 = arith.constant 0 : index
    %803 = vector.load %arg24[%c0_277, %c0_278] : memref<1x32xf32, #tpu.memory_space<vmem>>, vector<1x32xf32>
    %c0_279 = arith.constant 0 : index
    %c0_280 = arith.constant 0 : index
    %804 = vector.load %arg25[%c0_279, %c0_280] : memref<1x32xf32, #tpu.memory_space<vmem>>, vector<1x32xf32>
    %cst_281 = arith.constant dense<0.000000e+00> : vector<8xf32>
    %805 = vector.multi_reduction <add>, %802, %cst_281 [1] : vector<8x32xf32> to vector<8xf32>
    %806 = vector.shape_cast %805 : vector<8xf32> to vector<8x1xf32>
    %cst_282 = arith.constant 3.200000e+01 : f32
    %807 = vector.broadcast %cst_282 : f32 to vector<8x1xf32>
    %808 = arith.divf %806, %807 : vector<8x1xf32>
    %809 = vector.broadcast %808 : vector<8x1xf32> to vector<8x32xf32>
    %810 = arith.subf %802, %809 : vector<8x32xf32>
    %811 = arith.mulf %810, %810 : vector<8x32xf32>
    %cst_283 = arith.constant dense<0.000000e+00> : vector<8xf32>
    %812 = vector.multi_reduction <add>, %811, %cst_283 [1] : vector<8x32xf32> to vector<8xf32>
    %813 = vector.shape_cast %812 : vector<8xf32> to vector<8x1xf32>
    %cst_284 = arith.constant 3.200000e+01 : f32
    %814 = vector.broadcast %cst_284 : f32 to vector<8x1xf32>
    %815 = arith.divf %813, %814 : vector<8x1xf32>
    %816 = vector.broadcast %808 : vector<8x1xf32> to vector<8x32xf32>
    %817 = arith.subf %802, %816 : vector<8x32xf32>
    %cst_285 = arith.constant 9.99999974E-6 : f32
    %818 = vector.broadcast %cst_285 : f32 to vector<8x1xf32>
    %819 = arith.addf %815, %818 : vector<8x1xf32>
    %820 = math.rsqrt %819 : vector<8x1xf32>
    %821 = vector.broadcast %820 : vector<8x1xf32> to vector<8x32xf32>
    %822 = arith.mulf %817, %821 : vector<8x32xf32>
    %823 = vector.broadcast %803 : vector<1x32xf32> to vector<8x32xf32>
    %824 = arith.mulf %822, %823 : vector<8x32xf32>
    %825 = vector.broadcast %804 : vector<1x32xf32> to vector<8x32xf32>
    %826 = arith.addf %824, %825 : vector<8x32xf32>
    %827 = arith.truncf %826 : vector<8x32xf32> to vector<8x32xbf16>
    %c0_286 = arith.constant 0 : index
    %c0_287 = arith.constant 0 : index
    %828 = vector.load %arg26[%c0_286, %c0_287] : memref<32x128xbf16, #tpu.memory_space<vmem>>, vector<32x128xbf16>
    %cst_288 = arith.constant dense<0.000000e+00> : vector<8x128xf32>
    %829 = tpu.matmul %827, %828, %cst_288 {dimension_numbers = #tpu.dot_dimension_numbers<[1], [0], [0], [1], [0, 0, 1, 1], [], []>} : vector<8x32xbf16>, vector<32x128xbf16>, vector<8x128xf32> -> vector<8x128xf32>
    %c0_289 = arith.constant 0 : index
    %c0_290 = arith.constant 0 : index
    %830 = vector.load %arg27[%c0_289, %c0_290] : memref<1x128xf32, #tpu.memory_space<vmem>>, vector<1x128xf32>
    %831 = vector.broadcast %830 : vector<1x128xf32> to vector<8x128xf32>
    %832 = arith.addf %829, %831 : vector<8x128xf32>
    %cst_291 = arith.constant dense<0xFF800000> : vector<8xf32>
    %833 = vector.multi_reduction <maximumf>, %832, %cst_291 [1] : vector<8x128xf32> to vector<8xf32>
    %834 = vector.shape_cast %833 : vector<8xf32> to vector<8x1xf32>
    %835 = vector.broadcast %834 : vector<8x1xf32> to vector<8x128xf32>
    %836 = arith.subf %832, %835 : vector<8x128xf32>
    %837 = math.exp %836 : vector<8x128xf32>
    %cst_292 = arith.constant dense<0.000000e+00> : vector<8xf32>
    %838 = vector.multi_reduction <add>, %837, %cst_292 [1] : vector<8x128xf32> to vector<8xf32>
    %839 = vector.shape_cast %838 : vector<8xf32> to vector<8x1xf32>
    %840 = math.log %839 : vector<8x1xf32>
    %841 = vector.broadcast %840 : vector<8x1xf32> to vector<8x128xf32>
    %842 = arith.subf %836, %841 : vector<8x128xf32>
    %c0_293 = arith.constant 0 : index
    %c0_294 = arith.constant 0 : index
    %c0_295 = arith.constant 0 : index
    %843 = vector.load %arg28[%c0_293, %c0_294, %c0_295] : memref<1x8x128xf32, #tpu.memory_space<vmem>>, vector<1x8x128xf32>
    %844 = vector.shape_cast %843 : vector<1x8x128xf32> to vector<8x128xf32>
    %845 = vector.shape_cast %842 : vector<8x128xf32> to vector<1x8x128xf32>
    tpu.vector_store %arg28[%c0_293, %c0_294, %c0_295], %845 {strides = array<i32>} : memref<1x8x128xf32, #tpu.memory_space<vmem>>, vector<1x8x128xf32>,
    return
  }
  func.func @transform_0(%arg0: i32) -> (i32, i32, i32) {
    %c0_i32 = arith.constant 0 : i32
    %c0_i32_0 = arith.constant 0 : i32
    %c0_i32_1 = arith.constant 0 : i32
    return %arg0, %c0_i32, %c0_i32_0 : i32, i32, i32
  }
  func.func @transform_1(%arg0: i32) -> (i32, i32, i32) {
    %c0_i32 = arith.constant 0 : i32
    %c0_i32_0 = arith.constant 0 : i32
    %c0_i32_1 = arith.constant 0 : i32
    return %arg0, %c0_i32, %c0_i32_0 : i32, i32, i32
  }
  func.func @transform_2(%arg0: i32) -> (i32, i32, i32) {
    %c0_i32 = arith.constant 0 : i32
    %c0_i32_0 = arith.constant 0 : i32
    %c0_i32_1 = arith.constant 0 : i32
    return %arg0, %c0_i32, %c0_i32_0 : i32, i32, i32
  }
  func.func @transform_3(%arg0: i32) -> (i32, i32, i32) {
    %c0_i32 = arith.constant 0 : i32
    %c0_i32_0 = arith.constant 0 : i32
    %c0_i32_1 = arith.constant 0 : i32
    %c0_i32_2 = arith.constant 0 : i32
    return %c0_i32, %c0_i32_0, %c0_i32_1 : i32, i32, i32
  }
  func.func @transform_4(%arg0: i32) -> (i32, i32, i32) {
    %c0_i32 = arith.constant 0 : i32
    %c0_i32_0 = arith.constant 0 : i32
    %c0_i32_1 = arith.constant 0 : i32
    %c0_i32_2 = arith.constant 0 : i32
    return %c0_i32, %c0_i32_0, %c0_i32_1 : i32, i32, i32
  }
  func.func @transform_5(%arg0: i32) -> (i32, i32) {
    %c0_i32 = arith.constant 0 : i32
    %c0_i32_0 = arith.constant 0 : i32
    %c0_i32_1 = arith.constant 0 : i32
    return %c0_i32, %c0_i32_0 : i32, i32
  }
  func.func @transform_6(%arg0: i32) -> (i32, i32) {
    %c0_i32 = arith.constant 0 : i32
    %c0_i32_0 = arith.constant 0 : i32
    %c0_i32_1 = arith.constant 0 : i32
    return %c0_i32, %c0_i32_0 : i32, i32
  }
  func.func @transform_7(%arg0: i32) -> (i32, i32, i32) {
    %c0_i32 = arith.constant 0 : i32
    %c0_i32_0 = arith.constant 0 : i32
    %c0_i32_1 = arith.constant 0 : i32
    %c0_i32_2 = arith.constant 0 : i32
    return %c0_i32, %c0_i32_0, %c0_i32_1 : i32, i32, i32
  }
  func.func @transform_8(%arg0: i32) -> (i32, i32, i32) {
    %c0_i32 = arith.constant 0 : i32
    %c0_i32_0 = arith.constant 0 : i32
    %c0_i32_1 = arith.constant 0 : i32
    %c0_i32_2 = arith.constant 0 : i32
    return %c0_i32, %c0_i32_0, %c0_i32_1 : i32, i32, i32
  }
  func.func @transform_9(%arg0: i32) -> (i32, i32, i32) {
    %c0_i32 = arith.constant 0 : i32
    %c0_i32_0 = arith.constant 0 : i32
    %c0_i32_1 = arith.constant 0 : i32
    %c0_i32_2 = arith.constant 0 : i32
    return %c0_i32, %c0_i32_0, %c0_i32_1 : i32, i32, i32
  }
  func.func @transform_10(%arg0: i32) -> (i32, i32, i32) {
    %c0_i32 = arith.constant 0 : i32
    %c0_i32_0 = arith.constant 0 : i32
    %c0_i32_1 = arith.constant 0 : i32
    %c0_i32_2 = arith.constant 0 : i32
    return %c0_i32, %c0_i32_0, %c0_i32_1 : i32, i32, i32
  }
  func.func @transform_11(%arg0: i32) -> (i32, i32, i32) {
    %c0_i32 = arith.constant 0 : i32
    %c0_i32_0 = arith.constant 0 : i32
    %c0_i32_1 = arith.constant 0 : i32
    %c0_i32_2 = arith.constant 0 : i32
    return %c0_i32, %c0_i32_0, %c0_i32_1 : i32, i32, i32
  }
  func.func @transform_12(%arg0: i32) -> (i32, i32, i32) {
    %c0_i32 = arith.constant 0 : i32
    %c0_i32_0 = arith.constant 0 : i32
    %c0_i32_1 = arith.constant 0 : i32
    %c0_i32_2 = arith.constant 0 : i32
    return %c0_i32, %c0_i32_0, %c0_i32_1 : i32, i32, i32
  }
  func.func @transform_13(%arg0: i32) -> (i32, i32, i32) {
    %c0_i32 = arith.constant 0 : i32
    %c0_i32_0 = arith.constant 0 : i32
    %c0_i32_1 = arith.constant 0 : i32
    %c0_i32_2 = arith.constant 0 : i32
    return %c0_i32, %c0_i32_0, %c0_i32_1 : i32, i32, i32
  }
  func.func @transform_14(%arg0: i32) -> (i32, i32, i32) {
    %c0_i32 = arith.constant 0 : i32
    %c0_i32_0 = arith.constant 0 : i32
    %c0_i32_1 = arith.constant 0 : i32
    %c0_i32_2 = arith.constant 0 : i32
    return %c0_i32, %c0_i32_0, %c0_i32_1 : i32, i32, i32
  }
  func.func @transform_15(%arg0: i32) -> (i32, i32, i32) {
    %c0_i32 = arith.constant 0 : i32
    %c0_i32_0 = arith.constant 0 : i32
    %c0_i32_1 = arith.constant 0 : i32
    %c0_i32_2 = arith.constant 0 : i32
    return %c0_i32, %c0_i32_0, %c0_i32_1 : i32, i32, i32
  }
  func.func @transform_16(%arg0: i32) -> (i32, i32, i32) {
    %c0_i32 = arith.constant 0 : i32
    %c0_i32_0 = arith.constant 0 : i32
    %c0_i32_1 = arith.constant 0 : i32
    %c0_i32_2 = arith.constant 0 : i32
    return %c0_i32, %c0_i32_0, %c0_i32_1 : i32, i32, i32
  }
  func.func @transform_17(%arg0: i32) -> (i32, i32, i32) {
    %c0_i32 = arith.constant 0 : i32
    %c0_i32_0 = arith.constant 0 : i32
    %c0_i32_1 = arith.constant 0 : i32
    %c0_i32_2 = arith.constant 0 : i32
    return %c0_i32, %c0_i32_0, %c0_i32_1 : i32, i32, i32
  }
  func.func @transform_18(%arg0: i32) -> (i32, i32, i32) {
    %c0_i32 = arith.constant 0 : i32
    %c0_i32_0 = arith.constant 0 : i32
    %c0_i32_1 = arith.constant 0 : i32
    %c0_i32_2 = arith.constant 0 : i32
    return %c0_i32, %c0_i32_0, %c0_i32_1 : i32, i32, i32
  }
  func.func @transform_19(%arg0: i32) -> (i32, i32, i32) {
    %c0_i32 = arith.constant 0 : i32
    %c0_i32_0 = arith.constant 0 : i32
    %c0_i32_1 = arith.constant 0 : i32
    %c0_i32_2 = arith.constant 0 : i32
    return %c0_i32, %c0_i32_0, %c0_i32_1 : i32, i32, i32
  }
  func.func @transform_20(%arg0: i32) -> (i32, i32, i32) {
    %c0_i32 = arith.constant 0 : i32
    %c0_i32_0 = arith.constant 0 : i32
    %c0_i32_1 = arith.constant 0 : i32
    %c0_i32_2 = arith.constant 0 : i32
    return %c0_i32, %c0_i32_0, %c0_i32_1 : i32, i32, i32
  }
  func.func @transform_21(%arg0: i32) -> (i32, i32, i32) {
    %c0_i32 = arith.constant 0 : i32
    %c0_i32_0 = arith.constant 0 : i32
    %c0_i32_1 = arith.constant 0 : i32
    %c0_i32_2 = arith.constant 0 : i32
    return %c0_i32, %c0_i32_0, %c0_i32_1 : i32, i32, i32
  }
  func.func @transform_22(%arg0: i32) -> (i32, i32, i32) {
    %c0_i32 = arith.constant 0 : i32
    %c0_i32_0 = arith.constant 0 : i32
    %c0_i32_1 = arith.constant 0 : i32
    %c0_i32_2 = arith.constant 0 : i32
    return %c0_i32, %c0_i32_0, %c0_i32_1 : i32, i32, i32
  }
  func.func @transform_23(%arg0: i32) -> (i32, i32) {
    %c0_i32 = arith.constant 0 : i32
    %c0_i32_0 = arith.constant 0 : i32
    %c0_i32_1 = arith.constant 0 : i32
    return %c0_i32, %c0_i32_0 : i32, i32
  }
  func.func @transform_24(%arg0: i32) -> (i32, i32) {
    %c0_i32 = arith.constant 0 : i32
    %c0_i32_0 = arith.constant 0 : i32
    %c0_i32_1 = arith.constant 0 : i32
    return %c0_i32, %c0_i32_0 : i32, i32
  }
  func.func @transform_25(%arg0: i32) -> (i32, i32) {
    %c0_i32 = arith.constant 0 : i32
    %c0_i32_0 = arith.constant 0 : i32
    %c0_i32_1 = arith.constant 0 : i32
    return %c0_i32, %c0_i32_0 : i32, i32
  }
  func.func @transform_26(%arg0: i32) -> (i32, i32) {
    %c0_i32 = arith.constant 0 : i32
    %c0_i32_0 = arith.constant 0 : i32
    %c0_i32_1 = arith.constant 0 : i32
    return %c0_i32, %c0_i32_0 : i32, i32
  }
  func.func @transform_27(%arg0: i32) -> (i32, i32, i32) {
    %c0_i32 = arith.constant 0 : i32
    %c0_i32_0 = arith.constant 0 : i32
    %c0_i32_1 = arith.constant 0 : i32
    return %arg0, %c0_i32, %c0_i32_0 : i32, i32, i32
  }
}

</mosaic_0001>

<bundles_post_ra>
// kernel: transformer_forward.2
= control target key start
LH: loop header
LB: loop body
LE: loop exit
PB: predicated region body
PF: predicated region fallthrough
CT: control target
= control target key end

     0   :  { %s2826_s18 = smov 0   ;;  %s3499_s0 = inlined_call_operand.vmem [shape: s32[2,12,1], index: 0, kind: input, shape index: {}]   ;;  %s3500_s1 = inlined_call_operand.vmem [shape: f32[2,1,12], index: 1, kind: input, shape index: {}]   ;;  %s3501_s2 = inlined_call_operand.vmem [shape: f32[2,1,12], index: 2, kind: input, shape index: {}]   ;;  %s3502_s3 = inlined_call_operand.vmem [shape: bf16[50,32], index: 3, kind: input, shape index: {}]   ;;  %s3503_s4 = inlined_call_operand.vmem [shape: f32[12,32], index: 4, kind: input, shape index: {}]   ;;  %s3504_s5 = inlined_call_operand.vmem [shape: f32[2,1,32], index: 5, kind: input, shape index: {}]   ;;  %s3505_s6 = inlined_call_operand.vmem [shape: f32[2,1,32], index: 6, kind: input, shape index: {}]   ;;  %s3506_s7 = inlined_call_operand.vmem [shape: bf16[2,32,96], index: 7, kind: input, shape index: {}]   ;;  %s3507_s8 = inlined_call_operand.vmem [shape: f32[2,1,96], index: 8, kind: input, shape index: {}]   ;;  %s3508_s9 = inlined_call_operand.vmem [shape: bf16[2,32,32], index: 9, kind: input, shape index: {}]   ;;  %s3509_s10 = inlined_call_operand.vmem [shape: f32[2,1,32], index: 10, kind: input, shape index: {}]   ;;  %s3510_s11 = inlined_call_operand.vmem [shape: bf16[2,32,128], index: 11, kind: input, shape index: {}]   ;;  %s3511_s12 = inlined_call_operand.vmem [shape: f32[2,1,128], index: 12, kind: input, shape index: {}]   ;;  %s3512_s13 = inlined_call_operand.vmem [shape: bf16[2,128,32], index: 13, kind: input, shape index: {}]   ;;  %s3513_s14 = inlined_call_operand.vmem [shape: f32[2,1,32], index: 14, kind: input, shape index: {}]   ;;  %s3514_s15 = inlined_call_operand.vmem [shape: f32[2,12,32], index: 15, kind: output, shape index: {}]  }
   0x1 LB: > { %s2309_s19 = sadd.s32 4294967295, %s2727_s18   ;;  %p2313_p0 = scmp.ge.s32.totalorder %s2727_s18, 1  ;;  %s2727_s18 = sphi %s2826_s18, %s25_s18  }
   0x2   : > { %p445_p1 = scmp.lt.s32.totalorder %s2727_s18, 3 }
   0x4   : > { %p446_p2 = pnand %p2313_p0, %p445_p1 }
   0x5   : > { %p496_p3 = scmp.lt.s32.totalorder (!%p446_p2), %s2309_s19, 1  ;;  %s2732_s27 = smov (!%p446_p2), 96  }
   0x6   : > { %449 = sbr.rel (%p446_p2) target bundleno = 5909 (0x1715), region = 80  ;;  %s2734_s29 = smov (!%p446_p2), 64  }
   0x7   : > { %s3525_s17 = smov (!%p446_p2), 120   ;;  %s3521_s20 = smov (!%p446_p2), 72  }
   0x8   : > { %s3526_s21 = smov (!%p446_p2), 88   ;;  %s3520_s23 = smov (!%p446_p2), 104  }
   0x9   : > { %s3519_s24 = smov (!%p446_p2), 112   ;;  %s3518_s26 = smov (!%p446_p2), 48  }
   0xa   : > { %s3517_s30 = smov (!%p446_p2), 56   ;;  %s3516_s16 = smov (!%p446_p2), 40  }
   0xb   : > { %v2729_v0 = vmov 0   ;;  %v518_v1 = vld [vmem:[%s3502_s3 + $0x18] sm:$0x1]  ;;  %s3560_s19 = smov (!%p496_p3, %s2309_s19), 1  ;;  %vm559_vm0 = vcmask 1040384   ;;  %v2506_v7 = vld [vmem:[%s3502_s3 + $0x10] sm:$0xff]  ;;  %v521_v10 = vlaneseq }
   0xc   : > { %2560 = vset.pattern.permute.xlu0 %v2729_v0  ;;  %v547_v2 = vunpack.c.l.b16 %v518_v1  ;;  %s3515_s22 = sshll.u32 %s3560_s19, 4  ;;  %s2845_s25 = scalar_lea.vmem %s3500_s1, %s3560_s19  ;;  %v2505_v8 = vld [vmem:[%s3502_s3 + $0x8] sm:$0xff]  ;;  %v2504_v9 = vld [vmem:[%s3502_s3] sm:$0xff]  ;;  %v2730_v14 = vmov 0.0   ;;  %vm555_vm3 = vcmask 408576   ;;  %vm580_vm4 = vcmask 261120  }
   0xd   : > { %s500_s28 = scalar_lea.vmem %s3499_s0, %s3515_s22  ;;  %v522_v12 = vand.u32 127, %v521_v10  ;;  %v519_v18 = vld [vmem:[%s3503_s4] sm:$0xff]  ;;  %v520_v22 = vld [vmem:[%s3503_s4 + $0x8] sm:$0xf]  ;;  %vm3527_vm5 = vcmask 257024   ;;  %v2731_v26 = vmov 32.0  }
   0xe   : > { %v551_v3 = vpack.c.b16 %v547_v2, %v547_v2  ;;  %v510_v4 = vld [vmem:[%s500_s28] sm:$0xff]  ;;  %v511_v6 = vld [vmem:[%s500_s28 + $0x8] sm:$0xf]  ;;  %2604 = vrcp.f32 %v2731_v26  ;;  %vm698_vm13 = vcmask 64512   ;;  %vm719_vm14 = vcmask 97280   ;;  %s2733_s28 = smov 80  }
   0xf   : > { %524 = vperm.xlu0 %2560, %v510_v4   ;;  %v2508_v43 = vld [vmem:[%s3506_s7 + $0x8] sm:$0xff]  ;;  %v2507_v45 = vld [vmem:[%s3506_s7] sm:$0xff]  ;;  %vm723_vm15 = vcmask 93184   ;;  %s3523_s22 = smov 16  }
  0x10   : > { %v561_v5 = vsel %vm559_vm0, %v551_v3, 0  ;;  %673 = vmatpush.bf16.msra.mxu2 %v2508_v43  ;;  %v2592_v1 = vld [vmem:[%s3504_s5] ss:$0 sm:$0xff] }
  0x11   : > { %567 = vmatpush.bf16.msra.mxu0 %v561_v5 }
  0x14   : > { %v2605_v27 = vpop.eup %2604  ;;  %674 = vmatpush.bf16.msra.mxu2 %v2507_v45 }
  0x15   : > { %568 = vmatpush.bf16.msra.mxu0 %v2506_v7  ;;  %v589_v28 = vmul.f32 32.0, %v2605_v27  ;;  %vm593_vm6 = vweird.f32 %v2605_v27 }
  0x17   : > { %527 = vperm.xlu0 %2560, %v511_v6   ;;  %v590_v29 = vsub.f32 1.0, %v589_v28  ;;  %v2593_v6 = vld [vmem:[%s3505_s6] ss:$0 sm:$0xff] }
  0x19   : > { %569 = vmatpush.bf16.msra.mxu0 %v2505_v8  ;;  %v591_v30 = vmul.f32 %v2605_v27, %v590_v29 }
  0x1b   : > { %v592_v31 = vadd.f32 %v2605_v27, %v591_v30 }
  0x1d   : > { %570 = vmatpush.bf16.msra.mxu0 %v2504_v9  ;;  %v2875_v32 = vsel %vm593_vm6, %v2605_v27, %v592_v31  ;;  %vm799_vm6 = vcmask 1045504  }
  0x81   : > { %v525_v11 = vpop.permute.xlu0 %524 }
  0x82   : > { %vm529_vm1 = vcmp.eq.s32.totalorder %v525_v11, %v522_v12 }
  0x83   : > { %v531_v15 = vsel %vm529_vm1, 1.0, %v2730_v14 }
  0x89   : > { %v528_v13 = vpop.permute.xlu0 %527 }
  0x8a   : > { %vm530_vm2 = vcmp.eq.s32.totalorder %v528_v13, %v522_v12  ;;  %v2594_v12 = vld [vmem:[%s3507_s8] ss:$0 sm:$0xff] }
  0x8b   : > { %v532_v16 = vsel %vm530_vm2, 1.0, %v2730_v14 }
  0x8c   : > { %v533_v17 = vpack.c.bf16 %v532_v16, %v531_v15 }
  0x8e   : > { %2330 = vmatmul.msk.bf16.vlgmr.msra.gmra.mxu0 %vm555_vm3, %v533_v17 }
 0x10b   : > { %v572_v19 = vpop.f32.mrf.mxu0 }
 0x10c   : > { %v2864_v20 = vadd.f32 %v572_v19, %v519_v18  ;;  %v2909_v19 = vld [vmem:[%s2845_s25] ss:$0 sm:$0xff] }
 0x10e   : > { %v581_v21 = vsel %vm580_vm4, %v2864_v20, 0.0 }
 0x10f   : > { %582 = vadd.xlane.f32.xlu1 %v581_v21 }
 0x113   : > { %v574_v23 = vpop.f32.mrf.mxu0 }
 0x114   : > { %v2871_v24 = vadd.f32 %v574_v23, %v520_v22 }
 0x116   : > { %v585_v25 = vsel %vm3527_vm5, %v2871_v24, 0.0 }
 0x117   : > { %586 = vadd.xlane.f32.xlu1 %v585_v25 }
 0x182   : > { %v583_v33 = vpop.xlane.xlu1 %582 }
 0x183   : > { %v595_v34 = vmul.f32 %v2875_v32, %v583_v33 }
 0x185   : > { %v597_v35 = vsub.f32 %v2864_v20, %v595_v34 }
 0x187   : > { %v599_v36 = vmul.f32 %v597_v35, %v597_v35 }
 0x189   : > { %v601_v37 = vsel %vm580_vm4, %v599_v36, 0.0 }
 0x18a   : > { %602 = vadd.xlane.f32.xlu2 %v601_v37  ;;  %v587_v38 = vpop.xlane.xlu1 %586 }
 0x18b   : > { %v596_v39 = vmul.f32 %v2875_v32, %v587_v38 }
 0x18d   : > { %v598_v40 = vsub.f32 %v2871_v24, %v596_v39 }
 0x18f   : > { %v600_v41 = vmul.f32 %v598_v40, %v598_v40 }
 0x191   : > { %v604_v42 = vsel %vm3527_vm5, %v600_v41, 0.0 }
 0x192   : > { %605 = vadd.xlane.f32.xlu2 %v604_v42 }
 0x1fd   : > { %v603_v44 = vpop.xlane.xlu2 %602 }
 0x1fe   : > { %v607_v46 = vmul.f32 %v603_v44, %v2875_v32 }
 0x200   : > { %v609_v47 = vadd.f32 1e-05, %v607_v46 }
 0x202   : > { %2606 = vrsqrt.f32 %v609_v47  ;;  %vm617_vm8 = vweird.f32 %v609_v47 }
 0x205   : > { %v606_v48 = vpop.xlane.xlu2 %605 }
 0x206   : > { %v608_v49 = vmul.f32 %v606_v48, %v2875_v32 }
 0x208   : > { %v2607_v50 = vpop.eup %2606  ;;  %v610_v51 = vadd.f32 1e-05, %v608_v49  ;;  %v681_v49 = vld [vmem:[%s3501_s2] sm:$0x1] }
 0x209   : > { %v612_v52 = vmul.f32 %v2607_v50, %v609_v47  ;;  %vm618_vm7 = vweird.f32 %v2607_v50  ;;  %vm687_vm0 = vcmp.gt.f32.partialorder %v681_v49, 0.0 }
 0x20a   : > { %2608 = vrsqrt.f32 %v610_v51  ;;  %vm619_vm9 = vmor %vm617_vm8, %vm618_vm7  ;;  %vm627_vm11 = vweird.f32 %v610_v51 }
 0x20b   : > { %v613_v53 = vmul.f32 %v2607_v50, %v612_v52 }
 0x20d   : > { %v614_v54 = vmul.f32 0.5, %v613_v53 }
 0x20f   : > { %v615_v55 = vsub.f32 1.5, %v614_v54 }
 0x210   : > { %v2609_v56 = vpop.eup %2608 }
 0x211   : > { %v616_v57 = vmul.f32 %v2607_v50, %v615_v55  ;;  %v622_v58 = vmul.f32 %v2609_v56, %v610_v51  ;;  %vm628_vm10 = vweird.f32 %v2609_v56 }
 0x212   : > { %vm629_vm12 = vmor %vm627_vm11, %vm628_vm10 }
 0x213   : > { %v623_v59 = vmul.f32 %v2609_v56, %v622_v58  ;;  %v620_v60 = vsel %vm619_vm9, %v2607_v50, %v616_v57  ;;  %v688_v50 = vsel %vm687_vm0, 1, %v2729_v0 }
 0x214   : > { %v631_v63 = vmul.f32 %v620_v60, %v597_v35  ;;  %v689_v51 = vperm.slane %v688_v50, 0 }
 0x215   : > { %v624_v61 = vmul.f32 0.5, %v623_v59 }
 0x216   : > { %v636_v5 = vmul.f32 %v2592_v1, %v631_v63  ;;  %vm2928_vm1 = vcmp.eq.s32.totalorder %v689_v51, 1 }
 0x217   : > { %v625_v62 = vsub.f32 1.5, %v624_v61 }
 0x218   : > { %v641_v8 = vadd.f32 %v2593_v6, %v636_v5 }
 0x219   : > { %v626_v2 = vmul.f32 %v2609_v56, %v625_v62 }
 0x21b   : > { %v630_v3 = vsel %vm629_vm12, %v2609_v56, %v626_v2 }
 0x21c   : > { %v632_v4 = vmul.f32 %v630_v3, %v598_v40 }
 0x21e   : > { %v637_v7 = vmul.f32 %v2592_v1, %v632_v4 }
 0x220   : > { %v642_v9 = vadd.f32 %v2593_v6, %v637_v7 }
 0x222   : > { %v643_v10 = vpack.c.bf16 %v642_v9, %v641_v8 }
 0x224   : > { %2339 = vmatmul.msk.bf16.vlgmr.msra.gmra.mxu2 %vm580_vm4, %v643_v10 }
 0x2a7   : > { %v676_v11 = vpop.f32.mrf.mxu2 }
 0x2a8   : > { %v677_v14 = vadd.f32 %v2594_v12, %v676_v11 }
 0x2af   : > { %v678_v13 = vpop.f32.mrf.mxu2 }
 0x2b0   : > { %v679_v15 = vadd.f32 %v2594_v12, %v678_v13 }
 0x2b2   : > { %v2901_v16 = vpack.c.bf16 %v679_v15, %v677_v14 }
 0x2b4   : > { %696 = vrot.lane.b32.xlu0 %v2901_v16, %s2732_s27 }
 0x326   : > { %v697_v17 = vpop.permute.xlu0 %696 }
 0x327   : > { %v703_v18 = vsel %vm698_vm13, %v697_v17, 0 }
 0x328   : > { %712 = vmatpush.bf16.xpose.msrb.mxu2 %v703_v18 }
 0x32f   : > { %2340 = vmatmul.msk.bf16.vlgmr.msrb.gmra.mxu2 %vm698_vm13, %v2901_v16 }
 0x3b2   : > { %v714_v21 = vpop.f32.mrf.mxu2 }
 0x3b3   : > { %v715_v22 = vadd.f32 %v2909_v19, %v714_v21 }
 0x3b5   : > { %v720_v23 = vsel %vm719_vm14, %v715_v22, -inf }
 0x3b6   : > { %721 = vmax.xlane.f32.xlu1 %v720_v23 }
 0x3ba   : > { %v716_v25 = vpop.f32.mrf.mxu2 }
 0x3bb   : > { %v717_v26 = vadd.f32 %v2909_v19, %v716_v25 }
 0x3bd   : > { %v724_v27 = vsel %vm723_vm15, %v717_v26, -inf }
 0x3be   : > { %725 = vmax.xlane.f32.xlu2 %v724_v27 }
 0x429   : > { %v722_v28 = vpop.xlane.xlu1 %721 }
 0x42a   : > { %v727_v29 = vsub.f32 %v715_v22, %v722_v28 }
 0x42c   : > { %v729_v30 = vmul.f32 1.442695, %v727_v29 }
 0x42e   : > { %2610 = vpow2.f32 %v729_v30 }
 0x431   : > { %v726_v31 = vpop.xlane.xlu2 %725 }
 0x432   : > { %v728_v33 = vsub.f32 %v717_v26, %v726_v31 }
 0x434   : > { %v2611_v34 = vpop.eup %2610  ;;  %v731_v35 = vmul.f32 1.442695, %v728_v33 }
 0x435   : > { %v733_v36 = vsel %vm719_vm14, %v2611_v34, 0.0 }
 0x436   : > { %2612 = vpow2.f32 %v731_v35  ;;  %734 = vadd.xlane.f32.xlu0 %v733_v36 }
 0x43c   : > { %v2613_v37 = vpop.eup %2612 }
 0x43d   : > { %v736_v38 = vsel %vm723_vm15, %v2613_v37, 0.0 }
 0x43e   : > { %737 = vadd.xlane.f32.xlu1 %v736_v38 }
 0x44a   : > { %938 = vrot.lane.b32.xlu0 %v2901_v16, %s2733_s28 }
 0x4a9   : > { %v735_v39 = vpop.xlane.xlu0 %734 }
 0x4aa   : > { %2614 = vrcp.f32 %v735_v39 }
 0x4b0   : > { %v2615_v40 = vpop.eup %2614 }
 0x4b1   : > { %v741_v41 = vmul.f32 %v2615_v40, %v2611_v34  ;;  %v738_v42 = vpop.xlane.xlu1 %737 }
 0x4b2   : > { %2616 = vrcp.f32 %v738_v42 }
 0x4b3   : > { %v743_v43 = vsel %vm719_vm14, %v741_v41, -inf  ;;  %v753_v54 = vmul.f32 1.2, %v741_v41 }
 0x4b4   : > { %744 = vmax.xlane.f32.xlu2 %v743_v43 }
 0x4b8   : > { %v2617_v44 = vpop.eup %2616 }
 0x4b9   : > { %v742_v45 = vmul.f32 %v2617_v44, %v2613_v37 }
 0x4bb   : > { %v746_v46 = vsel %vm723_vm15, %v742_v45, -inf  ;;  %v754_v60 = vmul.f32 1.2, %v742_v45 }
 0x4bc   : > { %v939_v47 = vpop.permute.xlu0 %938  ;;  %747 = vmax.xlane.f32.xlu1 %v746_v46 }
 0x4bd   : > { %v944_v48 = vsel %vm698_vm13, %v939_v47, 0 }
 0x4be   : > { %953 = vmatpush.bf16.xpose.msra.mxu2 %v944_v48 }
 0x4cc   : > { %794 = vrot.lane.b32.xlu2 %v2901_v16, %s2734_s29 }
 0x527   : > { %v745_v53 = vpop.xlane.xlu2 %744 }
 0x528   : > { %vm749_vm2 = vcmp.ge.f32.partialorder %v741_v41, %v745_v53 }
 0x529   : > { %vm751_vm3 = vmor %vm749_vm2, %vm2928_vm1 }
 0x52a   : > { %v755_v55 = vsel %vm751_vm3, %v753_v54, %v741_v41 }
 0x52b   : > { %v757_v56 = vsel %vm719_vm14, %v755_v55, 0.0 }
 0x52c   : > { %758 = vadd.xlane.f32.xlu2 %v757_v56 }
 0x52f   : > { %v795_v57 = vpop.permute.xlu2 %794  ;;  %v748_v58 = vpop.xlane.xlu1 %747 }
 0x530   : > { %vm750_vm7 = vcmp.ge.f32.partialorder %v742_v45, %v748_v58  ;;  %v801_v59 = vsel %vm799_vm6, %v795_v57, 0 }
 0x531   : > { %vm752_vm8 = vmor %vm750_vm7, %vm2928_vm1  ;;  %810 = vmatpush.bf16.msra.mxu3 %v801_v59 }
 0x532   : > { %v756_v61 = vsel %vm752_vm8, %v754_v60, %v742_v45 }
 0x533   : > { %v760_v62 = vsel %vm723_vm15, %v756_v61, 0.0 }
 0x534   : > { %761 = vadd.xlane.f32.xlu1 %v760_v62 }
 0x544   : > { %817 = vrot.lane.b32.xlu2 %v2901_v16, %s3525_s17  ;;  %s3552_s17 = smov 8  }
 0x54c   : > { %1057 = vrot.lane.b32.xlu2 %v2901_v16, %s3521_s20  ;;  %s3543_s20 = smov 48  }
 0x54d   : > { %819 = vrot.lane.b32.xlu1 %v2901_v16, %s3526_s21  ;;  %s3554_s21 = smov 24  }
 0x554   : > { %1055 = vrot.lane.b32.xlu2 %v2901_v16, %s3520_s23  ;;  %s3544_s23 = smov 56  }
 0x555   : > { %936 = vrot.lane.b32.xlu1 %v2901_v16, %s3519_s24 }
 0x59f   : > { %v759_v63 = vpop.xlane.xlu2 %758 }
 0x5a0   : > { %2618 = vrcp.f32 %v759_v63  ;;  %v774_v9 = vand.u32 2147483648, %v759_v63  ;;  %vm768_vm10 = vweird.f32 %v759_v63  ;;  %v772_v10 = vand.u32 2147483647, %v759_v63 }
 0x5a2   : > { %v775_v17 = vor.u32 1.1754944e-38, %v774_v9  ;;  %vm773_vm0 = vcmp.eq.f32.partialorder %v772_v10, 8.507059e+37 }
 0x5a6   : > { %v2619_v1 = vpop.eup %2618 }
 0x5a7   : > { %v764_v2 = vmul.f32 %v2619_v1, %v759_v63  ;;  %v762_v3 = vpop.xlane.xlu1 %761  ;;  %vm769_vm9 = vweird.f32 %v2619_v1  ;;  %v818_v18 = vpop.permute.xlu2 %817 }
 0x5a8   : > { %2620 = vrcp.f32 %v762_v3  ;;  %vm770_vm11 = vmor %vm768_vm10, %vm769_vm9  ;;  %v789_v12 = vand.u32 2147483648, %v762_v3  ;;  %v787_v14 = vand.u32 2147483647, %v762_v3  ;;  %vm783_vm2 = vweird.f32 %v762_v3 }
 0x5a9   : > { %v765_v4 = vsub.f32 1.0, %v764_v2 }
 0x5aa   : > { %v790_v22 = vor.u32 1.1754944e-38, %v789_v12  ;;  %vm788_vm7 = vcmp.eq.f32.partialorder %v787_v14, 8.507059e+37 }
 0x5ab   : > { %v766_v5 = vmul.f32 %v2619_v1, %v765_v4 }
 0x5ad   : > { %v767_v7 = vadd.f32 %v2619_v1, %v766_v5 }
 0x5ae   : > { %v2621_v6 = vpop.eup %2620 }
 0x5af   : > { %v779_v8 = vmul.f32 %v2621_v6, %v762_v3  ;;  %vm784_vm12 = vweird.f32 %v2621_v6  ;;  %v771_v15 = vsel %vm770_vm11, %v2619_v1, %v767_v7  ;;  %v1058_v30 = vpop.permute.xlu2 %1057 }
 0x5b0   : > { %vm785_vm3 = vmor %vm783_vm2, %vm784_vm12  ;;  %v776_v23 = vsel %vm773_vm0, %v775_v17, %v771_v15  ;;  %v1063_v34 = vsel %vm698_vm13, %v1058_v30, 0 }
 0x5b1   : > { %v780_v11 = vsub.f32 1.0, %v779_v8  ;;  %v777_v27 = vmul.f32 %v776_v23, %v755_v55 }
 0x5b3   : > { %v781_v13 = vmul.f32 %v2621_v6, %v780_v11 }
 0x5b5   : > { %v782_v21 = vadd.f32 %v2621_v6, %v781_v13 }
 0x5b7   : > { %v786_v25 = vsel %vm785_vm3, %v2621_v6, %v782_v21  ;;  %v1056_v36 = vpop.permute.xlu2 %1055 }
 0x5b8   : > { %v791_v26 = vsel %vm788_vm7, %v790_v22, %v786_v25 }
 0x5b9   : > { %v792_v28 = vmul.f32 %v791_v26, %v756_v61 }
 0x5bb   : > { %v793_v29 = vpack.c.bf16 %v792_v28, %v777_v27 }
 0x5bd   : > { %2341 = vmatmul.msk.bf16.vlgmr.msra.gmra.mxu3 %vm719_vm14, %v793_v29 }
 0x5bf   : > { %v820_v31 = vpop.permute.xlu1 %819 }
 0x5c0   : > { %v825_v33 = vsel %vm698_vm13, %v820_v31, 0 }
 0x5c1   : > { %834 = vmatpush.bf16.xpose.msrb.mxu3 %v825_v33 }
 0x5c7   : > { %v937_v35 = vpop.permute.xlu1 %936 }
 0x5c8   : > { %2344 = vmatmul.msk.bf16.vlgmr.msra.gmra.mxu2 %vm698_vm13, %v937_v35 }
 0x5c9   : > { %1072 = vmatpush.bf16.xpose.msra.mxu3 %v1063_v34 }
 0x5cd   : > { %2342 = vmatmul.msk.bf16.vlgmr.msrb.gmra.mxu3 %vm698_vm13, %v818_v18 }
 0x5dd   : > { %2346 = vmatmul.msk.bf16.vlgmr.msra.gmra.mxu3 %vm698_vm13, %v1056_v36 }
 0x640   : > { %v2955_v37 = vpop.f32.mrf.mxu3 }
 0x648   : > { %v2957_v38 = vpop.f32.mrf.mxu3 }
 0x64b   : > { %v955_v39 = vpop.f32.mrf.mxu2 }
 0x64c   : > { %v956_v40 = vadd.f32 %v2909_v19, %v955_v39 }
 0x64e   : > { %v960_v41 = vsel %vm719_vm14, %v956_v40, -inf }
 0x64f   : > { %961 = vmax.xlane.f32.xlu2 %v960_v41 }
 0x650   : > { %v836_v42 = vpop.f32.mrf.mxu3 }
 0x651   : > { %v837_v43 = vadd.f32 %v2909_v19, %v836_v42 }
 0x653   : > { %v841_v44 = vsel %vm719_vm14, %v837_v43, -inf  ;;  %v957_v45 = vpop.f32.mrf.mxu2 }
 0x654   : > { %842 = vmax.xlane.f32.xlu1 %v841_v44  ;;  %v958_v46 = vadd.f32 %v2909_v19, %v957_v45 }
 0x656   : > { %v963_v50 = vsel %vm723_vm15, %v958_v46, -inf }
 0x658   : > { %v838_v47 = vpop.f32.mrf.mxu3 }
 0x659   : > { %v839_v48 = vadd.f32 %v2909_v19, %v838_v47 }
 0x65b   : > { %v844_v49 = vsel %vm723_vm15, %v839_v48, -inf }
 0x65c   : > { %845 = vmax.xlane.f32.xlu0 %v844_v49  ;;  %964 = vmax.xlane.f32.xlu1 %v963_v50 }
 0x660   : > { %v1074_v51 = vpop.f32.mrf.mxu3 }
 0x661   : > { %v1075_v53 = vadd.f32 %v2909_v19, %v1074_v51 }
 0x663   : > { %v1079_v54 = vsel %vm719_vm14, %v1075_v53, -inf }
 0x664   : > { %1080 = vmax.xlane.f32.xlu0 %v1079_v54 }
 0x668   : > { %v1076_v55 = vpop.f32.mrf.mxu3 }
 0x669   : > { %v1077_v56 = vadd.f32 %v2909_v19, %v1076_v55 }
 0x66b   : > { %v1082_v57 = vsel %vm723_vm15, %v1077_v56, -inf }
 0x66c   : > { %1083 = vmax.xlane.f32.xlu2 %v1082_v57 }
 0x6c2   : > { %v962_v58 = vpop.xlane.xlu2 %961 }
 0x6c3   : > { %v966_v59 = vsub.f32 %v956_v40, %v962_v58 }
 0x6c5   : > { %v968_v60 = vmul.f32 1.442695, %v966_v59 }
 0x6c7   : > { %2622 = vpow2.f32 %v968_v60  ;;  %v843_v61 = vpop.xlane.xlu1 %842 }
 0x6c8   : > { %v847_v62 = vsub.f32 %v837_v43, %v843_v61 }
 0x6ca   : > { %v849_v63 = vmul.f32 1.442695, %v847_v62 }
 0x6cc   : > { %2624 = vpow2.f32 %v849_v63 }
 0x6cd   : > { %v2623_v1 = vpop.eup %2622 }
 0x6ce   : > { %v972_v2 = vsel %vm719_vm14, %v2623_v1, 0.0 }
 0x6cf   : > { %v846_v3 = vpop.xlane.xlu0 %845  ;;  %973 = vadd.xlane.f32.xlu2 %v972_v2  ;;  %v965_v4 = vpop.xlane.xlu1 %964 }
 0x6d0   : > { %v848_v5 = vsub.f32 %v839_v48, %v846_v3  ;;  %v967_v6 = vsub.f32 %v958_v46, %v965_v4 }
 0x6d2   : > { %v2625_v19 = vpop.eup %2624  ;;  %v851_v7 = vmul.f32 1.442695, %v848_v5  ;;  %v970_v8 = vmul.f32 1.442695, %v967_v6 }
 0x6d3   : > { %v853_v9 = vsel %vm719_vm14, %v2625_v19, 0.0 }
 0x6d4   : > { %2626 = vpow2.f32 %v851_v7  ;;  %854 = vadd.xlane.f32.xlu1 %v853_v9 }
 0x6d5   : > { %2628 = vpow2.f32 %v970_v8 }
 0x6d7   : > { %v1081_v10 = vpop.xlane.xlu0 %1080 }
 0x6d8   : > { %v1085_v11 = vsub.f32 %v1075_v53, %v1081_v10 }
 0x6da   : > { %v2627_v12 = vpop.eup %2626  ;;  %v1087_v13 = vmul.f32 1.442695, %v1085_v11 }
 0x6db   : > { %v2629_v14 = vpop.eup %2628  ;;  %v856_v15 = vsel %vm723_vm15, %v2627_v12, 0.0 }
 0x6dc   : > { %2630 = vpow2.f32 %v1087_v13  ;;  %857 = vadd.xlane.f32.xlu0 %v856_v15  ;;  %v975_v17 = vsel %vm723_vm15, %v2629_v14, 0.0 }
 0x6dd   : > { %976 = vadd.xlane.f32.xlu1 %v975_v17 }
 0x6df   : > { %v1084_v18 = vpop.xlane.xlu2 %1083 }
 0x6e0   : > { %v1086_v21 = vsub.f32 %v1077_v56, %v1084_v18 }
 0x6e2   : > { %v2631_v22 = vpop.eup %2630  ;;  %v1089_v23 = vmul.f32 1.442695, %v1086_v21 }
 0x6e3   : > { %v1091_v25 = vsel %vm719_vm14, %v2631_v22, 0.0 }
 0x6e4   : > { %2632 = vpow2.f32 %v1089_v23  ;;  %1092 = vadd.xlane.f32.xlu0 %v1091_v25 }
 0x6ea   : > { %v2633_v26 = vpop.eup %2632 }
 0x6eb   : > { %v1094_v27 = vsel %vm723_vm15, %v2633_v26, 0.0 }
 0x6ec   : > { %1095 = vadd.xlane.f32.xlu2 %v1094_v27 }
 0x742   : > { %v974_v28 = vpop.xlane.xlu2 %973 }
 0x743   : > { %2634 = vrcp.f32 %v974_v28 }
 0x747   : > { %v855_v29 = vpop.xlane.xlu1 %854 }
 0x748   : > { %2636 = vrcp.f32 %v855_v29 }
 0x749   : > { %v2635_v30 = vpop.eup %2634 }
 0x74a   : > { %v980_v31 = vmul.f32 %v2635_v30, %v2623_v1 }
 0x74c   : > { %v982_v33 = vsel %vm719_vm14, %v980_v31, -inf  ;;  %v992_v57 = vmul.f32 1.2, %v980_v31 }
 0x74d   : > { %983 = vmax.xlane.f32.xlu2 %v982_v33 }
 0x74e   : > { %v2637_v34 = vpop.eup %2636 }
 0x74f   : > { %v861_v35 = vmul.f32 %v2637_v34, %v2625_v19  ;;  %v858_v36 = vpop.xlane.xlu0 %857 }
 0x750   : > { %2638 = vrcp.f32 %v858_v36  ;;  %v977_v39 = vpop.xlane.xlu1 %976 }
 0x751   : > { %2640 = vrcp.f32 %v977_v39  ;;  %v863_v40 = vsel %vm719_vm14, %v861_v35, -inf  ;;  %v873_v19 = vmul.f32 1.2, %v861_v35 }
 0x752   : > { %864 = vmax.xlane.f32.xlu1 %v863_v40 }
 0x756   : > { %v2639_v41 = vpop.eup %2638 }
 0x757   : > { %v2641_v42 = vpop.eup %2640  ;;  %v862_v43 = vmul.f32 %v2639_v41, %v2627_v12  ;;  %v1093_v44 = vpop.xlane.xlu0 %1092 }
 0x758   : > { %v981_v45 = vmul.f32 %v2641_v42, %v2629_v14  ;;  %2642 = vrcp.f32 %v1093_v44 }
 0x759   : > { %v866_v46 = vsel %vm723_vm15, %v862_v43, -inf  ;;  %v874_v63 = vmul.f32 1.2, %v862_v43 }
 0x75a   : > { %867 = vmax.xlane.f32.xlu0 %v866_v46  ;;  %v985_v47 = vsel %vm723_vm15, %v981_v45, -inf  ;;  %v993_v1 = vmul.f32 1.2, %v981_v45 }
 0x75b   : > { %986 = vmax.xlane.f32.xlu1 %v985_v47 }
 0x75e   : > { %v2643_v48 = vpop.eup %2642 }
 0x75f   : > { %v1099_v49 = vmul.f32 %v2643_v48, %v2631_v22  ;;  %v1096_v50 = vpop.xlane.xlu2 %1095 }
 0x760   : > { %2644 = vrcp.f32 %v1096_v50 }
 0x761   : > { %v1101_v51 = vsel %vm719_vm14, %v1099_v49, -inf  ;;  %v1111_v7 = vmul.f32 1.2, %v1099_v49 }
 0x762   : > { %1102 = vmax.xlane.f32.xlu0 %v1101_v51 }
 0x766   : > { %v2645_v53 = vpop.eup %2644 }
 0x767   : > { %v1100_v54 = vmul.f32 %v2645_v53, %v2633_v26 }
 0x769   : > { %v1104_v55 = vsel %vm723_vm15, %v1100_v54, -inf  ;;  %v1112_v13 = vmul.f32 1.2, %v1100_v54 }
 0x76a   : > { %1105 = vmax.xlane.f32.xlu2 %v1104_v55 }
 0x7c0   : > { %v984_v56 = vpop.xlane.xlu2 %983 }
 0x7c1   : > { %vm988_vm8 = vcmp.ge.f32.partialorder %v980_v31, %v984_v56 }
 0x7c2   : > { %vm990_vm9 = vmor %vm988_vm8, %vm2928_vm1 }
 0x7c3   : > { %v2985_v58 = vsel %vm990_vm9, %v992_v57, %v980_v31 }
 0x7c4   : > { %v996_v59 = vsel %vm719_vm14, %v2985_v58, 0.0 }
 0x7c5   : > { %997 = vadd.xlane.f32.xlu2 %v996_v59  ;;  %v865_v60 = vpop.xlane.xlu1 %864 }
 0x7c6   : > { %vm869_vm2 = vcmp.ge.f32.partialorder %v861_v35, %v865_v60 }
 0x7c7   : > { %vm871_vm3 = vmor %vm869_vm2, %vm2928_vm1 }
 0x7c8   : > { %v3005_v8 = vsel %vm871_vm3, %v873_v19, %v861_v35 }
 0x7c9   : > { %v877_v11 = vsel %vm719_vm14, %v3005_v8, 0.0 }
 0x7cd   : > { %v868_v61 = vpop.xlane.xlu0 %867 }
 0x7ce   : > { %vm870_vm10 = vcmp.ge.f32.partialorder %v862_v43, %v868_v61  ;;  %v987_v62 = vpop.xlane.xlu1 %986 }
 0x7cf   : > { %vm872_vm11 = vmor %vm870_vm10, %vm2928_vm1  ;;  %vm989_vm12 = vcmp.ge.f32.partialorder %v981_v45, %v987_v62 }
 0x7d0   : > { %vm991_vm0 = vmor %vm989_vm12, %vm2928_vm1  ;;  %v2993_v2 = vsel %vm872_vm11, %v874_v63, %v862_v43 }
 0x7d1   : > { %v880_v3 = vsel %vm723_vm15, %v2993_v2, 0.0  ;;  %v2997_v4 = vsel %vm991_vm0, %v993_v1, %v981_v45 }
 0x7d2   : > { %881 = vadd.xlane.f32.xlu0 %v880_v3  ;;  %v999_v5 = vsel %vm723_vm15, %v2997_v4, 0.0 }
 0x7d3   : > { %1000 = vadd.xlane.f32.xlu1 %v999_v5 }
 0x7d5   : > { %v1103_v6 = vpop.xlane.xlu0 %1102 }
 0x7d6   : > { %vm1107_vm7 = vcmp.ge.f32.partialorder %v1099_v49, %v1103_v6 }
 0x7d7   : > { %vm1109_vm8 = vmor %vm1107_vm7, %vm2928_vm1 }
 0x7d8   : > { %v3007_v9 = vsel %vm1109_vm8, %v1111_v7, %v1099_v49 }
 0x7d9   : > { %v1115_v10 = vsel %vm719_vm14, %v3007_v9, 0.0 }
 0x7da   : > { %1116 = vadd.xlane.f32.xlu0 %v1115_v10 }
 0x7db   : > { %878 = vadd.xlane.f32.xlu1 %v877_v11 }
 0x7dd   : > { %v1106_v12 = vpop.xlane.xlu2 %1105 }
 0x7de   : > { %vm1108_vm9 = vcmp.ge.f32.partialorder %v1100_v54, %v1106_v12 }
 0x7df   : > { %vm1110_vm10 = vmor %vm1108_vm9, %vm2928_vm1 }
 0x7e0   : > { %v3015_v14 = vsel %vm1110_vm10, %v1112_v13, %v1100_v54 }
 0x7e1   : > { %v1118_v15 = vsel %vm723_vm15, %v3015_v14, 0.0 }
 0x7e2   : > { %1119 = vadd.xlane.f32.xlu2 %v1118_v15 }
 0x7ee   : > { %1033 = vrot.lane.b32.xlu0 %v2901_v16, %s3518_s26  ;;  %s3557_s26 = sshll.u32 %s3560_s19, 4 }
 0x7f4   : > { %914 = vrot.lane.b32.xlu1 %v2901_v16, %s3517_s30  ;;  %s3522_s30 = smov 24  }
 0x7fa   : > { %1152 = vrot.lane.b32.xlu2 %v2901_v16, %s3516_s16  ;;  %s3524_s16 = smov 8  }
 0x838   : > { %v998_v52 = vpop.xlane.xlu2 %997 }
 0x839   : > { %2646 = vrcp.f32 %v998_v52  ;;  %vm1007_vm1 = vweird.f32 %v998_v52  ;;  %v1013_v41 = vand.u32 2147483648, %v998_v52  ;;  %v1011_v45 = vand.u32 2147483647, %v998_v52 }
 0x83b   : > { %v1014_v53 = vor.u32 1.1754944e-38, %v1013_v41  ;;  %vm1012_vm7 = vcmp.eq.f32.partialorder %v1011_v45, 8.507059e+37 }
 0x83f   : > { %v2647_v18 = vpop.eup %2646 }
 0x840   : > { %v1003_v22 = vmul.f32 %v2647_v18, %v998_v52  ;;  %vm1008_vm11 = vweird.f32 %v2647_v18 }
 0x841   : > { %vm3037_vm0 = vmor %vm1007_vm1, %vm1008_vm11 }
 0x842   : > { %v1004_v25 = vsub.f32 1.0, %v1003_v22 }
 0x844   : > { %v1005_v30 = vmul.f32 %v2647_v18, %v1004_v25 }
 0x845   : > { %v3025_v17 = vpop.xlane.xlu0 %881 }
 0x846   : > { %v1001_v21 = vpop.xlane.xlu1 %1000  ;;  %v1006_v34 = vadd.f32 %v2647_v18, %v1005_v30  ;;  %vm903_vm11 = vweird.f32 %v3025_v17  ;;  %v909_v3 = vand.u32 2147483648, %v3025_v17  ;;  %v907_v6 = vand.u32 2147483647, %v3025_v17 }
 0x847   : > { %2648 = vrcp.f32 %v1001_v21  ;;  %v1028_v42 = vand.u32 2147483648, %v1001_v21  ;;  %vm1022_vm2 = vweird.f32 %v1001_v21  ;;  %v1026_v46 = vand.u32 2147483647, %v1001_v21 }
 0x848   : > { %2650 = vrcp.f32 %v3025_v17  ;;  %v1010_v49 = vsel %vm3037_vm0, %v2647_v18, %v1006_v34  ;;  %v910_v18 = vor.u32 1.1754944e-38, %v909_v3 }
 0x849   : > { %v1029_v54 = vor.u32 1.1754944e-38, %v1028_v42  ;;  %vm1027_vm8 = vcmp.eq.f32.partialorder %v1026_v46, 8.507059e+37  ;;  %v1015_v60 = vsel %vm1012_vm7, %v1014_v53, %v1010_v49 }
 0x84a   : > { %v1016_v13 = vmul.f32 %v1015_v60, %v2985_v58 }
 0x84d   : > { %v2649_v23 = vpop.eup %2648  ;;  %v3032_v39 = vpop.xlane.xlu0 %1116 }
 0x84e   : > { %v3028_v26 = vpop.eup %2650  ;;  %v1018_v27 = vmul.f32 %v2649_v23, %v1001_v21  ;;  %v879_v28 = vpop.xlane.xlu1 %878  ;;  %vm1023_vm12 = vweird.f32 %v2649_v23  ;;  %v1130_v41 = vand.u32 2147483647, %v3032_v39 }
 0x84f   : > { %2652 = vrcp.f32 %v879_v28  ;;  %v899_v16 = vmul.f32 %v3028_v26, %v3025_v17  ;;  %vm3041_vm3 = vmor %vm1022_vm2, %vm1023_vm12  ;;  %v894_v59 = vand.u32 2147483648, %v879_v28  ;;  %vm904_vm10 = vweird.f32 %v3028_v26 }
 0x850   : > { %v1019_v29 = vsub.f32 1.0, %v1018_v27  ;;  %vm888_vm1 = vweird.f32 %v879_v28  ;;  %v892_v63 = vand.u32 2147483647, %v879_v28  ;;  %vm905_vm0 = vmor %vm903_vm11, %vm904_vm10 }
 0x851   : > { %v900_v35 = vsub.f32 1.0, %v899_v16  ;;  %v895_v11 = vor.u32 1.1754944e-38, %v894_v59  ;;  %v2509_v59 = vld [vmem:[%s3508_s9] sm:$0xff] }
 0x852   : > { %v1020_v31 = vmul.f32 %v2649_v23, %v1019_v29  ;;  %vm893_vm2 = vcmp.eq.f32.partialorder %v892_v63, 8.507059e+37 }
 0x853   : > { %v901_v50 = vmul.f32 %v3028_v26, %v900_v35 }
 0x854   : > { %v1021_v36 = vadd.f32 %v2649_v23, %v1020_v31 }
 0x855   : > { %v2653_v33 = vpop.eup %2652  ;;  %v3034_v40 = vpop.xlane.xlu2 %1119  ;;  %v902_v62 = vadd.f32 %v3028_v26, %v901_v50 }
 0x856   : > { %v884_v43 = vmul.f32 %v2653_v33, %v879_v28  ;;  %2654 = vrcp.f32 %v3034_v40  ;;  %v1025_v51 = vsel %vm3041_vm3, %v2649_v23, %v1021_v36  ;;  %vm889_vm9 = vweird.f32 %v2653_v33 }
 0x857   : > { %2656 = vrcp.f32 %v3032_v39  ;;  %v1030_v61 = vsel %vm1027_vm8, %v1029_v54, %v1025_v51  ;;  %vm3057_vm12 = vmor %vm888_vm1, %vm889_vm9  ;;  %v906_v17 = vsel %vm905_vm0, %v3028_v26, %v902_v62  ;;  %vm908_vm3 = vcmp.eq.f32.partialorder %v907_v6, 8.507059e+37 }
 0x858   : > { %v885_v48 = vsub.f32 1.0, %v884_v43  ;;  %v1031_v7 = vmul.f32 %v1030_v61, %v2997_v4  ;;  %v911_v23 = vsel %vm908_vm3, %v910_v18, %v906_v17  ;;  %vm1141_vm9 = vweird.f32 %v3034_v40  ;;  %v2595_v17 = vld [vmem:[%s3509_s10] ss:$0 sm:$0xff] }
 0x859   : > { %v912_v26 = vmul.f32 %v911_v23, %v2993_v2  ;;  %v1145_v2 = vand.u32 2147483647, %v3034_v40  ;;  %v1132_v36 = vand.u32 2147483648, %v3032_v39  ;;  %vm1126_vm1 = vweird.f32 %v3032_v39 }
 0x85a   : > { %v886_v55 = vmul.f32 %v2653_v33, %v885_v48  ;;  %v1032_v22 = vpack.c.bf16 %v1031_v7, %v1016_v13  ;;  %vm1131_vm0 = vcmp.eq.f32.partialorder %v1130_v41, 8.507059e+37  ;;  %vm1203_vm3 = vcmask 195584  }
 0x85b   : > { %v1133_v45 = vor.u32 1.1754944e-38, %v1132_v36  ;;  %v2520_v36 = vld [vmem:[%s3512_s13 + $0x38] sm:$0xff] }
 0x85c   : > { %v3051_v56 = vpop.eup %2654  ;;  %v887_v57 = vadd.f32 %v2653_v33, %v886_v55  ;;  %1398 = vmatpush.bf16.msrb.mxu3 %v2520_v36  ;;  %v2522_v36 = vld [vmem:[%s3506_s7 + $0x18] sm:$0xff] }
 0x85d   : > { %v2657_v1 = vpop.eup %2656  ;;  %v1137_v19 = vmul.f32 %v3051_v56, %v3034_v40  ;;  %v1153_v27 = vpop.permute.xlu2 %1152  ;;  %vm1142_vm7 = vweird.f32 %v3051_v56 }
 0x85e   : > { %v891_v10 = vsel %vm3057_vm12, %v2653_v33, %v887_v57  ;;  %v1122_v15 = vmul.f32 %v2657_v1, %v3032_v39  ;;  %v1158_v16 = vsel %vm799_vm6, %v1153_v27, 0  ;;  %vm1127_vm8 = vweird.f32 %v2657_v1  ;;  %vm1143_vm10 = vmor %vm1141_vm9, %vm1142_vm7 }
 0x85f   : > { %v896_v21 = vsel %vm893_vm2, %v895_v11, %v891_v10  ;;  %v1138_v4 = vsub.f32 1.0, %v1137_v19  ;;  %vm1128_vm11 = vmor %vm1126_vm1, %vm1127_vm8  ;;  %vm1146_vm12 = vcmp.eq.f32.partialorder %v1145_v2, 8.507059e+37  ;;  %vm1200_vm2 = vcmask 130048   ;;  %v2511_v2 = vld [vmem:[%s3510_s11] sm:$0xff] }
 0x860   : > { %v1034_v12 = vpop.permute.xlu0 %1033  ;;  %v1123_v25 = vsub.f32 1.0, %v1122_v15  ;;  %v897_v58 = vmul.f32 %v896_v21, %v3005_v8  ;;  %v1147_v8 = vand.u32 2147483648, %v3034_v40 }
 0x861   : > { %v1039_v52 = vsel %vm799_vm6, %v1034_v12, 0  ;;  %v1139_v29 = vmul.f32 %v3051_v56, %v1138_v4 }
 0x862   : > { %1048 = vmatpush.bf16.msrb.mxu0 %v1039_v52  ;;  %v1124_v31 = vmul.f32 %v2657_v1, %v1123_v25  ;;  %v913_v33 = vpack.c.bf16 %v912_v26, %v897_v58  ;;  %v1148_v43 = vor.u32 1.1754944e-38, %v1147_v8 }
 0x863   : > { %v1140_v34 = vadd.f32 %v3051_v56, %v1139_v29 }
 0x864   : > { %v1125_v35 = vadd.f32 %v2657_v1, %v1124_v31 }
 0x865   : > { %2345 = vmatmul.msk.bf16.vlgmr.msrb.gmra.mxu0 %vm719_vm14, %v1032_v22  ;;  %v1144_v42 = vsel %vm1143_vm10, %v3051_v56, %v1140_v34  ;;  %v2512_v34 = vld [vmem:[%s3510_s11 + $0x8] sm:$0xff] }
 0x866   : > { %v915_v28 = vpop.permute.xlu1 %914  ;;  %v1129_v44 = vsel %vm1128_vm11, %v2657_v1, %v1125_v35  ;;  %v1149_v46 = vsel %vm1146_vm12, %v1148_v43, %v1144_v42  ;;  %1336 = vmatpush.bf16.msra.mxu0 %v2512_v34  ;;  %v2519_v43 = vld [vmem:[%s3512_s13 + $0x30] sm:$0xff] }
 0x867   : > { %v920_v30 = vsel %vm799_vm6, %v915_v28, 0  ;;  %v1134_v47 = vsel %vm1131_vm0, %v1133_v45, %v1129_v44  ;;  %v1150_v48 = vmul.f32 %v1149_v46, %v3015_v14  ;;  %1399 = vmatpush.bf16.msrb.mxu3 %v2519_v43  ;;  %v2521_v43 = vld [vmem:[%s3506_s7 + $0x10] sm:$0xff] }
 0x868   : > { %929 = vmatpush.bf16.msra.mxu1 %v920_v30  ;;  %v1135_v40 = vmul.f32 %v1134_v47, %v3007_v9  ;;  %v2510_v9 = vld [vmem:[%s3508_s9 + $0x8] sm:$0xff] }
 0x869   : > { %1231 = vmatpush.bf16.msrb.mxu2 %v2510_v9  ;;  %v2518_v47 = vld [vmem:[%s3512_s13 + $0x28] sm:$0xff] }
 0x86a   : > { %v1151_v49 = vpack.c.bf16 %v1150_v48, %v1135_v40  ;;  %1337 = vmatpush.bf16.msra.mxu0 %v2511_v2 }
 0x86b   : > { %2343 = vmatmul.msk.bf16.vlgmr.msra.gmra.mxu1 %vm719_vm14, %v913_v33  ;;  %1400 = vmatpush.bf16.msrb.mxu3 %v2518_v47 }
 0x86c   : > { %1167 = vmatpush.bf16.msrb.mxu1 %v1158_v16 }
 0x86d   : > { %1232 = vmatpush.bf16.msrb.mxu2 %v2509_v59 }
 0x870   : > { %1504 = vmatpush.bf16.msra.mxu1 %v2522_v36 }
 0x874   : > { %1505 = vmatpush.bf16.msra.mxu1 %v2521_v43  ;;  %v2414_v43 = vld [vmem:[%s3501_s2 + $0x1] sm:$0x1] }
 0x87b   : > { %2347 = vmatmul.msk.bf16.vlgmr.msrb.gmra.mxu1 %vm719_vm14, %v1151_v49  ;;  %v2517_v49 = vld [vmem:[%s3512_s13 + $0x20] sm:$0xff] }
 0x87c   : > { %1401 = vmatpush.bf16.msrb.mxu3 %v2517_v49 }
 0x8e2   : > { %v1050_v50 = vpop.f32.mrf.mxu0 }
 0x8e8   : > { %v931_v51 = vpop.f32.mrf.mxu1 }
 0x8ea   : > { %v1052_v39 = vpop.f32.mrf.mxu0 }
 0x8eb   : > { %v2566_v53 = vpack.i.bf16 %v1052_v39, %v1050_v50 }
 0x8ed   : > { %2567 = vrot.lane.b32.xlu1 %v2566_v53, %s3523_s22  ;;  %s3545_s22 = smov 40  }
 0x8f0   : > { %v933_v54 = vpop.f32.mrf.mxu1 }
 0x8f1   : > { %v2561_v55 = vpack.i.bf16 %v933_v54, %v931_v51 }
 0x8f3   : > { %2562 = vrot.lane.b32.xlu0 %v2561_v55, %s3524_s16  ;;  %s3553_s16 = smov 16  }
 0x8f8   : > { %v1169_v56 = vpop.f32.mrf.mxu1 }
 0x900   : > { %v1171_v57 = vpop.f32.mrf.mxu1 }
 0x901   : > { %v2571_v14 = vpack.i.bf16 %v1171_v57, %v1169_v56 }
 0x903   : > { %2572 = vrot.lane.b32.xlu2 %v2571_v14, %s3522_s30  ;;  %s3538_s30 = smov 72  }
 0x95d   : > { %v2573_v61 = vpop.permute.xlu2 %2572 }
 0x95e   : > { %v2575_v6 = vunpack.i.h.bf16 %v2573_v61  ;;  %v2574_v19 = vunpack.i.l.bf16 %v2573_v61 }
 0x95f   : > { %v2568_v60 = vpop.permute.xlu1 %2567 }
 0x960   : > { %v2570_v3 = vunpack.i.h.bf16 %v2568_v60  ;;  %v2569_v5 = vunpack.i.l.bf16 %v2568_v60  ;;  %v2718_v60 = vld [vmem:[%s3504_s5] ss:$0 sm:$0xff] }
 0x965   : > { %v2563_v62 = vpop.permute.xlu0 %2562 }
 0x966   : > { %v2565_v63 = vunpack.i.h.bf16 %v2563_v62  ;;  %v2564_v1 = vunpack.i.l.bf16 %v2563_v62 }
 0x968   : > { %v1199_v7 = vsel %vm698_vm13, %v2957_v38, %v2565_v63  ;;  %v1198_v10 = vsel %vm698_vm13, %v2955_v37, %v2564_v1  ;;  %v2719_v1 = vld [vmem:[%s3505_s6] ss:$0 sm:$0xff] }
 0x969   : > { %v1201_v11 = vsel %vm1200_vm2, %v1198_v10, %v2569_v5  ;;  %v1202_v12 = vsel %vm1200_vm2, %v1199_v7, %v2570_v3  ;;  %v2515_v7 = vld [vmem:[%s3512_s13 + $0x10] sm:$0xff]  ;;  %v2514_v10 = vld [vmem:[%s3512_s13 + $0x8] sm:$0xff] }
 0x96a   : > { %v1204_v13 = vsel %vm1203_vm3, %v1201_v11, %v2574_v19  ;;  %v1205_v15 = vsel %vm1203_vm3, %v1202_v12, %v2575_v6  ;;  %v2516_v19 = vld [vmem:[%s3512_s13 + $0x18] sm:$0xff]  ;;  %v2513_v11 = vld [vmem:[%s3512_s13] sm:$0xff] }
 0x96b   : > { %v1206_v52 = vpack.c.bf16 %v1205_v15, %v1204_v13  ;;  %1402 = vmatpush.bf16.msrb.mxu3 %v2516_v19  ;;  %v2596_v13 = vld [vmem:[%s3511_s12] ss:$0 sm:$0xff] }
 0x96d   : > { %2356 = vmatmul.msk.bf16.vlgmr.msrb.gmra.mxu2 %vm580_vm4, %v1206_v52 }
 0x96f   : > { %1403 = vmatpush.bf16.msrb.mxu3 %v2515_v7  ;;  %v2600_v7 = vld [vmem:[%s3507_s8 + $0x1] ss:$0 sm:$0xff] }
 0x973   : > { %1404 = vmatpush.bf16.msrb.mxu3 %v2514_v10 }
 0x977   : > { %1405 = vmatpush.bf16.msrb.mxu3 %v2513_v11 }
 0x9f0   : > { %v1234_v18 = vpop.f32.mrf.mxu2 }
 0x9f1   : > { %v1235_v38 = vadd.f32 %v2595_v17, %v1234_v18 }
 0x9f3   : > { %v3112_v21 = vadd.f32 %v1235_v38, %v2864_v20 }
 0x9f5   : > { %v1241_v37 = vsel %vm580_vm4, %v3112_v21, 0.0 }
 0x9f6   : > { %1242 = vadd.xlane.f32.xlu0 %v1241_v37 }
 0x9f8   : > { %v1236_v4 = vpop.f32.mrf.mxu2 }
 0x9f9   : > { %v1237_v22 = vadd.f32 %v2595_v17, %v1236_v4  ;;  %v2597_v4 = vld [vmem:[%s3513_s14] ss:$0 sm:$0xff] }
 0x9fb   : > { %v3117_v23 = vadd.f32 %v1237_v22, %v2871_v24 }
 0x9fd   : > { %v1244_v25 = vsel %vm3527_vm5, %v3117_v23, 0.0 }
 0x9fe   : > { %1245 = vadd.xlane.f32.xlu1 %v1244_v25 }
 0xa69   : > { %v1243_v27 = vpop.xlane.xlu0 %1242 }
 0xa6a   : > { %v1247_v58 = vmul.f32 %v1243_v27, %v2875_v32 }
 0xa6c   : > { %v1249_v28 = vsub.f32 %v3112_v21, %v1247_v58 }
 0xa6e   : > { %v1251_v20 = vmul.f32 %v1249_v28, %v1249_v28 }
 0xa70   : > { %v1253_v29 = vsel %vm580_vm4, %v1251_v20, 0.0 }
 0xa71   : > { %v1246_v30 = vpop.xlane.xlu1 %1245  ;;  %1254 = vadd.xlane.f32.xlu2 %v1253_v29 }
 0xa72   : > { %v1248_v26 = vmul.f32 %v1246_v30, %v2875_v32 }
 0xa74   : > { %v1250_v16 = vsub.f32 %v3117_v23, %v1248_v26 }
 0xa76   : > { %v1252_v24 = vmul.f32 %v1250_v16, %v1250_v16 }
 0xa78   : > { %v1256_v31 = vsel %vm3527_vm5, %v1252_v24, 0.0 }
 0xa79   : > { %1257 = vadd.xlane.f32.xlu0 %v1256_v31 }
 0xae4   : > { %v1255_v33 = vpop.xlane.xlu2 %1254 }
 0xae5   : > { %v1259_v8 = vmul.f32 %v1255_v33, %v2875_v32 }
 0xae7   : > { %v1261_v35 = vadd.f32 1e-05, %v1259_v8 }
 0xae9   : > { %2658 = vrsqrt.f32 %v1261_v35  ;;  %vm1269_vm8 = vweird.f32 %v1261_v35 }
 0xaec   : > { %v1258_v41 = vpop.xlane.xlu0 %1257 }
 0xaed   : > { %v1260_v42 = vmul.f32 %v1258_v41, %v2875_v32 }
 0xaef   : > { %v2659_v44 = vpop.eup %2658  ;;  %v1262_v45 = vadd.f32 1e-05, %v1260_v42 }
 0xaf0   : > { %v1264_v46 = vmul.f32 %v2659_v44, %v1261_v35  ;;  %vm1270_vm7 = vweird.f32 %v2659_v44 }
 0xaf1   : > { %2660 = vrsqrt.f32 %v1262_v45  ;;  %vm1271_vm9 = vmor %vm1269_vm8, %vm1270_vm7  ;;  %vm1279_vm1 = vweird.f32 %v1262_v45 }
 0xaf2   : > { %v1265_v48 = vmul.f32 %v2659_v44, %v1264_v46 }
 0xaf4   : > { %v1266_v40 = vmul.f32 0.5, %v1265_v48 }
 0xaf6   : > { %v1267_v50 = vsub.f32 1.5, %v1266_v40 }
 0xaf7   : > { %v2661_v51 = vpop.eup %2660 }
 0xaf8   : > { %v1268_v39 = vmul.f32 %v2659_v44, %v1267_v50  ;;  %v1274_v53 = vmul.f32 %v2661_v51, %v1262_v45  ;;  %vm1280_vm10 = vweird.f32 %v2661_v51 }
 0xaf9   : > { %vm1281_vm11 = vmor %vm1279_vm1, %vm1280_vm10  ;;  %vm1521_vm1 = vcmp.gt.f32.partialorder %v2414_v43, 0.0 }
 0xafa   : > { %v1275_v54 = vmul.f32 %v2661_v51, %v1274_v53  ;;  %v1272_v55 = vsel %vm1271_vm9, %v2659_v44, %v1268_v39 }
 0xafb   : > { %v1283_v14 = vmul.f32 %v1272_v55, %v1249_v28 }
 0xafc   : > { %v1276_v56 = vmul.f32 0.5, %v1275_v54 }
 0xafd   : > { %v1285_v61 = vmul.f32 %v2718_v60, %v1283_v14  ;;  %v3199_v14 = vld [vmem:[%s3504_s5 + $0x1] ss:$0 sm:$0xff] }
 0xafe   : > { %v1277_v57 = vsub.f32 1.5, %v1276_v56 }
 0xaff   : > { %v1287_v3 = vadd.f32 %v2719_v1, %v1285_v61  ;;  %v3204_v61 = vld [vmem:[%s3505_s6 + $0x1] ss:$0 sm:$0xff] }
 0xb00   : > { %v1278_v9 = vmul.f32 %v2661_v51, %v1277_v57 }
 0xb02   : > { %v1282_v59 = vsel %vm1281_vm11, %v2661_v51, %v1278_v9 }
 0xb03   : > { %v1284_v62 = vmul.f32 %v1282_v59, %v1250_v16 }
 0xb05   : > { %v1286_v63 = vmul.f32 %v2718_v60, %v1284_v62 }
 0xb07   : > { %v1288_v5 = vadd.f32 %v2719_v1, %v1286_v63 }
 0xb09   : > { %v1311_v6 = vpack.c.bf16 %v1288_v5, %v1287_v3 }
 0xb0b   : > { %2365 = vmatmul.msk.bf16.vlgmr.msra.gmra.mxu0 %vm580_vm4, %v1311_v6 }
 0xb88   : > { %v1339_v12 = vpop.f32.mrf.mxu0 }
 0xb89   : > { %v1340_v15 = vadd.f32 %v2596_v13, %v1339_v12 }
 0xb8b   : > { %v1344_v18 = vmax.f32 %v1340_v15, 0.0 }
 0xb90   : > { %v1341_v52 = vpop.f32.mrf.mxu0 }
 0xb91   : > { %v1342_v17 = vadd.f32 %v2596_v13, %v1341_v52 }
 0xb93   : > { %v1345_v38 = vmax.f32 %v1342_v17, 0.0 }
 0xb95   : > { %v1346_v37 = vpack.c.bf16 %v1345_v38, %v1344_v18  ;;  %v3222_v18 = vld [vmem:[%s2845_s25] ss:$0 sm:$0xff]  ;;  %s3536_s25 = smov 88  }
 0xb97   : > { %1406 = vmatmul.bf16.vlgmr.msrb.gmra.mxu3 %v1346_v37 }
 0xc1a   : > { %v1407_v22 = vpop.f32.mrf.mxu3 }
 0xc1b   : > { %v1408_v25 = vadd.f32 %v2597_v4, %v1407_v22 }
 0xc1d   : > { %v3173_v27 = vadd.f32 %v1408_v25, %v3112_v21 }
 0xc1f   : > { %v1418_v58 = vsel %vm580_vm4, %v3173_v27, 0.0 }
 0xc20   : > { %1419 = vadd.xlane.f32.xlu1 %v1418_v58 }
 0xc22   : > { %v1409_v28 = vpop.f32.mrf.mxu3 }
 0xc23   : > { %v1410_v20 = vadd.f32 %v2597_v4, %v1409_v28 }
 0xc25   : > { %v3178_v29 = vadd.f32 %v1410_v20, %v3117_v23 }
 0xc27   : > { %v1421_v30 = vsel %vm3527_vm5, %v3178_v29, 0.0 }
 0xc28   : > { %1422 = vadd.xlane.f32.xlu2 %v1421_v30 }
 0xc93   : > { %v1420_v26 = vpop.xlane.xlu1 %1419 }
 0xc94   : > { %v1424_v16 = vmul.f32 %v1420_v26, %v2875_v32 }
 0xc96   : > { %v1426_v24 = vsub.f32 %v3173_v27, %v1424_v16 }
 0xc98   : > { %v1428_v21 = vmul.f32 %v1426_v24, %v1426_v24 }
 0xc9a   : > { %v1430_v31 = vsel %vm580_vm4, %v1428_v21, 0.0 }
 0xc9b   : > { %v1423_v33 = vpop.xlane.xlu2 %1422  ;;  %1431 = vadd.xlane.f32.xlu0 %v1430_v31 }
 0xc9c   : > { %v1425_v34 = vmul.f32 %v1423_v33, %v2875_v32 }
 0xc9e   : > { %v1427_v8 = vsub.f32 %v3178_v29, %v1425_v34 }
 0xca0   : > { %v1429_v23 = vmul.f32 %v1427_v8, %v1427_v8 }
 0xca2   : > { %v1433_v35 = vsel %vm3527_vm5, %v1429_v23, 0.0 }
 0xca3   : > { %1434 = vadd.xlane.f32.xlu1 %v1433_v35 }
 0xd0e   : > { %v1432_v2 = vpop.xlane.xlu0 %1431 }
 0xd0f   : > { %v1436_v41 = vmul.f32 %v1432_v2, %v2875_v32 }
 0xd11   : > { %v1438_v42 = vadd.f32 1e-05, %v1436_v41 }
 0xd13   : > { %2662 = vrsqrt.f32 %v1438_v42  ;;  %vm1446_vm0 = vweird.f32 %v1438_v42 }
 0xd16   : > { %v1435_v44 = vpop.xlane.xlu1 %1434 }
 0xd17   : > { %v1437_v45 = vmul.f32 %v1435_v44, %v2875_v32  ;;  %v1522_v44 = vsel %vm1521_vm1, 1, %v2729_v0 }
 0xd19   : > { %v2663_v46 = vpop.eup %2662  ;;  %v1439_v47 = vadd.f32 1e-05, %v1437_v45  ;;  %v1523_v45 = vperm.slane %v1522_v44, 0 }
 0xd1a   : > { %v1441_v48 = vmul.f32 %v2663_v46, %v1438_v42  ;;  %vm1447_vm12 = vweird.f32 %v2663_v46 }
 0xd1b   : > { %2664 = vrsqrt.f32 %v1439_v47  ;;  %vm1448_vm7 = vmor %vm1446_vm0, %vm1447_vm12  ;;  %vm1456_vm9 = vweird.f32 %v1439_v47  ;;  %vm3246_vm11 = vcmp.eq.s32.totalorder %v1523_v45, 1 }
 0xd1c   : > { %v1442_v40 = vmul.f32 %v2663_v46, %v1441_v48 }
 0xd1e   : > { %v1443_v49 = vmul.f32 0.5, %v1442_v40 }
 0xd20   : > { %v1444_v50 = vsub.f32 1.5, %v1443_v49 }
 0xd21   : > { %v2665_v51 = vpop.eup %2664 }
 0xd22   : > { %v1445_v39 = vmul.f32 %v2663_v46, %v1444_v50  ;;  %v1451_v53 = vmul.f32 %v2665_v51, %v1439_v47  ;;  %vm1457_vm8 = vweird.f32 %v2665_v51 }
 0xd23   : > { %vm1458_vm10 = vmor %vm1456_vm9, %vm1457_vm8 }
 0xd24   : > { %v1452_v54 = vmul.f32 %v2665_v51, %v1451_v53  ;;  %v1449_v55 = vsel %vm1448_vm7, %v2663_v46, %v1445_v39 }
 0xd25   : > { %v1460_v9 = vmul.f32 %v1449_v55, %v1426_v24 }
 0xd26   : > { %v1453_v56 = vmul.f32 0.5, %v1452_v54 }
 0xd27   : > { %v1465_v62 = vmul.f32 %v3199_v14, %v1460_v9 }
 0xd28   : > { %v1454_v57 = vsub.f32 1.5, %v1453_v56 }
 0xd29   : > { %v1470_v3 = vadd.f32 %v3204_v61, %v1465_v62 }
 0xd2a   : > { %v1455_v59 = vmul.f32 %v2665_v51, %v1454_v57 }
 0xd2c   : > { %v1459_v60 = vsel %vm1458_vm10, %v2665_v51, %v1455_v59 }
 0xd2d   : > { %v1461_v63 = vmul.f32 %v1459_v60, %v1427_v8 }
 0xd2f   : > { %v1466_v1 = vmul.f32 %v3199_v14, %v1461_v63 }
 0xd31   : > { %v1471_v5 = vadd.f32 %v3204_v61, %v1466_v1 }
 0xd33   : > { %v1472_v6 = vpack.c.bf16 %v1471_v5, %v1470_v3 }
 0xd35   : > { %2413 = vmatmul.msk.bf16.vlgmr.msra.gmra.mxu1 %vm580_vm4, %v1472_v6 }
 0xdb2   : > { %v1507_v19 = vpop.f32.mrf.mxu1 }
 0xdb3   : > { %v1508_v11 = vadd.f32 %v2600_v7, %v1507_v19 }
 0xdba   : > { %v1509_v10 = vpop.f32.mrf.mxu1 }
 0xdbb   : > { %v1510_v12 = vadd.f32 %v2600_v7, %v1509_v10 }
 0xdbd   : > { %v3214_v13 = vpack.c.bf16 %v1510_v12, %v1508_v11 }
 0xdbf   : > { %1527 = vrot.lane.b32.xlu2 %v3214_v13, %s2732_s27  ;;  %s3537_s27 = smov 120  }
 0xe19   : > { %v1528_v15 = vpop.permute.xlu2 %1527 }
 0xe1a   : > { %v1533_v52 = vsel %vm698_vm13, %v1528_v15, 0 }
 0xe1b   : > { %1542 = vmatpush.bf16.xpose.msra.mxu2 %v1533_v52 }
 0xe22   : > { %2420 = vmatmul.msk.bf16.vlgmr.msra.gmra.mxu2 %vm698_vm13, %v3214_v13 }
 0xea5   : > { %v1544_v17 = vpop.f32.mrf.mxu2 }
 0xea6   : > { %v1545_v38 = vadd.f32 %v3222_v18, %v1544_v17 }
 0xea8   : > { %v1549_v37 = vsel %vm719_vm14, %v1545_v38, -inf }
 0xea9   : > { %1550 = vmax.xlane.f32.xlu0 %v1549_v37 }
 0xead   : > { %v1546_v4 = vpop.f32.mrf.mxu2 }
 0xeae   : > { %v1547_v22 = vadd.f32 %v3222_v18, %v1546_v4 }
 0xeb0   : > { %v1552_v25 = vsel %vm723_vm15, %v1547_v22, -inf }
 0xeb1   : > { %1553 = vmax.xlane.f32.xlu1 %v1552_v25 }
 0xf1c   : > { %v1551_v58 = vpop.xlane.xlu0 %1550 }
 0xf1d   : > { %v1555_v28 = vsub.f32 %v1545_v38, %v1551_v58 }
 0xf1f   : > { %v1557_v20 = vmul.f32 1.442695, %v1555_v28 }
 0xf21   : > { %2666 = vpow2.f32 %v1557_v20 }
 0xf24   : > { %v1554_v30 = vpop.xlane.xlu1 %1553 }
 0xf25   : > { %v1556_v26 = vsub.f32 %v1547_v22, %v1554_v30 }
 0xf27   : > { %v2667_v16 = vpop.eup %2666  ;;  %v1559_v24 = vmul.f32 1.442695, %v1556_v26 }
 0xf28   : > { %v1561_v21 = vsel %vm719_vm14, %v2667_v16, 0.0 }
 0xf29   : > { %2668 = vpow2.f32 %v1559_v24  ;;  %1562 = vadd.xlane.f32.xlu0 %v1561_v21 }
 0xf2f   : > { %v2669_v31 = vpop.eup %2668 }
 0xf30   : > { %v1564_v33 = vsel %vm723_vm15, %v2669_v31, 0.0 }
 0xf31   : > { %1565 = vadd.xlane.f32.xlu1 %v1564_v33 }
 0xf9c   : > { %v1563_v34 = vpop.xlane.xlu0 %1562 }
 0xf9d   : > { %2670 = vrcp.f32 %v1563_v34 }
 0xfa3   : > { %v2671_v8 = vpop.eup %2670 }
 0xfa4   : > { %v1569_v23 = vmul.f32 %v2671_v8, %v2667_v16  ;;  %v1566_v35 = vpop.xlane.xlu1 %1565 }
 0xfa5   : > { %2672 = vrcp.f32 %v1566_v35 }
 0xfa6   : > { %v1571_v2 = vsel %vm719_vm14, %v1569_v23, -inf  ;;  %v1581_v48 = vmul.f32 1.2, %v1569_v23 }
 0xfa7   : > { %1572 = vmax.xlane.f32.xlu0 %v1571_v2 }
 0xfab   : > { %v2673_v36 = vpop.eup %2672 }
 0xfac   : > { %v1570_v41 = vmul.f32 %v2673_v36, %v2669_v31 }
 0xfae   : > { %v1574_v42 = vsel %vm723_vm15, %v1570_v41, -inf  ;;  %v1582_v51 = vmul.f32 1.2, %v1570_v41 }
 0xfaf   : > { %1575 = vmax.xlane.f32.xlu1 %v1574_v42 }
 0xfbb   : > { %1622 = vrot.lane.b32.xlu0 %v3214_v13, %s2734_s29  ;;  %s3542_s29 = smov 112  }
 0xfc3   : > { %1765 = vrot.lane.b32.xlu0 %v3214_v13, %s2733_s28  ;;  %s3541_s28 = smov 104  }
 0xfc8   : > { %1646 = vrot.lane.b32.xlu1 %v3214_v13, %s3536_s25 }
 0xfd0   : > { %1644 = vrot.lane.b32.xlu1 %v3214_v13, %s3537_s27 }
 0xfd8   : > { %1884 = vrot.lane.b32.xlu1 %v3214_v13, %s3538_s30 }
0x101a   : > { %v1573_v47 = vpop.xlane.xlu0 %1572 }
0x101b   : > { %vm1577_vm12 = vcmp.ge.f32.partialorder %v1569_v23, %v1573_v47 }
0x101c   : > { %vm1579_vm0 = vmor %vm1577_vm12, %vm3246_vm11 }
0x101d   : > { %v1583_v40 = vsel %vm1579_vm0, %v1581_v48, %v1569_v23 }
0x101e   : > { %v1585_v49 = vsel %vm719_vm14, %v1583_v40, 0.0 }
0x101f   : > { %1586 = vadd.xlane.f32.xlu2 %v1585_v49 }
0x1022   : > { %v1576_v50 = vpop.xlane.xlu1 %1575 }
0x1023   : > { %vm1578_vm7 = vcmp.ge.f32.partialorder %v1570_v41, %v1576_v50 }
0x1024   : > { %vm1580_vm8 = vmor %vm1578_vm7, %vm3246_vm11 }
0x1025   : > { %v1584_v0 = vsel %vm1580_vm8, %v1582_v51, %v1570_v41 }
0x1026   : > { %v1588_v39 = vsel %vm723_vm15, %v1584_v0, 0.0 }
0x1027   : > { %1589 = vadd.xlane.f32.xlu0 %v1588_v39 }
0x102d   : > { %v1623_v53 = vpop.permute.xlu0 %1622 }
0x102e   : > { %v1628_v54 = vsel %vm799_vm6, %v1623_v53, 0 }
0x102f   : > { %1637 = vmatpush.bf16.msrb.mxu0 %v1628_v54 }
0x1035   : > { %v1766_v55 = vpop.permute.xlu0 %1765 }
0x1036   : > { %v1771_v56 = vsel %vm698_vm13, %v1766_v55, 0 }
0x1037   : > { %1882 = vrot.lane.b32.xlu2 %v3214_v13, %s3541_s28  ;;  %1780 = vmatpush.bf16.xpose.msra.mxu0 %v1771_v56 }
0x103a   : > { %v1647_v57 = vpop.permute.xlu1 %1646 }
0x103b   : > { %v1652_v9 = vsel %vm698_vm13, %v1647_v57, 0  ;;  %1763 = vrot.lane.b32.xlu0 %v3214_v13, %s3542_s29 }
0x103c   : > { %1661 = vmatpush.bf16.xpose.msrb.mxu1 %v1652_v9 }
0x1042   : > { %v1645_v59 = vpop.permute.xlu1 %1644 }
0x1043   : > { %2422 = vmatmul.msk.bf16.vlgmr.msrb.gmra.mxu1 %vm698_vm13, %v1645_v59 }
0x104a   : > { %v1885_v60 = vpop.permute.xlu1 %1884 }
0x104b   : > { %v1890_v62 = vsel %vm698_vm13, %v1885_v60, 0 }
0x104c   : > { %1899 = vmatpush.bf16.xpose.msra.mxu1 %v1890_v62 }
0x1092   : > { %v1587_v63 = vpop.xlane.xlu2 %1586 }
0x1093   : > { %2674 = vrcp.f32 %v1587_v63  ;;  %v1602_v15 = vand.u32 2147483648, %v1587_v63  ;;  %vm1596_vm10 = vweird.f32 %v1587_v63  ;;  %v1600_v52 = vand.u32 2147483647, %v1587_v63 }
0x1095   : > { %v1603_v25 = vor.u32 1.1754944e-38, %v1602_v15  ;;  %vm1601_vm0 = vcmp.eq.f32.partialorder %v1600_v52, 8.507059e+37 }
0x1099   : > { %v2675_v1 = vpop.eup %2674 }
0x109a   : > { %v1592_v3 = vmul.f32 %v2675_v1, %v1587_v63  ;;  %v1883_v5 = vpop.permute.xlu2 %1882  ;;  %v1590_v6 = vpop.xlane.xlu0 %1589  ;;  %vm1597_vm9 = vweird.f32 %v2675_v1 }
0x109b   : > { %2676 = vrcp.f32 %v1590_v6  ;;  %2426 = vmatmul.msk.bf16.vlgmr.msra.gmra.mxu1 %vm698_vm13, %v1883_v5  ;;  %vm1598_vm1 = vmor %vm1596_vm10, %vm1597_vm9  ;;  %v1617_v38 = vand.u32 2147483648, %v1590_v6  ;;  %v1615_v22 = vand.u32 2147483647, %v1590_v6  ;;  %vm1611_vm7 = vweird.f32 %v1590_v6 }
0x109c   : > { %v1593_v19 = vsub.f32 1.0, %v1592_v3 }
0x109d   : > { %v1618_v20 = vor.u32 1.1754944e-38, %v1617_v38  ;;  %vm1616_vm5 = vcmp.eq.f32.partialorder %v1615_v22, 8.507059e+37 }
0x109e   : > { %v1594_v7 = vmul.f32 %v2675_v1, %v1593_v19 }
0x10a0   : > { %v1595_v11 = vadd.f32 %v2675_v1, %v1594_v7 }
0x10a1   : > { %v2677_v10 = vpop.eup %2676 }
0x10a2   : > { %v1607_v12 = vmul.f32 %v2677_v10, %v1590_v6  ;;  %v1599_v37 = vsel %vm1598_vm1, %v2675_v1, %v1595_v11  ;;  %vm1612_vm12 = vweird.f32 %v2677_v10 }
0x10a3   : > { %v1604_v28 = vsel %vm1601_vm0, %v1603_v25, %v1599_v37  ;;  %vm1613_vm8 = vmor %vm1611_vm7, %vm1612_vm12 }
0x10a4   : > { %v1608_v17 = vsub.f32 1.0, %v1607_v12  ;;  %v1605_v16 = vmul.f32 %v1604_v28, %v1583_v40 }
0x10a6   : > { %v1609_v4 = vmul.f32 %v2677_v10, %v1608_v17 }
0x10a8   : > { %v1610_v58 = vadd.f32 %v2677_v10, %v1609_v4 }
0x10aa   : > { %v1614_v30 = vsel %vm1613_vm8, %v2677_v10, %v1610_v58 }
0x10ab   : > { %v1619_v26 = vsel %vm1616_vm5, %v1618_v20, %v1614_v30 }
0x10ac   : > { %v1620_v24 = vmul.f32 %v1619_v26, %v1584_v0 }
0x10ad   : > { %v1764_v31 = vpop.permute.xlu0 %1763 }
0x10ae   : > { %v1621_v21 = vpack.c.bf16 %v1620_v24, %v1605_v16 }
0x10b0   : > { %2421 = vmatmul.msk.bf16.vlgmr.msrb.gmra.mxu0 %vm719_vm14, %v1621_v21 }
0x10c0   : > { %v1663_v33 = vpop.f32.mrf.mxu1  ;;  %2424 = vmatmul.msk.bf16.vlgmr.msra.gmra.mxu0 %vm698_vm13, %v1764_v31 }
0x10c1   : > { %v1664_v34 = vadd.f32 %v3222_v18, %v1663_v33 }
0x10c3   : > { %v1668_v8 = vsel %vm719_vm14, %v1664_v34, -inf }
0x10c4   : > { %1669 = vmax.xlane.f32.xlu1 %v1668_v8 }
0x10c8   : > { %v1665_v23 = vpop.f32.mrf.mxu1 }
0x10c9   : > { %v1666_v35 = vadd.f32 %v3222_v18, %v1665_v23 }
0x10cb   : > { %v1671_v2 = vsel %vm723_vm15, %v1666_v35, -inf }
0x10cc   : > { %1672 = vmax.xlane.f32.xlu0 %v1671_v2 }
0x1118   : > { %v1901_v36 = vpop.f32.mrf.mxu1 }
0x1119   : > { %v1902_v41 = vadd.f32 %v3222_v18, %v1901_v36 }
0x111b   : > { %v1906_v42 = vsel %vm719_vm14, %v1902_v41, -inf }
0x111c   : > { %1907 = vmax.xlane.f32.xlu0 %v1906_v42 }
0x1120   : > { %v1903_v57 = vpop.f32.mrf.mxu1 }
0x1121   : > { %v1904_v59 = vadd.f32 %v3222_v18, %v1903_v57 }
0x1123   : > { %v1909_v60 = vsel %vm723_vm15, %v1904_v59, -inf }
0x112d   : > { %v3274_v43 = vpop.f32.mrf.mxu0 }
0x1135   : > { %v3276_v44 = vpop.f32.mrf.mxu0 }
0x1137   : > { %v1670_v45 = vpop.xlane.xlu1 %1669 }
0x1138   : > { %v1674_v47 = vsub.f32 %v1664_v34, %v1670_v45 }
0x113a   : > { %v1676_v48 = vmul.f32 1.442695, %v1674_v47 }
0x113c   : > { %2678 = vpow2.f32 %v1676_v48 }
0x113d   : > { %v1782_v40 = vpop.f32.mrf.mxu0 }
0x113e   : > { %v1783_v49 = vadd.f32 %v3222_v18, %v1782_v40 }
0x113f   : > { %v1673_v39 = vpop.xlane.xlu0 %1672 }
0x1140   : > { %v1787_v50 = vsel %vm719_vm14, %v1783_v49, -inf  ;;  %v1675_v55 = vsub.f32 %v1666_v35, %v1673_v39 }
0x1141   : > { %1788 = vmax.xlane.f32.xlu2 %v1787_v50 }
0x1142   : > { %v2679_v51 = vpop.eup %2678  ;;  %v1678_v9 = vmul.f32 1.442695, %v1675_v55 }
0x1143   : > { %v1680_v0 = vsel %vm719_vm14, %v2679_v51, 0.0 }
0x1144   : > { %1681 = vadd.xlane.f32.xlu0 %v1680_v0  ;;  %2680 = vpow2.f32 %v1678_v9 }
0x1145   : > { %v1784_v53 = vpop.f32.mrf.mxu0 }
0x1146   : > { %v1785_v54 = vadd.f32 %v3222_v18, %v1784_v53 }
0x1148   : > { %v1790_v56 = vsel %vm723_vm15, %v1785_v54, -inf }
0x1149   : > { %1791 = vmax.xlane.f32.xlu1 %v1790_v56 }
0x114a   : > { %v2681_v62 = vpop.eup %2680 }
0x114b   : > { %v1683_v63 = vsel %vm723_vm15, %v2681_v62, 0.0 }
0x1151   : > { %1910 = vmax.xlane.f32.xlu1 %v1909_v60 }
0x1159   : > { %1684 = vadd.xlane.f32.xlu1 %v1683_v63 }
0x118f   : > { %v1908_v1 = vpop.xlane.xlu0 %1907 }
0x1190   : > { %v1912_v3 = vsub.f32 %v1902_v41, %v1908_v1 }
0x1192   : > { %v1914_v5 = vmul.f32 1.442695, %v1912_v3 }
0x1194   : > { %2682 = vpow2.f32 %v1914_v5 }
0x119a   : > { %v2683_v6 = vpop.eup %2682 }
0x119b   : > { %v1918_v19 = vsel %vm719_vm14, %v2683_v6, 0.0 }
0x119c   : > { %1919 = vadd.xlane.f32.xlu1 %v1918_v19 }
0x11b4   : > { %v1789_v7 = vpop.xlane.xlu2 %1788 }
0x11b5   : > { %v1793_v10 = vsub.f32 %v1783_v49, %v1789_v7 }
0x11b7   : > { %v1795_v11 = vmul.f32 1.442695, %v1793_v10  ;;  %v1682_v17 = vpop.xlane.xlu0 %1681 }
0x11b9   : > { %2684 = vpow2.f32 %v1795_v11 }
0x11bc   : > { %v1792_v18 = vpop.xlane.xlu1 %1791 }
0x11bd   : > { %v1794_v12 = vsub.f32 %v1785_v54, %v1792_v18 }
0x11bf   : > { %v2685_v15 = vpop.eup %2684  ;;  %v1797_v52 = vmul.f32 1.442695, %v1794_v12 }
0x11c0   : > { %v1799_v38 = vsel %vm719_vm14, %v2685_v15, 0.0 }
0x11c1   : > { %2686 = vpow2.f32 %v1797_v52  ;;  %1800 = vadd.xlane.f32.xlu0 %v1799_v38 }
0x11c2   : > { %2688 = vrcp.f32 %v1682_v17 }
0x11c4   : > { %v1911_v37 = vpop.xlane.xlu1 %1910 }
0x11c5   : > { %v1913_v4 = vsub.f32 %v1904_v59, %v1911_v37 }
0x11c7   : > { %v2687_v22 = vpop.eup %2686  ;;  %v1916_v25 = vmul.f32 1.442695, %v1913_v4 }
0x11c8   : > { %v1802_v58 = vsel %vm723_vm15, %v2687_v22, 0.0  ;;  %v2689_v28 = vpop.eup %2688 }
0x11c9   : > { %2690 = vpow2.f32 %v1916_v25  ;;  %1803 = vadd.xlane.f32.xlu2 %v1802_v58  ;;  %v1688_v20 = vmul.f32 %v2689_v28, %v2679_v51 }
0x11cb   : > { %v1690_v24 = vsel %vm719_vm14, %v1688_v20, -inf  ;;  %v1700_v40 = vmul.f32 1.2, %v1688_v20 }
0x11cc   : > { %v1685_v30 = vpop.xlane.xlu1 %1684 }
0x11cd   : > { %2692 = vrcp.f32 %v1685_v30 }
0x11cf   : > { %v2691_v26 = vpop.eup %2690 }
0x11d0   : > { %v1921_v16 = vsel %vm723_vm15, %v2691_v26, 0.0 }
0x11d1   : > { %1922 = vadd.xlane.f32.xlu0 %v1921_v16  ;;  %1691 = vmax.xlane.f32.xlu2 %v1690_v24 }
0x11d3   : > { %v2693_v21 = vpop.eup %2692 }
0x11d4   : > { %v1689_v31 = vmul.f32 %v2693_v21, %v2681_v62 }
0x11d6   : > { %v1693_v33 = vsel %vm723_vm15, %v1689_v31, -inf  ;;  %v1701_v53 = vmul.f32 1.2, %v1689_v31 }
0x11d7   : > { %1694 = vmax.xlane.f32.xlu1 %v1693_v33 }
0x120f   : > { %v1920_v34 = vpop.xlane.xlu1 %1919 }
0x1210   : > { %2694 = vrcp.f32 %v1920_v34 }
0x1216   : > { %v2695_v8 = vpop.eup %2694 }
0x1217   : > { %v1926_v23 = vmul.f32 %v2695_v8, %v2683_v6 }
0x1219   : > { %v1928_v35 = vsel %vm719_vm14, %v1926_v23, -inf  ;;  %v1938_v62 = vmul.f32 1.2, %v1926_v23 }
0x121a   : > { %1929 = vmax.xlane.f32.xlu1 %v1928_v35 }
0x1234   : > { %v1801_v2 = vpop.xlane.xlu0 %1800 }
0x1235   : > { %2696 = vrcp.f32 %v1801_v2 }
0x123b   : > { %v2697_v36 = vpop.eup %2696 }
0x123c   : > { %v1807_v41 = vmul.f32 %v2697_v36, %v2685_v15  ;;  %v1804_v42 = vpop.xlane.xlu2 %1803 }
0x123d   : > { %2698 = vrcp.f32 %v1804_v42 }
0x123e   : > { %v1809_v45 = vsel %vm719_vm14, %v1807_v41, -inf  ;;  %v1819_v52 = vmul.f32 1.2, %v1807_v41 }
0x123f   : > { %1810 = vmax.xlane.f32.xlu0 %v1809_v45 }
0x1243   : > { %v2699_v51 = vpop.eup %2698 }
0x1244   : > { %v1692_v47 = vpop.xlane.xlu2 %1691  ;;  %v1923_v48 = vpop.xlane.xlu0 %1922  ;;  %v1808_v54 = vmul.f32 %v2699_v51, %v2687_v22 }
0x1245   : > { %vm1696_vm5 = vcmp.ge.f32.partialorder %v1688_v20, %v1692_v47  ;;  %2700 = vrcp.f32 %v1923_v48 }
0x1246   : > { %vm1698_vm9 = vmor %vm1696_vm5, %vm3246_vm11  ;;  %v1812_v59 = vsel %vm723_vm15, %v1808_v54, -inf  ;;  %v1820_v10 = vmul.f32 1.2, %v1808_v54 }
0x1247   : > { %v3296_v49 = vsel %vm1698_vm9, %v1700_v40, %v1688_v20 }
0x1248   : > { %v1704_v50 = vsel %vm719_vm14, %v3296_v49, 0.0 }
0x1249   : > { %1705 = vadd.xlane.f32.xlu2 %v1704_v50 }
0x124a   : > { %v1695_v0 = vpop.xlane.xlu1 %1694 }
0x124b   : > { %v2701_v39 = vpop.eup %2700  ;;  %vm1697_vm10 = vcmp.ge.f32.partialorder %v1689_v31, %v1695_v0 }
0x124c   : > { %v1927_v55 = vmul.f32 %v2701_v39, %v2691_v26  ;;  %vm1699_vm1 = vmor %vm1697_vm10, %vm3246_vm11 }
0x124d   : > { %v3302_v56 = vsel %vm1699_vm1, %v1701_v53, %v1689_v31 }
0x124e   : > { %v1707_v57 = vsel %vm723_vm15, %v3302_v56, 0.0  ;;  %v1931_v9 = vsel %vm723_vm15, %v1927_v55, -inf  ;;  %v1939_v7 = vmul.f32 1.2, %v1927_v55 }
0x124f   : > { %1708 = vadd.xlane.f32.xlu1 %v1707_v57  ;;  %1932 = vmax.xlane.f32.xlu0 %v1931_v9 }
0x1251   : > { %1813 = vmax.xlane.f32.xlu2 %v1812_v59 }
0x128d   : > { %v1930_v60 = vpop.xlane.xlu1 %1929 }
0x128e   : > { %vm1934_vm12 = vcmp.ge.f32.partialorder %v1926_v23, %v1930_v60 }
0x128f   : > { %vm1936_vm0 = vmor %vm1934_vm12, %vm3246_vm11 }
0x1290   : > { %v3310_v63 = vsel %vm1936_vm0, %v1938_v62, %v1926_v23 }
0x1291   : > { %v1942_v1 = vsel %vm719_vm14, %v3310_v63, 0.0 }
0x1292   : > { %1943 = vadd.xlane.f32.xlu1 %v1942_v1 }
0x12ab   : > { %1860 = vrot.lane.b32.xlu1 %v3214_v13, %s3543_s20  ;;  %s508_s20 = scalar_lea.vmem %s3514_s15, %s3557_s26 }
0x12b2   : > { %v1811_v3 = vpop.xlane.xlu0 %1810 }
0x12b3   : > { %vm1815_vm9 = vcmp.ge.f32.partialorder %v1807_v41, %v1811_v3 }
0x12b4   : > { %vm1817_vm1 = vmor %vm1815_vm9, %vm3246_vm11 }
0x12b5   : > { %v3332_v17 = vsel %vm1817_vm1, %v1819_v52, %v1807_v41 }
0x12b6   : > { %v1823_v38 = vsel %vm719_vm14, %v3332_v17, 0.0 }
0x12bc   : > { %v3316_v5 = vpop.xlane.xlu2 %1705 }
0x12bd   : > { %v1721_v8 = vand.u32 2147483648, %v3316_v5  ;;  %v1719_v2 = vand.u32 2147483647, %v3316_v5 }
0x12bf   : > { %v1722_v45 = vor.u32 1.1754944e-38, %v1721_v8  ;;  %vm1720_vm9 = vcmp.eq.f32.partialorder %v1719_v2, 8.507059e+37 }
0x12c2   : > { %v1933_v6 = vpop.xlane.xlu0 %1932  ;;  %v1709_v37 = vpop.xlane.xlu1 %1708 }
0x12c3   : > { %vm1935_vm7 = vcmp.ge.f32.partialorder %v1927_v55, %v1933_v6  ;;  %2702 = vrcp.f32 %v1709_v37  ;;  %v1736_v21 = vand.u32 2147483648, %v1709_v37  ;;  %vm1730_vm12 = vweird.f32 %v1709_v37 }
0x12c4   : > { %v1814_v19 = vpop.xlane.xlu2 %1813  ;;  %vm1937_vm5 = vmor %vm1935_vm7, %vm3246_vm11  ;;  %2704 = vrcp.f32 %v3316_v5  ;;  %v1734_v33 = vand.u32 2147483647, %v1709_v37  ;;  %vm1715_vm7 = vweird.f32 %v3316_v5 }
0x12c5   : > { %vm1816_vm8 = vcmp.ge.f32.partialorder %v1808_v54, %v1814_v19  ;;  %v3322_v11 = vsel %vm1937_vm5, %v1939_v7, %v1927_v55  ;;  %v1737_v41 = vor.u32 1.1754944e-38, %v1736_v21 }
0x12c6   : > { %vm1818_vm10 = vmor %vm1816_vm8, %vm3246_vm11  ;;  %v1945_v18 = vsel %vm723_vm15, %v3322_v11, 0.0  ;;  %vm1735_vm5 = vcmp.eq.f32.partialorder %v1734_v33, 8.507059e+37 }
0x12c7   : > { %v3326_v12 = vsel %vm1818_vm10, %v1820_v10, %v1808_v54  ;;  %1946 = vadd.xlane.f32.xlu0 %v1945_v18 }
0x12c8   : > { %v1826_v15 = vsel %vm723_vm15, %v3326_v12, 0.0 }
0x12c9   : > { %1827 = vadd.xlane.f32.xlu2 %v1826_v15  ;;  %v2703_v25 = vpop.eup %2702 }
0x12ca   : > { %v2705_v58 = vpop.eup %2704  ;;  %v1726_v28 = vmul.f32 %v2703_v25, %v1709_v37  ;;  %vm1731_vm15 = vweird.f32 %v2703_v25 }
0x12cb   : > { %v1711_v20 = vmul.f32 %v2705_v58, %v3316_v5  ;;  %vm1716_vm11 = vweird.f32 %v2705_v58  ;;  %vm1732_vm0 = vmor %vm1730_vm12, %vm1731_vm15 }
0x12cc   : > { %v1727_v30 = vsub.f32 1.0, %v1726_v28  ;;  %vm1717_vm8 = vmor %vm1715_vm7, %vm1716_vm11 }
0x12cd   : > { %v1712_v26 = vsub.f32 1.0, %v1711_v20 }
0x12ce   : > { %v1728_v16 = vmul.f32 %v2703_v25, %v1727_v30 }
0x12cf   : > { %1824 = vadd.xlane.f32.xlu0 %v1823_v38  ;;  %v1713_v24 = vmul.f32 %v2705_v58, %v1712_v26 }
0x12d1   : > { %v1714_v31 = vadd.f32 %v2705_v58, %v1713_v24 }
0x12d3   : > { %v1718_v42 = vsel %vm1717_vm8, %v2705_v58, %v1714_v31 }
0x12d4   : > { %v1723_v50 = vsel %vm1720_vm9, %v1722_v45, %v1718_v42 }
0x12d5   : > { %v1724_v9 = vmul.f32 %v1723_v50, %v3296_v49 }
0x12e1   : > { %1741 = vrot.lane.b32.xlu2 %v3214_v13, %s3544_s23 }
0x12e3   : > { %1979 = vrot.lane.b32.xlu0 %v3214_v13, %s3545_s22  ;;  %v1729_v13 = vadd.f32 %v2703_v25, %v1728_v16 }
0x12e5   : > { %v1733_v36 = vsel %vm1732_vm0, %v2703_v25, %v1729_v13 }
0x12e6   : > { %v1738_v47 = vsel %vm1735_vm5, %v1737_v41, %v1733_v36 }
0x12e7   : > { %v1739_v0 = vmul.f32 %v1738_v47, %v3302_v56 }
0x12e9   : > { %v1740_v3 = vpack.c.bf16 %v1739_v0, %v1724_v9  ;;  %v2523_v9 = vld [vmem:[%s3508_s9 + $0x10] sm:$0xff] }
0x1305   : > { %v3340_v4 = vpop.xlane.xlu1 %1943 }
0x1306   : > { %2706 = vrcp.f32 %v3340_v4  ;;  %vm1953_vm10 = vweird.f32 %v3340_v4  ;;  %v1959_v25 = vand.u32 2147483648, %v3340_v4 }
0x1308   : > { %v1960_v33 = vor.u32 1.1754944e-38, %v1959_v25 }
0x130c   : > { %v3352_v35 = vpop.eup %2706 }
0x130d   : > { %v1949_v48 = vmul.f32 %v3352_v35, %v3340_v4  ;;  %vm1954_vm1 = vweird.f32 %v3352_v35 }
0x130e   : > { %vm3389_vm5 = vmor %vm1953_vm10, %vm1954_vm1 }
0x130f   : > { %v1950_v54 = vsub.f32 1.0, %v1949_v48 }
0x1311   : > { %v1951_v5 = vmul.f32 %v3352_v35, %v1950_v54 }
0x1313   : > { %v1952_v10 = vadd.f32 %v3352_v35, %v1951_v5 }
0x1315   : > { %v1956_v13 = vsel %vm3389_vm5, %v3352_v35, %v1952_v10 }
0x131d   : > { %v1861_v22 = vpop.permute.xlu1 %1860 }
0x131e   : > { %v1866_v46 = vsel %vm799_vm6, %v1861_v22, 0 }
0x131f   : > { %1875 = vmatpush.bf16.msra.mxu3 %v1866_v46  ;;  %v1957_v46 = vand.u32 2147483647, %v3340_v4 }
0x133a   : > { %v3346_v34 = vpop.xlane.xlu0 %1946 }
0x133b   : > { %2708 = vrcp.f32 %v3346_v34  ;;  %vm1968_vm12 = vweird.f32 %v3346_v34  ;;  %v1974_v18 = vand.u32 2147483648, %v3346_v34  ;;  %v1972_v38 = vand.u32 2147483647, %v3346_v34 }
0x133c   : > { %v3350_v23 = vpop.xlane.xlu2 %1827 }
0x133d   : > { %2710 = vrcp.f32 %v3350_v23  ;;  %v1855_v15 = vand.u32 2147483648, %v3350_v23  ;;  %vm1849_vm7 = vweird.f32 %v3350_v23  ;;  %v1853_v37 = vand.u32 2147483647, %v3350_v23 }
0x133e   : > { %v1975_v21 = vor.u32 1.1754944e-38, %v1974_v18 }
0x133f   : > { %v1856_v31 = vor.u32 1.1754944e-38, %v1855_v15 }
0x1341   : > { %v2709_v40 = vpop.eup %2708 }
0x1342   : > { %v1964_v39 = vmul.f32 %v2709_v40, %v3346_v34  ;;  %v1825_v53 = vpop.xlane.xlu0 %1824  ;;  %vm1969_vm15 = vweird.f32 %v2709_v40 }
0x1343   : > { %v2711_v51 = vpop.eup %2710  ;;  %2712 = vrcp.f32 %v1825_v53  ;;  %vm3372_vm0 = vmor %vm1968_vm12, %vm1969_vm15  ;;  %v1838_v28 = vand.u32 2147483647, %v1825_v53  ;;  %v1840_v20 = vand.u32 2147483648, %v1825_v53  ;;  %vm1973_vm15 = vcmp.eq.f32.partialorder %v1972_v38, 8.507059e+37 }
0x1344   : > { %v1845_v55 = vmul.f32 %v2711_v51, %v3350_v23  ;;  %v1742_v57 = vpop.permute.xlu2 %1741  ;;  %v1965_v59 = vsub.f32 1.0, %v1964_v39  ;;  %vm1850_vm11 = vweird.f32 %v2711_v51  ;;  %vm1834_vm10 = vweird.f32 %v1825_v53 }
0x1345   : > { %v1747_v60 = vsel %vm799_vm6, %v1742_v57, 0  ;;  %vm3381_vm8 = vmor %vm1849_vm7, %vm1850_vm11  ;;  %vm1854_vm11 = vcmp.eq.f32.partialorder %v1853_v37, 8.507059e+37  ;;  %v1841_v23 = vor.u32 1.1754944e-38, %v1840_v20  ;;  %vm1958_vm12 = vcmp.eq.f32.partialorder %v1957_v46, 8.507059e+37  ;;  %v2524_v57 = vld [vmem:[%s3508_s9 + $0x18] sm:$0xff] }
0x1346   : > { %v1846_v62 = vsub.f32 1.0, %v1845_v55  ;;  %1756 = vmatpush.bf16.msrb.mxu2 %v1747_v60  ;;  %v1966_v1 = vmul.f32 %v2709_v40, %v1965_v59  ;;  %v1961_v36 = vsel %vm1958_vm12, %v1960_v33, %v1956_v13  ;;  %2056 = vmatpush.bf16.msrb.mxu0 %v2524_v57  ;;  %v2526_v33 = vld [vmem:[%s3510_s11 + $0x18] sm:$0xff] }
0x1347   : > { %v1962_v48 = vmul.f32 %v1961_v36, %v3310_v63  ;;  %2165 = vmatpush.bf16.msrb.mxu3 %v2526_v33  ;;  %v2534_v36 = vld [vmem:[%s3512_s13 + $0x78] sm:$0xff] }
0x1348   : > { %v1847_v56 = vmul.f32 %v2711_v51, %v1846_v62  ;;  %v1967_v19 = vadd.f32 %v2709_v40, %v1966_v1  ;;  %2227 = vmatpush.bf16.msrb.mxu1 %v2534_v36 }
0x1349   : > { %2423 = vmatmul.msk.bf16.vlgmr.msrb.gmra.mxu2 %vm719_vm14, %v1740_v3  ;;  %v2713_v6 = vpop.eup %2712 }
0x134a   : > { %v1848_v49 = vadd.f32 %v2711_v51, %v1847_v56  ;;  %v1830_v7 = vmul.f32 %v2713_v6, %v1825_v53  ;;  %v1971_v26 = vsel %vm3372_vm0, %v2709_v40, %v1967_v19  ;;  %vm1835_vm9 = vweird.f32 %v2713_v6  ;;  %2057 = vmatpush.bf16.msrb.mxu0 %v2523_v9 }
0x134b   : > { %v1976_v34 = vsel %vm1973_vm15, %v1975_v21, %v1971_v26  ;;  %vm1836_vm1 = vmor %vm1834_vm10, %vm1835_vm9  ;;  %vm1839_vm0 = vcmp.eq.f32.partialorder %v1838_v28, 8.507059e+37 }
0x134c   : > { %v1831_v22 = vsub.f32 1.0, %v1830_v7  ;;  %v1852_v16 = vsel %vm3381_vm8, %v2711_v51, %v1848_v49  ;;  %v1977_v42 = vmul.f32 %v1976_v34, %v3322_v11 }
0x134d   : > { %v1857_v8 = vsel %vm1854_vm11, %v1856_v31, %v1852_v16 }
0x134e   : > { %v1832_v24 = vmul.f32 %v2713_v6, %v1831_v22  ;;  %v1858_v35 = vmul.f32 %v1857_v8, %v3326_v12  ;;  %v1978_v51 = vpack.c.bf16 %v1977_v42, %v1962_v48 }
0x1350   : > { %v1833_v4 = vadd.f32 %v2713_v6, %v1832_v24 }
0x1352   : > { %v1837_v2 = vsel %vm1836_vm1, %v2713_v6, %v1833_v4 }
0x1353   : > { %v1842_v41 = vsel %vm1839_vm0, %v1841_v23, %v1837_v2  ;;  %v2525_v2 = vld [vmem:[%s3510_s11 + $0x10] sm:$0xff] }
0x1354   : > { %v1843_v45 = vmul.f32 %v1842_v41, %v3332_v17  ;;  %2166 = vmatpush.bf16.msrb.mxu3 %v2525_v2 }
0x1355   : > { %v1980_v47 = vpop.permute.xlu0 %1979 }
0x1356   : > { %v1985_v40 = vsel %vm799_vm6, %v1980_v47, 0  ;;  %v1859_v50 = vpack.c.bf16 %v1858_v35, %v1843_v45  ;;  %v2533_v35 = vld [vmem:[%s3512_s13 + $0x70] sm:$0xff] }
0x1357   : > { %1994 = vmatpush.bf16.msra.mxu2 %v1985_v40  ;;  %2228 = vmatpush.bf16.msrb.mxu1 %v2533_v35  ;;  %v2532_v40 = vld [vmem:[%s3512_s13 + $0x68] sm:$0xff] }
0x1358   : > { %2425 = vmatmul.msk.bf16.vlgmr.msra.gmra.mxu3 %vm719_vm14, %v1859_v50 }
0x135a   : > { %2427 = vmatmul.msk.bf16.vlgmr.msra.gmra.mxu2 %vm719_vm14, %v1978_v51 }
0x135b   : > { %2229 = vmatpush.bf16.msrb.mxu1 %v2532_v40 }
0x13cc   : > { %v1758_v0 = vpop.f32.mrf.mxu2 }
0x13d4   : > { %v1760_v39 = vpop.f32.mrf.mxu2 }
0x13d5   : > { %v2576_v53 = vpack.i.bf16 %v1760_v39, %v1758_v0 }
0x13d7   : > { %2577 = vrot.lane.b32.xlu2 %v2576_v53, %s3552_s17 }
0x13db   : > { %v1877_v11 = vpop.f32.mrf.mxu3 }
0x13dd   : > { %v1996_v12 = vpop.f32.mrf.mxu2 }
0x13e3   : > { %v1879_v17 = vpop.f32.mrf.mxu3 }
0x13e4   : > { %v2581_v54 = vpack.i.bf16 %v1879_v17, %v1877_v11 }
0x13e5   : > { %v1998_v55 = vpop.f32.mrf.mxu2 }
0x13e6   : > { %v2586_v63 = vpack.i.bf16 %v1998_v55, %v1996_v12  ;;  %2582 = vrot.lane.b32.xlu0 %v2581_v54, %s3553_s16 }
0x13e8   : > { %2587 = vrot.lane.b32.xlu1 %v2586_v63, %s3554_s21 }
0x1431   : > { %v2578_v59 = vpop.permute.xlu2 %2577 }
0x1432   : > { %v2580_v60 = vunpack.i.h.bf16 %v2578_v59  ;;  %v2579_v62 = vunpack.i.l.bf16 %v2578_v59 }
0x1434   : > { %v2026_v56 = vsel %vm698_vm13, %v3276_v44, %v2580_v60  ;;  %v2025_v6 = vsel %vm698_vm13, %v3274_v43, %v2579_v62  ;;  %v2601_v44 = vld [vmem:[%s3509_s10 + $0x1] ss:$0 sm:$0xff]  ;;  %vm3555_vm13 = vcmask 257024  }
0x1435   : > { %vm3556_vm14 = vmmov %vm3555_vm13 }
0x1436   : > { %vm3558_vm9 = vmmov %vm3555_vm13 }
0x1458   : > { %v2583_v1 = vpop.permute.xlu0 %2582 }
0x1459   : > { %v2585_v3 = vunpack.i.h.bf16 %v2583_v1  ;;  %v2584_v5 = vunpack.i.l.bf16 %v2583_v1 }
0x145a   : > { %v2588_v19 = vpop.permute.xlu1 %2587 }
0x145b   : > { %v2028_v49 = vsel %vm1200_vm2, %v2026_v56, %v2585_v3  ;;  %v2027_v7 = vsel %vm1200_vm2, %v2025_v6, %v2584_v5  ;;  %v2590_v10 = vunpack.i.h.bf16 %v2588_v19  ;;  %v2589_v18 = vunpack.i.l.bf16 %v2588_v19  ;;  %v2530_v56 = vld [vmem:[%s3512_s13 + $0x58] sm:$0xff]  ;;  %v2529_v6 = vld [vmem:[%s3512_s13 + $0x50] sm:$0xff] }
0x145d   : > { %v2029_v15 = vsel %vm1203_vm3, %v2027_v7, %v2589_v18  ;;  %v2030_v52 = vsel %vm1203_vm3, %v2028_v49, %v2590_v10  ;;  %v2602_v49 = vld [vmem:[%s3511_s12 + $0x1] ss:$0 sm:$0xff] }
0x145e   : > { %v2031_v38 = vpack.c.bf16 %v2030_v52, %v2029_v15 }
0x1460   : > { %2436 = vmatmul.msk.bf16.vlgmr.msrb.gmra.mxu0 %vm580_vm4, %v2031_v38 }
0x14dd   : > { %v2059_v37 = vpop.f32.mrf.mxu0 }
0x14de   : > { %v2060_v43 = vadd.f32 %v2601_v44, %v2059_v37 }
0x14e0   : > { %v3429_v22 = vadd.f32 %v2060_v43, %v3173_v27 }
0x14e2   : > { %v2066_v46 = vsel %vm580_vm4, %v3429_v22, 0.0 }
0x14e3   : > { %2067 = vadd.xlane.f32.xlu2 %v2066_v46 }
0x14e5   : > { %v2061_v25 = vpop.f32.mrf.mxu0 }
0x14e6   : > { %v2062_v58 = vadd.f32 %v2601_v44, %v2061_v25  ;;  %v2603_v44 = vld [vmem:[%s3513_s14 + $0x1] ss:$0 sm:$0xff] }
0x14e8   : > { %v3434_v28 = vadd.f32 %v2062_v58, %v3178_v29 }
0x14ea   : > { %v2069_v20 = vsel %vm3555_vm13, %v3434_v28, 0.0 }
0x14eb   : > { %2070 = vadd.xlane.f32.xlu0 %v2069_v20 }
0x1556   : > { %v2068_v30 = vpop.xlane.xlu2 %2067 }
0x1557   : > { %v2072_v26 = vmul.f32 %v2068_v30, %v2875_v32 }
0x1559   : > { %v2074_v16 = vsub.f32 %v3429_v22, %v2072_v26 }
0x155b   : > { %v2076_v27 = vmul.f32 %v2074_v16, %v2074_v16 }
0x155d   : > { %v2078_v24 = vsel %vm580_vm4, %v2076_v27, 0.0 }
0x155e   : > { %v2071_v13 = vpop.xlane.xlu0 %2070  ;;  %2079 = vadd.xlane.f32.xlu1 %v2078_v24 }
0x155f   : > { %v2073_v21 = vmul.f32 %v2071_v13, %v2875_v32 }
0x1561   : > { %v2075_v31 = vsub.f32 %v3434_v28, %v2073_v21 }
0x1563   : > { %v2077_v29 = vmul.f32 %v2075_v31, %v2075_v31 }
0x1565   : > { %v2081_v4 = vsel %vm3556_vm14, %v2077_v29, 0.0 }
0x1566   : > { %2082 = vadd.xlane.f32.xlu2 %v2081_v4 }
0x15d1   : > { %v2080_v34 = vpop.xlane.xlu1 %2079 }
0x15d2   : > { %v2084_v8 = vmul.f32 %v2080_v34, %v2875_v32 }
0x15d4   : > { %v2086_v23 = vadd.f32 1e-05, %v2084_v8 }
0x15d6   : > { %2714 = vrsqrt.f32 %v2086_v23  ;;  %vm2094_vm2 = vweird.f32 %v2086_v23 }
0x15d9   : > { %v2083_v41 = vpop.xlane.xlu2 %2082 }
0x15da   : > { %v2085_v42 = vmul.f32 %v2083_v41, %v2875_v32  ;;  %v2531_v32 = vld [vmem:[%s3512_s13 + $0x60] sm:$0xff] }
0x15db   : > { %2230 = vmatpush.bf16.msrb.mxu1 %v2531_v32 }
0x15dc   : > { %v2715_v45 = vpop.eup %2714  ;;  %v2087_v47 = vadd.f32 1e-05, %v2085_v42 }
0x15dd   : > { %v2089_v48 = vmul.f32 %v2715_v45, %v2086_v23  ;;  %vm2095_vm6 = vweird.f32 %v2715_v45 }
0x15de   : > { %2716 = vrsqrt.f32 %v2087_v47  ;;  %vm2096_vm3 = vmor %vm2094_vm2, %vm2095_vm6  ;;  %vm2104_vm8 = vweird.f32 %v2087_v47 }
0x15df   : > { %v2090_v50 = vmul.f32 %v2715_v45, %v2089_v48  ;;  %2231 = vmatpush.bf16.msrb.mxu1 %v2530_v56 }
0x15e1   : > { %v2091_v51 = vmul.f32 0.5, %v2090_v50 }
0x15e3   : > { %v2092_v0 = vsub.f32 1.5, %v2091_v51  ;;  %2232 = vmatpush.bf16.msrb.mxu1 %v2529_v6 }
0x15e4   : > { %v2717_v39 = vpop.eup %2716 }
0x15e5   : > { %v2093_v53 = vmul.f32 %v2715_v45, %v2092_v0  ;;  %v2099_v11 = vmul.f32 %v2717_v39, %v2087_v47  ;;  %vm2105_vm7 = vweird.f32 %v2717_v39 }
0x15e6   : > { %vm2106_vm5 = vmor %vm2104_vm8, %vm2105_vm7 }
0x15e7   : > { %v2100_v12 = vmul.f32 %v2717_v39, %v2099_v11  ;;  %v2097_v17 = vsel %vm2096_vm3, %v2715_v45, %v2093_v53 }
0x15e8   : > { %v2108_v63 = vmul.f32 %v2097_v17, %v2074_v16 }
0x15e9   : > { %v2101_v54 = vmul.f32 0.5, %v2100_v12 }
0x15ea   : > { %v2110_v59 = vmul.f32 %v3199_v14, %v2108_v63 }
0x15eb   : > { %v2102_v55 = vsub.f32 1.5, %v2101_v54 }
0x15ec   : > { %v2112_v1 = vadd.f32 %v3204_v61, %v2110_v59 }
0x15ed   : > { %v2103_v57 = vmul.f32 %v2717_v39, %v2102_v55 }
0x15ef   : > { %v2107_v9 = vsel %vm2106_vm5, %v2717_v39, %v2103_v57 }
0x15f0   : > { %v2109_v60 = vmul.f32 %v2107_v9, %v2075_v31 }
0x15f2   : > { %v2111_v62 = vmul.f32 %v3199_v14, %v2109_v60  ;;  %v2528_v14 = vld [vmem:[%s3512_s13 + $0x48] sm:$0xff] }
0x15f3   : > { %2233 = vmatpush.bf16.msrb.mxu1 %v2528_v14 }
0x15f4   : > { %v2113_v3 = vadd.f32 %v3204_v61, %v2111_v62  ;;  %v2527_v61 = vld [vmem:[%s3512_s13 + $0x40] sm:$0xff] }
0x15f6   : > { %v2140_v5 = vpack.c.bf16 %v2113_v3, %v2112_v1 }
0x15f7   : > { %2234 = vmatpush.bf16.msrb.mxu1 %v2527_v61 }
0x15f8   : > { %2467 = vmatmul.msk.bf16.vlgmr.msrb.gmra.mxu3 %vm580_vm4, %v2140_v5 }
0x167b   : > { %v2168_v19 = vpop.f32.mrf.mxu3 }
0x167c   : > { %v2169_v7 = vadd.f32 %v2602_v49, %v2168_v19 }
0x167e   : > { %v2173_v15 = vmax.f32 %v2169_v7, 0.0 }
0x1683   : > { %v2170_v10 = vpop.f32.mrf.mxu3 }
0x1684   : > { %v2171_v18 = vadd.f32 %v2602_v49, %v2170_v10 }
0x1686   : > { %v2174_v52 = vmax.f32 %v2171_v18, 0.0 }
0x1688   : > { %v2175_v38 = vpack.c.bf16 %v2174_v52, %v2173_v15 }
0x168a   : > { %2235 = vmatmul.bf16.vlgmr.msrb.gmra.mxu1 %v2175_v38 }
0x1707   : > { %v2236_v37 = vpop.f32.mrf.mxu1 }
0x1708   : > { %v2237_v43 = vadd.f32 %v2603_v44, %v2236_v37 }
0x170a   : > { %v2241_v46 = vadd.f32 %v2237_v43, %v3429_v22 }
0x170c   : > { %2243 = vst.msk [vmem:[%s508_s20] sm:$0xff] %vm580_vm4, %v2241_v46 }
0x170f   : > { %v2238_v25 = vpop.f32.mrf.mxu1 }
0x1710   : > { %v2239_v58 = vadd.f32 %v2603_v44, %v2238_v25 }
0x1712   : > { %v2242_v20 = vadd.f32 %v2239_v58, %v3434_v28 }
0x1714   : > { %2244 = vst.msk [vmem:[%s508_s20 + $0x8] sm:$0xf] %vm3558_vm9, %v2242_v20 }
0x1715 PF: > { %s25_s18 = sadd.s32 1, %s2727_s18  }
0x1716   : > { %p22_p4 = scmp.ge.s32.totalorder %s25_s18, 4  }
0x1718   :  { %24 = sbr.rel (!%p22_p4) target bundleno = 1 (0x1), region = 124 }

// kernel: transformer_forward.3
= control target key start
LH: loop header
LB: loop body
LE: loop exit
PB: predicated region body
PF: predicated region fallthrough
CT: control target
= control target key end

     0   :  { %s4730_s0 = inlined_call_operand.vmem [shape: s32[2,8,1], index: 0, kind: input, shape index: {}]   ;;  %s4731_s1 = inlined_call_operand.vmem [shape: f32[2,12,32], index: 1, kind: input, shape index: {}]   ;;  %s4732_s2 = inlined_call_operand.vmem [shape: f32[2,1,12], index: 2, kind: input, shape index: {}]   ;;  %s4733_s3 = inlined_call_operand.vmem [shape: f32[2,1,8], index: 3, kind: input, shape index: {}]   ;;  %s4734_s4 = inlined_call_operand.vmem [shape: f32[2,1,12], index: 4, kind: input, shape index: {}]   ;;  %s4735_s5 = inlined_call_operand.vmem [shape: bf16[40,32], index: 5, kind: input, shape index: {}]   ;;  %s4736_s6 = inlined_call_operand.vmem [shape: f32[8,32], index: 6, kind: input, shape index: {}]   ;;  %s4737_s7 = inlined_call_operand.vmem [shape: f32[2,1,32], index: 7, kind: input, shape index: {}]   ;;  %s4738_s8 = inlined_call_operand.vmem [shape: f32[2,1,32], index: 8, kind: input, shape index: {}]   ;;  %s4739_s9 = inlined_call_operand.vmem [shape: bf16[2,32,96], index: 9, kind: input, shape index: {}]   ;;  %s4740_s10 = inlined_call_operand.vmem [shape: f32[2,1,96], index: 10, kind: input, shape index: {}]   ;;  %s4741_s11 = inlined_call_operand.vmem [shape: bf16[2,32,32], index: 11, kind: input, shape index: {}]   ;;  %s4742_s12 = inlined_call_operand.vmem [shape: f32[2,1,32], index: 12, kind: input, shape index: {}]   ;;  %s4743_s13 = inlined_call_operand.vmem [shape: bf16[2,32,32], index: 13, kind: input, shape index: {}]   ;;  %s4744_s14 = inlined_call_operand.vmem [shape: f32[2,1,32], index: 14, kind: input, shape index: {}]   ;;  %s4745_s15 = inlined_call_operand.vmem [shape: bf16[2,32,64], index: 15, kind: input, shape index: {}]   ;;  %s4746_s16 = inlined_call_operand.vmem [shape: f32[2,1,64], index: 16, kind: input, shape index: {}]   ;;  %s4747_s17 = inlined_call_operand.vmem [shape: bf16[2,32,32], index: 17, kind: input, shape index: {}]   ;;  %s4748_s18 = inlined_call_operand.vmem [shape: f32[2,1,32], index: 18, kind: input, shape index: {}]   ;;  %s4749_s19 = inlined_call_operand.vmem [shape: bf16[2,32,128], index: 19, kind: input, shape index: {}]   ;;  %s4750_s20 = inlined_call_operand.vmem [shape: f32[2,1,128], index: 20, kind: input, shape index: {}]   ;;  %s4751_s21 = inlined_call_operand.vmem [shape: bf16[2,128,32], index: 21, kind: input, shape index: {}]   ;;  %s4752_s22 = inlined_call_operand.vmem [shape: f32[2,1,32], index: 22, kind: input, shape index: {}]   ;;  %s4753_s23 = inlined_call_operand.vmem [shape: f32[1,32], index: 23, kind: input, shape index: {}]   ;;  %s4754_s24 = inlined_call_operand.vmem [shape: f32[1,32], index: 24, kind: input, shape index: {}]   ;;  %s4755_s25 = inlined_call_operand.vmem [shape: bf16[32,128], index: 25, kind: input, shape index: {}]   ;;  %s4756_s26 = inlined_call_operand.vmem [shape: f32[1,128], index: 26, kind: input, shape index: {}]   ;;  %s4757_s27 = inlined_call_operand.hbm [shape: f32[2,8,128], index: 27, kind: output, shape index: {}]  }
   0x1   :  { %4805 = sst [smem:[#allocation15_spill]] %s4730_s0 }
   0x2   :  { %4806 = sst [smem:[#allocation16_spill]] %s4731_s1 }
   0x3   :  { %4807 = sst [smem:[#allocation17_spill]] %s4732_s2 }
   0x4   :  { %4808 = sst [smem:[#allocation18_spill]] %s4733_s3 }
   0x5   :  { %4809 = sst [smem:[#allocation19_spill]] %s4734_s4 }
   0x6   :  { %4810 = sst [smem:[#allocation20_spill]] %s4735_s5 }
   0x7   :  { %4811 = sst [smem:[#allocation21_spill]] %s4736_s6 }
   0x8   :  { %4812 = sst [smem:[#allocation22_spill]] %s4737_s7 }
   0x9   :  { %4813 = sst [smem:[#allocation23_spill]] %s4738_s8 }
   0xa   :  { %4814 = sst [smem:[#allocation24_spill]] %s4739_s9 }
   0xb   :  { %4815 = sst [smem:[#allocation25_spill]] %s4740_s10 }
   0xc   :  { %4816 = sst [smem:[#allocation26_spill]] %s4741_s11 }
   0xd   :  { %4817 = sst [smem:[#allocation27_spill]] %s4744_s14 }
   0xe   :  { %4818 = sst [smem:[#allocation28_spill]] %s4746_s16 }
   0xf   :  { %4819 = sst [smem:[#allocation29_spill]] %s4747_s17 }
  0x10   :  { %4820 = sst [smem:[#allocation30_spill]] %s4748_s18 }
  0x11   :  { %4821 = sst [smem:[#allocation31_spill]] %s4753_s23 }
  0x12   :  { %4822 = sst [smem:[#allocation32_spill]] %s4754_s24 }
  0x13   :  { %4823 = sst [smem:[#allocation33_spill]] %s4755_s25 }
  0x14   :  { %4824 = sst [smem:[#allocation34_spill]] %s4756_s26 }
  0x15   :  { %4825 = sst [smem:[#allocation35_spill]] %s4757_s27 }
  0x16   :  { %32 = vsyncpa [#allocation3], 0 }
  0x17   :  { %34 = vsyncpa [#allocation3 + $0x1], 0  ;;  %s3978_s7 = smov 0   ;;  %s3980_s4 = smov 0  }
  0x18   :  { %s3982_s8 = smov 0   ;;  %s3984_s30 = smov 0  }
  0x19 LB: > { %4826 = sst [smem:[#allocation5_spill]] %s3807_s7  ;;  %s3999_s9 = sadd.s32 4294967295, %s3819_s30   ;;  %s3819_s30 = sphi %s3984_s30, %s4895_s30   ;;  %s3815_s8 = sphi %s3982_s8, %s4898_s8   ;;  %s3811_s4 = sphi %s3980_s4, %s4897_s4   ;;  %s3807_s7 = sphi %s3978_s7, %s4896_s7  }
  0x1a   : > { %4827 = sst [smem:[#allocation6_spill]] %s3811_s4  ;;  %s3227_s5 = sadd.s32 4294967294, %s3819_s30  }
  0x1b   : > { %4828 = sst [smem:[#allocation7_spill]] %s3815_s8  ;;  %s4003_s28 = sadd.s32 1, %s3819_s30  }
  0x1c   : > { %4829 = sst [smem:[#allocation8_spill]] %s3819_s30  ;;  %s629_s0 = sadd.s32 1, %s3815_s8 }
  0x1d   : > { %4830 = sst [smem:[#allocation9_spill]] %s3999_s9  ;;  %s626_s10 = ssub.s32 %s3819_s30, %s4003_s28 }
  0x1e   : > { %4831 = sst [smem:[#allocation10_spill]] %s4003_s28  ;;  %p639_p0 = scmp.ne.s32.totalorder %s3815_s8, %s3811_s4 }
  0x1f   : > { %p627_p1 = scmp.eq.s32.totalorder %s626_s10, 0  ;;  %p640_p2 = scmp.eq.s32.totalorder %s3999_s9, 1 }
  0x20   : > { %p645_p3 = scmp.ne.s32.totalorder %s3811_s4, %s3807_s7  ;;  %p646_p4 = scmp.eq.s32.totalorder %s3227_s5, 1 }
  0x21   : > { %s4014_s29 = scalar_select %p627_p1, %s3815_s8, %s629_s0  }
  0x22   : > { %p4016_p5 = por %p640_p2, %p639_p0  ;;  %p4020_p6 = por %p646_p4, %p645_p3 }
  0x23   : > { %4832 = sst [smem:[#allocation11_spill]] %s4014_s29  ;;  %p3230_p7 = scmp.ge.s32.totalorder %s3819_s30, 1 }
  0x24   : > { %s4833_s1 = scalar_select %p4016_p5, 1, 0 }
  0x25   : > { %s4835_s6 = scalar_select %p4020_p6, 1, 0 }
  0x26   : > { %4834 = sst [smem:[#allocation12_spill]] %s4833_s1  ;;  %p757_p8 = scmp.lt.s32.totalorder %s3819_s30, 3 }
  0x27   : > { %4836 = sst [smem:[#allocation13_spill]] %s4835_s6 }
  0x28   : > { %p758_p9 = pnand %p3230_p7, %p757_p8 }
  0x2a   : > { %761 = sbr.rel (%p758_p9) target bundleno = 9162 (0x23ca), region = 128 }
  0x2f   : > { %p836_p10 = scmp.lt.s32.totalorder %s3999_s9, 1  ;;  %s4837_s3 = sld [smem:[#allocation20_spill]]  ;;  %v3821_v1 = vmov 0   ;;  %vm883_vm0 = vcmask 1043456   ;;  %v856_v8 = vlaneseq  ;;  %v3822_v11 = vmov 0.0  }
  0x30   : > { %3613 = vset.pattern.permute.xlu0 %v3821_v1  ;;  %s4838_s8 = sld [smem:[#allocation15_spill]]  ;;  %vm879_vm2 = vcmask 326656   ;;  %vm909_vm3 = vcmask 261120   ;;  %v3823_v19 = vmov 32.0   ;;  %s4776_s6 = smov 72   ;;  %vm998_vm8 = vcmask 64512  }
  0x31   : > { %s4032_s5 = scalar_select %p836_p10, %s3999_s9, 1  ;;  %v4052_v9 = vand.u32 127, %v856_v8  ;;  %3636 = vrcp.f32 %v3823_v19  ;;  %v904_v56 = vshrl.u32 %v856_v8, 7 }
  0x32   : > { %s4839_s2 = sld [smem:[#allocation17_spill]]  ;;  %s4780_s10 = smov 88  }
  0x33   : > { %s3232_s0 = sshll.u32 %s4032_s5, 3  ;;  %s4842_s29 = sld [smem:[#allocation24_spill]]  ;;  %vm905_vm9 = vcmp.gt.s32.totalorder %v4052_v9, %v904_v56 }
  0x34   : > { %s4843_s11 = sld [smem:[#allocation22_spill]]  ;;  %v4109_v57 = vsel %vm905_vm9, -1e+30, %v3822_v11  ;;  %s4786_s27 = smov 80  }
  0x35   : > { %v854_v0 = vld [vmem:[%s4837_s3 + $0x10] sm:$0xf]  ;;  %v3514_v6 = vld [vmem:[%s4837_s3 + $0x8] sm:$0xff]  ;;  %v3513_v7 = vld [vmem:[%s4837_s3] sm:$0xff]  ;;  %s4844_s30 = sld [smem:[#allocation23_spill]]  ;;  %s3512_s3 = sshll.u32 %s4032_s5, 4 }
  0x36   : > { %v873_v2 = vunpack.c.l.b16 %v854_v0  ;;  %s839_s28 = scalar_lea.vmem %s4838_s8, %s3232_s0  ;;  %s4846_s1 = sld [smem:[#allocation25_spill]] }
  0x37   : > { %v849_v5 = vld [vmem:[%s839_s28] sm:$0xff]  ;;  %s4841_s28 = sld [smem:[#allocation21_spill]]  ;;  %v3637_v20 = vpop.eup %3636  ;;  %s4784_s0 = smov 96  }
  0x38   : > { %v876_v3 = vpack.c.b16 %v873_v2, %v873_v2  ;;  %s4043_s7 = scalar_lea.vmem %s4839_s2, %s4032_s5  ;;  %859 = vperm.xlu0 %3613, %v849_v5   ;;  %v914_v21 = vmul.f32 32.0, %v3637_v20  ;;  %vm918_vm4 = vweird.f32 %v3637_v20  ;;  %s4792_s2 = smov 120  }
  0x39   : > { %4840 = sst [smem:[#allocation14_spill]] %s4043_s7  ;;  %v3516_v31 = vld [vmem:[%s4842_s29 + $0x8] sm:$0xff]  ;;  %v3515_v32 = vld [vmem:[%s4842_s29] sm:$0xff]  ;;  %s4790_s8 = smov 112  }
  0x3a   : > { %v885_v4 = vsel %vm883_vm0, %v876_v3, 0  ;;  %v915_v22 = vsub.f32 1.0, %v914_v21  ;;  %977 = vmatpush.bf16.msra.mxu1 %v3516_v31  ;;  %v4078_v42 = vld [vmem:[%s4843_s11] ss:$0 sm:$0xff]  ;;  %s4847_s9 = sld [smem:[#allocation18_spill]]  ;;  %s4857_s4 = smov 104  }
  0x3b   : > { %892 = vmatpush.bf16.msra.mxu0 %v885_v4  ;;  %v4083_v45 = vld [vmem:[%s4844_s30] ss:$0 sm:$0xff]  ;;  %s4853_s16 = sld [smem:[#allocation28_spill]]  ;;  %s4864_s26 = smov 72  }
  0x3c   : > { %v916_v23 = vmul.f32 %v3637_v20, %v915_v22  ;;  %v3617_v49 = vld [vmem:[%s4846_s1] ss:$0 sm:$0xff]  ;;  %s4856_s14 = sld [smem:[#allocation27_spill]]  ;;  %s4865_s5 = smov 8  }
  0x3d   : > { %v855_v14 = vld [vmem:[%s4841_s28] sm:$0xff]  ;;  %s4845_s28 = smov %s4844_s30  ;;  %s4778_s30 = smov 64  }
  0x3e   : > { %v917_v24 = vadd.f32 %v3637_v20, %v916_v23  ;;  %978 = vmatpush.bf16.msra.mxu1 %v3515_v32  ;;  %s4867_s24 = smov 24   ;;  %s4868_s17 = sld [smem:[#allocation29_spill]] }
  0x3f   : > { %893 = vmatpush.bf16.msra.mxu0 %v3514_v6  ;;  %s4869_s18 = sld [smem:[#allocation30_spill]]  ;;  %s4874_s23 = smov 40  }
  0x40   : > { %v4063_v25 = vsel %vm918_vm4, %v3637_v20, %v917_v24  ;;  %v984_v4 = vld [vmem:[%s4847_s9] sm:$0x1]  ;;  %s4875_s25 = smov 48  }
  0x41   : > { %vm990_vm10 = vcmp.gt.f32.partialorder %v984_v4, 0.0 }
  0x42   : > { %v991_v6 = vsel %vm990_vm10, 1, %v3821_v1 }
  0x43   : > { %894 = vmatpush.bf16.msra.mxu0 %v3513_v7  ;;  %v992_v7 = vperm.slane %v991_v6, 0 }
  0x45   : > { %vm4118_vm11 = vcmp.eq.s32.totalorder %v992_v7, 1 }
  0xaa   : > { %v860_v10 = vpop.permute.xlu0 %859 }
  0xab   : > { %vm861_vm1 = vcmp.eq.s32.totalorder %v860_v10, %v4052_v9 }
  0xac   : > { %v862_v12 = vsel %vm861_vm1, 1.0, %v3822_v11 }
  0xad   : > { %v863_v13 = vpack.c.bf16 %v862_v12, %v862_v12 }
  0xaf   : > { %3243 = vmatmul.msk.bf16.vlgmr.msra.gmra.mxu0 %vm879_vm2, %v863_v13 }
 0x12c   : > { %v896_v15 = vpop.f32.mrf.mxu0 }
 0x12d   : > { %v4059_v16 = vadd.f32 %v896_v15, %v855_v14 }
 0x12f   : > { %v910_v17 = vsel %vm909_vm3, %v4059_v16, 0.0 }
 0x130   : > { %911 = vadd.xlane.f32.xlu0 %v910_v17 }
 0x134   : > { %v898_v18 = vpop.f32.mrf.mxu0 }
 0x1a3   : > { %v912_v26 = vpop.xlane.xlu0 %911 }
 0x1a4   : > { %v920_v27 = vmul.f32 %v4063_v25, %v912_v26 }
 0x1a6   : > { %v921_v28 = vsub.f32 %v4059_v16, %v920_v27 }
 0x1a8   : > { %v922_v29 = vmul.f32 %v921_v28, %v921_v28 }
 0x1aa   : > { %v923_v30 = vsel %vm909_vm3, %v922_v29, 0.0 }
 0x1ab   : > { %924 = vadd.xlane.f32.xlu1 %v923_v30 }
 0x21e   : > { %v925_v33 = vpop.xlane.xlu1 %924 }
 0x21f   : > { %v926_v34 = vmul.f32 %v925_v33, %v4063_v25 }
 0x221   : > { %v927_v35 = vadd.f32 1e-05, %v926_v34 }
 0x223   : > { %3638 = vrsqrt.f32 %v927_v35  ;;  %vm934_vm6 = vweird.f32 %v927_v35 }
 0x229   : > { %v3639_v36 = vpop.eup %3638 }
 0x22a   : > { %v929_v37 = vmul.f32 %v3639_v36, %v927_v35  ;;  %vm935_vm5 = vweird.f32 %v3639_v36 }
 0x22b   : > { %vm936_vm7 = vmor %vm934_vm6, %vm935_vm5 }
 0x22c   : > { %v930_v38 = vmul.f32 %v3639_v36, %v929_v37 }
 0x22e   : > { %v931_v39 = vmul.f32 0.5, %v930_v38 }
 0x230   : > { %v932_v40 = vsub.f32 1.5, %v931_v39 }
 0x232   : > { %v933_v41 = vmul.f32 %v3639_v36, %v932_v40 }
 0x234   : > { %v937_v43 = vsel %vm936_vm7, %v3639_v36, %v933_v41 }
 0x235   : > { %v938_v44 = vmul.f32 %v937_v43, %v921_v28 }
 0x237   : > { %v942_v46 = vmul.f32 %v4078_v42, %v938_v44 }
 0x239   : > { %v946_v47 = vadd.f32 %v4083_v45, %v942_v46 }
 0x23b   : > { %v947_v48 = vpack.c.bf16 %v946_v47, %v946_v47 }
 0x23d   : > { %3252 = vmatmul.msk.bf16.vlgmr.msra.gmra.mxu1 %vm909_vm3, %v947_v48 }
 0x2ba   : > { %v980_v50 = vpop.f32.mrf.mxu1 }
 0x2bb   : > { %v981_v51 = vadd.f32 %v3617_v49, %v980_v50 }
 0x2bd   : > { %v4091_v52 = vpack.c.bf16 %v981_v51, %v981_v51 }
 0x2bf   : > { %1225 = vrot.lane.b32.xlu0 %v4091_v52, %s4776_s6  ;;  %996 = vrot.lane.b32.xlu1 %v4091_v52, %s4784_s0  ;;  %s4788_s6 = smov 104   ;;  %s4795_s0 = smov 24  }
 0x2c2   : > { %v982_v53 = vpop.f32.mrf.mxu1 }
 0x2c7   : > { %1073 = vrot.lane.b32.xlu1 %v4091_v52, %s4780_s10  ;;  %s4783_s10 = smov 40  }
 0x2cf   : > { %1071 = vrot.lane.b32.xlu1 %v4091_v52, %s4792_s2 }
 0x2d7   : > { %1147 = vrot.lane.b32.xlu1 %v4091_v52, %s4790_s8  ;;  %s4850_s8 = sld [smem:[#allocation26_spill]] }
 0x2dd   : > { %s4851_s2 = smov %s4850_s8 }
 0x331   : > { %v997_v54 = vpop.permute.xlu1 %996  ;;  %v1226_v35 = vpop.permute.xlu0 %1225 }
 0x332   : > { %v1003_v55 = vsel %vm998_vm8, %v997_v54, 0  ;;  %v1231_v37 = vsel %vm998_vm8, %v1226_v35, 0 }
 0x333   : > { %1012 = vmatpush.bf16.xpose.msra.mxu2 %v1003_v55 }
 0x339   : > { %v1074_v15 = vpop.permute.xlu1 %1073 }
 0x33a   : > { %3253 = vmatmul.msk.bf16.vlgmr.msra.gmra.mxu2 %vm998_vm8, %v4091_v52  ;;  %v1079_v22 = vsel %vm998_vm8, %v1074_v15, 0 }
 0x341   : > { %v1072_v27 = vpop.permute.xlu1 %1071 }
 0x349   : > { %v1148_v38 = vpop.permute.xlu1 %1147 }
 0x3bd   : > { %v1014_v58 = vpop.f32.mrf.mxu2 }
 0x3be   : > { %v1015_v59 = vadd.f32 %v1014_v58, %v4109_v57 }
 0x3c0   : > { %v1018_v60 = vsel %vm998_vm8, %v1015_v59, -inf }
 0x3c1   : > { %1019 = vmax.xlane.f32.xlu2 %v1018_v60 }
 0x3c5   : > { %v1016_v61 = vpop.f32.mrf.mxu2 }
 0x434   : > { %v1020_v62 = vpop.xlane.xlu2 %1019 }
 0x435   : > { %v1021_v63 = vsub.f32 %v1015_v59, %v1020_v62 }
 0x437   : > { %v1022_v0 = vmul.f32 1.442695, %v1021_v63 }
 0x439   : > { %3640 = vpow2.f32 %v1022_v0 }
 0x43f   : > { %v3641_v2 = vpop.eup %3640 }
 0x440   : > { %v1024_v3 = vsel %vm998_vm8, %v3641_v2, 0.0 }
 0x441   : > { %1025 = vadd.xlane.f32.xlu2 %v1024_v3 }
 0x4b4   : > { %v1026_v5 = vpop.xlane.xlu2 %1025 }
 0x4b5   : > { %3642 = vrcp.f32 %v1026_v5 }
 0x4bb   : > { %v3643_v8 = vpop.eup %3642 }
 0x4bc   : > { %v1028_v9 = vmul.f32 %v3643_v8, %v3641_v2 }
 0x4be   : > { %v1029_v11 = vmul.f32 1.2, %v1028_v9 }
 0x4c0   : > { %v1030_v12 = vsel %vm4118_vm11, %v1029_v11, %v1028_v9 }
 0x4c1   : > { %v1031_v13 = vsel %vm998_vm8, %v1030_v12, 0.0 }
 0x4c2   : > { %1032 = vadd.xlane.f32.xlu2 %v1031_v13 }
 0x4da   : > { %1050 = vrot.lane.b32.xlu2 %v4091_v52, %s4778_s30  ;;  %s4779_s30 = smov 56  }
 0x4e2   : > { %1149 = vrot.lane.b32.xlu2 %v4091_v52, %s4786_s27  ;;  %s4855_s27 = smov 112  }
 0x4ea   : > { %1223 = vrot.lane.b32.xlu2 %v4091_v52, %s4788_s6  ;;  %s4863_s6 = smov 88  }
 0x535   : > { %v1033_v14 = vpop.xlane.xlu2 %1032 }
 0x536   : > { %3644 = vrcp.f32 %v1033_v14  ;;  %v1045_v23 = vand.u32 2147483648, %v1033_v14  ;;  %v1043_v26 = vand.u32 2147483647, %v1033_v14  ;;  %vm1039_vm13 = vweird.f32 %v1033_v14 }
 0x538   : > { %v1046_v29 = vor.u32 1.1754944e-38, %v1045_v23  ;;  %vm1044_vm15 = vcmp.eq.f32.partialorder %v1043_v26, 8.507059e+37 }
 0x53c   : > { %v3645_v17 = vpop.eup %3644 }
 0x53d   : > { %v1035_v18 = vmul.f32 %v3645_v17, %v1033_v14  ;;  %v1051_v19 = vpop.permute.xlu2 %1050  ;;  %vm1040_vm12 = vweird.f32 %v3645_v17 }
 0x53e   : > { %v1056_v20 = vsel %vm883_vm0, %v1051_v19, 0  ;;  %vm1041_vm14 = vmor %vm1039_vm13, %vm1040_vm12 }
 0x53f   : > { %v1036_v21 = vsub.f32 1.0, %v1035_v18  ;;  %1065 = vmatpush.bf16.msra.mxu3 %v1056_v20 }
 0x541   : > { %v1037_v24 = vmul.f32 %v3645_v17, %v1036_v21 }
 0x543   : > { %1088 = vmatpush.bf16.xpose.msrb.mxu3 %v1079_v22  ;;  %v1038_v28 = vadd.f32 %v3645_v17, %v1037_v24 }
 0x545   : > { %v1150_v30 = vpop.permute.xlu2 %1149  ;;  %v1042_v31 = vsel %vm1041_vm14, %v3645_v17, %v1038_v28 }
 0x546   : > { %v1155_v32 = vsel %vm998_vm8, %v1150_v30, 0  ;;  %v1047_v33 = vsel %vm1044_vm15, %v1046_v29, %v1042_v31  ;;  %vm1312_vm15 = vcmask 130048  }
 0x547   : > { %1164 = vmatpush.bf16.xpose.msrb.mxu2 %v1155_v32  ;;  %v1048_v34 = vmul.f32 %v1047_v33, %v1030_v12 }
 0x549   : > { %v1049_v36 = vpack.c.bf16 %v1048_v34, %v1048_v34 }
 0x54b   : > { %3254 = vmatmul.msk.bf16.vlgmr.msra.gmra.mxu3 %vm998_vm8, %v1049_v36 }
 0x54c   : > { %1240 = vmatpush.bf16.xpose.msra.mxu3 %v1231_v37 }
 0x54d   : > { %v1224_v39 = vpop.permute.xlu2 %1223 }
 0x54e   : > { %3257 = vmatmul.msk.bf16.vlgmr.msrb.gmra.mxu2 %vm998_vm8, %v1148_v38 }
 0x55b   : > { %3255 = vmatmul.msk.bf16.vlgmr.msrb.gmra.mxu3 %vm998_vm8, %v1072_v27 }
 0x56b   : > { %3259 = vmatmul.msk.bf16.vlgmr.msra.gmra.mxu3 %vm998_vm8, %v1224_v39 }
 0x5ce   : > { %v4139_v40 = vpop.f32.mrf.mxu3 }
 0x5d1   : > { %v1166_v41 = vpop.f32.mrf.mxu2 }
 0x5d2   : > { %v1167_v43 = vadd.f32 %v1166_v41, %v4109_v57 }
 0x5d4   : > { %v1170_v44 = vsel %vm998_vm8, %v1167_v43, -inf }
 0x5d5   : > { %1171 = vmax.xlane.f32.xlu2 %v1170_v44 }
 0x5d6   : > { %v1069_v46 = vpop.f32.mrf.mxu3 }
 0x5d9   : > { %v1168_v47 = vpop.f32.mrf.mxu2 }
 0x5de   : > { %v1090_v48 = vpop.f32.mrf.mxu3 }
 0x5df   : > { %v1091_v49 = vadd.f32 %v1090_v48, %v4109_v57 }
 0x5e1   : > { %v1094_v50 = vsel %vm998_vm8, %v1091_v49, -inf }
 0x5e2   : > { %1095 = vmax.xlane.f32.xlu1 %v1094_v50 }
 0x5e6   : > { %v1092_v51 = vpop.f32.mrf.mxu3 }
 0x5ee   : > { %v1242_v53 = vpop.f32.mrf.mxu3 }
 0x5ef   : > { %v1243_v54 = vadd.f32 %v1242_v53, %v4109_v57 }
 0x5f1   : > { %v1246_v55 = vsel %vm998_vm8, %v1243_v54, -inf }
 0x5f2   : > { %1247 = vmax.xlane.f32.xlu0 %v1246_v55 }
 0x5f6   : > { %v1244_v56 = vpop.f32.mrf.mxu3 }
 0x648   : > { %v1172_v58 = vpop.xlane.xlu2 %1171 }
 0x649   : > { %v1173_v59 = vsub.f32 %v1167_v43, %v1172_v58 }
 0x64b   : > { %v1174_v60 = vmul.f32 1.442695, %v1173_v59 }
 0x64d   : > { %3646 = vpow2.f32 %v1174_v60 }
 0x653   : > { %v3647_v61 = vpop.eup %3646 }
 0x654   : > { %v1176_v62 = vsel %vm998_vm8, %v3647_v61, 0.0 }
 0x655   : > { %1177 = vadd.xlane.f32.xlu2 %v1176_v62  ;;  %v1096_v63 = vpop.xlane.xlu1 %1095 }
 0x656   : > { %v1097_v0 = vsub.f32 %v1091_v49, %v1096_v63 }
 0x658   : > { %v1098_v2 = vmul.f32 1.442695, %v1097_v0 }
 0x65a   : > { %3648 = vpow2.f32 %v1098_v2 }
 0x660   : > { %v3649_v3 = vpop.eup %3648 }
 0x661   : > { %v1100_v4 = vsel %vm998_vm8, %v3649_v3, 0.0 }
 0x662   : > { %1101 = vadd.xlane.f32.xlu1 %v1100_v4 }
 0x665   : > { %v1248_v5 = vpop.xlane.xlu0 %1247 }
 0x666   : > { %v1249_v6 = vsub.f32 %v1243_v54, %v1248_v5 }
 0x668   : > { %v1250_v7 = vmul.f32 1.442695, %v1249_v6 }
 0x66a   : > { %3650 = vpow2.f32 %v1250_v7 }
 0x670   : > { %v3651_v8 = vpop.eup %3650 }
 0x671   : > { %v1252_v9 = vsel %vm998_vm8, %v3651_v8, 0.0 }
 0x672   : > { %1253 = vadd.xlane.f32.xlu1 %v1252_v9 }
 0x68b   : > { %1126 = vrot.lane.b32.xlu1 %v4091_v52, %s4779_s30  ;;  %s4782_s30 = smov 48  }
 0x6c8   : > { %v1178_v11 = vpop.xlane.xlu2 %1177 }
 0x6c9   : > { %3652 = vrcp.f32 %v1178_v11 }
 0x6cf   : > { %v3653_v12 = vpop.eup %3652 }
 0x6d0   : > { %v1180_v13 = vmul.f32 %v3653_v12, %v3647_v61 }
 0x6d2   : > { %v1181_v14 = vmul.f32 1.2, %v1180_v13 }
 0x6d4   : > { %v4154_v15 = vsel %vm4118_vm11, %v1181_v14, %v1180_v13 }
 0x6d5   : > { %v1102_v17 = vpop.xlane.xlu1 %1101  ;;  %v1183_v18 = vsel %vm998_vm8, %v4154_v15, 0.0 }
 0x6d6   : > { %3654 = vrcp.f32 %v1102_v17  ;;  %1184 = vadd.xlane.f32.xlu2 %v1183_v18 }
 0x6dc   : > { %v3655_v19 = vpop.eup %3654 }
 0x6dd   : > { %v1104_v20 = vmul.f32 %v3655_v19, %v3649_v3 }
 0x6df   : > { %v1105_v21 = vmul.f32 1.2, %v1104_v20 }
 0x6e1   : > { %v1106_v22 = vsel %vm4118_vm11, %v1105_v21, %v1104_v20 }
 0x6e2   : > { %v1107_v23 = vsel %vm998_vm8, %v1106_v22, 0.0 }
 0x6e3   : > { %1108 = vadd.xlane.f32.xlu0 %v1107_v23 }
 0x6e5   : > { %v1254_v24 = vpop.xlane.xlu1 %1253 }
 0x6e6   : > { %3656 = vrcp.f32 %v1254_v24  ;;  %v3518_v24 = vld [vmem:[%s4850_s8 + $0x8] sm:$0xff]  ;;  %s4854_s8 = smov 120  }
 0x6e7   : > { %1341 = vmatpush.bf16.msra.mxu2 %v3518_v24 }
 0x6ec   : > { %v3657_v26 = vpop.eup %3656 }
 0x6ed   : > { %v1256_v27 = vmul.f32 %v3657_v26, %v3651_v8  ;;  %v3517_v26 = vld [vmem:[%s4851_s2] sm:$0xff] }
 0x6ee   : > { %1202 = vrot.lane.b32.xlu2 %v4091_v52, %s4782_s30  ;;  %s4799_s30 = smov 8   ;;  %1342 = vmatpush.bf16.msra.mxu2 %v3517_v26 }
 0x6ef   : > { %v1257_v28 = vmul.f32 1.2, %v1256_v27 }
 0x6f1   : > { %v4165_v29 = vsel %vm4118_vm11, %v1257_v28, %v1256_v27 }
 0x6f2   : > { %v1259_v30 = vsel %vm998_vm8, %v4165_v29, 0.0 }
 0x6f3   : > { %1260 = vadd.xlane.f32.xlu0 %v1259_v30 }
 0x6fd   : > { %v1127_v31 = vpop.permute.xlu1 %1126 }
 0x6fe   : > { %v1132_v32 = vsel %vm883_vm0, %v1127_v31, 0 }
 0x6ff   : > { %1141 = vmatpush.bf16.msrb.mxu1 %v1132_v32 }
 0x707   : > { %1278 = vrot.lane.b32.xlu0 %v4091_v52, %s4783_s10  ;;  %s4797_s10 = smov 16  }
 0x749   : > { %v1185_v33 = vpop.xlane.xlu2 %1184 }
 0x74a   : > { %v1197_v59 = vand.u32 2147483648, %v1185_v33  ;;  %vm1191_vm7 = vweird.f32 %v1185_v33  ;;  %v1195_v60 = vand.u32 2147483647, %v1185_v33 }
 0x74c   : > { %v1198_v63 = vor.u32 1.1754944e-38, %v1197_v59  ;;  %vm1196_vm10 = vcmp.eq.f32.partialorder %v1195_v60, 8.507059e+37 }
 0x751   : > { %v1203_v34 = vpop.permute.xlu2 %1202 }
 0x752   : > { %v1208_v35 = vsel %vm883_vm0, %v1203_v34, 0  ;;  %v3618_v34 = vld [vmem:[%s4742_s12] ss:$0 sm:$0xff] }
 0x753   : > { %1217 = vmatpush.bf16.msra.mxu1 %v1208_v35 }
 0x756   : > { %v1109_v10 = vpop.xlane.xlu0 %1108 }
 0x757   : > { %3658 = vrcp.f32 %v1109_v10  ;;  %v1121_v44 = vand.u32 2147483648, %v1109_v10  ;;  %v1119_v46 = vand.u32 2147483647, %v1109_v10  ;;  %vm1115_vm2 = vweird.f32 %v1109_v10 }
 0x758   : > { %3660 = vrcp.f32 %v1185_v33 }
 0x759   : > { %v1122_v48 = vor.u32 1.1754944e-38, %v1121_v44  ;;  %vm1120_vm5 = vcmp.eq.f32.partialorder %v1119_v46, 8.507059e+37 }
 0x75d   : > { %v3659_v36 = vpop.eup %3658 }
 0x75e   : > { %v3661_v37 = vpop.eup %3660  ;;  %v1111_v38 = vmul.f32 %v3659_v36, %v1109_v10  ;;  %vm1116_vm1 = vweird.f32 %v3659_v36 }
 0x75f   : > { %v1187_v41 = vmul.f32 %v3661_v37, %v1185_v33  ;;  %vm1117_vm4 = vmor %vm1115_vm2, %vm1116_vm1  ;;  %vm1192_vm6 = vweird.f32 %v3661_v37  ;;  %vm1314_vm1 = vcmask 195584  }
 0x760   : > { %v1112_v39 = vsub.f32 1.0, %v1111_v38  ;;  %vm1193_vm9 = vmor %vm1191_vm7, %vm1192_vm6  ;;  %v3522_v38 = vld [vmem:[%s4745_s15 + $0x8] sm:$0xff]  ;;  %vm1482_vm6 = vcmask 97280  }
 0x761   : > { %v1188_v52 = vsub.f32 1.0, %v1187_v41  ;;  %1440 = vmatpush.bf16.msrb.mxu3 %v3522_v38 }
 0x762   : > { %v1113_v43 = vmul.f32 %v3659_v36, %v1112_v39 }
 0x763   : > { %v1189_v53 = vmul.f32 %v3661_v37, %v1188_v52 }
 0x764   : > { %v1114_v47 = vadd.f32 %v3659_v36, %v1113_v43 }
 0x765   : > { %v1190_v56 = vadd.f32 %v3661_v37, %v1189_v53 }
 0x766   : > { %v1261_v49 = vpop.xlane.xlu0 %1260  ;;  %v1118_v50 = vsel %vm1117_vm4, %v3659_v36, %v1114_v47 }
 0x767   : > { %3662 = vrcp.f32 %v1261_v49  ;;  %v1123_v51 = vsel %vm1120_vm5, %v1122_v48, %v1118_v50  ;;  %v1194_v61 = vsel %vm1193_vm9, %v3661_v37, %v1190_v56  ;;  %v1273_v9 = vand.u32 2147483648, %v1261_v49  ;;  %v3519_v50 = vld [vmem:[%s4743_s13] sm:$0xff] }
 0x768   : > { %v1124_v54 = vmul.f32 %v1123_v51, %v1106_v22  ;;  %v1199_v0 = vsel %vm1196_vm10, %v1198_v63, %v1194_v61  ;;  %vm1267_vm12 = vweird.f32 %v1261_v49  ;;  %v1271_v11 = vand.u32 2147483647, %v1261_v49 }
 0x769   : > { %v1200_v3 = vmul.f32 %v1199_v0, %v4154_v15  ;;  %v1274_v13 = vor.u32 1.1754944e-38, %v1273_v9 }
 0x76a   : > { %v1125_v55 = vpack.c.bf16 %v1124_v54, %v1124_v54  ;;  %vm1272_vm14 = vcmp.eq.f32.partialorder %v1271_v11, 8.507059e+37 }
 0x76b   : > { %v1201_v7 = vpack.c.bf16 %v1200_v3, %v1200_v3 }
 0x76c   : > { %3256 = vmatmul.msk.bf16.vlgmr.msrb.gmra.mxu1 %vm998_vm8, %v1125_v55  ;;  %v3619_v55 = vld [vmem:[%s4853_s16] ss:$0 sm:$0xff]  ;;  %s4877_s16 = sld [smem:[#allocation27_spill]] }
 0x76d   : > { %v3663_v58 = vpop.eup %3662 }
 0x76e   : > { %v1263_v62 = vmul.f32 %v3663_v58, %v1261_v49  ;;  %vm1268_vm11 = vweird.f32 %v3663_v58  ;;  %v3520_v49 = vld [vmem:[%s4743_s13 + $0x8] sm:$0xff] }
 0x76f   : > { %vm1269_vm13 = vmor %vm1267_vm12, %vm1268_vm11  ;;  %1403 = vmatpush.bf16.msrb.mxu0 %v3520_v49 }
 0x770   : > { %v1264_v2 = vsub.f32 1.0, %v1263_v62 }
 0x772   : > { %v1265_v4 = vmul.f32 %v3663_v58, %v1264_v2 }
 0x773   : > { %1404 = vmatpush.bf16.msrb.mxu0 %v3519_v50 }
 0x774   : > { %v1266_v8 = vadd.f32 %v3663_v58, %v1265_v4 }
 0x776   : > { %v1270_v12 = vsel %vm1269_vm13, %v3663_v58, %v1266_v8 }
 0x777   : > { %v1275_v14 = vsel %vm1272_vm14, %v1274_v13, %v1270_v12 }
 0x778   : > { %v1276_v15 = vmul.f32 %v1275_v14, %v4165_v29  ;;  %v3620_v14 = vld [vmem:[%s4856_s14] ss:$0 sm:$0xff] }
 0x779   : > { %v1279_v5 = vpop.permute.xlu0 %1278 }
 0x77a   : > { %v1284_v6 = vsel %vm883_vm0, %v1279_v5, 0  ;;  %v1277_v17 = vpack.c.bf16 %v1276_v15, %v1276_v15 }
 0x77b   : > { %1293 = vmatpush.bf16.msrb.mxu1 %v1284_v6 }
 0x77c   : > { %3258 = vmatmul.msk.bf16.vlgmr.msra.gmra.mxu1 %vm998_vm8, %v1201_v7 }
 0x78c   : > { %3260 = vmatmul.msk.bf16.vlgmr.msrb.gmra.mxu1 %vm998_vm8, %v1277_v17 }
 0x7e9   : > { %v1143_v18 = vpop.f32.mrf.mxu1 }
 0x7ea   : > { %1300 = vrot.lane.b32.xlu1 %v1143_v18, %s4799_s30  ;;  %s4861_s30 = smov 80  }
 0x7f1   : > { %v1145_v19 = vpop.f32.mrf.mxu1 }
 0x7f9   : > { %v1219_v20 = vpop.f32.mrf.mxu1 }
 0x7fa   : > { %1304 = vrot.lane.b32.xlu2 %v1219_v20, %s4797_s10 }
 0x801   : > { %v1221_v21 = vpop.f32.mrf.mxu1 }
 0x809   : > { %v1295_v22 = vpop.f32.mrf.mxu1 }
 0x80a   : > { %1308 = vrot.lane.b32.xlu0 %v1295_v22, %s4795_s0  ;;  %s4852_s0 = sld [smem:[#allocation16_spill]]  ;;  %v3614_v22 = vld [vmem:[%s4043_s7] ss:$0 sm:$0xff]  ;;  %s4872_s7 = smov 64  }
 0x810   : > { %s844_s10 = scalar_lea.vmem %s4852_s0, %s3512_s3  ;;  %s4862_s3 = smov 96  }
 0x811   : > { %v1297_v23 = vpop.f32.mrf.mxu1  ;;  %v900_v39 = vld [vmem:[%s844_s10] sm:$0xff]  ;;  %v901_v41 = vld [vmem:[%s844_s10 + $0x8] sm:$0xf]  ;;  %s4858_s10 = sld [smem:[#allocation19_spill]]  ;;  %s4866_s0 = smov 16  }
 0x812   : > { %v4211_v43 = vpack.c.bf16 %v901_v41, %v900_v39 }
 0x854   : > { %v1305_v29 = vpop.permute.xlu2 %1304 }
 0x85c   : > { %v1301_v27 = vpop.permute.xlu1 %1300 }
 0x85d   : > { %v1311_v28 = vsel %vm998_vm8, %v4139_v40, %v1301_v27 }
 0x85e   : > { %v1313_v30 = vsel %vm1312_vm15, %v1311_v28, %v1305_v29 }
 0x87c   : > { %v1309_v31 = vpop.permute.xlu0 %1308 }
 0x87d   : > { %v1315_v32 = vsel %vm1314_vm1, %v1313_v30, %v1309_v31 }
 0x87e   : > { %v1316_v33 = vpack.c.bf16 %v1315_v32, %v1315_v32 }
 0x880   : > { %3269 = vmatmul.msk.bf16.vlgmr.msra.gmra.mxu2 %vm909_vm3, %v1316_v33 }
 0x903   : > { %v1344_v35 = vpop.f32.mrf.mxu2 }
 0x904   : > { %v1345_v10 = vadd.f32 %v3618_v34, %v1344_v35 }
 0x906   : > { %v4197_v40 = vadd.f32 %v1345_v10, %v4059_v16  ;;  %v3521_v16 = vld [vmem:[%s4745_s15] sm:$0xff] }
 0x907   : > { %1441 = vmatpush.bf16.msrb.mxu3 %v3521_v16 }
 0x908   : > { %v1349_v36 = vsel %vm909_vm3, %v4197_v40, 0.0 }
 0x909   : > { %1350 = vadd.xlane.f32.xlu1 %v1349_v36 }
 0x90a   : > { %3287 = vmatmul.msk.bf16.vlgmr.msrb.gmra.mxu3 %vm909_vm3, %v4211_v43 }
 0x90b   : > { %v1346_v37 = vpop.f32.mrf.mxu2 }
 0x97c   : > { %v1351_v44 = vpop.xlane.xlu1 %1350 }
 0x97d   : > { %v1352_v46 = vmul.f32 %v1351_v44, %v4063_v25 }
 0x97f   : > { %v1353_v47 = vsub.f32 %v4197_v40, %v1352_v46 }
 0x981   : > { %v1354_v52 = vmul.f32 %v1353_v47, %v1353_v47 }
 0x983   : > { %v1355_v48 = vsel %vm909_vm3, %v1354_v52, 0.0 }
 0x984   : > { %1356 = vadd.xlane.f32.xlu2 %v1355_v48 }
 0x98d   : > { %v1443_v51 = vpop.f32.mrf.mxu3 }
 0x98e   : > { %v1444_v58 = vadd.f32 %v3619_v55, %v1443_v51 }
 0x995   : > { %v1445_v59 = vpop.f32.mrf.mxu3 }
 0x996   : > { %v1446_v60 = vadd.f32 %v3619_v55, %v1445_v59 }
 0x998   : > { %v4228_v61 = vpack.c.bf16 %v1446_v60, %v1444_v58 }
 0x99a   : > { %1546 = vrot.lane.b32.xlu0 %v4228_v61, %s4854_s8  ;;  %v1467_v0 = vsel %vm998_vm8, %v4228_v61, 0 }
 0x99b   : > { %1476 = vmatpush.bf16.xpose.msra.mxu1 %v1467_v0 }
 0x9a2   : > { %1627 = vrot.lane.b32.xlu0 %v4228_v61, %s4855_s27 }
 0x9f7   : > { %v1357_v53 = vpop.xlane.xlu2 %1356 }
 0x9f8   : > { %v1358_v54 = vmul.f32 %v1357_v53, %v4063_v25 }
 0x9fa   : > { %v1359_v56 = vadd.f32 1e-05, %v1358_v54 }
 0x9fc   : > { %3664 = vrsqrt.f32 %v1359_v56  ;;  %vm1366_vm4 = vweird.f32 %v1359_v56 }
 0xa02   : > { %v3665_v62 = vpop.eup %3664 }
 0xa03   : > { %v1361_v63 = vmul.f32 %v3665_v62, %v1359_v56  ;;  %vm1367_vm2 = vweird.f32 %v3665_v62 }
 0xa04   : > { %vm1368_vm5 = vmor %vm1366_vm4, %vm1367_vm2 }
 0xa05   : > { %v1362_v2 = vmul.f32 %v3665_v62, %v1361_v63 }
 0xa07   : > { %v1363_v3 = vmul.f32 0.5, %v1362_v2 }
 0xa09   : > { %v1364_v4 = vsub.f32 1.5, %v1363_v3 }
 0xa0b   : > { %v1365_v5 = vmul.f32 %v3665_v62, %v1364_v4 }
 0xa0c   : > { %v1547_v12 = vpop.permute.xlu0 %1546 }
 0xa0d   : > { %v1369_v6 = vsel %vm1368_vm5, %v3665_v62, %v1365_v5  ;;  %v1552_v13 = vsel %vm998_vm8, %v1547_v12, 0 }
 0xa0e   : > { %v1370_v7 = vmul.f32 %v1369_v6, %v1353_v47  ;;  %1561 = vmatpush.bf16.xpose.msra.mxu0 %v1552_v13  ;;  %v1448_v13 = vld [vmem:[%s4858_s10] sm:$0x1]  ;;  %s4873_s10 = smov 56  }
 0xa0f   : > { %vm1454_vm7 = vcmp.gt.f32.partialorder %v1448_v13, 0.0 }
 0xa10   : > { %v1371_v8 = vmul.f32 %v4078_v42, %v1370_v7 }
 0xa12   : > { %v1372_v9 = vadd.f32 %v4083_v45, %v1371_v8 }
 0xa14   : > { %v1373_v11 = vpack.c.bf16 %v1372_v9, %v1372_v9  ;;  %v1628_v15 = vpop.permute.xlu0 %1627 }
 0xa15   : > { %v1633_v17 = vsel %vm998_vm8, %v1628_v15, 0  ;;  %v1455_v15 = vsel %vm1454_vm7, 1, %v3821_v1 }
 0xa16   : > { %3278 = vmatmul.msk.bf16.vlgmr.msrb.gmra.mxu0 %vm909_vm3, %v1373_v11  ;;  %1642 = vmatpush.bf16.xpose.msrb.mxu1 %v1633_v17  ;;  %v1456_v17 = vperm.slane %v1455_v15, 0 }
 0xa18   : > { %vm4269_vm9 = vcmp.eq.s32.totalorder %v1456_v17, 1 }
 0xa93   : > { %v1406_v18 = vpop.f32.mrf.mxu0 }
 0xa94   : > { %v1407_v42 = vadd.f32 %v3620_v14, %v1406_v18 }
 0xa96   : > { %v1458_v19 = vpack.c.bf16 %v1407_v42, %v1407_v42 }
 0xa98   : > { %1706 = vrot.lane.b32.xlu1 %v1458_v19, %s4857_s4  ;;  %1544 = vrot.lane.b32.xlu0 %v1458_v19, %s4854_s8 }
 0xa99   : > { %3288 = vmatmul.msk.bf16.vlgmr.msra.gmra.mxu1 %vm998_vm8, %v1458_v19 }
 0xa9b   : > { %v1408_v45 = vpop.f32.mrf.mxu0 }
 0xaa0   : > { %1708 = vrot.lane.b32.xlu0 %v4228_v61, %s4857_s4 }
 0xaa8   : > { %1625 = vrot.lane.b32.xlu0 %v1458_v19, %s4855_s27 }
 0xb0a   : > { %v1545_v20 = vpop.permute.xlu0 %1544  ;;  %v1707_v28 = vpop.permute.xlu1 %1706 }
 0xb0b   : > { %3290 = vmatmul.msk.bf16.vlgmr.msra.gmra.mxu0 %vm998_vm8, %v1545_v20 }
 0xb12   : > { %v1709_v21 = vpop.permute.xlu0 %1708 }
 0xb13   : > { %v1714_v23 = vsel %vm998_vm8, %v1709_v21, 0 }
 0xb14   : > { %1723 = vmatpush.bf16.xpose.msrb.mxu0 %v1714_v23 }
 0xb16   : > { %v1478_v24 = vpop.f32.mrf.mxu1 }
 0xb17   : > { %v1479_v26 = vadd.f32 %v3614_v22, %v1478_v24 }
 0xb19   : > { %v1483_v27 = vsel %vm1482_vm6, %v1479_v26, -inf }
 0xb1a   : > { %1484 = vmax.xlane.f32.xlu2 %v1483_v27  ;;  %v1626_v29 = vpop.permute.xlu0 %1625 }
 0xb1b   : > { %3292 = vmatmul.msk.bf16.vlgmr.msrb.gmra.mxu1 %vm998_vm8, %v1626_v29  ;;  %3294 = vmatmul.msk.bf16.vlgmr.msrb.gmra.mxu0 %vm998_vm8, %v1707_v28 }
 0xb1e   : > { %v1480_v30 = vpop.f32.mrf.mxu1 }
 0xb88   : > { %v1563_v31 = vpop.f32.mrf.mxu0 }
 0xb89   : > { %v1564_v32 = vadd.f32 %v3614_v22, %v1563_v31 }
 0xb8b   : > { %v1567_v33 = vsel %vm1482_vm6, %v1564_v32, -inf }
 0xb8c   : > { %1568 = vmax.xlane.f32.xlu0 %v1567_v33 }
 0xb8d   : > { %v1485_v34 = vpop.xlane.xlu2 %1484 }
 0xb8e   : > { %v1486_v35 = vsub.f32 %v1479_v26, %v1485_v34 }
 0xb90   : > { %v1487_v10 = vmul.f32 1.442695, %v1486_v35  ;;  %v1565_v36 = vpop.f32.mrf.mxu0 }
 0xb92   : > { %3666 = vpow2.f32 %v1487_v10 }
 0xb98   : > { %v3667_v37 = vpop.eup %3666  ;;  %v1644_v38 = vpop.f32.mrf.mxu1 }
 0xb99   : > { %v1725_v39 = vpop.f32.mrf.mxu0  ;;  %v1645_v41 = vadd.f32 %v3614_v22, %v1644_v38  ;;  %v1489_v16 = vsel %vm1482_vm6, %v3667_v37, 0.0 }
 0xb9a   : > { %1490 = vadd.xlane.f32.xlu1 %v1489_v16  ;;  %v1726_v46 = vadd.f32 %v3614_v22, %v1725_v39 }
 0xb9b   : > { %v1648_v44 = vsel %vm1482_vm6, %v1645_v41, -inf }
 0xb9c   : > { %1649 = vmax.xlane.f32.xlu2 %v1648_v44  ;;  %v1729_v48 = vsel %vm1482_vm6, %v1726_v46, -inf }
 0xba0   : > { %v1646_v47 = vpop.f32.mrf.mxu1 }
 0xba1   : > { %v1727_v52 = vpop.f32.mrf.mxu0 }
 0xba4   : > { %1730 = vmax.xlane.f32.xlu2 %v1729_v48 }
 0xbff   : > { %v1569_v49 = vpop.xlane.xlu0 %1568 }
 0xc00   : > { %v1570_v50 = vsub.f32 %v1564_v32, %v1569_v49 }
 0xc02   : > { %v1571_v51 = vmul.f32 1.442695, %v1570_v50 }
 0xc04   : > { %3668 = vpow2.f32 %v1571_v51 }
 0xc0a   : > { %v3669_v53 = vpop.eup %3668 }
 0xc0b   : > { %v1573_v54 = vsel %vm1482_vm6, %v3669_v53, 0.0 }
 0xc0c   : > { %1574 = vadd.xlane.f32.xlu2 %v1573_v54 }
 0xc0d   : > { %v1491_v55 = vpop.xlane.xlu1 %1490 }
 0xc0e   : > { %3670 = vrcp.f32 %v1491_v55 }
 0xc0f   : > { %v1650_v56 = vpop.xlane.xlu2 %1649 }
 0xc10   : > { %v1651_v58 = vsub.f32 %v1645_v41, %v1650_v56 }
 0xc12   : > { %v1652_v59 = vmul.f32 1.442695, %v1651_v58 }
 0xc14   : > { %v3671_v60 = vpop.eup %3670  ;;  %3672 = vpow2.f32 %v1652_v59 }
 0xc15   : > { %v1493_v62 = vmul.f32 %v3671_v60, %v3667_v37 }
 0xc17   : > { %v1494_v63 = vsel %vm1482_vm6, %v1493_v62, -inf  ;;  %v1731_v0 = vpop.xlane.xlu2 %1730  ;;  %v1499_v22 = vmul.f32 1.2, %v1493_v62 }
 0xc18   : > { %1495 = vmax.xlane.f32.xlu0 %v1494_v63  ;;  %v1732_v2 = vsub.f32 %v1726_v46, %v1731_v0 }
 0xc1a   : > { %v3673_v3 = vpop.eup %3672  ;;  %v1733_v4 = vmul.f32 1.442695, %v1732_v2 }
 0xc1b   : > { %v1654_v5 = vsel %vm1482_vm6, %v3673_v3, 0.0 }
 0xc1c   : > { %3674 = vpow2.f32 %v1733_v4  ;;  %1655 = vadd.xlane.f32.xlu2 %v1654_v5 }
 0xc22   : > { %v3675_v6 = vpop.eup %3674 }
 0xc23   : > { %v1735_v7 = vsel %vm1482_vm6, %v3675_v6, 0.0 }
 0xc24   : > { %1736 = vadd.xlane.f32.xlu2 %v1735_v7 }
 0xc7f   : > { %v1575_v8 = vpop.xlane.xlu2 %1574 }
 0xc80   : > { %3676 = vrcp.f32 %v1575_v8 }
 0xc86   : > { %v3677_v9 = vpop.eup %3676 }
 0xc87   : > { %v1577_v11 = vmul.f32 %v3677_v9, %v3669_v53 }
 0xc89   : > { %v1578_v12 = vsel %vm1482_vm6, %v1577_v11, -inf  ;;  %v1583_v30 = vmul.f32 1.2, %v1577_v11 }
 0xc8a   : > { %1579 = vmax.xlane.f32.xlu2 %v1578_v12 }
 0xc8b   : > { %v1496_v18 = vpop.xlane.xlu0 %1495 }
 0xc8c   : > { %vm1497_vm10 = vcmp.ge.f32.partialorder %v1493_v62, %v1496_v18 }
 0xc8d   : > { %vm1498_vm11 = vmor %vm1497_vm10, %vm4269_vm9 }
 0xc8e   : > { %v4276_v24 = vsel %vm1498_vm11, %v1499_v22, %v1493_v62 }
 0xc8f   : > { %v1656_v14 = vpop.xlane.xlu2 %1655  ;;  %v1501_v27 = vsel %vm1482_vm6, %v4276_v24, 0.0 }
 0xc90   : > { %3678 = vrcp.f32 %v1656_v14 }
 0xc96   : > { %v3679_v42 = vpop.eup %3678 }
 0xc97   : > { %v1658_v19 = vmul.f32 %v3679_v42, %v3673_v3  ;;  %v1737_v45 = vpop.xlane.xlu2 %1736 }
 0xc98   : > { %3680 = vrcp.f32 %v1737_v45 }
 0xc99   : > { %v1659_v21 = vsel %vm1482_vm6, %v1658_v19, -inf  ;;  %v1664_v34 = vmul.f32 1.2, %v1658_v19 }
 0xc9a   : > { %1660 = vmax.xlane.f32.xlu0 %v1659_v21 }
 0xc9e   : > { %v3681_v23 = vpop.eup %3680 }
 0xc9f   : > { %v1739_v26 = vmul.f32 %v3681_v23, %v3675_v6 }
 0xca1   : > { %v1740_v28 = vsel %vm1482_vm6, %v1739_v26, -inf  ;;  %v1745_v37 = vmul.f32 1.2, %v1739_v26 }
 0xca2   : > { %1502 = vadd.xlane.f32.xlu0 %v1501_v27  ;;  %1741 = vmax.xlane.f32.xlu2 %v1740_v28 }
 0xcb6   : > { %1685 = vrot.lane.b32.xlu0 %v4228_v61, %s4861_s30 }
 0xcfd   : > { %v1580_v29 = vpop.xlane.xlu2 %1579 }
 0xcfe   : > { %vm1581_vm12 = vcmp.ge.f32.partialorder %v1577_v11, %v1580_v29 }
 0xcff   : > { %vm1582_vm13 = vmor %vm1581_vm12, %vm4269_vm9 }
 0xd00   : > { %v1584_v31 = vsel %vm1582_vm13, %v1583_v30, %v1577_v11 }
 0xd01   : > { %v1585_v32 = vsel %vm1482_vm6, %v1584_v31, 0.0 }
 0xd02   : > { %1586 = vadd.xlane.f32.xlu1 %v1585_v32 }
 0xd0d   : > { %v1661_v33 = vpop.xlane.xlu0 %1660 }
 0xd0e   : > { %vm1662_vm14 = vcmp.ge.f32.partialorder %v1658_v19, %v1661_v33 }
 0xd0f   : > { %vm1663_vm2 = vmor %vm1662_vm14, %vm4269_vm9 }
 0xd10   : > { %v4288_v35 = vsel %vm1663_vm2, %v1664_v34, %v1658_v19 }
 0xd11   : > { %v1666_v10 = vsel %vm1482_vm6, %v4288_v35, 0.0 }
 0xd12   : > { %1667 = vadd.xlane.f32.xlu2 %v1666_v10 }
 0xd15   : > { %v1742_v36 = vpop.xlane.xlu2 %1741  ;;  %v1503_v41 = vpop.xlane.xlu0 %1502 }
 0xd16   : > { %vm1743_vm4 = vcmp.ge.f32.partialorder %v1739_v26, %v1742_v36  ;;  %3682 = vrcp.f32 %v1503_v41  ;;  %vm1509_vm10 = vweird.f32 %v1503_v41  ;;  %v1515_v54 = vand.u32 2147483648, %v1503_v41 }
 0xd17   : > { %vm1744_vm5 = vmor %vm1743_vm4, %vm4269_vm9  ;;  %vm1526_vm4 = vcmask 1045504  }
 0xd18   : > { %v4294_v38 = vsel %vm1744_vm5, %v1745_v37, %v1739_v26  ;;  %v1516_v0 = vor.u32 1.1754944e-38, %v1515_v54 }
 0xd19   : > { %v1747_v39 = vsel %vm1482_vm6, %v4294_v38, 0.0 }
 0xd1a   : > { %1748 = vadd.xlane.f32.xlu0 %v1747_v39 }
 0xd1b   : > { %1521 = vrot.lane.b32.xlu1 %v4228_v61, %s4862_s3 }
 0xd1c   : > { %v3683_v16 = vpop.eup %3682 }
 0xd1d   : > { %v1505_v46 = vmul.f32 %v3683_v16, %v1503_v41  ;;  %vm1510_vm7 = vweird.f32 %v3683_v16 }
 0xd1e   : > { %vm1511_vm11 = vmor %vm1509_vm10, %vm1510_vm7 }
 0xd1f   : > { %v1506_v47 = vsub.f32 1.0, %v1505_v46 }
 0xd21   : > { %v1507_v49 = vmul.f32 %v3683_v16, %v1506_v47 }
 0xd23   : > { %v1508_v53 = vadd.f32 %v3683_v16, %v1507_v49 }
 0xd25   : > { %v1512_v60 = vsel %vm1511_vm11, %v3683_v16, %v1508_v53  ;;  %v3523_v53 = vld [vmem:[%s4868_s17] sm:$0xff] }
 0xd28   : > { %v1686_v62 = vpop.permute.xlu0 %1685 }
 0xd29   : > { %v1691_v15 = vsel %vm1526_vm4, %v1686_v62, 0  ;;  %v3621_v62 = vld [vmem:[%s4869_s18] ss:$0 sm:$0xff]  ;;  %s4887_s18 = sld [smem:[#allocation6_spill]] }
 0xd2a   : > { %1604 = vrot.lane.b32.xlu2 %v4228_v61, %s4863_s6 }
 0xd2e   : > { %1766 = vrot.lane.b32.xlu0 %v4228_v61, %s4864_s26  ;;  %v1513_v61 = vand.u32 2147483647, %v1503_v41 }
 0xd30   : > { %vm1514_vm14 = vcmp.eq.f32.partialorder %v1513_v61, 8.507059e+37 }
 0xd31   : > { %v1517_v3 = vsel %vm1514_vm14, %v1516_v0, %v1512_v60 }
 0xd32   : > { %v1518_v6 = vmul.f32 %v1517_v3, %v4276_v24 }
 0xd34   : > { %v1519_v18 = vpack.c.bf16 %v1518_v6, %v1518_v6 }
 0xd75   : > { %v1587_v44 = vpop.xlane.xlu1 %1586 }
 0xd76   : > { %3684 = vrcp.f32 %v1587_v44  ;;  %v1599_v56 = vand.u32 2147483648, %v1587_v44  ;;  %vm1593_vm12 = vweird.f32 %v1587_v44  ;;  %v1597_v58 = vand.u32 2147483647, %v1587_v44 }
 0xd78   : > { %v1600_v2 = vor.u32 1.1754944e-38, %v1599_v56  ;;  %vm1598_vm2 = vcmp.eq.f32.partialorder %v1597_v58, 8.507059e+37 }
 0xd7c   : > { %v3685_v52 = vpop.eup %3684 }
 0xd7d   : > { %v1589_v48 = vmul.f32 %v3685_v52, %v1587_v44  ;;  %vm1594_vm9 = vweird.f32 %v3685_v52 }
 0xd7e   : > { %vm1595_vm13 = vmor %vm1593_vm12, %vm1594_vm9 }
 0xd7f   : > { %v1590_v50 = vsub.f32 1.0, %v1589_v48 }
 0xd81   : > { %v1591_v51 = vmul.f32 %v3685_v52, %v1590_v50 }
 0xd83   : > { %v1592_v55 = vadd.f32 %v3685_v52, %v1591_v51  ;;  %v3524_v51 = vld [vmem:[%s4868_s17 + $0x8] sm:$0xff]  ;;  %s4876_s17 = sld [smem:[#allocation28_spill]] }
 0xd84   : > { %1827 = vmatpush.bf16.msra.mxu1 %v3524_v51 }
 0xd85   : > { %v1668_v59 = vpop.xlane.xlu2 %1667  ;;  %v1596_v63 = vsel %vm1595_vm13, %v3685_v52, %v1592_v55 }
 0xd86   : > { %3686 = vrcp.f32 %v1668_v59  ;;  %v1601_v4 = vsel %vm1598_vm2, %v1600_v2, %v1596_v63  ;;  %v1680_v20 = vand.u32 2147483648, %v1668_v59  ;;  %vm1674_vm7 = vweird.f32 %v1668_v59 }
 0xd87   : > { %v1602_v7 = vmul.f32 %v1601_v4, %v1584_v31  ;;  %v1678_v21 = vand.u32 2147483647, %v1668_v59 }
 0xd88   : > { %v1681_v26 = vor.u32 1.1754944e-38, %v1680_v20  ;;  %1828 = vmatpush.bf16.msra.mxu1 %v3523_v53  ;;  %v3530_v20 = vld [vmem:[%s4751_s21 + $0x18] sm:$0xff] }
 0xd89   : > { %v1603_v42 = vpack.c.bf16 %v1602_v7, %v1602_v7  ;;  %vm1679_vm10 = vcmp.eq.f32.partialorder %v1678_v21, 8.507059e+37 }
 0xd8c   : > { %v3687_v5 = vpop.eup %3686 }
 0xd8d   : > { %v1670_v8 = vmul.f32 %v3687_v5, %v1668_v59  ;;  %v1522_v9 = vpop.permute.xlu1 %1521  ;;  %v1605_v11 = vpop.permute.xlu2 %1604  ;;  %vm1675_vm5 = vweird.f32 %v3687_v5 }
 0xd8e   : > { %v1528_v12 = vsel %vm1526_vm4, %v1522_v9, 0  ;;  %v1749_v13 = vpop.xlane.xlu0 %1748  ;;  %v1610_v14 = vsel %vm1526_vm4, %v1605_v11, 0  ;;  %vm1676_vm9 = vmor %vm1674_vm7, %vm1675_vm5  ;;  %v3526_v11 = vld [vmem:[%s4749_s19 + $0x8] sm:$0xff] }
 0xd8f   : > { %v1671_v17 = vsub.f32 1.0, %v1670_v8  ;;  %3688 = vrcp.f32 %v1749_v13  ;;  %1537 = vmatpush.bf16.msrb.mxu2 %v1528_v12  ;;  %1619 = vmatpush.bf16.msra.mxu3 %v1610_v14  ;;  %v1761_v29 = vand.u32 2147483648, %v1749_v13  ;;  %v1759_v31 = vand.u32 2147483647, %v1749_v13  ;;  %v3534_v12 = vld [vmem:[%s4751_s21 + $0x38] sm:$0xff] }
 0xd90   : > { %vm1755_vm12 = vweird.f32 %v1749_v13  ;;  %1966 = vmatpush.bf16.msra.mxu0 %v3534_v12 }
 0xd91   : > { %v1672_v19 = vmul.f32 %v3687_v5, %v1671_v17  ;;  %v1762_v34 = vor.u32 1.1754944e-38, %v1761_v29  ;;  %vm1760_vm14 = vcmp.eq.f32.partialorder %v1759_v31, 8.507059e+37  ;;  %v3752_v29 = vld [vmem:[%s4843_s11] ss:$0 sm:$0xff] }
 0xd92   : > { %3289 = vmatmul.msk.bf16.vlgmr.msrb.gmra.mxu2 %vm1482_vm6, %v1519_v18  ;;  %3291 = vmatmul.msk.bf16.vlgmr.msra.gmra.mxu3 %vm1482_vm6, %v1603_v42  ;;  %v3532_v18 = vld [vmem:[%s4751_s21 + $0x28] sm:$0xff]  ;;  %v3531_v42 = vld [vmem:[%s4751_s21 + $0x20] sm:$0xff] }
 0xd93   : > { %1700 = vmatpush.bf16.msra.mxu2 %v1691_v15  ;;  %v1673_v45 = vadd.f32 %v3687_v5, %v1672_v19  ;;  %v3533_v15 = vld [vmem:[%s4751_s21 + $0x30] sm:$0xff]  ;;  %v3753_v31 = vld [vmem:[%s4845_s28] ss:$0 sm:$0xff] }
 0xd94   : > { %1967 = vmatpush.bf16.msra.mxu0 %v3533_v15 }
 0xd95   : > { %v3689_v22 = vpop.eup %3688  ;;  %v1677_v23 = vsel %vm1676_vm9, %v3687_v5, %v1673_v45 }
 0xd96   : > { %v1751_v24 = vmul.f32 %v3689_v22, %v1749_v13  ;;  %v1682_v28 = vsel %vm1679_vm10, %v1681_v26, %v1677_v23  ;;  %vm1756_vm11 = vweird.f32 %v3689_v22  ;;  %v3529_v23 = vld [vmem:[%s4751_s21 + $0x10] sm:$0xff] }
 0xd97   : > { %v1683_v32 = vmul.f32 %v1682_v28, %v4288_v35  ;;  %vm1757_vm13 = vmor %vm1755_vm12, %vm1756_vm11  ;;  %1906 = vmatpush.bf16.msrb.mxu2 %v3526_v11 }
 0xd98   : > { %v1752_v27 = vsub.f32 1.0, %v1751_v24  ;;  %1968 = vmatpush.bf16.msra.mxu0 %v3532_v18 }
 0xd99   : > { %v1684_v39 = vpack.c.bf16 %v1683_v32, %v1683_v32 }
 0xd9a   : > { %v1753_v30 = vmul.f32 %v3689_v22, %v1752_v27 }
 0xd9c   : > { %v1754_v33 = vadd.f32 %v3689_v22, %v1753_v30  ;;  %1969 = vmatpush.bf16.msra.mxu0 %v3531_v42 }
 0xd9e   : > { %v1758_v10 = vsel %vm1757_vm13, %v3689_v22, %v1754_v33 }
 0xd9f   : > { %v1763_v36 = vsel %vm1760_vm14, %v1762_v34, %v1758_v10  ;;  %v3528_v34 = vld [vmem:[%s4751_s21 + $0x8] sm:$0xff]  ;;  %v3527_v10 = vld [vmem:[%s4751_s21] sm:$0xff] }
 0xda0   : > { %v1764_v37 = vmul.f32 %v1763_v36, %v4294_v38  ;;  %v1767_v41 = vpop.permute.xlu0 %1766  ;;  %1970 = vmatpush.bf16.msra.mxu0 %v3530_v20  ;;  %v3622_v36 = vld [vmem:[%s4750_s20] ss:$0 sm:$0xff] }
 0xda1   : > { %v1772_v16 = vsel %vm1526_vm4, %v1767_v41, 0 }
 0xda2   : > { %3293 = vmatmul.msk.bf16.vlgmr.msra.gmra.mxu2 %vm1482_vm6, %v1684_v39  ;;  %1781 = vmatpush.bf16.msrb.mxu3 %v1772_v16  ;;  %v1765_v44 = vpack.c.bf16 %v1764_v37, %v1764_v37 }
 0xda4   : > { %1971 = vmatpush.bf16.msra.mxu0 %v3529_v23 }
 0xda5   : > { %3295 = vmatmul.msk.bf16.vlgmr.msrb.gmra.mxu3 %vm1482_vm6, %v1765_v44 }
 0xda8   : > { %1972 = vmatpush.bf16.msra.mxu0 %v3528_v34 }
 0xdac   : > { %1973 = vmatpush.bf16.msra.mxu0 %v3527_v10 }
 0xe15   : > { %v1539_v35 = vpop.f32.mrf.mxu2  ;;  %v1621_v46 = vpop.f32.mrf.mxu3 }
 0xe16   : > { %1788 = vrot.lane.b32.xlu1 %v1621_v46, %s4865_s5 }
 0xe1d   : > { %v1541_v47 = vpop.f32.mrf.mxu2  ;;  %v1623_v52 = vpop.f32.mrf.mxu3 }
 0xe25   : > { %v1702_v48 = vpop.f32.mrf.mxu2 }
 0xe26   : > { %1792 = vrot.lane.b32.xlu2 %v1702_v48, %s4866_s0 }
 0xe28   : > { %v1783_v38 = vpop.f32.mrf.mxu3 }
 0xe29   : > { %1796 = vrot.lane.b32.xlu0 %v1783_v38, %s4867_s24 }
 0xe2d   : > { %v1704_v49 = vpop.f32.mrf.mxu2 }
 0xe30   : > { %v1785_v50 = vpop.f32.mrf.mxu3 }
 0xe80   : > { %v1793_v56 = vpop.permute.xlu2 %1792 }
 0xe88   : > { %v1789_v54 = vpop.permute.xlu1 %1788 }
 0xe89   : > { %v1799_v55 = vsel %vm998_vm8, %v1539_v35, %v1789_v54  ;;  %v3623_v35 = vld [vmem:[%s4752_s22] ss:$0 sm:$0xff] }
 0xe8a   : > { %v1800_v58 = vsel %vm1312_vm15, %v1799_v55, %v1793_v56  ;;  %v3536_v55 = vld [vmem:[%s4842_s29 + $0x18] sm:$0xff]  ;;  %v3535_v56 = vld [vmem:[%s4842_s29 + $0x10] sm:$0xff] }
 0xe8b   : > { %2046 = vmatpush.bf16.msra.mxu3 %v3536_v55 }
 0xe8f   : > { %2047 = vmatpush.bf16.msra.mxu3 %v3535_v56 }
 0xe9b   : > { %v1797_v61 = vpop.permute.xlu0 %1796 }
 0xe9c   : > { %v1801_v59 = vsel %vm1314_vm1, %v1800_v58, %v1797_v61 }
 0xe9d   : > { %v1802_v60 = vpack.c.bf16 %v1801_v59, %v1801_v59 }
 0xe9f   : > { %3304 = vmatmul.msk.bf16.vlgmr.msra.gmra.mxu1 %vm909_vm3, %v1802_v60 }
 0xf1c   : > { %v1830_v63 = vpop.f32.mrf.mxu1 }
 0xf1d   : > { %v1831_v0 = vadd.f32 %v3621_v62, %v1830_v63 }
 0xf1f   : > { %v1834_v2 = vadd.f32 %v1831_v0, %v4197_v40  ;;  %v3525_v40 = vld [vmem:[%s4749_s19] sm:$0xff] }
 0xf20   : > { %1907 = vmatpush.bf16.msrb.mxu2 %v3525_v40  ;;  %v3626_v40 = vld [vmem:[%s4846_s1 + $0x1] ss:$0 sm:$0xff] }
 0xf21   : > { %v1835_v3 = vsel %vm909_vm3, %v1834_v2, 0.0 }
 0xf22   : > { %1836 = vadd.xlane.f32.xlu1 %v1835_v3 }
 0xf24   : > { %v1832_v4 = vpop.f32.mrf.mxu1 }
 0xf25   : > { %v4396_v4 = vld [vmem:[%s4843_s11 + $0x1] ss:$0 sm:$0xff] }
 0xf95   : > { %v1837_v5 = vpop.xlane.xlu1 %1836 }
 0xf96   : > { %v1838_v6 = vmul.f32 %v1837_v5, %v4063_v25 }
 0xf98   : > { %v1839_v7 = vsub.f32 %v1834_v2, %v1838_v6 }
 0xf9a   : > { %v1840_v8 = vmul.f32 %v1839_v7, %v1839_v7 }
 0xf9c   : > { %v1841_v9 = vsel %vm909_vm3, %v1840_v8, 0.0 }
 0xf9d   : > { %1842 = vadd.xlane.f32.xlu2 %v1841_v9 }
0x1010   : > { %v1843_v13 = vpop.xlane.xlu2 %1842 }
0x1011   : > { %v1844_v14 = vmul.f32 %v1843_v13, %v4063_v25 }
0x1013   : > { %v1845_v17 = vadd.f32 1e-05, %v1844_v14 }
0x1015   : > { %3690 = vrsqrt.f32 %v1845_v17  ;;  %vm1852_vm5 = vweird.f32 %v1845_v17 }
0x101b   : > { %v3691_v19 = vpop.eup %3690 }
0x101c   : > { %v1847_v45 = vmul.f32 %v3691_v19, %v1845_v17  ;;  %vm1853_vm2 = vweird.f32 %v3691_v19 }
0x101d   : > { %vm1854_vm7 = vmor %vm1852_vm5, %vm1853_vm2 }
0x101e   : > { %v1848_v21 = vmul.f32 %v3691_v19, %v1847_v45 }
0x1020   : > { %v1849_v22 = vmul.f32 0.5, %v1848_v21 }
0x1022   : > { %v1850_v24 = vsub.f32 1.5, %v1849_v22 }
0x1024   : > { %v1851_v26 = vmul.f32 %v3691_v19, %v1850_v24 }
0x1026   : > { %v1855_v27 = vsel %vm1854_vm7, %v3691_v19, %v1851_v26 }
0x1027   : > { %v1856_v28 = vmul.f32 %v1855_v27, %v1839_v7  ;;  %v4401_v7 = vld [vmem:[%s4845_s28 + $0x1] ss:$0 sm:$0xff] }
0x1028   : > { %v3362_v27 = vld [vmem:[%s4847_s9 + $0x1] sm:$0x1] }
0x1029   : > { %v1857_v30 = vmul.f32 %v3752_v29, %v1856_v28  ;;  %vm2062_vm12 = vcmp.gt.f32.partialorder %v3362_v27, 0.0 }
0x102a   : > { %v2063_v29 = vsel %vm2062_vm12, 1, %v3821_v1 }
0x102b   : > { %v1858_v32 = vadd.f32 %v3753_v31, %v1857_v30  ;;  %v2064_v30 = vperm.slane %v2063_v29, 0 }
0x102d   : > { %v1881_v33 = vpack.c.bf16 %v1858_v32, %v1858_v32  ;;  %vm4435_vm13 = vcmp.eq.s32.totalorder %v2064_v30, 1 }
0x102f   : > { %3313 = vmatmul.msk.bf16.vlgmr.msrb.gmra.mxu2 %vm909_vm3, %v1881_v33 }
0x10b2   : > { %v1909_v37 = vpop.f32.mrf.mxu2 }
0x10b3   : > { %v1910_v39 = vadd.f32 %v3622_v36, %v1909_v37 }
0x10b5   : > { %v1913_v41 = vmax.f32 %v1910_v39, 0.0 }
0x10b7   : > { %v1914_v16 = vpack.c.bf16 %v1913_v41, %v1913_v41 }
0x10b9   : > { %1974 = vmatmul.bf16.vlgmr.msra.gmra.mxu0 %v1914_v16 }
0x10ba   : > { %v1911_v44 = vpop.f32.mrf.mxu2 }
0x1136   : > { %v1975_v46 = vpop.f32.mrf.mxu0 }
0x1137   : > { %v1976_v47 = vadd.f32 %v3623_v35, %v1975_v46 }
0x1139   : > { %v4379_v52 = vadd.f32 %v1976_v47, %v1834_v2 }
0x113b   : > { %v1984_v48 = vsel %vm909_vm3, %v4379_v52, 0.0 }
0x113c   : > { %1985 = vadd.xlane.f32.xlu0 %v1984_v48 }
0x113e   : > { %v1977_v38 = vpop.f32.mrf.mxu0 }
0x11af   : > { %v1986_v49 = vpop.xlane.xlu0 %1985 }
0x11b0   : > { %v1987_v50 = vmul.f32 %v1986_v49, %v4063_v25 }
0x11b2   : > { %v1988_v51 = vsub.f32 %v4379_v52, %v1987_v50 }
0x11b4   : > { %v1989_v53 = vmul.f32 %v1988_v51, %v1988_v51 }
0x11b6   : > { %v1990_v54 = vsel %vm909_vm3, %v1989_v53, 0.0 }
0x11b7   : > { %1991 = vadd.xlane.f32.xlu2 %v1990_v54 }
0x122a   : > { %v1992_v61 = vpop.xlane.xlu2 %1991 }
0x122b   : > { %v1993_v58 = vmul.f32 %v1992_v61, %v4063_v25 }
0x122d   : > { %v1994_v59 = vadd.f32 1e-05, %v1993_v58 }
0x122f   : > { %3692 = vrsqrt.f32 %v1994_v59  ;;  %vm2001_vm10 = vweird.f32 %v1994_v59 }
0x1235   : > { %v3693_v60 = vpop.eup %3692 }
0x1236   : > { %v1996_v62 = vmul.f32 %v3693_v60, %v1994_v59  ;;  %vm2002_vm9 = vweird.f32 %v3693_v60 }
0x1237   : > { %vm2003_vm11 = vmor %vm2001_vm10, %vm2002_vm9 }
0x1238   : > { %v1997_v63 = vmul.f32 %v3693_v60, %v1996_v62 }
0x123a   : > { %v1998_v0 = vmul.f32 0.5, %v1997_v63 }
0x123c   : > { %v1999_v2 = vsub.f32 1.5, %v1998_v0 }
0x123e   : > { %v2000_v3 = vmul.f32 %v3693_v60, %v1999_v2 }
0x1240   : > { %v2004_v5 = vsel %vm2003_vm11, %v3693_v60, %v2000_v3 }
0x1241   : > { %v2005_v6 = vmul.f32 %v2004_v5, %v1988_v51 }
0x1243   : > { %v2009_v8 = vmul.f32 %v4396_v4, %v2005_v6 }
0x1245   : > { %v2013_v9 = vadd.f32 %v4401_v7, %v2009_v8 }
0x1247   : > { %v2014_v11 = vpack.c.bf16 %v2013_v9, %v2013_v9 }
0x1249   : > { %3361 = vmatmul.msk.bf16.vlgmr.msra.gmra.mxu3 %vm909_vm3, %v2014_v11 }
0x12cc   : > { %v2049_v12 = vpop.f32.mrf.mxu3 }
0x12cd   : > { %v2050_v13 = vadd.f32 %v3626_v40, %v2049_v12 }
0x12cf   : > { %v4409_v14 = vpack.c.bf16 %v2050_v13, %v2050_v13 }
0x12d1   : > { %2068 = vrot.lane.b32.xlu1 %v4409_v14, %s4862_s3 }
0x12d4   : > { %v2051_v15 = vpop.f32.mrf.mxu3 }
0x12d9   : > { %2142 = vrot.lane.b32.xlu1 %v4409_v14, %s4854_s8 }
0x12e1   : > { %2220 = vrot.lane.b32.xlu1 %v4409_v14, %s4861_s30 }
0x12e9   : > { %2218 = vrot.lane.b32.xlu1 %v4409_v14, %s4855_s27 }
0x1343   : > { %v2069_v17 = vpop.permute.xlu1 %2068 }
0x1344   : > { %v2074_v18 = vsel %vm998_vm8, %v2069_v17, 0 }
0x1345   : > { %2083 = vmatpush.bf16.xpose.msrb.mxu1 %v2074_v18 }
0x134b   : > { %v2143_v41 = vpop.permute.xlu1 %2142 }
0x134c   : > { %3368 = vmatmul.msk.bf16.vlgmr.msrb.gmra.mxu1 %vm998_vm8, %v4409_v14 }
0x1353   : > { %v2221_v48 = vpop.permute.xlu1 %2220 }
0x1354   : > { %v2226_v51 = vsel %vm998_vm8, %v2221_v48, 0 }
0x135b   : > { %v2219_v5 = vpop.permute.xlu1 %2218 }
0x13c9   : > { %v2085_v42 = vpop.f32.mrf.mxu1 }
0x13ca   : > { %v2086_v19 = vadd.f32 %v2085_v42, %v4109_v57 }
0x13cc   : > { %v2089_v45 = vsel %vm998_vm8, %v2086_v19, -inf }
0x13cd   : > { %2090 = vmax.xlane.f32.xlu2 %v2089_v45 }
0x13d1   : > { %v2087_v20 = vpop.f32.mrf.mxu1 }
0x1440   : > { %v2091_v21 = vpop.xlane.xlu2 %2090 }
0x1441   : > { %v2092_v22 = vsub.f32 %v2086_v19, %v2091_v21 }
0x1443   : > { %v2093_v23 = vmul.f32 1.442695, %v2092_v22 }
0x1445   : > { %3694 = vpow2.f32 %v2093_v23 }
0x144b   : > { %v3695_v24 = vpop.eup %3694 }
0x144c   : > { %v2095_v26 = vsel %vm998_vm8, %v3695_v24, 0.0 }
0x144d   : > { %2096 = vadd.xlane.f32.xlu0 %v2095_v26 }
0x1461   : > { %2144 = vrot.lane.b32.xlu0 %v4409_v14, %s4863_s6 }
0x1469   : > { %2296 = vrot.lane.b32.xlu0 %v4409_v14, %s4864_s26 }
0x1471   : > { %2294 = vrot.lane.b32.xlu0 %v4409_v14, %s4857_s4 }
0x14c0   : > { %v2097_v28 = vpop.xlane.xlu0 %2096 }
0x14c1   : > { %3696 = vrcp.f32 %v2097_v28 }
0x14c7   : > { %v3697_v31 = vpop.eup %3696 }
0x14c8   : > { %v2099_v32 = vmul.f32 %v3697_v31, %v3695_v24 }
0x14ca   : > { %v2100_v34 = vmul.f32 1.2, %v2099_v32 }
0x14cc   : > { %v2101_v10 = vsel %vm4435_vm13, %v2100_v34, %v2099_v32 }
0x14cd   : > { %v2102_v36 = vsel %vm998_vm8, %v2101_v10, 0.0 }
0x14ce   : > { %2103 = vadd.xlane.f32.xlu2 %v2102_v36 }
0x14d3   : > { %v2145_v37 = vpop.permute.xlu0 %2144 }
0x14d4   : > { %v2150_v39 = vsel %vm998_vm8, %v2145_v37, 0 }
0x14d5   : > { %2159 = vmatpush.bf16.xpose.msrb.mxu3 %v2150_v39 }
0x14db   : > { %v2297_v16 = vpop.permute.xlu0 %2296 }
0x14dc   : > { %v2302_v44 = vsel %vm998_vm8, %v2297_v16, 0  ;;  %3370 = vmatmul.msk.bf16.vlgmr.msrb.gmra.mxu3 %vm998_vm8, %v2143_v41 }
0x14dd   : > { %2311 = vmatpush.bf16.xpose.msra.mxu3 %v2302_v44 }
0x14e3   : > { %v2295_v35 = vpop.permute.xlu0 %2294 }
0x14e6   : > { %2121 = vrot.lane.b32.xlu2 %v4409_v14, %s4872_s7  ;;  %s4878_s7 = sld [smem:[#allocation14_spill]] }
0x14ec   : > { %3374 = vmatmul.msk.bf16.vlgmr.msra.gmra.mxu3 %vm998_vm8, %v2295_v35 }
0x1541   : > { %v2104_v46 = vpop.xlane.xlu2 %2103 }
0x1542   : > { %3698 = vrcp.f32 %v2104_v46  ;;  %v2116_v54 = vand.u32 2147483648, %v2104_v46  ;;  %v2114_v56 = vand.u32 2147483647, %v2104_v46  ;;  %vm2110_vm2 = vweird.f32 %v2104_v46 }
0x1544   : > { %v2117_v58 = vor.u32 1.1754944e-38, %v2116_v54  ;;  %vm2115_vm7 = vcmp.eq.f32.partialorder %v2114_v56, 8.507059e+37 }
0x1548   : > { %v3699_v47 = vpop.eup %3698 }
0x1549   : > { %v2106_v38 = vmul.f32 %v3699_v47, %v2104_v46  ;;  %v2122_v49 = vpop.permute.xlu2 %2121  ;;  %vm2111_vm14 = vweird.f32 %v3699_v47 }
0x154a   : > { %v2127_v50 = vsel %vm883_vm0, %v2122_v49, 0  ;;  %vm2112_vm5 = vmor %vm2110_vm2, %vm2111_vm14 }
0x154b   : > { %v2107_v53 = vsub.f32 1.0, %v2106_v38  ;;  %2136 = vmatpush.bf16.msra.mxu2 %v2127_v50 }
0x154d   : > { %v2108_v55 = vmul.f32 %v3699_v47, %v2107_v53 }
0x154f   : > { %2235 = vmatpush.bf16.xpose.msrb.mxu2 %v2226_v51  ;;  %v2109_v61 = vadd.f32 %v3699_v47, %v2108_v55 }
0x1551   : > { %v2113_v59 = vsel %vm2112_vm5, %v3699_v47, %v2109_v61 }
0x1552   : > { %v2118_v60 = vsel %vm2115_vm7, %v2117_v58, %v2113_v59 }
0x1553   : > { %v2119_v62 = vmul.f32 %v2118_v60, %v2101_v10 }
0x1555   : > { %v2120_v63 = vpack.c.bf16 %v2119_v62, %v2119_v62 }
0x1557   : > { %3369 = vmatmul.msk.bf16.vlgmr.msra.gmra.mxu2 %vm998_vm8, %v2120_v63 }
0x155f   : > { %v2161_v0 = vpop.f32.mrf.mxu3 }
0x1560   : > { %v2162_v2 = vadd.f32 %v2161_v0, %v4109_v57 }
0x1562   : > { %v2165_v3 = vsel %vm998_vm8, %v2162_v2, -inf }
0x1563   : > { %2166 = vmax.xlane.f32.xlu2 %v2165_v3 }
0x1567   : > { %v2163_v6 = vpop.f32.mrf.mxu3  ;;  %3372 = vmatmul.msk.bf16.vlgmr.msrb.gmra.mxu2 %vm998_vm8, %v2219_v5 }
0x156f   : > { %v2313_v8 = vpop.f32.mrf.mxu3 }
0x1570   : > { %v2314_v9 = vadd.f32 %v2313_v8, %v4109_v57 }
0x1572   : > { %v2317_v11 = vsel %vm998_vm8, %v2314_v9, -inf }
0x1573   : > { %2318 = vmax.xlane.f32.xlu0 %v2317_v11 }
0x1577   : > { %v2315_v40 = vpop.f32.mrf.mxu3 }
0x15d6   : > { %v2167_v12 = vpop.xlane.xlu2 %2166 }
0x15d7   : > { %v2168_v13 = vsub.f32 %v2162_v2, %v2167_v12 }
0x15d9   : > { %v2169_v15 = vmul.f32 1.442695, %v2168_v13 }
0x15da   : > { %v4456_v17 = vpop.f32.mrf.mxu2 }
0x15db   : > { %3700 = vpow2.f32 %v2169_v15 }
0x15e1   : > { %v3701_v18 = vpop.eup %3700 }
0x15e2   : > { %v2140_v42 = vpop.f32.mrf.mxu2  ;;  %v2171_v19 = vsel %vm998_vm8, %v3701_v18, 0.0 }
0x15e3   : > { %2172 = vadd.xlane.f32.xlu2 %v2171_v19 }
0x15e6   : > { %v2319_v45 = vpop.xlane.xlu0 %2318 }
0x15e7   : > { %v2320_v20 = vsub.f32 %v2314_v9, %v2319_v45 }
0x15e9   : > { %v2321_v21 = vmul.f32 1.442695, %v2320_v20 }
0x15ea   : > { %v2237_v22 = vpop.f32.mrf.mxu2 }
0x15eb   : > { %3702 = vpow2.f32 %v2321_v21  ;;  %v2238_v23 = vadd.f32 %v2237_v22, %v4109_v57 }
0x15ed   : > { %v2241_v24 = vsel %vm998_vm8, %v2238_v23, -inf }
0x15ee   : > { %2242 = vmax.xlane.f32.xlu1 %v2241_v24 }
0x15f1   : > { %v3703_v26 = vpop.eup %3702 }
0x15f2   : > { %v2239_v27 = vpop.f32.mrf.mxu2  ;;  %v2323_v28 = vsel %vm998_vm8, %v3703_v26, 0.0 }
0x15f3   : > { %2324 = vadd.xlane.f32.xlu0 %v2323_v28 }
0x1656   : > { %v2173_v29 = vpop.xlane.xlu2 %2172 }
0x1657   : > { %3704 = vrcp.f32 %v2173_v29 }
0x165d   : > { %v3705_v30 = vpop.eup %3704 }
0x165e   : > { %v2175_v31 = vmul.f32 %v3705_v30, %v3701_v18 }
0x1660   : > { %v2176_v32 = vmul.f32 1.2, %v2175_v31 }
0x1661   : > { %v2243_v34 = vpop.xlane.xlu1 %2242 }
0x1662   : > { %v2244_v10 = vsub.f32 %v2238_v23, %v2243_v34  ;;  %v2177_v36 = vsel %vm4435_vm13, %v2176_v32, %v2175_v31 }
0x1663   : > { %v2178_v57 = vsel %vm998_vm8, %v2177_v36, 0.0 }
0x1664   : > { %v2245_v37 = vmul.f32 1.442695, %v2244_v10  ;;  %2179 = vadd.xlane.f32.xlu2 %v2178_v57 }
0x1666   : > { %3706 = vpow2.f32 %v2245_v37  ;;  %v2325_v39 = vpop.xlane.xlu0 %2324 }
0x1667   : > { %3708 = vrcp.f32 %v2325_v39 }
0x166c   : > { %v3707_v41 = vpop.eup %3706 }
0x166d   : > { %v3709_v16 = vpop.eup %3708  ;;  %v2247_v44 = vsel %vm998_vm8, %v3707_v41, 0.0 }
0x166e   : > { %2248 = vadd.xlane.f32.xlu1 %v2247_v44  ;;  %v2327_v35 = vmul.f32 %v3709_v16, %v3703_v26 }
0x1670   : > { %v2328_v46 = vmul.f32 1.2, %v2327_v35 }
0x1672   : > { %v2329_v47 = vsel %vm4435_vm13, %v2328_v46, %v2327_v35 }
0x1673   : > { %v2330_v48 = vsel %vm998_vm8, %v2329_v47, 0.0 }
0x1674   : > { %2331 = vadd.xlane.f32.xlu0 %v2330_v48 }
0x167c   : > { %2197 = vrot.lane.b32.xlu2 %v4409_v14, %s4873_s10  ;;  %s4890_s10 = sld [smem:[#allocation35_spill]] }
0x1688   : > { %2349 = vrot.lane.b32.xlu0 %v4409_v14, %s4874_s23 }
0x16d7   : > { %v2180_v38 = vpop.xlane.xlu2 %2179 }
0x16d8   : > { %3710 = vrcp.f32 %v2180_v38  ;;  %v2192_v56 = vand.u32 2147483648, %v2180_v38  ;;  %v2190_v58 = vand.u32 2147483647, %v2180_v38  ;;  %vm2186_vm10 = vweird.f32 %v2180_v38 }
0x16da   : > { %v2193_v60 = vor.u32 1.1754944e-38, %v2192_v56  ;;  %vm2191_vm12 = vcmp.eq.f32.partialorder %v2190_v58, 8.507059e+37  ;;  %v3627_v58 = vld [vmem:[%s4742_s12 + $0x1] ss:$0 sm:$0xff] }
0x16de   : > { %v3711_v49 = vpop.eup %3710 }
0x16df   : > { %v2182_v50 = vmul.f32 %v3711_v49, %v2180_v38  ;;  %v2198_v51 = vpop.permute.xlu2 %2197  ;;  %vm2187_vm9 = vweird.f32 %v3711_v49 }
0x16e0   : > { %v2203_v53 = vsel %vm883_vm0, %v2198_v51, 0  ;;  %vm2188_vm11 = vmor %vm2186_vm10, %vm2187_vm9 }
0x16e1   : > { %v2183_v54 = vsub.f32 1.0, %v2182_v50  ;;  %2212 = vmatpush.bf16.msra.mxu1 %v2203_v53  ;;  %v2249_v55 = vpop.xlane.xlu1 %2248 }
0x16e2   : > { %3712 = vrcp.f32 %v2249_v55 }
0x16e3   : > { %v2184_v61 = vmul.f32 %v3711_v49, %v2183_v54 }
0x16e5   : > { %v2185_v59 = vadd.f32 %v3711_v49, %v2184_v61 }
0x16e7   : > { %v2189_v62 = vsel %vm2188_vm11, %v3711_v49, %v2185_v59  ;;  %v2332_v63 = vpop.xlane.xlu0 %2331  ;;  %v3537_v49 = vld [vmem:[%s4851_s2 + $0x10] sm:$0xff] }
0x16e8   : > { %v3713_v0 = vpop.eup %3712  ;;  %v2194_v2 = vsel %vm2191_vm12, %v2193_v60, %v2189_v62  ;;  %3714 = vrcp.f32 %v2332_v63  ;;  %v2344_v15 = vand.u32 2147483648, %v2332_v63  ;;  %v2342_v42 = vand.u32 2147483647, %v2332_v63 }
0x16e9   : > { %v2195_v3 = vmul.f32 %v2194_v2, %v2177_v36  ;;  %v2251_v5 = vmul.f32 %v3713_v0, %v3707_v41  ;;  %vm2338_vm2 = vweird.f32 %v2332_v63  ;;  %v3542_v0 = vld [vmem:[%s4745_s15 + $0x18] sm:$0xff]  ;;  %v3541_v2 = vld [vmem:[%s4745_s15 + $0x10] sm:$0xff] }
0x16ea   : > { %v2345_v45 = vor.u32 1.1754944e-38, %v2344_v15  ;;  %vm2343_vm7 = vcmp.eq.f32.partialorder %v2342_v42, 8.507059e+37  ;;  %2509 = vmatpush.bf16.msrb.mxu3 %v3542_v0 }
0x16eb   : > { %v2196_v6 = vpack.c.bf16 %v2195_v3, %v2195_v3  ;;  %v2252_v8 = vmul.f32 1.2, %v2251_v5 }
0x16ed   : > { %3371 = vmatmul.msk.bf16.vlgmr.msra.gmra.mxu1 %vm998_vm8, %v2196_v6  ;;  %v2253_v9 = vsel %vm4435_vm13, %v2252_v8, %v2251_v5 }
0x16ee   : > { %v3715_v11 = vpop.eup %3714  ;;  %v2254_v40 = vsel %vm998_vm8, %v2253_v9, 0.0  ;;  %2510 = vmatpush.bf16.msrb.mxu3 %v3541_v2 }
0x16ef   : > { %v2334_v12 = vmul.f32 %v3715_v11, %v2332_v63  ;;  %2255 = vadd.xlane.f32.xlu1 %v2254_v40  ;;  %vm2339_vm14 = vweird.f32 %v3715_v11 }
0x16f0   : > { %vm2340_vm5 = vmor %vm2338_vm2, %vm2339_vm14 }
0x16f1   : > { %v2335_v13 = vsub.f32 1.0, %v2334_v12  ;;  %3412 = vmatmul.msk.bf16.vlgmr.msrb.gmra.mxu3 %vm909_vm3, %v4211_v43 }
0x16f3   : > { %v2336_v18 = vmul.f32 %v3715_v11, %v2335_v13  ;;  %v3628_v13 = vld [vmem:[%s4876_s17 + $0x1] ss:$0 sm:$0xff]  ;;  %s4886_s17 = sld [smem:[#allocation32_spill]] }
0x16f5   : > { %v2337_v19 = vadd.f32 %v3715_v11, %v2336_v18 }
0x16f7   : > { %v2341_v20 = vsel %vm2340_vm5, %v3715_v11, %v2337_v19  ;;  %v3539_v11 = vld [vmem:[%s4743_s13 + $0x10] sm:$0xff] }
0x16f8   : > { %v2346_v21 = vsel %vm2343_vm7, %v2345_v45, %v2341_v20 }
0x16f9   : > { %v2347_v22 = vmul.f32 %v2346_v21, %v2329_v47  ;;  %v3538_v47 = vld [vmem:[%s4851_s2 + $0x18] sm:$0xff] }
0x16fa   : > { %v2350_v33 = vpop.permute.xlu0 %2349  ;;  %2410 = vmatpush.bf16.msra.mxu2 %v3538_v47 }
0x16fb   : > { %v2355_v23 = vsel %vm883_vm0, %v2350_v33, 0  ;;  %v2348_v24 = vpack.c.bf16 %v2347_v22, %v2347_v22 }
0x16fc   : > { %2364 = vmatpush.bf16.msrb.mxu1 %v2355_v23 }
0x16fe   : > { %2411 = vmatpush.bf16.msra.mxu2 %v3537_v49 }
0x16ff   : > { %3375 = vmatmul.msk.bf16.vlgmr.msrb.gmra.mxu1 %vm998_vm8, %v2348_v24 }
0x1708   : > { %2273 = vrot.lane.b32.xlu1 %v4409_v14, %s4875_s25 }
0x1762   : > { %v2256_v26 = vpop.xlane.xlu1 %2255 }
0x1763   : > { %3716 = vrcp.f32 %v2256_v26  ;;  %v2268_v34 = vand.u32 2147483648, %v2256_v26  ;;  %vm2262_vm9 = vweird.f32 %v2256_v26  ;;  %v2266_v10 = vand.u32 2147483647, %v2256_v26 }
0x1765   : > { %v2269_v37 = vor.u32 1.1754944e-38, %v2268_v34  ;;  %vm2267_vm11 = vcmp.eq.f32.partialorder %v2266_v10, 8.507059e+37  ;;  %v3629_v10 = vld [vmem:[%s4877_s16 + $0x1] ss:$0 sm:$0xff] }
0x1769   : > { %v3717_v27 = vpop.eup %3716 }
0x176a   : > { %v2258_v28 = vmul.f32 %v3717_v27, %v2256_v26  ;;  %v2214_v29 = vpop.f32.mrf.mxu1  ;;  %vm2263_vm13 = vweird.f32 %v3717_v27 }
0x176b   : > { %2371 = vrot.lane.b32.xlu2 %v2214_v29, %s4865_s5  ;;  %vm2264_vm10 = vmor %vm2262_vm9, %vm2263_vm13 }
0x176c   : > { %v2259_v30 = vsub.f32 1.0, %v2258_v28 }
0x176e   : > { %v2260_v31 = vmul.f32 %v3717_v27, %v2259_v30 }
0x1770   : > { %v2261_v32 = vadd.f32 %v3717_v27, %v2260_v31 }
0x1772   : > { %v2216_v36 = vpop.f32.mrf.mxu1  ;;  %v2265_v57 = vsel %vm2264_vm10, %v3717_v27, %v2261_v32 }
0x1773   : > { %v2270_v14 = vsel %vm2267_vm11, %v2269_v37, %v2265_v57 }
0x1774   : > { %v2271_v39 = vmul.f32 %v2270_v14, %v2253_v9  ;;  %v3540_v9 = vld [vmem:[%s4743_s13 + $0x18] sm:$0xff]  ;;  %v2512_v43 = vpop.f32.mrf.mxu3 }
0x1775   : > { %v2513_v18 = vadd.f32 %v3628_v13, %v2512_v43 }
0x1776   : > { %v2272_v35 = vpack.c.bf16 %v2271_v39, %v2271_v39 }
0x177a   : > { %v2274_v41 = vpop.permute.xlu1 %2273 }
0x177b   : > { %v2279_v16 = vsel %vm883_vm0, %v2274_v41, 0 }
0x177c   : > { %2288 = vmatpush.bf16.msrb.mxu0 %v2279_v16  ;;  %v2366_v44 = vpop.f32.mrf.mxu1  ;;  %v2514_v42 = vpop.f32.mrf.mxu3 }
0x177d   : > { %2379 = vrot.lane.b32.xlu1 %v2366_v44, %s4867_s24  ;;  %v2515_v19 = vadd.f32 %v3628_v13, %v2514_v42 }
0x177f   : > { %3373 = vmatmul.msk.bf16.vlgmr.msrb.gmra.mxu0 %vm998_vm8, %v2272_v35  ;;  %v4527_v45 = vpack.c.bf16 %v2515_v19, %v2513_v18  ;;  %v3754_v35 = vld [vmem:[%s4878_s7] ss:$0 sm:$0xff]  ;;  %s4888_s7 = sld [smem:[#allocation34_spill]] }
0x1780   : > { %2474 = vmatpush.bf16.msra.mxu0 %v3540_v9 }
0x1781   : > { %v2536_v22 = vsel %vm998_vm8, %v4527_v45, 0 }
0x1782   : > { %2545 = vmatpush.bf16.xpose.msra.mxu1 %v2536_v22 }
0x1784   : > { %v2368_v46 = vpop.f32.mrf.mxu1  ;;  %2475 = vmatpush.bf16.msra.mxu0 %v3539_v11 }
0x1785   : > { %2613 = vrot.lane.b32.xlu1 %v4527_v45, %s4854_s8 }
0x178d   : > { %2694 = vrot.lane.b32.xlu1 %v4527_v45, %s4855_s27 }
0x17c5   : > { %v2372_v50 = vpop.permute.xlu2 %2371 }
0x17c6   : > { %v2382_v51 = vsel %vm998_vm8, %v4456_v17, %v2372_v50 }
0x17ef   : > { %v2380_v54 = vpop.permute.xlu1 %2379 }
0x17f7   : > { %v2614_v32 = vpop.permute.xlu1 %2613 }
0x17f8   : > { %v2619_v34 = vsel %vm998_vm8, %v2614_v32, 0 }
0x17f9   : > { %2628 = vmatpush.bf16.xpose.msrb.mxu0 %v2619_v34 }
0x17fc   : > { %v2290_v48 = vpop.f32.mrf.mxu0 }
0x17fd   : > { %2375 = vrot.lane.b32.xlu0 %v2290_v48, %s4866_s0 }
0x1804   : > { %v2292_v38 = vpop.f32.mrf.mxu0 }
0x186f   : > { %v2376_v53 = vpop.permute.xlu0 %2375 }
0x1870   : > { %v2383_v55 = vsel %vm1312_vm15, %v2382_v51, %v2376_v53 }
0x1871   : > { %v2384_v56 = vsel %vm1314_vm1, %v2383_v55, %v2380_v54 }
0x1872   : > { %v2385_v61 = vpack.c.bf16 %v2384_v56, %v2384_v56 }
0x1874   : > { %3384 = vmatmul.msk.bf16.vlgmr.msra.gmra.mxu2 %vm909_vm3, %v2385_v61 }
0x18f7   : > { %v2413_v59 = vpop.f32.mrf.mxu2 }
0x18f8   : > { %v2414_v60 = vadd.f32 %v3627_v58, %v2413_v59 }
0x18fa   : > { %v4502_v62 = vadd.f32 %v2414_v60, %v4379_v52 }
0x18fc   : > { %v2418_v17 = vsel %vm909_vm3, %v4502_v62, 0.0 }
0x18fd   : > { %2419 = vadd.xlane.f32.xlu2 %v2418_v17 }
0x18ff   : > { %v2415_v63 = vpop.f32.mrf.mxu2 }
0x1970   : > { %v2420_v52 = vpop.xlane.xlu2 %2419 }
0x1971   : > { %v2421_v3 = vmul.f32 %v2420_v52, %v4063_v25 }
0x1973   : > { %v2422_v5 = vsub.f32 %v4502_v62, %v2421_v3 }
0x1975   : > { %v2423_v6 = vmul.f32 %v2422_v5, %v2422_v5 }
0x1977   : > { %v2424_v8 = vsel %vm909_vm3, %v2423_v6, 0.0 }
0x1978   : > { %2425 = vadd.xlane.f32.xlu0 %v2424_v8 }
0x19eb   : > { %v2426_v40 = vpop.xlane.xlu0 %2425 }
0x19ec   : > { %v2427_v12 = vmul.f32 %v2426_v40, %v4063_v25 }
0x19ee   : > { %v2428_v15 = vadd.f32 1e-05, %v2427_v12 }
0x19f0   : > { %3718 = vrsqrt.f32 %v2428_v15  ;;  %vm2435_vm12 = vweird.f32 %v2428_v15 }
0x19f6   : > { %v3719_v20 = vpop.eup %3718 }
0x19f7   : > { %v2430_v21 = vmul.f32 %v3719_v20, %v2428_v15  ;;  %vm2436_vm0 = vweird.f32 %v3719_v20 }
0x19f8   : > { %vm2437_vm14 = vmor %vm2435_vm12, %vm2436_vm0 }
0x19f9   : > { %v2431_v33 = vmul.f32 %v3719_v20, %v2430_v21 }
0x19fb   : > { %v2432_v23 = vmul.f32 0.5, %v2431_v33 }
0x19fd   : > { %v2433_v24 = vsub.f32 1.5, %v2432_v23 }
0x19ff   : > { %v2434_v26 = vmul.f32 %v3719_v20, %v2433_v24 }
0x1a01   : > { %v2438_v27 = vsel %vm2437_vm14, %v3719_v20, %v2434_v26 }
0x1a02   : > { %v2439_v28 = vmul.f32 %v2438_v27, %v2422_v5 }
0x1a04   : > { %v2440_v29 = vmul.f32 %v4396_v4, %v2439_v28 }
0x1a06   : > { %v2441_v30 = vadd.f32 %v4401_v7, %v2440_v29  ;;  %v2695_v7 = vpop.permute.xlu1 %2694 }
0x1a07   : > { %v2700_v14 = vsel %vm998_vm8, %v2695_v7, 0 }
0x1a08   : > { %v2442_v31 = vpack.c.bf16 %v2441_v30, %v2441_v30  ;;  %2709 = vmatpush.bf16.xpose.msrb.mxu1 %v2700_v14 }
0x1a0a   : > { %3398 = vmatmul.msk.bf16.vlgmr.msra.gmra.mxu0 %vm909_vm3, %v2442_v31 }
0x1a87   : > { %v2477_v36 = vpop.f32.mrf.mxu0 }
0x1a88   : > { %v2478_v57 = vadd.f32 %v3629_v10, %v2477_v36 }
0x1a8a   : > { %v2530_v37 = vpack.c.bf16 %v2478_v57, %v2478_v57 }
0x1a8c   : > { %2773 = vrot.lane.b32.xlu2 %v2530_v37, %s4857_s4  ;;  %2611 = vrot.lane.b32.xlu1 %v2530_v37, %s4854_s8  ;;  %s4889_s8 = sld [smem:[#allocation9_spill]] }
0x1a8d   : > { %3419 = vmatmul.msk.bf16.vlgmr.msra.gmra.mxu1 %vm998_vm8, %v2530_v37 }
0x1a8f   : > { %v2479_v4 = vpop.f32.mrf.mxu0 }
0x1a94   : > { %2775 = vrot.lane.b32.xlu1 %v4527_v45, %s4857_s4  ;;  %s4879_s4 = sld [smem:[#allocation19_spill]] }
0x1a9a   : > { %v3413_v31 = vld [vmem:[%s4879_s4 + $0x1] sm:$0x1] }
0x1a9b   : > { %vm2526_vm2 = vcmp.gt.f32.partialorder %v3413_v31, 0.0 }
0x1a9c   : > { %2692 = vrot.lane.b32.xlu1 %v2530_v37, %s4855_s27  ;;  %v2527_v34 = vsel %vm2526_vm2, 1, %v3821_v1  ;;  %s833_s27 = sand.u32 1, %s4887_s18  }
0x1a9d   : > { %v2528_v10 = vperm.slane %v2527_v34, 0  ;;  %s3231_s4 = sshll.u32 %s833_s27, 3 }
0x1a9f   : > { %vm4568_vm5 = vcmp.eq.s32.totalorder %v2528_v10, 1 }
0x1ae6   : > { %v2774_v48 = vpop.permute.xlu2 %2773 }
0x1afe   : > { %v2612_v39 = vpop.permute.xlu1 %2611 }
0x1aff   : > { %3421 = vmatmul.msk.bf16.vlgmr.msrb.gmra.mxu0 %vm998_vm8, %v2612_v39 }
0x1b06   : > { %v2776_v41 = vpop.permute.xlu1 %2775 }
0x1b07   : > { %v2781_v16 = vsel %vm998_vm8, %v2776_v41, 0 }
0x1b08   : > { %2790 = vmatpush.bf16.xpose.msra.mxu0 %v2781_v16 }
0x1b0a   : > { %v2547_v44 = vpop.f32.mrf.mxu1 }
0x1b0b   : > { %v2548_v46 = vadd.f32 %v3754_v35, %v2547_v44 }
0x1b0d   : > { %v2551_v47 = vsel %vm1482_vm6, %v2548_v46, -inf }
0x1b0e   : > { %2552 = vmax.xlane.f32.xlu0 %v2551_v47  ;;  %v2693_v38 = vpop.permute.xlu1 %2692 }
0x1b0f   : > { %3423 = vmatmul.msk.bf16.vlgmr.msrb.gmra.mxu1 %vm998_vm8, %v2693_v38  ;;  %3425 = vmatmul.msk.bf16.vlgmr.msra.gmra.mxu0 %vm998_vm8, %v2774_v48 }
0x1b12   : > { %v2549_v49 = vpop.f32.mrf.mxu1 }
0x1b7c   : > { %v2630_v50 = vpop.f32.mrf.mxu0 }
0x1b7d   : > { %v2631_v51 = vadd.f32 %v3754_v35, %v2630_v50 }
0x1b7f   : > { %v2634_v53 = vsel %vm1482_vm6, %v2631_v51, -inf }
0x1b80   : > { %2635 = vmax.xlane.f32.xlu1 %v2634_v53 }
0x1b81   : > { %v2553_v54 = vpop.xlane.xlu0 %2552 }
0x1b82   : > { %v2554_v55 = vsub.f32 %v2548_v46, %v2553_v54 }
0x1b84   : > { %v2555_v56 = vmul.f32 1.442695, %v2554_v55  ;;  %v2632_v61 = vpop.f32.mrf.mxu0 }
0x1b86   : > { %3720 = vpow2.f32 %v2555_v56 }
0x1b8c   : > { %v3721_v58 = vpop.eup %3720  ;;  %v2711_v59 = vpop.f32.mrf.mxu1 }
0x1b8d   : > { %v2792_v60 = vpop.f32.mrf.mxu0  ;;  %v2712_v17 = vadd.f32 %v3754_v35, %v2711_v59  ;;  %v2557_v63 = vsel %vm1482_vm6, %v3721_v58, 0.0 }
0x1b8e   : > { %2558 = vadd.xlane.f32.xlu2 %v2557_v63  ;;  %v2793_v2 = vadd.f32 %v3754_v35, %v2792_v60 }
0x1b8f   : > { %v2715_v0 = vsel %vm1482_vm6, %v2712_v17, -inf }
0x1b90   : > { %2716 = vmax.xlane.f32.xlu0 %v2715_v0  ;;  %v2796_v5 = vsel %vm1482_vm6, %v2793_v2, -inf }
0x1b94   : > { %v2713_v52 = vpop.f32.mrf.mxu1 }
0x1b95   : > { %v2794_v3 = vpop.f32.mrf.mxu0 }
0x1b98   : > { %2797 = vmax.xlane.f32.xlu0 %v2796_v5 }
0x1bf3   : > { %v2636_v6 = vpop.xlane.xlu1 %2635 }
0x1bf4   : > { %v2637_v8 = vsub.f32 %v2631_v51, %v2636_v6 }
0x1bf6   : > { %v2638_v9 = vmul.f32 1.442695, %v2637_v8 }
0x1bf8   : > { %3722 = vpow2.f32 %v2638_v9 }
0x1bfe   : > { %v3723_v11 = vpop.eup %3722 }
0x1bff   : > { %v2640_v43 = vsel %vm1482_vm6, %v3723_v11, 0.0 }
0x1c00   : > { %2641 = vadd.xlane.f32.xlu0 %v2640_v43 }
0x1c01   : > { %v2559_v40 = vpop.xlane.xlu2 %2558 }
0x1c02   : > { %3724 = vrcp.f32 %v2559_v40 }
0x1c03   : > { %v2717_v12 = vpop.xlane.xlu0 %2716 }
0x1c04   : > { %v2718_v13 = vsub.f32 %v2712_v17, %v2717_v12 }
0x1c06   : > { %v2719_v15 = vmul.f32 1.442695, %v2718_v13 }
0x1c08   : > { %v3725_v18 = vpop.eup %3724  ;;  %3726 = vpow2.f32 %v2719_v15 }
0x1c09   : > { %v2561_v42 = vmul.f32 %v3725_v18, %v3721_v58 }
0x1c0b   : > { %v2562_v19 = vsel %vm1482_vm6, %v2561_v42, -inf  ;;  %v2798_v20 = vpop.xlane.xlu0 %2797  ;;  %v2567_v39 = vmul.f32 1.2, %v2561_v42 }
0x1c0c   : > { %2563 = vmax.xlane.f32.xlu1 %v2562_v19  ;;  %v2799_v21 = vsub.f32 %v2793_v2, %v2798_v20 }
0x1c0e   : > { %v3727_v22 = vpop.eup %3726  ;;  %v2800_v33 = vmul.f32 1.442695, %v2799_v21 }
0x1c0f   : > { %v2721_v23 = vsel %vm1482_vm6, %v3727_v22, 0.0 }
0x1c10   : > { %3728 = vpow2.f32 %v2800_v33  ;;  %2722 = vadd.xlane.f32.xlu0 %v2721_v23 }
0x1c16   : > { %v3729_v24 = vpop.eup %3728 }
0x1c17   : > { %v2802_v26 = vsel %vm1482_vm6, %v3729_v24, 0.0 }
0x1c18   : > { %2803 = vadd.xlane.f32.xlu0 %v2802_v26 }
0x1c73   : > { %v2642_v27 = vpop.xlane.xlu0 %2641 }
0x1c74   : > { %3730 = vrcp.f32 %v2642_v27 }
0x1c7a   : > { %v3731_v28 = vpop.eup %3730 }
0x1c7b   : > { %v2644_v29 = vmul.f32 %v3731_v28, %v3723_v11 }
0x1c7d   : > { %v2645_v30 = vsel %vm1482_vm6, %v2644_v29, -inf  ;;  %v2650_v47 = vmul.f32 1.2, %v2644_v29 }
0x1c7e   : > { %2646 = vmax.xlane.f32.xlu0 %v2645_v30 }
0x1c7f   : > { %v2564_v36 = vpop.xlane.xlu1 %2563 }
0x1c80   : > { %vm2565_vm7 = vcmp.ge.f32.partialorder %v2561_v42, %v2564_v36 }
0x1c81   : > { %vm2566_vm13 = vmor %vm2565_vm7, %vm4568_vm5 }
0x1c82   : > { %v2568_v1 = vsel %vm2566_vm13, %v2567_v39, %v2561_v42 }
0x1c83   : > { %v2723_v32 = vpop.xlane.xlu0 %2722  ;;  %v2569_v35 = vsel %vm1482_vm6, %v2568_v1, 0.0 }
0x1c84   : > { %3732 = vrcp.f32 %v2723_v32 }
0x1c8a   : > { %v3733_v57 = vpop.eup %3732 }
0x1c8b   : > { %v2725_v37 = vmul.f32 %v3733_v57, %v3727_v22  ;;  %v2804_v4 = vpop.xlane.xlu0 %2803 }
0x1c8c   : > { %3734 = vrcp.f32 %v2804_v4 }
0x1c8d   : > { %v2726_v14 = vsel %vm1482_vm6, %v2725_v37, -inf  ;;  %v2731_v50 = vmul.f32 1.2, %v2725_v37 }
0x1c8e   : > { %2727 = vmax.xlane.f32.xlu1 %v2726_v14 }
0x1c92   : > { %v3735_v41 = vpop.eup %3734 }
0x1c93   : > { %v2806_v16 = vmul.f32 %v3735_v41, %v3729_v24 }
0x1c95   : > { %v2807_v44 = vsel %vm1482_vm6, %v2806_v16, -inf  ;;  %v2812_v55 = vmul.f32 1.2, %v2806_v16 }
0x1c96   : > { %2808 = vmax.xlane.f32.xlu0 %v2807_v44  ;;  %2570 = vadd.xlane.f32.xlu1 %v2569_v35 }
0x1caa   : > { %2671 = vrot.lane.b32.xlu0 %v4527_v45, %s4863_s6  ;;  %s4882_s6 = sld [smem:[#allocation29_spill]] }
0x1cf1   : > { %v2647_v46 = vpop.xlane.xlu0 %2646 }
0x1cf2   : > { %vm2648_vm9 = vcmp.ge.f32.partialorder %v2644_v29, %v2647_v46 }
0x1cf3   : > { %vm2649_vm10 = vmor %vm2648_vm9, %vm4568_vm5 }
0x1cf4   : > { %v4581_v48 = vsel %vm2649_vm10, %v2650_v47, %v2644_v29 }
0x1cf5   : > { %v2652_v38 = vsel %vm1482_vm6, %v4581_v48, 0.0 }
0x1cf6   : > { %2653 = vadd.xlane.f32.xlu2 %v2652_v38 }
0x1d01   : > { %v2728_v49 = vpop.xlane.xlu1 %2727 }
0x1d02   : > { %vm2729_vm11 = vcmp.ge.f32.partialorder %v2725_v37, %v2728_v49 }
0x1d03   : > { %vm2730_vm0 = vmor %vm2729_vm11, %vm4568_vm5 }
0x1d04   : > { %v4587_v51 = vsel %vm2730_vm0, %v2731_v50, %v2725_v37 }
0x1d05   : > { %v2733_v53 = vsel %vm1482_vm6, %v4587_v51, 0.0 }
0x1d06   : > { %2734 = vadd.xlane.f32.xlu0 %v2733_v53 }
0x1d09   : > { %v2809_v54 = vpop.xlane.xlu0 %2808  ;;  %v2571_v60 = vpop.xlane.xlu1 %2570 }
0x1d0a   : > { %vm2810_vm12 = vcmp.ge.f32.partialorder %v2806_v16, %v2809_v54  ;;  %3736 = vrcp.f32 %v2571_v60  ;;  %v2583_v3 = vand.u32 2147483648, %v2571_v60  ;;  %v2581_v5 = vand.u32 2147483647, %v2571_v60 }
0x1d0b   : > { %vm2811_vm14 = vmor %vm2810_vm12, %vm4568_vm5  ;;  %vm2577_vm5 = vweird.f32 %v2571_v60 }
0x1d0c   : > { %v4593_v56 = vsel %vm2811_vm14, %v2812_v55, %v2806_v16  ;;  %v2584_v9 = vor.u32 1.1754944e-38, %v2583_v3  ;;  %vm2582_vm13 = vcmp.eq.f32.partialorder %v2581_v5, 8.507059e+37 }
0x1d0d   : > { %v2814_v61 = vsel %vm1482_vm6, %v4593_v56, 0.0 }
0x1d0e   : > { %2589 = vrot.lane.b32.xlu2 %v4527_v45, %s4862_s3  ;;  %2815 = vadd.xlane.f32.xlu1 %v2814_v61 }
0x1d10   : > { %v3737_v17 = vpop.eup %3736 }
0x1d11   : > { %v2573_v63 = vmul.f32 %v3737_v17, %v2571_v60  ;;  %vm2578_vm2 = vweird.f32 %v3737_v17 }
0x1d12   : > { %vm2579_vm7 = vmor %vm2577_vm5, %vm2578_vm2 }
0x1d13   : > { %v2574_v0 = vsub.f32 1.0, %v2573_v63 }
0x1d15   : > { %v2575_v2 = vmul.f32 %v3737_v17, %v2574_v0 }
0x1d17   : > { %v2576_v52 = vadd.f32 %v3737_v17, %v2575_v2  ;;  %v3544_v2 = vld [vmem:[%s4882_s6 + $0x18] sm:$0xff] }
0x1d18   : > { %2894 = vmatpush.bf16.msra.mxu1 %v3544_v2 }
0x1d19   : > { %v2580_v8 = vsel %vm2579_vm7, %v3737_v17, %v2576_v52  ;;  %v3543_v52 = vld [vmem:[%s4882_s6 + $0x10] sm:$0xff]  ;;  %s4884_s6 = sld [smem:[#allocation33_spill]] }
0x1d1a   : > { %2833 = vrot.lane.b32.xlu0 %v4527_v45, %s4864_s26  ;;  %v2585_v11 = vsel %vm2582_vm13, %v2584_v9, %v2580_v8 }
0x1d1c   : > { %v2672_v58 = vpop.permute.xlu0 %2671  ;;  %2895 = vmatpush.bf16.msra.mxu1 %v3543_v52 }
0x1d1d   : > { %v2677_v59 = vsel %vm1526_vm4, %v2672_v58, 0 }
0x1d1e   : > { %2686 = vmatpush.bf16.msra.mxu3 %v2677_v59 }
0x1d1f   : > { %v3556_v2 = vld [vmem:[%s4884_s6 + $0x8] sm:$0xff]  ;;  %v3555_v52 = vld [vmem:[%s4884_s6] sm:$0xff] }
0x1d27   : > { %2752 = vrot.lane.b32.xlu1 %v4527_v45, %s4861_s30  ;;  %v2586_v45 = vmul.f32 %v2585_v11, %v2568_v1  ;;  %s3509_s30 = sshll.u32 %s4889_s8, 3  ;;  %s3777_s8 = scalar_lea.hbm %s4890_s10, 16 }
0x1d29   : > { %v2587_v42 = vpack.c.bf16 %v2586_v45, %v2586_v45 }
0x1d69   : > { %v2654_v6 = vpop.xlane.xlu2 %2653 }
0x1d6a   : > { %3738 = vrcp.f32 %v2654_v6  ;;  %v2666_v18 = vand.u32 2147483648, %v2654_v6  ;;  %v2664_v20 = vand.u32 2147483647, %v2654_v6  ;;  %vm2660_vm10 = vweird.f32 %v2654_v6 }
0x1d6c   : > { %v2667_v22 = vor.u32 1.1754944e-38, %v2666_v18  ;;  %vm2665_vm0 = vcmp.eq.f32.partialorder %v2664_v20, 8.507059e+37 }
0x1d70   : > { %v3739_v43 = vpop.eup %3738 }
0x1d71   : > { %v2656_v40 = vmul.f32 %v3739_v43, %v2654_v6  ;;  %v2590_v12 = vpop.permute.xlu2 %2589  ;;  %vm2661_vm9 = vweird.f32 %v3739_v43 }
0x1d72   : > { %v2595_v13 = vsel %vm1526_vm4, %v2590_v12, 0  ;;  %vm2662_vm11 = vmor %vm2660_vm10, %vm2661_vm9 }
0x1d73   : > { %v2657_v15 = vsub.f32 1.0, %v2656_v40  ;;  %2604 = vmatpush.bf16.msrb.mxu2 %v2595_v13 }
0x1d75   : > { %v2658_v19 = vmul.f32 %v3739_v43, %v2657_v15 }
0x1d76   : > { %3420 = vmatmul.msk.bf16.vlgmr.msrb.gmra.mxu2 %vm1482_vm6, %v2587_v42 }
0x1d77   : > { %v2659_v21 = vadd.f32 %v3739_v43, %v2658_v19 }
0x1d79   : > { %v2663_v33 = vsel %vm2662_vm11, %v3739_v43, %v2659_v21  ;;  %v2735_v23 = vpop.xlane.xlu0 %2734 }
0x1d7a   : > { %v2668_v24 = vsel %vm2665_vm0, %v2667_v22, %v2663_v33  ;;  %3740 = vrcp.f32 %v2735_v23  ;;  %v2747_v41 = vand.u32 2147483648, %v2735_v23  ;;  %vm2741_vm5 = vweird.f32 %v2735_v23  ;;  %v3546_v33 = vld [vmem:[%s4749_s19 + $0x18] sm:$0xff] }
0x1d7b   : > { %v2669_v26 = vmul.f32 %v2668_v24, %v4581_v48  ;;  %v2745_v16 = vand.u32 2147483647, %v2735_v23 }
0x1d7c   : > { %v2748_v48 = vor.u32 1.1754944e-38, %v2747_v41 }
0x1d7d   : > { %v2670_v27 = vpack.c.bf16 %v2669_v26, %v2669_v26  ;;  %vm2746_vm10 = vcmp.eq.f32.partialorder %v2745_v16, 8.507059e+37 }
0x1d7f   : > { %3422 = vmatmul.msk.bf16.vlgmr.msra.gmra.mxu3 %vm1482_vm6, %v2670_v27  ;;  %v3553_v27 = vld [vmem:[%s4751_s21 + $0x70] sm:$0xff] }
0x1d80   : > { %v3741_v28 = vpop.eup %3740 }
0x1d81   : > { %v2816_v29 = vpop.xlane.xlu1 %2815  ;;  %v2737_v30 = vmul.f32 %v3741_v28, %v2735_v23  ;;  %vm2742_vm14 = vweird.f32 %v3741_v28  ;;  %v3554_v23 = vld [vmem:[%s4751_s21 + $0x78] sm:$0xff] }
0x1d82   : > { %3742 = vrcp.f32 %v2816_v29  ;;  %v2828_v57 = vand.u32 2147483648, %v2816_v29  ;;  %v2826_v7 = vand.u32 2147483647, %v2816_v29  ;;  %vm2822_vm2 = vweird.f32 %v2816_v29  ;;  %vm2743_vm13 = vmor %vm2741_vm5, %vm2742_vm14  ;;  %3037 = vmatpush.bf16.msrb.mxu0 %v3554_v23 }
0x1d83   : > { %v2738_v31 = vsub.f32 1.0, %v2737_v30  ;;  %v3551_v30 = vld [vmem:[%s4751_s21 + $0x60] sm:$0xff] }
0x1d84   : > { %v2829_v44 = vor.u32 1.1754944e-38, %v2828_v57  ;;  %vm2827_vm9 = vcmp.eq.f32.partialorder %v2826_v7, 8.507059e+37  ;;  %v3549_v57 = vld [vmem:[%s4751_s21 + $0x50] sm:$0xff] }
0x1d85   : > { %v2739_v10 = vmul.f32 %v3741_v28, %v2738_v31 }
0x1d86   : > { %3038 = vmatpush.bf16.msrb.mxu0 %v3553_v27 }
0x1d87   : > { %v2740_v39 = vadd.f32 %v3741_v28, %v2739_v10 }
0x1d88   : > { %v3743_v32 = vpop.eup %3742 }
0x1d89   : > { %v2818_v34 = vmul.f32 %v3743_v32, %v2816_v29  ;;  %vm2823_vm12 = vweird.f32 %v3743_v32  ;;  %v2744_v46 = vsel %vm2743_vm13, %v3741_v28, %v2740_v39  ;;  %v3552_v29 = vld [vmem:[%s4751_s21 + $0x68] sm:$0xff]  ;;  %v3755_v39 = vld [vmem:[%s4843_s11 + $0x1] ss:$0 sm:$0xff] }
0x1d8a   : > { %vm2824_vm7 = vmor %vm2822_vm2, %vm2823_vm12  ;;  %v2749_v49 = vsel %vm2746_vm10, %v2748_v48, %v2744_v46  ;;  %3039 = vmatpush.bf16.msrb.mxu0 %v3552_v29  ;;  %v3547_v46 = vld [vmem:[%s4751_s21 + $0x40] sm:$0xff] }
0x1d8b   : > { %v2819_v36 = vsub.f32 1.0, %v2818_v34  ;;  %v2750_v53 = vmul.f32 %v2749_v49, %v4587_v51  ;;  %v3550_v34 = vld [vmem:[%s4751_s21 + $0x58] sm:$0xff] }
0x1d8c   : > { %v2834_v37 = vpop.permute.xlu0 %2833 }
0x1d8d   : > { %v2820_v4 = vmul.f32 %v3743_v32, %v2819_v36  ;;  %v2839_v14 = vsel %vm1526_vm4, %v2834_v37, 0  ;;  %v2751_v61 = vpack.c.bf16 %v2750_v53, %v2750_v53 }
0x1d8e   : > { %2848 = vmatpush.bf16.msrb.mxu3 %v2839_v14  ;;  %3040 = vmatpush.bf16.msrb.mxu0 %v3551_v30 }
0x1d8f   : > { %v2821_v1 = vadd.f32 %v3743_v32, %v2820_v4 }
0x1d91   : > { %v2825_v35 = vsel %vm2824_vm7, %v3743_v32, %v2821_v1  ;;  %v3756_v1 = vld [vmem:[%s4845_s28 + $0x1] ss:$0 sm:$0xff] }
0x1d92   : > { %v2830_v47 = vsel %vm2827_vm9, %v2829_v44, %v2825_v35  ;;  %3041 = vmatpush.bf16.msrb.mxu0 %v3550_v34  ;;  %v3548_v35 = vld [vmem:[%s4751_s21 + $0x48] sm:$0xff]  ;;  %3113 = vmatpush.bf16.msra.mxu3 %v3556_v2 }
0x1d93   : > { %v2831_v38 = vmul.f32 %v2830_v47, %v4593_v56  ;;  %v3631_v47 = vld [vmem:[%s4750_s20 + $0x1] ss:$0 sm:$0xff] }
0x1d95   : > { %v2832_v50 = vpack.c.bf16 %v2831_v38, %v2831_v38 }
0x1d96   : > { %3042 = vmatpush.bf16.msrb.mxu0 %v3549_v57  ;;  %3114 = vmatpush.bf16.msra.mxu3 %v3555_v52 }
0x1d97   : > { %3426 = vmatmul.msk.bf16.vlgmr.msrb.gmra.mxu3 %vm1482_vm6, %v2832_v50 }
0x1d99   : > { %v2753_v54 = vpop.permute.xlu1 %2752 }
0x1d9a   : > { %v2758_v55 = vsel %vm1526_vm4, %v2753_v54, 0  ;;  %3043 = vmatpush.bf16.msrb.mxu0 %v3548_v35  ;;  %v3632_v54 = vld [vmem:[%s4752_s22 + $0x1] ss:$0 sm:$0xff] }
0x1d9b   : > { %2767 = vmatpush.bf16.msra.mxu2 %v2758_v55 }
0x1d9e   : > { %3424 = vmatmul.msk.bf16.vlgmr.msra.gmra.mxu2 %vm1482_vm6, %v2751_v61  ;;  %3044 = vmatpush.bf16.msrb.mxu0 %v3547_v46 }
0x1d9f   : > { %2977 = vmatpush.bf16.msrb.mxu2 %v3546_v33 }
0x1df9   : > { %v2606_v58 = vpop.f32.mrf.mxu2 }
0x1e01   : > { %v2608_v59 = vpop.f32.mrf.mxu2 }
0x1e02   : > { %v2688_v60 = vpop.f32.mrf.mxu3 }
0x1e03   : > { %2855 = vrot.lane.b32.xlu2 %v2688_v60, %s4865_s5  ;;  %s3142_s5 = scalar_lea.hbm %s4890_s10, %s3509_s30 }
0x1e04   : > { %s3146_s25 = sshll.u32 %s3142_s5, 4  ;;  %s3147_s25 = int_to_ptr.hbm [resolvable:$true] %s3146_s25 }
0x1e05   : > { %s3771_s18 = sshra.s32 %s3147_s25, 4  ;;  %s3772_s18 = int_to_ptr.hbm [resolvable:$true] %s3771_s18 }
0x1e06   : > { %s3773_s14 = scalar_lea.hbm %s3772_s18, 8  ;;  %p3778_p0 = scmp.lt.s32.totalorder %s3772_s18, %s4890_s10 }
0x1e07   : > { %p3774_p11 = scmp.ne.s32.totalorder %s3772_s18, %s3773_s14  ;;  %p3779_p1 = scmp.lt.s32.totalorder %s3777_s8, %s3773_s14 }
0x1e09   : > { %p3775_p12 = pnand %p3774_p11, %p4016_p5  ;;  %p3780_p2 = por %p3779_p1, %p3778_p0 }
0x1e0a   : > { %v2690_v56 = vpop.f32.mrf.mxu3 }
0x1e0b   : > { %p3776_p13 = pneg %p3775_p12 }
0x1e0d   : > { %p3781_p3 = pnand %p3780_p2, %p3776_p13 }
0x1e1a   : > { %v2850_v17 = vpop.f32.mrf.mxu3 }
0x1e1b   : > { %2863 = vrot.lane.b32.xlu0 %v2850_v17, %s4867_s24 }
0x1e21   : > { %v2769_v63 = vpop.f32.mrf.mxu2 }
0x1e22   : > { %v2852_v0 = vpop.f32.mrf.mxu3  ;;  %2859 = vrot.lane.b32.xlu1 %v2769_v63, %s4866_s0  ;;  %s4883_s0 = sld [smem:[#allocation30_spill]] }
0x1e28   : > { %v3630_v45 = vld [vmem:[%s4883_s0 + $0x1] ss:$0 sm:$0xff]  ;;  %s4885_s0 = sld [smem:[#allocation31_spill]] }
0x1e29   : > { %v2771_v51 = vpop.f32.mrf.mxu2 }
0x1e5d   : > { %v2856_v3 = vpop.permute.xlu2 %2855 }
0x1e5e   : > { %v2866_v5 = vsel %vm998_vm8, %v2606_v58, %v2856_v3 }
0x1e8d   : > { %v2864_v8 = vpop.permute.xlu0 %2863 }
0x1e94   : > { %v2860_v6 = vpop.permute.xlu1 %2859 }
0x1e95   : > { %v2867_v9 = vsel %vm1312_vm15, %v2866_v5, %v2860_v6 }
0x1e96   : > { %v2868_v11 = vsel %vm1314_vm1, %v2867_v9, %v2864_v8 }
0x1e97   : > { %v2869_v43 = vpack.c.bf16 %v2868_v11, %v2868_v11 }
0x1e99   : > { %3435 = vmatmul.msk.bf16.vlgmr.msra.gmra.mxu1 %vm909_vm3, %v2869_v43 }
0x1f16   : > { %v2897_v40 = vpop.f32.mrf.mxu1 }
0x1f17   : > { %v2898_v12 = vadd.f32 %v3630_v45, %v2897_v40 }
0x1f19   : > { %v2901_v13 = vadd.f32 %v2898_v12, %v4502_v62  ;;  %v3545_v62 = vld [vmem:[%s4749_s19 + $0x10] sm:$0xff]  ;;  %v3633_v12 = vld [vmem:[%s4885_s0] ss:$0 sm:$0xff]  ;;  %s835_s0 = scalar_lea.vmem [#allocation2], %s3231_s4 }
0x1f1a   : > { %2978 = vmatpush.bf16.msrb.mxu2 %v3545_v62  ;;  %s3144_s23 = sshll.u32 %s835_s0, 4  ;;  %s3145_s23 = int_to_ptr.vmem [resolvable:$true] %s3144_s23 }
0x1f1b   : > { %v2902_v15 = vsel %vm909_vm3, %v2901_v13, 0.0 }
0x1f1c   : > { %2903 = vadd.xlane.f32.xlu2 %v2902_v15 }
0x1f1e   : > { %v2899_v18 = vpop.f32.mrf.mxu1 }
0x1f8f   : > { %v2904_v42 = vpop.xlane.xlu2 %2903 }
0x1f90   : > { %v2905_v19 = vmul.f32 %v2904_v42, %v4063_v25 }
0x1f92   : > { %v2906_v20 = vsub.f32 %v2901_v13, %v2905_v19 }
0x1f94   : > { %v2907_v21 = vmul.f32 %v2906_v20, %v2906_v20 }
0x1f96   : > { %v2908_v22 = vsel %vm909_vm3, %v2907_v21, 0.0 }
0x1f97   : > { %2909 = vadd.xlane.f32.xlu1 %v2908_v22 }
0x200a   : > { %v2910_v24 = vpop.xlane.xlu1 %2909 }
0x200b   : > { %v2911_v26 = vmul.f32 %v2910_v24, %v4063_v25 }
0x200d   : > { %v2912_v28 = vadd.f32 1e-05, %v2911_v26 }
0x200f   : > { %3744 = vrsqrt.f32 %v2912_v28  ;;  %vm2919_vm15 = vweird.f32 %v2912_v28 }
0x2015   : > { %v3745_v31 = vpop.eup %3744 }
0x2016   : > { %v2914_v32 = vmul.f32 %v3745_v31, %v2912_v28  ;;  %vm2920_vm8 = vweird.f32 %v3745_v31 }
0x2017   : > { %vm2921_vm1 = vmor %vm2919_vm15, %vm2920_vm8 }
0x2018   : > { %v2915_v10 = vmul.f32 %v3745_v31, %v2914_v32 }
0x201a   : > { %v2916_v36 = vmul.f32 0.5, %v2915_v10 }
0x201c   : > { %v2917_v37 = vsub.f32 1.5, %v2916_v36 }
0x201e   : > { %v2918_v4 = vmul.f32 %v3745_v31, %v2917_v37 }
0x2020   : > { %v2922_v7 = vsel %vm2921_vm1, %v3745_v31, %v2918_v4 }
0x2021   : > { %v2923_v14 = vmul.f32 %v2922_v7, %v2906_v20  ;;  %v3635_v20 = vld [vmem:[%s4888_s7] ss:$0 sm:$0xff] }
0x2023   : > { %v2924_v41 = vmul.f32 %v3755_v39, %v2923_v14 }
0x2025   : > { %v2925_v16 = vadd.f32 %v3756_v1, %v2924_v41 }
0x2027   : > { %v2952_v44 = vpack.c.bf16 %v2925_v16, %v2925_v16 }
0x2029   : > { %3466 = vmatmul.msk.bf16.vlgmr.msrb.gmra.mxu2 %vm909_vm3, %v2952_v44 }
0x20ac   : > { %v2980_v48 = vpop.f32.mrf.mxu2 }
0x20ad   : > { %v2981_v38 = vadd.f32 %v3631_v47, %v2980_v48 }
0x20af   : > { %v2984_v49 = vmax.f32 %v2981_v38, 0.0 }
0x20b1   : > { %v2985_v50 = vpack.c.bf16 %v2984_v49, %v2984_v49 }
0x20b3   : > { %3045 = vmatmul.bf16.vlgmr.msrb.gmra.mxu0 %v2985_v50 }
0x20b4   : > { %v2982_v53 = vpop.f32.mrf.mxu2 }
0x2130   : > { %v3046_v55 = vpop.f32.mrf.mxu0 }
0x2131   : > { %v3047_v61 = vadd.f32 %v3632_v54, %v3046_v55 }
0x2133   : > { %v3050_v58 = vadd.f32 %v3047_v61, %v2901_v13 }
0x2135   : > { %v3053_v59 = vsel %vm909_vm3, %v3050_v58, 0.0 }
0x2136   : > { %3054 = vadd.xlane.f32.xlu0 %v3053_v59 }
0x2138   : > { %v3048_v60 = vpop.f32.mrf.mxu0 }
0x21a9   : > { %v3055_v56 = vpop.xlane.xlu0 %3054 }
0x21aa   : > { %v3056_v17 = vmul.f32 %v3055_v56, %v4063_v25 }
0x21ac   : > { %v3057_v63 = vsub.f32 %v3050_v58, %v3056_v17 }
0x21ae   : > { %v3058_v0 = vmul.f32 %v3057_v63, %v3057_v63 }
0x21b0   : > { %v3059_v51 = vsel %vm909_vm3, %v3058_v0, 0.0 }
0x21b1   : > { %3060 = vadd.xlane.f32.xlu2 %v3059_v51 }
0x2224   : > { %v3061_v3 = vpop.xlane.xlu2 %3060 }
0x2225   : > { %v3062_v5 = vmul.f32 %v3061_v3, %v4063_v25  ;;  %v3634_v25 = vld [vmem:[%s4886_s17] ss:$0 sm:$0xff]  ;;  %s3132_s17 = scalar_lea.sflag [#allocation3], %s833_s27 }
0x2227   : > { %v3063_v6 = vadd.f32 1e-05, %v3062_v5 }
0x2229   : > { %3746 = vrsqrt.f32 %v3063_v6  ;;  %vm3070_vm4 = vweird.f32 %v3063_v6 }
0x222f   : > { %v3747_v8 = vpop.eup %3746 }
0x2230   : > { %v3065_v9 = vmul.f32 %v3747_v8, %v3063_v6  ;;  %vm3071_vm6 = vweird.f32 %v3747_v8 }
0x2231   : > { %vm3072_vm11 = vmor %vm3070_vm4, %vm3071_vm6 }
0x2232   : > { %v3066_v11 = vmul.f32 %v3747_v8, %v3065_v9 }
0x2234   : > { %v3067_v43 = vmul.f32 0.5, %v3066_v11 }
0x2236   : > { %v3068_v45 = vsub.f32 1.5, %v3067_v43 }
0x2238   : > { %v3069_v40 = vmul.f32 %v3747_v8, %v3068_v45 }
0x223a   : > { %v3073_v13 = vsel %vm3072_vm11, %v3747_v8, %v3069_v40 }
0x223b   : > { %v3074_v15 = vmul.f32 %v3073_v13, %v3057_v63 }
0x223d   : > { %v3078_v18 = vmul.f32 %v3633_v12, %v3074_v15 }
0x223f   : > { %v3082_v42 = vadd.f32 %v3634_v25, %v3078_v18 }
0x2241   : > { %v3083_v19 = vpack.c.bf16 %v3082_v42, %v3082_v42 }
0x2243   : > { %3507 = vmatmul.msk.bf16.vlgmr.msra.gmra.mxu3 %vm909_vm3, %v3083_v19 }
0x22c6   : > { %v3116_v21 = vpop.f32.mrf.mxu3 }
0x22c7   : > { %v3117_v22 = vadd.f32 %v3635_v20, %v3116_v21 }
0x22c9   : > { %3120 = vmax.xlane.f32.xlu1 %v3117_v22 }
0x22ce   : > { %v3118_v33 = vpop.f32.mrf.mxu3 }
0x233c   : > { %v3121_v62 = vpop.xlane.xlu1 %3120 }
0x233d   : > { %v3122_v23 = vsub.f32 %v3117_v22, %v3121_v62 }
0x233f   : > { %v3123_v24 = vmul.f32 1.442695, %v3122_v23 }
0x2341   : > { %3748 = vpow2.f32 %v3123_v24 }
0x2347   : > { %v3749_v26 = vpop.eup %3748 }
0x2348   : > { %3125 = vadd.xlane.f32.xlu0 %v3749_v26 }
0x23bb   : > { %v3126_v27 = vpop.xlane.xlu0 %3125 }
0x23bc   : > { %3750 = vlog2.f32 %v3126_v27 }
0x23c2   : > { %v3751_v28 = vpop.eup %3750 }
0x23c3   : > { %v3128_v29 = vmul.f32 0.6931472, %v3751_v28 }
0x23c5   : > { %v3129_v30 = vsub.f32 %v3122_v23, %v3128_v29 }
0x23c7   : > { %3130 = vst [vmem:[%s835_s0] sm:$0xff] %v3129_v30 }
0x23c8   : > { %3784 = shalt.err (!%p3781_p3)
}
0x23c9   : > { %3557 = dma.vmem_to_hbm [thread:$0]  (%p4016_p5), %s3145_s23, 128, %s3147_s25, %s3132_s17  }
0x23ca PF: > { %s4892_s27 = sld [smem:[#allocation8_spill]] }
0x23cb   : > { %s4893_s3 = sld [smem:[#allocation5_spill]] }
0x23d0   : > { %p3563_p4 = scmp.ge.s32.totalorder %s4892_s27, 2 }
0x23d1   : > { %s3158_s5 = sand.u32 1, %s4893_s3  }
0x23d2   : > { %p3560_p7 = pnand %p3563_p4, %p4020_p6  ;;  %s3159_s0 = scalar_lea.sflag [#allocation3], %s3158_s5 }
0x23d4   : > { %p3561_p8 = pneg %p3560_p7 }
0x23d6   : > { %3802 = dma.done.wait (%p3561_p8), %s3159_s0, 128  }
0x23d7   : > { %3804 = vsyncadd (%p3561_p8), %s3159_s0, 4294967168  ;;  %s4895_s30 = sld [smem:[#allocation10_spill]] }
0x23d8   : > { %s4896_s7 = sld [smem:[#allocation6_spill]] }
0x23d9   : > { %s4897_s4 = sld [smem:[#allocation7_spill]] }
0x23da   : > { %s4898_s8 = sld [smem:[#allocation11_spill]] }
0x23dd   : > { %p37_p9 = scmp.ge.s32.totalorder %s4895_s30, 4  }
0x23df   :  { %39 = sbr.rel (!%p37_p9) target bundleno = 25 (0x19), region = 187 }
0x23e4   :  { %3165 = vsyncpa [#allocation3], 1 }
0x23e5   :  { %3167 = vsyncpa [#allocation3 + $0x1], 1 }

</bundles_post_ra>
